<compile_context>
chip_gen: v6e
topology: v6e:2x2x1
jax: 0.10.0
libtpu: 0.0.40
codegen_flags: <defaults>
</compile_context>

<pallas_src>
import functools

import jax
import jax.numpy as jnp
import numpy as np
from jax.experimental import pallas as pl
from jax.experimental.pallas import tpu as pltpu

LEAKY_SLOPE = 0.01   # nn.LeakyReLU default
BN_EPS = 1e-5        # nn.BatchNorm1d default


def _leaky_relu(x):
    return jnp.where(x > 0, x, LEAKY_SLOPE * x)


# ----------------------------------------------------------------------------
# Fused encoder + decoder kernel (2-phase 1-D grid over hidden tiles).
# ----------------------------------------------------------------------------
def vae_kernel(x_ref, attr_ref, eps_ref,
               w1x_ref, w1a_ref, b1_ref, wmulv_ref, bmulv_ref,
               w3l_ref, w3a_ref, b3_ref, w4_ref, b4_ref, gamma_ref, beta_ref,
               mu_ref, logvar_ref, recon_ref,
               enc_acc, latent_sc, dec_acc):
    j = pl.program_id(0)
    n_enc = pl.num_programs(0) // 2
    L = attr_ref.shape[1]

    @pl.when(j == 0)
    def _():
        enc_acc[...] = jnp.zeros_like(enc_acc)
        dec_acc[...] = jnp.zeros_like(dec_acc)

    # ---- encoder phase: steps [0, n_enc) stream W1 / W[mu|logvar] tiles ----
    @pl.when(j < n_enc)
    def _():
        h = _leaky_relu(
            jnp.dot(x_ref[...].astype(w1x_ref.dtype), w1x_ref[...],
                    preferred_element_type=jnp.float32)
            + jnp.dot(attr_ref[...].astype(w1a_ref.dtype), w1a_ref[...],
                      preferred_element_type=jnp.float32)
            + b1_ref[...])
        # fused mu|logvar matmul: one 2L-wide MXU op, one (B, 2L) accumulator
        enc_acc[...] += jnp.dot(h.astype(wmulv_ref.dtype), wmulv_ref[...],
                                preferred_element_type=jnp.float32)

    # ---- end of encoder: split mu / logvar, reparameterize into scratch ----
    @pl.when(j == n_enc - 1)
    def _():
        pre = enc_acc[...] + bmulv_ref[...]
        mu = jnp.maximum(pre[:, :L], 0.0)
        logvar = jnp.maximum(pre[:, L:], 0.0)
        mu_ref[...] = mu
        logvar_ref[...] = logvar
        latent_sc[...] = mu + eps_ref[...] * jnp.exp(0.5 * logvar)

    # ---- decoder phase: steps [n_enc, 2*n_enc) stream W3 / W4 tiles ----
    @pl.when(j >= n_enc)
    def _():
        h2 = _leaky_relu(
            jnp.dot(latent_sc[...].astype(w3l_ref.dtype), w3l_ref[...],
                    preferred_element_type=jnp.float32)
            + jnp.dot(attr_ref[...].astype(w3a_ref.dtype), w3a_ref[...],
                      preferred_element_type=jnp.float32)
            + b3_ref[...])
        dec_acc[...] += jnp.dot(h2.astype(w4_ref.dtype), w4_ref[...],
                                preferred_element_type=jnp.float32)

    # ---- end of decoder: BatchNorm1d (batch stats, biased var) + ReLU ----
    @pl.when(j == pl.num_programs(0) - 1)
    def _():
        recon = dec_acc[...] + b4_ref[...]
        mean = jnp.mean(recon, axis=0, keepdims=True)
        var = jnp.mean((recon - mean) ** 2, axis=0, keepdims=True)
        norm = (recon - mean) * jax.lax.rsqrt(var + BN_EPS)
        recon_ref[...] = jnp.maximum(norm * gamma_ref[...] + beta_ref[...], 0.0)


def feats_vae_forward(x, attr, params, eps, *, hidden_tile=2048,
                      weight_dtype=jnp.float32):
    B, x_dim = x.shape
    L = attr.shape[1]
    H = params["w1x"].shape[1]
    T = min(hidden_tile, H)
    assert H % T == 0
    n_enc = H // T
    grid = (2 * n_enc,)

    # Optional low-precision weight streaming (HBM-bandwidth bound workload);
    # accumulation stays f32 inside the kernel.
    wd = weight_dtype
    w1x = params["w1x"].astype(wd)
    w1a = params["w1a"].astype(wd)
    wmulv = params["wmulv"].astype(wd)
    w3l = params["w3l"].astype(wd)
    w3a = params["w3a"].astype(wd)
    w4 = params["w4"].astype(wd)

    # Encoder weights advance during phase 1 and stay clamped (no re-DMA)
    # during phase 2; decoder weights stay at block 0 (prefetched early) during
    # phase 1 and advance during phase 2.
    enc_col = lambda j: (0, jnp.minimum(j, n_enc - 1))
    enc_row = lambda j: (jnp.minimum(j, n_enc - 1), 0)
    dec_col = lambda j: (0, jnp.maximum(j - n_enc, 0))
    dec_row = lambda j: (jnp.maximum(j - n_enc, 0), 0)
    const = lambda j: (0, 0)

    return pl.pallas_call(
        vae_kernel,
        out_shape=(jax.ShapeDtypeStruct((B, L), jnp.float32),
                   jax.ShapeDtypeStruct((B, L), jnp.float32),
                   jax.ShapeDtypeStruct((B, x_dim), jnp.float32)),
        grid_spec=pltpu.PrefetchScalarGridSpec(
            num_scalar_prefetch=0, grid=grid,
            in_specs=[
                pl.BlockSpec((B, x_dim), const),        # x
                pl.BlockSpec((B, L), const),            # attr
                pl.BlockSpec((B, L), const),            # eps
                pl.BlockSpec((x_dim, T), enc_col),      # W1 rows for x
                pl.BlockSpec((L, T), enc_col),          # W1 rows for attr
                pl.BlockSpec((1, T), enc_col),          # b1
                pl.BlockSpec((T, 2 * L), enc_row),      # [Wmu | Wlogvar]
                pl.BlockSpec((1, 2 * L), const),        # [bmu | blogvar]
                pl.BlockSpec((L, T), dec_col),          # W3 rows for latent
                pl.BlockSpec((L, T), dec_col),          # W3 rows for attr
                pl.BlockSpec((1, T), dec_col),          # b3
                pl.BlockSpec((T, x_dim), dec_row),      # W4
                pl.BlockSpec((1, x_dim), const),        # b4
                pl.BlockSpec((1, x_dim), const),        # bn gamma
                pl.BlockSpec((1, x_dim), const),        # bn beta
            ],
            out_specs=[pl.BlockSpec((B, L), const),     # mu
                       pl.BlockSpec((B, L), const),     # logvar
                       pl.BlockSpec((B, x_dim), const)],  # recon
            scratch_shapes=[pltpu.VMEM((B, 2 * L), jnp.float32),   # enc acc
                            pltpu.VMEM((B, L), jnp.float32),       # latent
                            pltpu.VMEM((B, x_dim), jnp.float32)]), # dec acc
        compiler_params=pltpu.CompilerParams(
            dimension_semantics=("arbitrary",),
            vmem_limit_bytes=48 * 1024 * 1024),
        # TODO(synk): on v7x, split the output-column dimension across the two
        # TensorCores (needs a CMEM exchange of mu/logvar for the
        # reparameterization); with one sequential 'arbitrary' axis a single
        # core streams all weights.
    )(x, attr, eps, w1x, w1a, params["b1"], wmulv, params["bmulv"],
      w3l, w3a, params["b3"], w4, params["b4"], params["gamma"], params["beta"])


def init_params(key, x_dim, latent_dim, hidden=4096):
    """Linear weights & biases ~ N(0, 0.02) like init_weights(); BN gamma=1, beta=0.

    W1 is stored as row blocks (x rows, attr rows); Wmu/Wlv are stored fused as
    a single (hidden, 2L) matrix; W3 is stored as row blocks (latent, attr).
    This is numerically equivalent to the PyTorch layout.
    """
    ks = jax.random.split(key, 10)
    n = lambda k, shape: 0.02 * jax.random.normal(k, shape, dtype=jnp.float32)
    return {
        "w1x": n(ks[0], (x_dim, hidden)),
        "w1a": n(ks[1], (latent_dim, hidden)),
        "b1": n(ks[2], (1, hidden)),
        "wmulv": n(ks[3], (hidden, 2 * latent_dim)),
        "bmulv": n(ks[4], (1, 2 * latent_dim)),
        "w3l": n(ks[5], (latent_dim, hidden)),
        "w3a": n(ks[6], (latent_dim, hidden)),
        "b3": n(ks[7], (1, hidden)),
        "w4": n(ks[8], (hidden, x_dim)),
        "b4": n(ks[9], (1, x_dim)),
        "gamma": jnp.ones((1, x_dim), jnp.float32),
        "beta": jnp.zeros((1, x_dim), jnp.float32),
    }


def reference_forward(x, attr, p, eps, weight_dtype=jnp.float32):
    """Pure-JAX reference (mirrors the kernel's weight dtype for bf16 checks)."""
    wd = weight_dtype
    dot = lambda a, w: jnp.dot(a.astype(wd), w.astype(wd),
                               preferred_element_type=jnp.float32)
    L = attr.shape[1]
    h = _leaky_relu(dot(x, p["w1x"]) + dot(attr, p["w1a"]) + p["b1"])
    pre = dot(h, p["wmulv"]) + p["bmulv"]
    mu = jnp.maximum(pre[:, :L], 0.0)
    logvar = jnp.maximum(pre[:, L:], 0.0)
    latent = mu + eps * jnp.exp(0.5 * logvar)
    h2 = _leaky_relu(dot(latent, p["w3l"]) + dot(attr, p["w3a"]) + p["b3"])
    recon = dot(h2, p["w4"]) + p["b4"]
    mean = jnp.mean(recon, 0, keepdims=True)
    var = jnp.mean((recon - mean) ** 2, 0, keepdims=True)
    recon = jnp.maximum((recon - mean) * jax.lax.rsqrt(var + BN_EPS) * p["gamma"]
                        + p["beta"], 0.0)
    return mu, logvar, recon


if __name__ == "__main__":
    B, X_DIM, LATENT_DIM = 8, 256, 128   # hidden is fixed at 4096 by the module

    key = jax.random.PRNGKey(0)
    k_x, k_a, k_eps, k_p = jax.random.split(key, 4)
    x = jax.random.normal(k_x, (B, X_DIM), dtype=jnp.float32)
    attr = jax.random.normal(k_a, (B, LATENT_DIM), dtype=jnp.float32)
    eps = jax.random.normal(k_eps, (B, LATENT_DIM), dtype=jnp.float32)
    params = init_params(k_p, X_DIM, LATENT_DIM)

    # ---- f32 weights: faithful to the PyTorch module's numerics ----
    fwd_f32 = jax.jit(feats_vae_forward)
    mu, logvar, recon = fwd_f32(x, attr, params, eps)
    jax.block_until_ready((mu, logvar, recon))

    mu_r, lv_r, rec_r = reference_forward(x, attr, params, eps)
    np.testing.assert_allclose(np.asarray(mu), np.asarray(mu_r), rtol=1e-4, atol=1e-4)
    np.testing.assert_allclose(np.asarray(logvar), np.asarray(lv_r), rtol=1e-4, atol=1e-4)
    np.testing.assert_allclose(np.asarray(recon), np.asarray(rec_r), rtol=1e-3, atol=1e-3)

    # ---- bf16 weight streaming (halves HBM weight bytes, f32 accumulation),
    #      checked against a reference that uses the same bf16 weights ----
    fwd_bf16 = jax.jit(functools.partial(feats_vae_forward,
                                         weight_dtype=jnp.bfloat16))
    mu_b, lv_b, rec_b = fwd_bf16(x, attr, params, eps)
    jax.block_until_ready((mu_b, lv_b, rec_b))

    mu_br, lv_br, rec_br = reference_forward(x, attr, params, eps,
                                             weight_dtype=jnp.bfloat16)
    np.testing.assert_allclose(np.asarray(mu_b), np.asarray(mu_br), rtol=1e-2, atol=1e-2)
    np.testing.assert_allclose(np.asarray(lv_b), np.asarray(lv_br), rtol=1e-2, atol=1e-2)
    np.testing.assert_allclose(np.asarray(rec_b), np.asarray(rec_br), rtol=1e-2, atol=1e-2)

    print("KERNEL_OK")
</pallas_src>

<mosaic_0001>
module attributes {stable_mosaic.version = 11 : i64} {
  func.func @vae_kernel(%arg0: i32, %arg1: memref<8x256xf32, #tpu.memory_space<vmem>>, %arg2: memref<8x128xf32, #tpu.memory_space<vmem>>, %arg3: memref<8x128xf32, #tpu.memory_space<vmem>>, %arg4: memref<256x2048xf32, #tpu.memory_space<vmem>>, %arg5: memref<128x2048xf32, #tpu.memory_space<vmem>>, %arg6: memref<1x2048xf32, #tpu.memory_space<vmem>>, %arg7: memref<2048x256xf32, #tpu.memory_space<vmem>>, %arg8: memref<1x256xf32, #tpu.memory_space<vmem>>, %arg9: memref<128x2048xf32, #tpu.memory_space<vmem>>, %arg10: memref<128x2048xf32, #tpu.memory_space<vmem>>, %arg11: memref<1x2048xf32, #tpu.memory_space<vmem>>, %arg12: memref<2048x256xf32, #tpu.memory_space<vmem>>, %arg13: memref<1x256xf32, #tpu.memory_space<vmem>>, %arg14: memref<1x256xf32, #tpu.memory_space<vmem>>, %arg15: memref<1x256xf32, #tpu.memory_space<vmem>>, %arg16: memref<8x128xf32, #tpu.memory_space<vmem>>, %arg17: memref<8x128xf32, #tpu.memory_space<vmem>>, %arg18: memref<8x256xf32, #tpu.memory_space<vmem>>, %arg19: memref<8x256xf32, #tpu.memory_space<vmem>>, %arg20: memref<8x128xf32, #tpu.memory_space<vmem>>, %arg21: memref<8x256xf32, #tpu.memory_space<vmem>>) attributes {dimension_semantics = [#tpu.dimension_semantics<arbitrary>], iteration_bounds = array<i64: 4>, scalar_prefetch = 0 : i64, scratch_operands = 3 : i64, tpu.core_type = #tpu.core_type<tc>, window_params = [{pipeline_mode = #tpu.pipeline_mode<synchronous>, transform_indices = @transform_0, window_bounds = array<i64: 8, 256>}, {pipeline_mode = #tpu.pipeline_mode<synchronous>, transform_indices = @transform_1, window_bounds = array<i64: 8, 128>}, {pipeline_mode = #tpu.pipeline_mode<synchronous>, transform_indices = @transform_2, window_bounds = array<i64: 8, 128>}, {transform_indices = @transform_3, window_bounds = array<i64: 256, 2048>}, {transform_indices = @transform_4, window_bounds = array<i64: 128, 2048>}, {transform_indices = @transform_5, window_bounds = array<i64: 1, 2048>}, {transform_indices = @transform_6, window_bounds = array<i64: 2048, 256>}, {pipeline_mode = #tpu.pipeline_mode<synchronous>, transform_indices = @transform_7, window_bounds = array<i64: 1, 256>}, {transform_indices = @transform_8, window_bounds = array<i64: 128, 2048>}, {transform_indices = @transform_9, window_bounds = array<i64: 128, 2048>}, {transform_indices = @transform_10, window_bounds = array<i64: 1, 2048>}, {transform_indices = @transform_11, window_bounds = array<i64: 2048, 256>}, {pipeline_mode = #tpu.pipeline_mode<synchronous>, transform_indices = @transform_12, window_bounds = array<i64: 1, 256>}, {pipeline_mode = #tpu.pipeline_mode<synchronous>, transform_indices = @transform_13, window_bounds = array<i64: 1, 256>}, {pipeline_mode = #tpu.pipeline_mode<synchronous>, transform_indices = @transform_14, window_bounds = array<i64: 1, 256>}, {pipeline_mode = #tpu.pipeline_mode<synchronous>, transform_indices = @transform_15, window_bounds = array<i64: 8, 128>}, {pipeline_mode = #tpu.pipeline_mode<synchronous>, transform_indices = @transform_16, window_bounds = array<i64: 8, 128>}, {pipeline_mode = #tpu.pipeline_mode<synchronous>, transform_indices = @transform_17, window_bounds = array<i64: 8, 256>}]} {
    %c0_i32 = arith.constant 0 : i32
    %0 = arith.cmpi eq, %arg0, %c0_i32 : i32
    %1 = arith.extui %0 : i1 to i32
    %c0_i32_0 = arith.constant 0 : i32
    %2 = arith.cmpi ne, %1, %c0_i32_0 : i32
    scf.if %2 {
      %cst = arith.constant 0.000000e+00 : f32
      %15 = vector.broadcast %cst : f32 to vector<8x256xf32>
      %c0 = arith.constant 0 : index
      %c0_6 = arith.constant 0 : index
      %16 = vector.load %arg19[%c0, %c0_6] : memref<8x256xf32, #tpu.memory_space<vmem>>, vector<8x256xf32>
      tpu.vector_store %arg19[%c0, %c0_6], %15 {strides = array<i32>} : memref<8x256xf32, #tpu.memory_space<vmem>>, vector<8x256xf32>,
      %cst_7 = arith.constant 0.000000e+00 : f32
      %17 = vector.broadcast %cst_7 : f32 to vector<8x256xf32>
      %c0_8 = arith.constant 0 : index
      %c0_9 = arith.constant 0 : index
      %18 = vector.load %arg21[%c0_8, %c0_9] : memref<8x256xf32, #tpu.memory_space<vmem>>, vector<8x256xf32>
      tpu.vector_store %arg21[%c0_8, %c0_9], %17 {strides = array<i32>} : memref<8x256xf32, #tpu.memory_space<vmem>>, vector<8x256xf32>,
    } else {
    }
    %c2_i32 = arith.constant 2 : i32
    %3 = arith.cmpi slt, %arg0, %c2_i32 : i32
    %4 = arith.extui %3 : i1 to i32
    %c0_i32_1 = arith.constant 0 : i32
    %5 = arith.cmpi ne, %4, %c0_i32_1 : i32
    scf.if %5 {
      %c0 = arith.constant 0 : index
      %c0_6 = arith.constant 0 : index
      %15 = vector.load %arg1[%c0, %c0_6] : memref<8x256xf32, #tpu.memory_space<vmem>>, vector<8x256xf32>
      %c0_7 = arith.constant 0 : index
      %c0_8 = arith.constant 0 : index
      %16 = vector.load %arg4[%c0_7, %c0_8] : memref<256x2048xf32, #tpu.memory_space<vmem>>, vector<256x2048xf32>
      %cst = arith.constant dense<0.000000e+00> : vector<8x2048xf32>
      %17 = tpu.matmul %15, %16, %cst {dimension_numbers = #tpu.dot_dimension_numbers<[1], [0], [0], [1], [0, 0, 1, 1], [], []>} : vector<8x256xf32>, vector<256x2048xf32>, vector<8x2048xf32> -> vector<8x2048xf32>
      %c0_9 = arith.constant 0 : index
      %c0_10 = arith.constant 0 : index
      %18 = vector.load %arg2[%c0_9, %c0_10] : memref<8x128xf32, #tpu.memory_space<vmem>>, vector<8x128xf32>
      %c0_11 = arith.constant 0 : index
      %c0_12 = arith.constant 0 : index
      %19 = vector.load %arg5[%c0_11, %c0_12] : memref<128x2048xf32, #tpu.memory_space<vmem>>, vector<128x2048xf32>
      %cst_13 = arith.constant dense<0.000000e+00> : vector<8x2048xf32>
      %20 = tpu.matmul %18, %19, %cst_13 {dimension_numbers = #tpu.dot_dimension_numbers<[1], [0], [0], [1], [0, 0, 1, 1], [], []>} : vector<8x128xf32>, vector<128x2048xf32>, vector<8x2048xf32> -> vector<8x2048xf32>
      %21 = arith.addf %17, %20 : vector<8x2048xf32>
      %c0_14 = arith.constant 0 : index
      %c0_15 = arith.constant 0 : index
      %22 = vector.load %arg6[%c0_14, %c0_15] : memref<1x2048xf32, #tpu.memory_space<vmem>>, vector<1x2048xf32>
      %23 = vector.broadcast %22 : vector<1x2048xf32> to vector<8x2048xf32>
      %24 = arith.addf %21, %23 : vector<8x2048xf32>
      %cst_16 = arith.constant 0.000000e+00 : f32
      %25 = vector.broadcast %cst_16 : f32 to vector<8x2048xf32>
      %26 = arith.cmpf ogt, %24, %25 : vector<8x2048xf32>
      %cst_17 = arith.constant 0.00999999977 : f32
      %27 = vector.broadcast %cst_17 : f32 to vector<8x2048xf32>
      %28 = arith.mulf %27, %24 : vector<8x2048xf32>
      %29 = arith.select %26, %24, %28 : vector<8x2048xi1>, vector<8x2048xf32>
      %c0_18 = arith.constant 0 : index
      %c0_19 = arith.constant 0 : index
      %30 = vector.load %arg19[%c0_18, %c0_19] : memref<8x256xf32, #tpu.memory_space<vmem>>, vector<8x256xf32>
      %c0_20 = arith.constant 0 : index
      %c0_21 = arith.constant 0 : index
      %31 = vector.load %arg7[%c0_20, %c0_21] : memref<2048x256xf32, #tpu.memory_space<vmem>>, vector<2048x256xf32>
      %cst_22 = arith.constant dense<0.000000e+00> : vector<8x256xf32>
      %32 = tpu.matmul %29, %31, %cst_22 {dimension_numbers = #tpu.dot_dimension_numbers<[1], [0], [0], [1], [0, 0, 1, 1], [], []>} : vector<8x2048xf32>, vector<2048x256xf32>, vector<8x256xf32> -> vector<8x256xf32>
      %33 = arith.addf %30, %32 : vector<8x256xf32>
      %c0_23 = arith.constant 0 : index
      %c0_24 = arith.constant 0 : index
      %34 = vector.load %arg19[%c0_23, %c0_24] : memref<8x256xf32, #tpu.memory_space<vmem>>, vector<8x256xf32>
      tpu.vector_store %arg19[%c0_23, %c0_24], %33 {strides = array<i32>} : memref<8x256xf32, #tpu.memory_space<vmem>>, vector<8x256xf32>,
    } else {
    }
    %c1_i32 = arith.constant 1 : i32
    %6 = arith.cmpi eq, %arg0, %c1_i32 : i32
    %7 = arith.extui %6 : i1 to i32
    %c0_i32_2 = arith.constant 0 : i32
    %8 = arith.cmpi ne, %7, %c0_i32_2 : i32
    scf.if %8 {
      %c0 = arith.constant 0 : index
      %c0_6 = arith.constant 0 : index
      %15 = vector.load %arg19[%c0, %c0_6] : memref<8x256xf32, #tpu.memory_space<vmem>>, vector<8x256xf32>
      %c0_7 = arith.constant 0 : index
      %c0_8 = arith.constant 0 : index
      %16 = vector.load %arg8[%c0_7, %c0_8] : memref<1x256xf32, #tpu.memory_space<vmem>>, vector<1x256xf32>
      %17 = vector.broadcast %16 : vector<1x256xf32> to vector<8x256xf32>
      %18 = arith.addf %15, %17 : vector<8x256xf32>
      %19 = vector.extract_strided_slice %18 {offsets = [0, 0], sizes = [8, 128], strides = [1, 1]} : vector<8x256xf32> to vector<8x128xf32>
      %cst = arith.constant 0.000000e+00 : f32
      %20 = vector.broadcast %cst : f32 to vector<8x128xf32>
      %21 = arith.maximumf %19, %20 : vector<8x128xf32>
      %22 = vector.extract_strided_slice %18 {offsets = [0, 128], sizes = [8, 128], strides = [1, 1]} : vector<8x256xf32> to vector<8x128xf32>
      %cst_9 = arith.constant 0.000000e+00 : f32
      %23 = vector.broadcast %cst_9 : f32 to vector<8x128xf32>
      %24 = arith.maximumf %22, %23 : vector<8x128xf32>
      %c0_10 = arith.constant 0 : index
      %c0_11 = arith.constant 0 : index
      %25 = vector.load %arg16[%c0_10, %c0_11] : memref<8x128xf32, #tpu.memory_space<vmem>>, vector<8x128xf32>
      tpu.vector_store %arg16[%c0_10, %c0_11], %21 {strides = array<i32>} : memref<8x128xf32, #tpu.memory_space<vmem>>, vector<8x128xf32>,
      %c0_12 = arith.constant 0 : index
      %c0_13 = arith.constant 0 : index
      %26 = vector.load %arg17[%c0_12, %c0_13] : memref<8x128xf32, #tpu.memory_space<vmem>>, vector<8x128xf32>
      tpu.vector_store %arg17[%c0_12, %c0_13], %24 {strides = array<i32>} : memref<8x128xf32, #tpu.memory_space<vmem>>, vector<8x128xf32>,
      %c0_14 = arith.constant 0 : index
      %c0_15 = arith.constant 0 : index
      %27 = vector.load %arg3[%c0_14, %c0_15] : memref<8x128xf32, #tpu.memory_space<vmem>>, vector<8x128xf32>
      %cst_16 = arith.constant 5.000000e-01 : f32
      %28 = vector.broadcast %cst_16 : f32 to vector<8x128xf32>
      %29 = arith.mulf %28, %24 : vector<8x128xf32>
      %30 = math.exp %29 : vector<8x128xf32>
      %31 = arith.mulf %27, %30 : vector<8x128xf32>
      %32 = arith.addf %21, %31 : vector<8x128xf32>
      %c0_17 = arith.constant 0 : index
      %c0_18 = arith.constant 0 : index
      %33 = vector.load %arg20[%c0_17, %c0_18] : memref<8x128xf32, #tpu.memory_space<vmem>>, vector<8x128xf32>
      tpu.vector_store %arg20[%c0_17, %c0_18], %32 {strides = array<i32>} : memref<8x128xf32, #tpu.memory_space<vmem>>, vector<8x128xf32>,
    } else {
    }
    %c2_i32_3 = arith.constant 2 : i32
    %9 = arith.cmpi sge, %arg0, %c2_i32_3 : i32
    %10 = arith.extui %9 : i1 to i32
    %c0_i32_4 = arith.constant 0 : i32
    %11 = arith.cmpi ne, %10, %c0_i32_4 : i32
    scf.if %11 {
      %c0 = arith.constant 0 : index
      %c0_6 = arith.constant 0 : index
      %15 = vector.load %arg20[%c0, %c0_6] : memref<8x128xf32, #tpu.memory_space<vmem>>, vector<8x128xf32>
      %c0_7 = arith.constant 0 : index
      %c0_8 = arith.constant 0 : index
      %16 = vector.load %arg9[%c0_7, %c0_8] : memref<128x2048xf32, #tpu.memory_space<vmem>>, vector<128x2048xf32>
      %cst = arith.constant dense<0.000000e+00> : vector<8x2048xf32>
      %17 = tpu.matmul %15, %16, %cst {dimension_numbers = #tpu.dot_dimension_numbers<[1], [0], [0], [1], [0, 0, 1, 1], [], []>} : vector<8x128xf32>, vector<128x2048xf32>, vector<8x2048xf32> -> vector<8x2048xf32>
      %c0_9 = arith.constant 0 : index
      %c0_10 = arith.constant 0 : index
      %18 = vector.load %arg2[%c0_9, %c0_10] : memref<8x128xf32, #tpu.memory_space<vmem>>, vector<8x128xf32>
      %c0_11 = arith.constant 0 : index
      %c0_12 = arith.constant 0 : index
      %19 = vector.load %arg10[%c0_11, %c0_12] : memref<128x2048xf32, #tpu.memory_space<vmem>>, vector<128x2048xf32>
      %cst_13 = arith.constant dense<0.000000e+00> : vector<8x2048xf32>
      %20 = tpu.matmul %18, %19, %cst_13 {dimension_numbers = #tpu.dot_dimension_numbers<[1], [0], [0], [1], [0, 0, 1, 1], [], []>} : vector<8x128xf32>, vector<128x2048xf32>, vector<8x2048xf32> -> vector<8x2048xf32>
      %21 = arith.addf %17, %20 : vector<8x2048xf32>
      %c0_14 = arith.constant 0 : index
      %c0_15 = arith.constant 0 : index
      %22 = vector.load %arg11[%c0_14, %c0_15] : memref<1x2048xf32, #tpu.memory_space<vmem>>, vector<1x2048xf32>
      %23 = vector.broadcast %22 : vector<1x2048xf32> to vector<8x2048xf32>
      %24 = arith.addf %21, %23 : vector<8x2048xf32>
      %cst_16 = arith.constant 0.000000e+00 : f32
      %25 = vector.broadcast %cst_16 : f32 to vector<8x2048xf32>
      %26 = arith.cmpf ogt, %24, %25 : vector<8x2048xf32>
      %cst_17 = arith.constant 0.00999999977 : f32
      %27 = vector.broadcast %cst_17 : f32 to vector<8x2048xf32>
      %28 = arith.mulf %27, %24 : vector<8x2048xf32>
      %29 = arith.select %26, %24, %28 : vector<8x2048xi1>, vector<8x2048xf32>
      %c0_18 = arith.constant 0 : index
      %c0_19 = arith.constant 0 : index
      %30 = vector.load %arg21[%c0_18, %c0_19] : memref<8x256xf32, #tpu.memory_space<vmem>>, vector<8x256xf32>
      %c0_20 = arith.constant 0 : index
      %c0_21 = arith.constant 0 : index
      %31 = vector.load %arg12[%c0_20, %c0_21] : memref<2048x256xf32, #tpu.memory_space<vmem>>, vector<2048x256xf32>
      %cst_22 = arith.constant dense<0.000000e+00> : vector<8x256xf32>
      %32 = tpu.matmul %29, %31, %cst_22 {dimension_numbers = #tpu.dot_dimension_numbers<[1], [0], [0], [1], [0, 0, 1, 1], [], []>} : vector<8x2048xf32>, vector<2048x256xf32>, vector<8x256xf32> -> vector<8x256xf32>
      %33 = arith.addf %30, %32 : vector<8x256xf32>
      %c0_23 = arith.constant 0 : index
      %c0_24 = arith.constant 0 : index
      %34 = vector.load %arg21[%c0_23, %c0_24] : memref<8x256xf32, #tpu.memory_space<vmem>>, vector<8x256xf32>
      tpu.vector_store %arg21[%c0_23, %c0_24], %33 {strides = array<i32>} : memref<8x256xf32, #tpu.memory_space<vmem>>, vector<8x256xf32>,
    } else {
    }
    %c3_i32 = arith.constant 3 : i32
    %12 = arith.cmpi eq, %arg0, %c3_i32 : i32
    %13 = arith.extui %12 : i1 to i32
    %c0_i32_5 = arith.constant 0 : i32
    %14 = arith.cmpi ne, %13, %c0_i32_5 : i32
    scf.if %14 {
      %c0 = arith.constant 0 : index
      %c0_6 = arith.constant 0 : index
      %15 = vector.load %arg21[%c0, %c0_6] : memref<8x256xf32, #tpu.memory_space<vmem>>, vector<8x256xf32>
      %c0_7 = arith.constant 0 : index
      %c0_8 = arith.constant 0 : index
      %16 = vector.load %arg13[%c0_7, %c0_8] : memref<1x256xf32, #tpu.memory_space<vmem>>, vector<1x256xf32>
      %17 = vector.broadcast %16 : vector<1x256xf32> to vector<8x256xf32>
      %18 = arith.addf %15, %17 : vector<8x256xf32>
      %cst = arith.constant dense<0.000000e+00> : vector<256xf32>
      %19 = vector.multi_reduction <add>, %18, %cst [0] : vector<8x256xf32> to vector<256xf32>
      %20 = vector.shape_cast %19 : vector<256xf32> to vector<1x256xf32>
      %cst_9 = arith.constant 8.000000e+00 : f32
      %21 = vector.broadcast %cst_9 : f32 to vector<1x256xf32>
      %22 = arith.divf %20, %21 : vector<1x256xf32>
      %23 = vector.broadcast %22 : vector<1x256xf32> to vector<8x256xf32>
      %24 = arith.subf %18, %23 : vector<8x256xf32>
      %25 = arith.mulf %24, %24 : vector<8x256xf32>
      %cst_10 = arith.constant dense<0.000000e+00> : vector<256xf32>
      %26 = vector.multi_reduction <add>, %25, %cst_10 [0] : vector<8x256xf32> to vector<256xf32>
      %27 = vector.shape_cast %26 : vector<256xf32> to vector<1x256xf32>
      %cst_11 = arith.constant 8.000000e+00 : f32
      %28 = vector.broadcast %cst_11 : f32 to vector<1x256xf32>
      %29 = arith.divf %27, %28 : vector<1x256xf32>
      %30 = vector.broadcast %22 : vector<1x256xf32> to vector<8x256xf32>
      %31 = arith.subf %18, %30 : vector<8x256xf32>
      %cst_12 = arith.constant 9.99999974E-6 : f32
      %32 = vector.broadcast %cst_12 : f32 to vector<1x256xf32>
      %33 = arith.addf %29, %32 : vector<1x256xf32>
      %34 = math.rsqrt %33 : vector<1x256xf32>
      %35 = vector.broadcast %34 : vector<1x256xf32> to vector<8x256xf32>
      %36 = arith.mulf %31, %35 : vector<8x256xf32>
      %c0_13 = arith.constant 0 : index
      %c0_14 = arith.constant 0 : index
      %37 = vector.load %arg14[%c0_13, %c0_14] : memref<1x256xf32, #tpu.memory_space<vmem>>, vector<1x256xf32>
      %38 = vector.broadcast %37 : vector<1x256xf32> to vector<8x256xf32>
      %39 = arith.mulf %36, %38 : vector<8x256xf32>
      %c0_15 = arith.constant 0 : index
      %c0_16 = arith.constant 0 : index
      %40 = vector.load %arg15[%c0_15, %c0_16] : memref<1x256xf32, #tpu.memory_space<vmem>>, vector<1x256xf32>
      %41 = vector.broadcast %40 : vector<1x256xf32> to vector<8x256xf32>
      %42 = arith.addf %39, %41 : vector<8x256xf32>
      %cst_17 = arith.constant 0.000000e+00 : f32
      %43 = vector.broadcast %cst_17 : f32 to vector<8x256xf32>
      %44 = arith.maximumf %42, %43 : vector<8x256xf32>
      %c0_18 = arith.constant 0 : index
      %c0_19 = arith.constant 0 : index
      %45 = vector.load %arg18[%c0_18, %c0_19] : memref<8x256xf32, #tpu.memory_space<vmem>>, vector<8x256xf32>
      tpu.vector_store %arg18[%c0_18, %c0_19], %44 {strides = array<i32>} : memref<8x256xf32, #tpu.memory_space<vmem>>, vector<8x256xf32>,
    } else {
    }
    return
  }
  func.func @transform_0(%arg0: i32) -> (i32, i32) {
    %c0_i32 = arith.constant 0 : i32
    %c0_i32_0 = arith.constant 0 : i32
    %c0_i32_1 = arith.constant 0 : i32
    return %c0_i32, %c0_i32_0 : i32, i32
  }
  func.func @transform_1(%arg0: i32) -> (i32, i32) {
    %c0_i32 = arith.constant 0 : i32
    %c0_i32_0 = arith.constant 0 : i32
    %c0_i32_1 = arith.constant 0 : i32
    return %c0_i32, %c0_i32_0 : i32, i32
  }
  func.func @transform_2(%arg0: i32) -> (i32, i32) {
    %c0_i32 = arith.constant 0 : i32
    %c0_i32_0 = arith.constant 0 : i32
    %c0_i32_1 = arith.constant 0 : i32
    return %c0_i32, %c0_i32_0 : i32, i32
  }
  func.func @transform_3(%arg0: i32) -> (i32, i32) {
    %c1_i32 = arith.constant 1 : i32
    %0 = arith.minsi %arg0, %c1_i32 : i32
    %c0_i32 = arith.constant 0 : i32
    %c0_i32_0 = arith.constant 0 : i32
    return %c0_i32, %0 : i32, i32
  }
  func.func @transform_4(%arg0: i32) -> (i32, i32) {
    %c1_i32 = arith.constant 1 : i32
    %0 = arith.minsi %arg0, %c1_i32 : i32
    %c0_i32 = arith.constant 0 : i32
    %c0_i32_0 = arith.constant 0 : i32
    return %c0_i32, %0 : i32, i32
  }
  func.func @transform_5(%arg0: i32) -> (i32, i32) {
    %c1_i32 = arith.constant 1 : i32
    %0 = arith.minsi %arg0, %c1_i32 : i32
    %c0_i32 = arith.constant 0 : i32
    %c0_i32_0 = arith.constant 0 : i32
    return %c0_i32, %0 : i32, i32
  }
  func.func @transform_6(%arg0: i32) -> (i32, i32) {
    %c1_i32 = arith.constant 1 : i32
    %0 = arith.minsi %arg0, %c1_i32 : i32
    %c0_i32 = arith.constant 0 : i32
    %c0_i32_0 = arith.constant 0 : i32
    return %0, %c0_i32 : i32, i32
  }
  func.func @transform_7(%arg0: i32) -> (i32, i32) {
    %c0_i32 = arith.constant 0 : i32
    %c0_i32_0 = arith.constant 0 : i32
    %c0_i32_1 = arith.constant 0 : i32
    return %c0_i32, %c0_i32_0 : i32, i32
  }
  func.func @transform_8(%arg0: i32) -> (i32, i32) {
    %c2_i32 = arith.constant 2 : i32
    %0 = arith.subi %arg0, %c2_i32 : i32
    %c0_i32 = arith.constant 0 : i32
    %1 = arith.maxsi %0, %c0_i32 : i32
    %c0_i32_0 = arith.constant 0 : i32
    %c0_i32_1 = arith.constant 0 : i32
    return %c0_i32_0, %1 : i32, i32
  }
  func.func @transform_9(%arg0: i32) -> (i32, i32) {
    %c2_i32 = arith.constant 2 : i32
    %0 = arith.subi %arg0, %c2_i32 : i32
    %c0_i32 = arith.constant 0 : i32
    %1 = arith.maxsi %0, %c0_i32 : i32
    %c0_i32_0 = arith.constant 0 : i32
    %c0_i32_1 = arith.constant 0 : i32
    return %c0_i32_0, %1 : i32, i32
  }
  func.func @transform_10(%arg0: i32) -> (i32, i32) {
    %c2_i32 = arith.constant 2 : i32
    %0 = arith.subi %arg0, %c2_i32 : i32
    %c0_i32 = arith.constant 0 : i32
    %1 = arith.maxsi %0, %c0_i32 : i32
    %c0_i32_0 = arith.constant 0 : i32
    %c0_i32_1 = arith.constant 0 : i32
    return %c0_i32_0, %1 : i32, i32
  }
  func.func @transform_11(%arg0: i32) -> (i32, i32) {
    %c2_i32 = arith.constant 2 : i32
    %0 = arith.subi %arg0, %c2_i32 : i32
    %c0_i32 = arith.constant 0 : i32
    %1 = arith.maxsi %0, %c0_i32 : i32
    %c0_i32_0 = arith.constant 0 : i32
    %c0_i32_1 = arith.constant 0 : i32
    return %1, %c0_i32_0 : i32, i32
  }
  func.func @transform_12(%arg0: i32) -> (i32, i32) {
    %c0_i32 = arith.constant 0 : i32
    %c0_i32_0 = arith.constant 0 : i32
    %c0_i32_1 = arith.constant 0 : i32
    return %c0_i32, %c0_i32_0 : i32, i32
  }
  func.func @transform_13(%arg0: i32) -> (i32, i32) {
    %c0_i32 = arith.constant 0 : i32
    %c0_i32_0 = arith.constant 0 : i32
    %c0_i32_1 = arith.constant 0 : i32
    return %c0_i32, %c0_i32_0 : i32, i32
  }
  func.func @transform_14(%arg0: i32) -> (i32, i32) {
    %c0_i32 = arith.constant 0 : i32
    %c0_i32_0 = arith.constant 0 : i32
    %c0_i32_1 = arith.constant 0 : i32
    return %c0_i32, %c0_i32_0 : i32, i32
  }
  func.func @transform_15(%arg0: i32) -> (i32, i32) {
    %c0_i32 = arith.constant 0 : i32
    %c0_i32_0 = arith.constant 0 : i32
    %c0_i32_1 = arith.constant 0 : i32
    return %c0_i32, %c0_i32_0 : i32, i32
  }
  func.func @transform_16(%arg0: i32) -> (i32, i32) {
    %c0_i32 = arith.constant 0 : i32
    %c0_i32_0 = arith.constant 0 : i32
    %c0_i32_1 = arith.constant 0 : i32
    return %c0_i32, %c0_i32_0 : i32, i32
  }
  func.func @transform_17(%arg0: i32) -> (i32, i32) {
    %c0_i32 = arith.constant 0 : i32
    %c0_i32_0 = arith.constant 0 : i32
    %c0_i32_1 = arith.constant 0 : i32
    return %c0_i32, %c0_i32_0 : i32, i32
  }
}

</mosaic_0001>

<bundles_post_ra>
// kernel: feats_vae_forward.1
= control target key start
LH: loop header
LB: loop body
LE: loop exit
PB: predicated region body
PF: predicated region fallthrough
CT: control target
= control target key end

     0   :  { %s11714_s0 = inlined_call_operand.hbm [shape: f32[8,256], index: 0, kind: input, shape index: {}]   ;;  %s11715_s1 = inlined_call_operand.hbm [shape: f32[8,128], index: 1, kind: input, shape index: {}]   ;;  %s11716_s2 = inlined_call_operand.hbm [shape: f32[8,128], index: 2, kind: input, shape index: {}]   ;;  %s11717_s3 = inlined_call_operand.hbm [shape: f32[256,4096], index: 3, kind: input, shape index: {}]   ;;  %s11718_s4 = inlined_call_operand.hbm [shape: f32[128,4096], index: 4, kind: input, shape index: {}]   ;;  %s11719_s5 = inlined_call_operand.hbm [shape: f32[1,4096], index: 5, kind: input, shape index: {}]   ;;  %s11720_s6 = inlined_call_operand.hbm [shape: f32[4096,256], index: 6, kind: input, shape index: {}]   ;;  %s11721_s7 = inlined_call_operand.hbm [shape: f32[1,256], index: 7, kind: input, shape index: {}]   ;;  %s11722_s8 = inlined_call_operand.hbm [shape: f32[128,4096], index: 8, kind: input, shape index: {}]   ;;  %s11723_s9 = inlined_call_operand.hbm [shape: f32[128,4096], index: 9, kind: input, shape index: {}]   ;;  %s11724_s10 = inlined_call_operand.hbm [shape: f32[1,4096], index: 10, kind: input, shape index: {}]   ;;  %s11725_s11 = inlined_call_operand.hbm [shape: f32[4096,256], index: 11, kind: input, shape index: {}]   ;;  %s11726_s12 = inlined_call_operand.hbm [shape: f32[1,256], index: 12, kind: input, shape index: {}]   ;;  %s11727_s13 = inlined_call_operand.hbm [shape: f32[1,256], index: 13, kind: input, shape index: {}]   ;;  %s11728_s14 = inlined_call_operand.hbm [shape: f32[1,256], index: 14, kind: input, shape index: {}]   ;;  %s11729_s15 = inlined_call_operand.hbm [shape: f32[8,128], index: 15, kind: output, shape index: {0}]   ;;  %s11730_s16 = inlined_call_operand.hbm [shape: f32[8,128], index: 16, kind: output, shape index: {1}]   ;;  %s11731_s17 = inlined_call_operand.hbm [shape: f32[8,256], index: 17, kind: output, shape index: {2}]  }
   0x1   :  { %11770 = sst [smem:[#allocation50_spill]] %s11714_s0 }
   0x2   :  { %11771 = sst [smem:[#allocation51_spill]] %s11715_s1 }
   0x3   :  { %11772 = sst [smem:[#allocation52_spill]] %s11716_s2 }
   0x4   :  { %11773 = sst [smem:[#allocation53_spill]] %s11717_s3 }
   0x5   :  { %11774 = sst [smem:[#allocation54_spill]] %s11718_s4 }
   0x6   :  { %11775 = sst [smem:[#allocation55_spill]] %s11721_s7 }
   0x7   :  { %11776 = sst [smem:[#allocation56_spill]] %s11722_s8 }
   0x8   :  { %11777 = sst [smem:[#allocation57_spill]] %s11723_s9 }
   0x9   :  { %11778 = sst [smem:[#allocation58_spill]] %s11724_s10 }
   0xa   :  { %11779 = sst [smem:[#allocation59_spill]] %s11725_s11 }
   0xb   :  { %11780 = sst [smem:[#allocation60_spill]] %s11726_s12 }
   0xc   :  { %11781 = sst [smem:[#allocation61_spill]] %s11727_s13 }
   0xd   :  { %11782 = sst [smem:[#allocation62_spill]] %s11728_s14 }
   0xe   :  { %11783 = sst [smem:[#allocation63_spill]] %s11729_s15 }
   0xf   :  { %11784 = sst [smem:[#allocation64_spill]] %s11730_s16 }
  0x10   :  { %11785 = sst [smem:[#allocation65_spill]] %s11731_s17 }
  0x11   :  { %23 = vsyncpa [#allocation6], 0 }
  0x12   :  { %24 = vsyncpa [#allocation9], 0 }
  0x13   :  { %25 = vsyncpa [#allocation12], 0 }
  0x14   :  { %27 = vsyncpa [#allocation12 + $0x1], 0 }
  0x15   :  { %28 = vsyncpa [#allocation15], 0 }
  0x16   :  { %30 = vsyncpa [#allocation15 + $0x1], 0 }
  0x17   :  { %31 = vsyncpa [#allocation18], 0 }
  0x18   :  { %32 = vsyncpa [#allocation7], 0 }
  0x19   :  { %33 = vsyncpa [#allocation28], 0  ;;  %s8463_s24 = smov 0   ;;  %s8465_s25 = smov 0  }
  0x1a   :  { %s8467_s26 = smov 0   ;;  %s8469_s27 = smov 0  }
  0x1b   :  { %s8471_s28 = smov 0   ;;  %s8473_s29 = smov 0  }
  0x1c   :  { %s8475_s0 = smov 0  }
  0x1d LB: > { %11786 = sst [smem:[#allocation44_spill]] %s8337_s28  ;;  %s8347_s30 = smov [#allocation24]   ;;  %s8345_s0 = sphi %s8475_s0, %s11871_s0   ;;  %s8341_s29 = sphi %s8473_s29, %s11867_s29   ;;  %s8337_s28 = sphi %s8471_s28, %s11866_s28   ;;  %s8333_s27 = sphi %s8469_s27, %s11865_s27   ;;  %s8329_s26 = sphi %s8467_s26, %s11870_s26   ;;  %s8325_s25 = sphi %s8465_s25, %s11869_s25   ;;  %s8321_s24 = sphi %s8463_s24, %s11868_s24  }
  0x1e   : > { %11787 = sst [smem:[#allocation45_spill]] %s8341_s29  ;;  %s570_s18 = sshll.u32 %s8347_s30, 4  ;;  %s571_s18 = int_to_ptr.vmem [resolvable:$true] %s570_s18 }
  0x1f   : > { %s8499_s19 = sadd.s32 4294967295, %s8345_s0   ;;  %p7469_p0 = scmp.ge.s32.totalorder %s8345_s0, 1 }
  0x20   : > { %11788 = sst [smem:[#allocation46_spill]] %s8499_s19  ;;  %p11733_p1 = scmp.eq.s32.totalorder %s8499_s19, 0 }
  0x21   : > { %p502_p2 = scmp.lt.s32.totalorder %s8345_s0, 5  ;;  %s8348_s20 = smov [#allocation25]  }
  0x22   : > { %s581_s21 = sshll.u32 %s8348_s20, 4  ;;  %s8349_s22 = smov [#allocation5]   ;;  %s582_s21 = int_to_ptr.vmem [resolvable:$true] %s581_s21 }
  0x23   : > { %p8505_p4 = pnand %p7469_p0, %p502_p2  ;;  %s515_s23 = sshll.u32 %s8349_s22, 4  ;;  %s8517_s23 = int_to_ptr.vmem [resolvable:$true] %s515_s23 }
  0x24   : > { %s8350_s17 = smov [#allocation8]   ;;  %s7768_s20 = scalar_lea.vmem %s571_s18, 32 }
  0x25   : > { %s11789_s1 = scalar_select %p8505_p4, 1, 0 }
  0x26   : > { %p7603_p5 = pneg %p8505_p4  ;;  %s8519_s15 = sshll.u32 %s8350_s17, 4  ;;  %s527_s15 = int_to_ptr.vmem [resolvable:$true] %s8519_s15 }
  0x27   : > { %11790 = sst [smem:[#allocation47_spill]] %s11789_s1  ;;  %p7769_p8 = scmp.ne.s32.totalorder %s571_s18, %s7768_s20 }
  0x28   : > { %p8513_p6 = pnand %p7603_p5, %p11733_p1  ;;  %p7776_p11 = scmp.lt.s32.totalorder %s571_s18, %s571_s18 }
  0x29   : > { %p7777_p12 = scmp.lt.s32.totalorder %s7768_s20, %s7768_s20 }
  0x2a   : > { %s11791_s30 = scalar_select %p8513_p6, 1, 0 }
  0x2b   : > { %p8523_p7 = pneg %p8513_p6  ;;  %p7778_p13 = por %p7777_p12, %p7776_p11 }
  0x2d   : > { %s11792_s16 = scalar_select %p8523_p7, 1, 0 }
  0x2e   : > { %p7771_p9 = pnand %p7769_p8, %p8523_p7 }
  0x30   : > { %p7772_p10 = pneg %p7771_p9 }
  0x32   : > { %p7779_p0 = pnand %p7778_p13, %p7772_p10 }
  0x34   : > { %7782 = shalt.err (!%p7779_p0)
}
  0x35   : > { %s11793_s13 = sld [smem:[#allocation61_spill]]  ;;  %s7794_s1 = scalar_lea.vmem %s582_s21, 32 }
  0x36   : > { %p7795_p2 = scmp.ne.s32.totalorder %s582_s21, %s7794_s1  ;;  %p7802_p1 = scmp.lt.s32.totalorder %s582_s21, %s582_s21 }
  0x37   : > { %p7803_p8 = scmp.lt.s32.totalorder %s7794_s1, %s7794_s1 }
  0x38   : > { %p7797_p5 = pnand %p7795_p2, %p8523_p7 }
  0x39   : > { %p7804_p9 = por %p7803_p8, %p7802_p1 }
  0x3a   : > { %p7798_p3 = pneg %p7797_p5 }
  0x3b   : > { %7621 = dma.hbm_to_vmem [thread:$0]  (!%p8513_p6), %s11793_s13, 32, %s571_s18, [#allocation12]  }
  0x3c   : > { %p7805_p4 = pnand %p7804_p9, %p7798_p3 }
  0x3e   : > { %7808 = shalt.err (!%p7805_p4)
}
  0x3f   : > { %s11794_s14 = sld [smem:[#allocation62_spill]]  ;;  %s7820_s18 = scalar_lea.vmem %s8517_s23, 256 }
  0x40   : > { %p7821_p10 = scmp.ne.s32.totalorder %s8517_s23, %s7820_s18  ;;  %p7828_p13 = scmp.lt.s32.totalorder %s8517_s23, %s8517_s23 }
  0x41   : > { %p7829_p1 = scmp.lt.s32.totalorder %s7820_s18, %s7820_s18 }
  0x42   : > { %p7823_p11 = pnand %p7821_p10, %p8523_p7 }
  0x43   : > { %p7830_p3 = por %p7829_p1, %p7828_p13 }
  0x44   : > { %p7824_p12 = pneg %p7823_p11 }
  0x45   : > { %7624 = dma.hbm_to_vmem [thread:$0]  (!%p8513_p6), %s11794_s14, 32, %s582_s21, [#allocation15]  }
  0x46   : > { %p7831_p4 = pnand %p7830_p3, %p7824_p12 }
  0x48   : > { %7834 = shalt.err (!%p7831_p4)
}
  0x49   : > { %s11795_s17 = sld [smem:[#allocation50_spill]]  ;;  %s7846_s21 = scalar_lea.vmem %s527_s15, 128 }
  0x4a   : > { %p7847_p0 = scmp.ne.s32.totalorder %s527_s15, %s7846_s21  ;;  %p7854_p8 = scmp.lt.s32.totalorder %s527_s15, %s527_s15 }
  0x4b   : > { %p7855_p9 = scmp.lt.s32.totalorder %s7846_s21, %s7846_s21 }
  0x4c   : > { %p7849_p2 = pnand %p7847_p0, %p8523_p7 }
  0x4d   : > { %p7856_p10 = por %p7855_p9, %p7854_p8 }
  0x4e   : > { %p7850_p5 = pneg %p7849_p2 }
  0x4f   : > { %7606 = dma.hbm_to_vmem [thread:$0]  (!%p8513_p6), %s11795_s17, 256, %s8517_s23, [#allocation6]  }
  0x50   : > { %p7857_p11 = pnand %p7856_p10, %p7850_p5 }
  0x52   : > { %7860 = shalt.err (!%p7857_p11)
}
  0x53   : > { %s11796_s18 = sld [smem:[#allocation51_spill]]  ;;  %s8562_s23 = sadd.s32 1, %s8345_s0  }
  0x54   : > { %p106_p12 = scmp.lt.s32.totalorder %s8345_s0, 1  ;;  %p108_p13 = scmp.lt.s32.totalorder %s8562_s23, 1 }
  0x55   : > { %s113_s11 = sadd.s32 1, %s8341_s29  ;;  %p120_p1 = scmp.ne.s32.totalorder %s8341_s29, %s8337_s28 }
  0x56   : > { %s8568_s1 = scalar_select %p106_p12, %s8345_s0, 1 }
  0x57   : > { %s109_s17 = scalar_select %p108_p13, %s8562_s23, 1 }
  0x58   : > { %p11745_p3 = scmp.eq.s32.totalorder %s8345_s0, 0  ;;  %p126_p4 = scmp.ne.s32.totalorder %s8337_s28, %s8333_s27 }
  0x59   : > { %7609 = dma.hbm_to_vmem [thread:$0]  (!%p8513_p6), %s11796_s18, 128, %s527_s15, [#allocation9]  }
  0x5a   : > { %s110_s21 = ssub.s32 %s8568_s1, %s109_s17  ;;  %p122_p2 = por %p11745_p3, %p120_p1 }
  0x5b   : > { %p111_p0 = scmp.eq.s32.totalorder %s110_s21, 0  ;;  %p11797_p5 = scmp.eq.s32.totalorder %s8499_s19, 0 }
  0x5c   : > { %p11744_p9 = scmp.lt.s32.totalorder %s8345_s0, 4  ;;  %s8590_s20 = sand.u32 1, %s8345_s0  }
  0x5d   : > { %p8581_p8 = por %p11797_p5, %p126_p4  ;;  %s8593_s18 = sand.u32 1, %s8341_s29  }
  0x5e   : > { %s8587_s22 = scalar_select %p111_p0, %s8341_s29, %s113_s11  }
  0x5f   : > { %s11798_s15 = scalar_select %p8581_p8, 1, 0 }
  0x60   : > { %11800 = sst [smem:[#allocation49_spill]] %s8587_s22  ;;  %s11740_s17 = sshll.u32 %s8593_s18, 12 }
  0x61   : > { %11799 = sst [smem:[#allocation48_spill]] %s11798_s15  ;;  %s11741_s27 = sshll.u32 %s8568_s1, 11 }
  0x62   : > { %s11801_s3 = sld [smem:[#allocation53_spill]]  ;;  %s596_s11 = scalar_lea.vmem [#allocation11], %s11740_s17 }
  0x63   : > { %s605_s22 = sshll.u32 %s596_s11, 4  ;;  %p8610_p10 = pnand %p11744_p9, %p122_p2  ;;  %s8606_s22 = int_to_ptr.vmem [resolvable:$true] %s605_s22 }
  0x64   : > { %s8615_s15 = scalar_lea.sflag [#allocation12], %s8590_s20 }
  0x65   : > { %p8621_p12 = pneg %p8610_p10 }
  0x68   : > { %s8602_s14 = scalar_lea.hbm %s11801_s3, %s11741_s27  ;;  %s7866_s17 = scalar_lea.hbm %s11801_s3, 131072 }
  0x69   : > { %s7861_s28 = scalar_lea.hbm %s8602_s14, 65536  ;;  %p7867_p4 = scmp.lt.s32.totalorder %s8602_s14, %s11801_s3 }
  0x6a   : > { %p7862_p11 = scmp.ne.s32.totalorder %s8602_s14, %s7861_s28  ;;  %p7868_p0 = scmp.lt.s32.totalorder %s7866_s17, %s7861_s28 }
  0x6c   : > { %p7864_p13 = pnand %p8621_p12, %p7862_p11  ;;  %p7869_p2 = por %p7868_p0, %p7867_p4 }
  0x6e   : > { %p7865_p1 = pneg %p7864_p13 }
  0x70   : > { %p7870_p5 = pnand %p7869_p2, %p7865_p1 }
  0x72   : > { %7873 = shalt.err (!%p7870_p5)
}
  0x73   : > { %s7874_s9 = scalar_lea.vmem %s8606_s22, 65536  ;;  %s8351_s12 = smov [#allocation11]  }
  0x74   : > { %p7875_p9 = scmp.ne.s32.totalorder %s8606_s22, %s7874_s9  ;;  %s7879_s21 = sshll.u32 %s8351_s12, 4  ;;  %s7880_s21 = int_to_ptr.vmem [resolvable:$false] %s7879_s21 }
  0x75   : > { %s7881_s11 = scalar_lea.vmem %s7880_s21, 131072  ;;  %p7882_p3 = scmp.lt.s32.totalorder %s8606_s22, %s7880_s21 }
  0x76   : > { %p7877_p11 = pnand %p7875_p9, %p8621_p12  ;;  %p7883_p8 = scmp.lt.s32.totalorder %s7881_s11, %s7874_s9 }
  0x78   : > { %p7878_p13 = pneg %p7877_p11  ;;  %p7884_p6 = por %p7883_p8, %p7882_p3 }
  0x7a   : > { %p7885_p7 = pnand %p7884_p6, %p7878_p13 }
  0x7c   : > { %7888 = shalt.err (!%p7885_p7)
}
  0x7d   : > { %s11755_s10 = smov 4096   ;;  %s11757_s28 = smov 2048  }
  0x7e   : > { %s11759_s17 = smov 128   ;;  %s7484_s9 = sshll.u32 %s8593_s18, 4 }
  0x7f   : > { %7628 = dma.hbm_to_vmem [thread:$0]  (!%p8610_p10), %s8602_s14, 65536, %s8606_s22, %s8615_s15, %s11755_s10, %s11757_s28, %s11759_s17  }
  0x80   : > { %s7539_s12 = sshll.u32 %s8568_s1, 8  ;;  %s642_s3 = scalar_lea.vmem [#allocation14], %s7484_s9 }
  0x81   : > { %s8652_s11 = scalar_lea.hbm %s11719_s5, %s7539_s12  ;;  %s652_s7 = sshll.u32 %s642_s3, 4  ;;  %s653_s7 = int_to_ptr.vmem [resolvable:$true] %s652_s7 }
  0x82   : > { %s8655_s8 = scalar_lea.sflag [#allocation15], %s8590_s20  ;;  %s7889_s19 = scalar_lea.hbm %s8652_s11, 256 }
  0x83   : > { %p7890_p6 = scmp.ne.s32.totalorder %s8652_s11, %s7889_s19  ;;  %s7894_s10 = scalar_lea.hbm %s11719_s5, 512 }
  0x84   : > { %p7895_p8 = scmp.lt.s32.totalorder %s8652_s11, %s11719_s5  ;;  %p7896_p9 = scmp.lt.s32.totalorder %s7894_s10, %s7889_s19 }
  0x85   : > { %p7892_p7 = pnand %p7890_p6, %p8621_p12 }
  0x86   : > { %p7897_p1 = por %p7896_p9, %p7895_p8 }
  0x87   : > { %p7893_p3 = pneg %p7892_p7 }
  0x89   : > { %p7898_p4 = pnand %p7897_p1, %p7893_p3 }
  0x8b   : > { %7901 = shalt.err (!%p7898_p4)
}
  0x8c   : > { %s7902_s3 = scalar_lea.vmem %s653_s7, 256  ;;  %s8355_s9 = smov [#allocation14]  }
  0x8d   : > { %p7903_p0 = scmp.ne.s32.totalorder %s653_s7, %s7902_s3  ;;  %s7907_s21 = sshll.u32 %s8355_s9, 4  ;;  %s7908_s21 = int_to_ptr.vmem [resolvable:$false] %s7907_s21 }
  0x8e   : > { %s7909_s28 = scalar_lea.vmem %s7908_s21, 512  ;;  %p7910_p11 = scmp.lt.s32.totalorder %s653_s7, %s7908_s21 }
  0x8f   : > { %p7905_p2 = pnand %p7903_p0, %p8621_p12  ;;  %p7911_p13 = scmp.lt.s32.totalorder %s7909_s28, %s7902_s3 }
  0x91   : > { %p7906_p5 = pneg %p7905_p2  ;;  %p7912_p6 = por %p7911_p13, %p7910_p11 }
  0x93   : > { %p7913_p7 = pnand %p7912_p6, %p7906_p5 }
  0x95   : > { %7916 = shalt.err (!%p7913_p7)
}
  0x96   : > { %7634 = dma.hbm_to_vmem [thread:$0]  (!%p8610_p10), %s8652_s11, 256, %s653_s7, %s8655_s8  }
  0x97   : > { %s8356_s19 = smov [#allocation10]   ;;  %s7481_s14 = sshll.u32 %s8593_s18, 11 }
  0x98   : > { %s537_s10 = sshll.u32 %s8356_s19, 4  ;;  %p11804_p8 = scmp.ne.s32.totalorder %s11792_s16, 0  ;;  %s538_s10 = int_to_ptr.vmem [resolvable:$true] %s537_s10 }
  0x99   : > { %s7928_s22 = scalar_lea.vmem %s538_s10, 128  ;;  %p7936_p4 = scmp.lt.s32.totalorder %s538_s10, %s538_s10 }
  0x9a   : > { %p7929_p3 = scmp.ne.s32.totalorder %s538_s10, %s7928_s22  ;;  %p7937_p0 = scmp.lt.s32.totalorder %s7928_s22, %s7928_s22 }
  0x9c   : > { %p7931_p9 = pnand %p7929_p3, %p11804_p8  ;;  %p7938_p2 = por %p7937_p0, %p7936_p4 }
  0x9e   : > { %p7932_p1 = pneg %p7931_p9 }
  0xa0   : > { %p7939_p5 = pnand %p7938_p2, %p7932_p1 }
  0xa2   : > { %7942 = shalt.err (!%p7939_p5)
}
  0xa3   : > { %p11805_p11 = scmp.ne.s32.totalorder %s11791_s30, 0  ;;  %s11806_s2 = sld [smem:[#allocation52_spill]] }
  0xa4   : > { %s11807_s7 = sshll.u32 %s8568_s1, 11  ;;  %s11808_s4 = sld [smem:[#allocation54_spill]] }
  0xa5   : > { %s619_s9 = scalar_lea.vmem [#allocation13], %s7481_s14 }
  0xa6   : > { %s628_s21 = sshll.u32 %s619_s9, 4  ;;  %s629_s21 = int_to_ptr.vmem [resolvable:$true] %s628_s21 }
  0xa9   : > { %7612 = dma.hbm_to_vmem [thread:$0]  (!%p11805_p11), %s11806_s2, 128, %s538_s10, [#allocation9]  }
  0xaa   : > { %s8687_s3 = scalar_lea.hbm %s11808_s4, %s11807_s7  ;;  %s7948_s10 = scalar_lea.hbm %s11808_s4, 65536 }
  0xab   : > { %s7943_s19 = scalar_lea.hbm %s8687_s3, 32768  ;;  %p7949_p3 = scmp.lt.s32.totalorder %s8687_s3, %s11808_s4 }
  0xac   : > { %p7944_p13 = scmp.ne.s32.totalorder %s8687_s3, %s7943_s19  ;;  %p7950_p9 = scmp.lt.s32.totalorder %s7948_s10, %s7943_s19 }
  0xae   : > { %p7946_p6 = pnand %p7944_p13, %p8621_p12  ;;  %p7951_p1 = por %p7950_p9, %p7949_p3 }
  0xb0   : > { %p7947_p7 = pneg %p7946_p6 }
  0xb2   : > { %p7952_p4 = pnand %p7951_p1, %p7947_p7 }
  0xb4   : > { %7955 = shalt.err (!%p7952_p4)
}
  0xb5   : > { %s7956_s14 = scalar_lea.vmem %s629_s21, 32768  ;;  %s8357_s7 = smov [#allocation13]  }
  0xb6   : > { %p7957_p0 = scmp.ne.s32.totalorder %s629_s21, %s7956_s14  ;;  %s7961_s11 = sshll.u32 %s8357_s7, 4  ;;  %s7962_s11 = int_to_ptr.vmem [resolvable:$false] %s7961_s11 }
  0xb7   : > { %s7963_s12 = scalar_lea.vmem %s7962_s11, 65536  ;;  %p7964_p13 = scmp.lt.s32.totalorder %s629_s21, %s7962_s11 }
  0xb8   : > { %p7959_p2 = pnand %p7957_p0, %p8621_p12  ;;  %p7965_p6 = scmp.lt.s32.totalorder %s7963_s12, %s7956_s14 }
  0xba   : > { %p7960_p5 = pneg %p7959_p2  ;;  %p7966_p11 = por %p7965_p6, %p7964_p13 }
  0xbc   : > { %p7967_p8 = pnand %p7966_p11, %p7960_p5 }
  0xbe   : > { %7970 = shalt.err (!%p7967_p8)
}
  0xbf   : > { %s11809_s17 = smov 128   ;;  %s11810_s9 = smov 2048  }
  0xc0   : > { %s11811_s19 = smov 4096   ;;  %s7541_s22 = sshll.u32 %s8568_s1, 16 }
  0xc1   : > { %7631 = dma.hbm_to_vmem [thread:$0]  (!%p8610_p10), %s8687_s3, 32768, %s629_s21, %s8615_s15, %s11811_s19, %s11810_s9, %s11809_s17  }
  0xc2   : > { %s11812_s28 = sshll.u32 %s8593_s18, 12  ;;  %s8715_s11 = scalar_lea.hbm %s11720_s6, %s7541_s22 }
  0xc3   : > { %s663_s10 = scalar_lea.vmem [#allocation16], %s11812_s28  ;;  %s7971_s12 = scalar_lea.hbm %s8715_s11, 65536 }
  0xc4   : > { %s673_s27 = sshll.u32 %s663_s10, 4  ;;  %p7972_p8 = scmp.ne.s32.totalorder %s8715_s11, %s7971_s12  ;;  %s8717_s27 = int_to_ptr.vmem [resolvable:$true] %s673_s27 }
  0xc5   : > { %s7976_s18 = scalar_lea.hbm %s11720_s6, 131072  ;;  %p7977_p3 = scmp.lt.s32.totalorder %s8715_s11, %s11720_s6 }
  0xc6   : > { %p7974_p11 = pnand %p7972_p8, %p8621_p12  ;;  %p7978_p9 = scmp.lt.s32.totalorder %s7976_s18, %s7971_s12 }
  0xc8   : > { %p7975_p7 = pneg %p7974_p11  ;;  %p7979_p1 = por %p7978_p9, %p7977_p3 }
  0xca   : > { %p7980_p4 = pnand %p7979_p1, %p7975_p7 }
  0xcc   : > { %7983 = shalt.err (!%p7980_p4)
}
  0xcd   : > { %s7984_s22 = scalar_lea.vmem %s8717_s27, 65536  ;;  %s8358_s10 = smov [#allocation16]  }
  0xce   : > { %p7985_p0 = scmp.ne.s32.totalorder %s8717_s27, %s7984_s22  ;;  %s7989_s7 = sshll.u32 %s8358_s10, 4  ;;  %s7990_s7 = int_to_ptr.vmem [resolvable:$false] %s7989_s7 }
  0xcf   : > { %s7991_s14 = scalar_lea.vmem %s7990_s7, 131072  ;;  %p7992_p13 = scmp.lt.s32.totalorder %s8717_s27, %s7990_s7 }
  0xd0   : > { %p7987_p2 = pnand %p7985_p0, %p8621_p12  ;;  %p7993_p6 = scmp.lt.s32.totalorder %s7991_s14, %s7984_s22 }
  0xd2   : > { %p7988_p5 = pneg %p7987_p2  ;;  %p7994_p8 = por %p7993_p6, %p7992_p13 }
  0xd4   : > { %p7995_p11 = pnand %p7994_p8, %p7988_p5 }
  0xd6   : > { %7998 = shalt.err (!%p7995_p11)
}
  0xd7   : > { %s11761_s12 = smov 256   ;;  %s11813_s13 = sld [smem:[#allocation46_spill]] }
  0xd8   : > { %s11762_s3 = smov 16   ;;  %s7461_s1 = sadd.s32 4294967294, %s8345_s0 }
  0xd9   : > { %7637 = dma.hbm_to_vmem [thread:$0]  (!%p8610_p10), %s8715_s11, 65536, %s8717_s27, %s8655_s8, %s11761_s12, %s11761_s12, %s11762_s3  }
  0xda   : > { %s7462_s18 = sadd.s32 4294967294, %s8562_s23  ;;  %p248_p12 = scmp.gt.s32.totalorder %s7461_s1, 0 }
  0xdb   : > { %p251_p7 = scmp.gt.s32.totalorder %s7462_s18, 0  ;;  %s256_s21 = sadd.s32 1, %s8329_s26 }
  0xdc   : > { %p263_p3 = scmp.ne.s32.totalorder %s8329_s26, %s8325_s25  ;;  %s11873_s1 = smov (!%p248_p12, %s7461_s1), 0 }
  0xdd   : > { %s11875_s18 = smov (!%p251_p7, %s7462_s18), 0  ;;  %p11814_p9 = scmp.eq.s32.totalorder %s8345_s0, 0 }
  0xde   : > { %p269_p4 = scmp.ne.s32.totalorder %s8325_s25, %s8321_s24  ;;  %s253_s29 = ssub.s32 %s11873_s1, %s11875_s18 }
  0xdf   : > { %p265_p1 = por %p263_p3, %p11814_p9  ;;  %p254_p10 = scmp.eq.s32.totalorder %s253_s29, 0 }
  0xe0   : > { %p11815_p0 = scmp.eq.s32.totalorder %s11813_s13, 0  ;;  %s8762_s11 = sand.u32 1, %s8329_s26  }
  0xe1   : > { %s11763_s28 = sshll.u32 %s11873_s1, 11  ;;  %s11764_s10 = sshll.u32 %s8762_s11, 11 }
  0xe2   : > { %p8757_p2 = por %p269_p4, %p11815_p0  ;;  %s11817_s12 = sld [smem:[#allocation56_spill]] }
  0xe3   : > { %s8766_s22 = scalar_select %p254_p10, %s8329_s26, %s256_s21  }
  0xe4   : > { %s11816_s27 = scalar_select %p8757_p2, 1, 0 }
  0xe5   : > { %p11818_p5 = scmp.lt.s32.totalorder %s8345_s0, 4  ;;  %s687_s18 = scalar_lea.vmem [#allocation19], %s11764_s10 }
  0xe6   : > { %s697_s21 = sshll.u32 %s687_s18, 4  ;;  %s8784_s21 = int_to_ptr.vmem [resolvable:$true] %s697_s21 }
  0xe7   : > { %p8778_p13 = pnand %p11818_p5, %p265_p1 }
  0xe8   : > { %s8774_s24 = scalar_lea.hbm %s11817_s12, %s11763_s28  ;;  %s8004_s28 = scalar_lea.hbm %s11817_s12, 65536 }
  0xe9   : > { %s11819_s13 = scalar_select %p8778_p13, 1, 0 }
  0xea   : > { %s7999_s3 = scalar_lea.hbm %s8774_s24, 32768  ;;  %p8791_p8 = pneg %p8778_p13 }
  0xeb   : > { %p8000_p6 = scmp.ne.s32.totalorder %s8774_s24, %s7999_s3  ;;  %p8005_p7 = scmp.lt.s32.totalorder %s8774_s24, %s11817_s12 }
  0xec   : > { %s11820_s7 = scalar_select %p8791_p8, 1, 0 }
  0xed   : > { %p8002_p11 = pnand %p8791_p8, %p8000_p6  ;;  %p8006_p3 = scmp.lt.s32.totalorder %s8004_s28, %s7999_s3 }
  0xef   : > { %p8003_p12 = pneg %p8002_p11  ;;  %p8007_p9 = por %p8006_p3, %p8005_p7 }
  0xf1   : > { %p8008_p1 = pnand %p8007_p9, %p8003_p12 }
  0xf3   : > { %8011 = shalt.err (!%p8008_p1)
}
  0xf4   : > { %s8012_s29 = scalar_lea.vmem %s8784_s21, 32768  ;;  %s8361_s2 = smov [#allocation19]  }
  0xf5   : > { %p8013_p4 = scmp.ne.s32.totalorder %s8784_s21, %s8012_s29  ;;  %s8017_s0 = sshll.u32 %s8361_s2, 4  ;;  %s8018_s0 = int_to_ptr.vmem [resolvable:$false] %s8017_s0 }
  0xf6   : > { %s8019_s14 = scalar_lea.vmem %s8018_s0, 65536  ;;  %p8020_p5 = scmp.lt.s32.totalorder %s8784_s21, %s8018_s0 }
  0xf7   : > { %p8015_p10 = pnand %p8013_p4, %p8791_p8  ;;  %p8021_p6 = scmp.lt.s32.totalorder %s8019_s14, %s8012_s29 }
  0xf9   : > { %p8016_p0 = pneg %p8015_p10  ;;  %p8022_p11 = por %p8021_p6, %p8020_p5 }
  0xfb   : > { %p8023_p2 = pnand %p8022_p11, %p8016_p0 }
  0xfd   : > { %8026 = shalt.err (!%p8023_p2)
}
  0xfe   : > { %s11821_s3 = scalar_lea.sflag [#allocation6], %s8590_s20  ;;  %s8362_s28 = smov [#allocation17]  }
  0xff   : > { %7640 = dma.hbm_to_vmem [thread:$0]  (!%p8778_p13), %s8774_s24, 32768, %s8784_s21, %s11821_s3, %s11811_s19, %s11810_s9, %s11809_s17  }
 0x100   : > { %s548_s2 = sshll.u32 %s8362_s28, 4  ;;  %s8363_s10 = smov [#allocation23]   ;;  %s549_s2 = int_to_ptr.vmem [resolvable:$true] %s548_s2 }
 0x101   : > { %s559_s18 = sshll.u32 %s8363_s10, 4  ;;  %s8038_s29 = scalar_lea.vmem %s549_s2, 32  ;;  %s560_s18 = int_to_ptr.vmem [resolvable:$true] %s559_s18 }
 0x102   : > { %p8039_p12 = scmp.ne.s32.totalorder %s549_s2, %s8038_s29  ;;  %p11822_p7 = scmp.ne.s32.totalorder %s11792_s16, 0 }
 0x103   : > { %p8046_p9 = scmp.lt.s32.totalorder %s549_s2, %s549_s2  ;;  %p8047_p1 = scmp.lt.s32.totalorder %s8038_s29, %s8038_s29 }
 0x104   : > { %p8041_p2 = pnand %p8039_p12, %p11822_p7 }
 0x105   : > { %p8048_p4 = por %p8047_p1, %p8046_p9 }
 0x106   : > { %p8042_p3 = pneg %p8041_p2 }
 0x108   : > { %p8049_p10 = pnand %p8048_p4, %p8042_p3 }
 0x10a   : > { %8052 = shalt.err (!%p8049_p10)
}
 0x10b   : > { %p11823_p0 = scmp.ne.s32.totalorder %s11791_s30, 0  ;;  %s11824_s24 = sld [smem:[#allocation55_spill]] }
 0x10c   : > { %s8064_s21 = scalar_lea.vmem %s560_s18, 32  ;;  %p8072_p12 = scmp.lt.s32.totalorder %s560_s18, %s560_s18 }
 0x10d   : > { %p8065_p5 = scmp.ne.s32.totalorder %s560_s18, %s8064_s21  ;;  %p8073_p2 = scmp.lt.s32.totalorder %s8064_s21, %s8064_s21 }
 0x10f   : > { %p8067_p6 = pnand %p8065_p5, %p11822_p7  ;;  %p8074_p13 = por %p8073_p2, %p8072_p12 }
 0x111   : > { %7615 = dma.hbm_to_vmem [thread:$0]  (!%p11823_p0), %s11824_s24, 32, %s549_s2, [#allocation18]  }
 0x112   : > { %p8068_p11 = pneg %p8067_p6 }
 0x114   : > { %p8075_p8 = pnand %p8074_p13, %p8068_p11 }
 0x116   : > { %8078 = shalt.err (!%p8075_p8)
}
 0x117   : > { %s11825_s10 = sld [smem:[#allocation60_spill]]  ;;  %s11826_s2 = sshll.u32 %s11873_s1, 11 }
 0x118   : > { %s11827_s0 = sld [smem:[#allocation57_spill]]  ;;  %s11829_s21 = sshll.u32 %s8762_s11, 11 }
 0x119   : > { %s711_s4 = scalar_lea.vmem [#allocation20], %s11829_s21  ;;  %s7499_s3 = sshll.u32 %s8762_s11, 4 }
 0x11a   : > { %s721_s30 = sshll.u32 %s711_s4, 4  ;;  %p11830_p8 = scmp.ne.s32.totalorder %s11820_s7, 0  ;;  %s8841_s30 = int_to_ptr.vmem [resolvable:$true] %s721_s30 }
 0x11d   : > { %7618 = dma.hbm_to_vmem [thread:$0]  (!%p11823_p0), %s11825_s10, 32, %s560_s18, [#allocation9]  }
 0x11e   : > { %s11828_s14 = smov %s11827_s0  ;;  %s8837_s24 = scalar_lea.hbm %s11827_s0, %s11826_s2 }
 0x11f   : > { %s8079_s28 = scalar_lea.hbm %s8837_s24, 32768  ;;  %s8084_s29 = scalar_lea.hbm %s11828_s14, 65536 }
 0x120   : > { %p8080_p13 = scmp.ne.s32.totalorder %s8837_s24, %s8079_s28  ;;  %p8085_p9 = scmp.lt.s32.totalorder %s8837_s24, %s11828_s14 }
 0x121   : > { %p8086_p1 = scmp.lt.s32.totalorder %s8084_s29, %s8079_s28 }
 0x122   : > { %p8082_p7 = pnand %p8080_p13, %p11830_p8 }
 0x123   : > { %p8087_p4 = por %p8086_p1, %p8085_p9 }
 0x124   : > { %p8083_p3 = pneg %p8082_p7 }
 0x126   : > { %p8088_p10 = pnand %p8087_p4, %p8083_p3 }
 0x128   : > { %8091 = shalt.err (!%p8088_p10)
}
 0x129   : > { %s8092_s4 = scalar_lea.vmem %s8841_s30, 32768  ;;  %s8364_s0 = smov [#allocation20]  }
 0x12a   : > { %p8093_p0 = scmp.ne.s32.totalorder %s8841_s30, %s8092_s4  ;;  %s8097_s21 = sshll.u32 %s8364_s0, 4  ;;  %s8098_s21 = int_to_ptr.vmem [resolvable:$false] %s8097_s21 }
 0x12b   : > { %s8099_s18 = scalar_lea.vmem %s8098_s21, 65536  ;;  %p8100_p11 = scmp.lt.s32.totalorder %s8841_s30, %s8098_s21 }
 0x12c   : > { %p8095_p5 = pnand %p8093_p0, %p11830_p8  ;;  %p8101_p12 = scmp.lt.s32.totalorder %s8099_s18, %s8092_s4 }
 0x12e   : > { %p8096_p6 = pneg %p8095_p5  ;;  %p8102_p2 = por %p8101_p12, %p8100_p11 }
 0x130   : > { %p8103_p13 = pnand %p8102_p2, %p8096_p6 }
 0x132   : > { %8106 = shalt.err (!%p8103_p13)
}
 0x133   : > { %p11831_p7 = scmp.ne.s32.totalorder %s11819_s13, 0  ;;  %s7544_s28 = sshll.u32 %s11873_s1, 8 }
 0x134   : > { %s11832_s2 = sld [smem:[#allocation58_spill]]  ;;  %s735_s4 = scalar_lea.vmem [#allocation21], %s7499_s3 }
 0x135   : > { %7643 = dma.hbm_to_vmem [thread:$0]  (!%p11831_p7), %s8837_s24, 32768, %s8841_s30, %s8615_s15, %s11811_s19, %s11810_s9, %s11809_s17  }
 0x136   : > { %s746_s0 = sshll.u32 %s735_s4, 4  ;;  %s7503_s21 = sshll.u32 %s8762_s11, 12  ;;  %s747_s0 = int_to_ptr.vmem [resolvable:$true] %s746_s0 }
 0x13a   : > { %s8872_s16 = scalar_lea.hbm %s11832_s2, %s7544_s28  ;;  %s8112_s9 = scalar_lea.hbm %s11832_s2, 512 }
 0x13b   : > { %s8107_s18 = scalar_lea.hbm %s8872_s16, 256  ;;  %p8113_p4 = scmp.lt.s32.totalorder %s8872_s16, %s11832_s2 }
 0x13c   : > { %p8108_p3 = scmp.ne.s32.totalorder %s8872_s16, %s8107_s18  ;;  %p8114_p10 = scmp.lt.s32.totalorder %s8112_s9, %s8107_s18 }
 0x13e   : > { %p8110_p9 = pnand %p8108_p3, %p11830_p8  ;;  %p8115_p0 = por %p8114_p10, %p8113_p4 }
 0x140   : > { %p8111_p1 = pneg %p8110_p9 }
 0x142   : > { %p8116_p5 = pnand %p8115_p0, %p8111_p1 }
 0x144   : > { %8119 = shalt.err (!%p8116_p5)
}
 0x145   : > { %s8120_s30 = scalar_lea.vmem %s747_s0, 256  ;;  %s8365_s11 = smov [#allocation21]  }
 0x146   : > { %p8121_p6 = scmp.ne.s32.totalorder %s747_s0, %s8120_s30  ;;  %s8125_s3 = sshll.u32 %s8365_s11, 4  ;;  %s8126_s3 = int_to_ptr.vmem [resolvable:$false] %s8125_s3 }
 0x147   : > { %s8127_s28 = scalar_lea.vmem %s8126_s3, 512  ;;  %p8128_p2 = scmp.lt.s32.totalorder %s747_s0, %s8126_s3 }
 0x148   : > { %p8123_p11 = pnand %p8121_p6, %p11830_p8  ;;  %p8129_p13 = scmp.lt.s32.totalorder %s8127_s28, %s8120_s30 }
 0x14a   : > { %p8124_p12 = pneg %p8123_p11  ;;  %p8130_p3 = por %p8129_p13, %p8128_p2 }
 0x14c   : > { %p8131_p9 = pnand %p8130_p3, %p8124_p12 }
 0x14e   : > { %8134 = shalt.err (!%p8131_p9)
}
 0x14f   : > { %7646 = dma.hbm_to_vmem [thread:$0]  (!%p11831_p7), %s8872_s16, 256, %s747_s0, %s8655_s8  }
 0x150   : > { %s7546_s10 = sshll.u32 %s11873_s1, 16  ;;  %s11833_s18 = sld [smem:[#allocation59_spill]] }
 0x151   : > { %s757_s17 = scalar_lea.vmem [#allocation22], %s7503_s21 }
 0x152   : > { %s768_s9 = sshll.u32 %s757_s17, 4  ;;  %s769_s9 = int_to_ptr.vmem [resolvable:$true] %s768_s9 }
 0x156   : > { %s8898_s15 = scalar_lea.hbm %s11833_s18, %s7546_s10  ;;  %s8140_s8 = scalar_lea.hbm %s11833_s18, 131072 }
 0x157   : > { %s8135_s19 = scalar_lea.hbm %s8898_s15, 65536  ;;  %p8141_p0 = scmp.lt.s32.totalorder %s8898_s15, %s11833_s18 }
 0x158   : > { %p8136_p1 = scmp.ne.s32.totalorder %s8898_s15, %s8135_s19  ;;  %p8142_p5 = scmp.lt.s32.totalorder %s8140_s8, %s8135_s19 }
 0x15a   : > { %p8138_p4 = pnand %p8136_p1, %p11830_p8  ;;  %p8143_p6 = por %p8142_p5, %p8141_p0 }
 0x15c   : > { %p8139_p10 = pneg %p8138_p4 }
 0x15e   : > { %p8144_p11 = pnand %p8143_p6, %p8139_p10 }
 0x160   : > { %8147 = shalt.err (!%p8144_p11)
}
 0x161   : > { %s8148_s0 = scalar_lea.vmem %s769_s9, 65536  ;;  %s8366_s21 = smov [#allocation22]  }
 0x162   : > { %p8149_p12 = scmp.ne.s32.totalorder %s769_s9, %s8148_s0  ;;  %s8153_s11 = sshll.u32 %s8366_s21, 4  ;;  %s8154_s11 = int_to_ptr.vmem [resolvable:$false] %s8153_s11 }
 0x163   : > { %s8155_s3 = scalar_lea.vmem %s8154_s11, 131072  ;;  %p8156_p3 = scmp.lt.s32.totalorder %s769_s9, %s8154_s11 }
 0x164   : > { %p8151_p2 = pnand %p8149_p12, %p11830_p8  ;;  %p8157_p9 = scmp.lt.s32.totalorder %s8155_s3, %s8148_s0 }
 0x166   : > { %p8152_p13 = pneg %p8151_p2  ;;  %p8158_p1 = por %p8157_p9, %p8156_p3 }
 0x168   : > { %p8159_p4 = pnand %p8158_p1, %p8152_p13 }
 0x16a   : > { %8162 = shalt.err (!%p8159_p4)
}
 0x16b   : > { %s11834_s28 = smov 16   ;;  %s11835_s10 = smov 256  }
 0x16c   : > { %s11836_s29 = scalar_lea.sflag [#allocation6], %s8590_s20  ;;  %s11837_s7 = sld [smem:[#allocation47_spill]] }
 0x16d   : > { %7649 = dma.hbm_to_vmem [thread:$0]  (!%p11831_p7), %s8898_s15, 65536, %s769_s9, %s11836_s29, %s11835_s10, %s11835_s10, %s11834_s28  }
 0x172   : > { %p11838_p8 = scmp.ne.s32.totalorder %s11837_s7, 0 }
 0x173   : > { %s11839_s4 = sld [smem:[#allocation46_spill]] (!%p11838_p8) }
 0x174   : > { %780 = sbr.rel (%p11838_p8) target bundleno = 2273 (0x8e1), region = 80 }
 0x179   : > { %p11840_p10 = scmp.eq.s32.totalorder %s11839_s4, 0 }
 0x17b   : > { %8264 = dma.done.wait (%p11840_p10), [#allocation6], 256   ;;  %p11841_p0 = pmov %p11840_p10 }
 0x17d   : > { %8266 = vsyncadd (%p11841_p0), [#allocation6], 4294967040  ;;  %p11842_p5 = pmov %p11841_p0 }
 0x17e   : > { %p11843_p6 = pmov %p11841_p0 }
 0x17f   : > { %8268 = dma.done.wait (%p11842_p5), [#allocation9], 256  }
 0x180   : > { %8270 = vsyncadd (%p11843_p6), [#allocation9], 4294967040  ;;  %s11844_s13 = sld [smem:[#allocation44_spill]]  ;;  %s794_s17 = sand.u32 1, %s11839_s4  }
 0x181   : > { %s11845_s20 = sld [smem:[#allocation48_spill]]  ;;  %s795_s19 = scalar_lea.sflag [#allocation12], %s794_s17 }
 0x186   : > { %s796_s15 = sand.u32 1, %s11844_s13  }
 0x187   : > { %s7512_s9 = sshll.u32 %s796_s15, 12  ;;  %p11846_p7 = scmp.ne.s32.totalorder %s11845_s20, 0 }
 0x188   : > { %s8933_s24 = scalar_lea.vmem [#allocation11], %s7512_s9 }
 0x189   : > { %8272 = dma.done.wait (%p11846_p7), %s795_s19, 98304  }
 0x18a   : > { %8274 = vsyncadd (%p11846_p7), %s795_s19, 4294868992  ;;  %s7513_s30 = sshll.u32 %s796_s15, 11  ;;  %s7514_s8 = sshll.u32 %s796_s15, 4 }
 0x18b   : > { %s8939_s1 = scalar_lea.vmem [#allocation13], %s7513_s30  ;;  %s813_s16 = scalar_lea.sflag [#allocation15], %s794_s17 }
 0x18c   : > { %s8941_s0 = scalar_lea.vmem [#allocation14], %s7514_s8 }
 0x18d   : > { %8276 = dma.done.wait (%p11846_p7), %s813_s16, 65792  }
 0x18e   : > { %8278 = vsyncadd (%p11846_p7), %s813_s16, 4294901504  ;;  %s8947_s21 = scalar_lea.vmem [#allocation16], %s7512_s9  ;;  %p11847_p11 = pmov %p11841_p0 }
 0x18f   : > { %p11848_p12 = pmov %p11841_p0 }
 0x190   : > { %8280 = dma.done.wait (%p11847_p11), [#allocation18], 32  }
 0x191   : > { %8282 = vsyncadd (%p11848_p12), [#allocation18], 4294967264  ;;  %s836_s11 = sand.u32 1, %s8325_s25   ;;  %s835_s28 = scalar_lea.sflag [#allocation6], %s794_s17 }
 0x192   : > { %s7517_s3 = sshll.u32 %s836_s11, 11  ;;  %p11849_p2 = scmp.ne.s32.totalorder %s11816_s27, 0 }
 0x193   : > { %s8954_s10 = scalar_lea.vmem [#allocation19], %s7517_s3 }
 0x194   : > { %8284 = dma.done.wait (%p11849_p2), %s835_s28, 32768  }
 0x195   : > { %8286 = vsyncadd (%p11849_p2), %s835_s28, 4294934528  ;;  %s8960_s29 = scalar_lea.vmem [#allocation20], %s7517_s3 }
 0x196   : > { %8288 = dma.done.wait (%p11849_p2), %s795_s19, 32768  }
 0x197   : > { %8290 = vsyncadd (%p11849_p2), %s795_s19, 4294934528  ;;  %s7519_s7 = sshll.u32 %s836_s11, 4 }
 0x198   : > { %s8966_s13 = scalar_lea.vmem [#allocation21], %s7519_s7 }
 0x199   : > { %8292 = dma.done.wait (%p11849_p2), %s813_s16, 256  }
 0x19a   : > { %8294 = vsyncadd (%p11849_p2), %s813_s16, 4294967040  ;;  %s7520_s20 = sshll.u32 %s836_s11, 12 }
 0x19b   : > { %s8972_s17 = scalar_lea.vmem [#allocation22], %s7520_s20 }
 0x19c   : > { %8296 = dma.done.wait (%p11849_p2), %s835_s28, 65536  }
 0x19d   : > { %8298 = vsyncadd (%p11849_p2), %s835_s28, 4294901760  ;;  %p11850_p13 = pmov %p11841_p0 }
 0x19e   : > { %p11851_p3 = pmov %p11841_p0 }
 0x19f   : > { %8300 = dma.done.wait (%p11850_p13), [#allocation9], 32  }
 0x1a0   : > { %8302 = vsyncadd (%p11851_p3), [#allocation9], 4294967264  ;;  %p11852_p9 = pmov %p11841_p0 }
 0x1a1   : > { %p11853_p1 = pmov %p11841_p0 }
 0x1a2   : > { %8304 = dma.done.wait (%p11852_p9), [#allocation12], 32  }
 0x1a3   : > { %8306 = vsyncadd (%p11853_p1), [#allocation12], 4294967264  ;;  %p11854_p4 = pmov %p11841_p0 }
 0x1a4   : > { %p11855_p8 = pmov %p11841_p0 }
 0x1a5   : > { %8308 = dma.done.wait (%p11854_p4), [#allocation15], 32  }
 0x1a6   : > { %8310 = vsyncadd (%p11855_p8), [#allocation15], 4294967264  ;;  %p11856_p10 = scmp.ne.s32.totalorder %s11839_s4, 0 }
 0x1a8   : > { %989 = sbr.rel (%p11856_p10) target bundleno = 432 (0x1b0), region = 144 }
 0x1ad   : > { %v8367_v0 = vmov 0.0  }
 0x1ae   : > { %990 = vst [vmem:[#allocation2] sm:$0xff] %v8367_v0  ;;  %991 = vst [vmem:[#allocation2 + $0x8] sm:$0xff] %v8367_v0 }
 0x1af   : > { %992 = vst [vmem:[#allocation4 + $0x8] sm:$0xff] %v8367_v0  ;;  %993 = vst [vmem:[#allocation4] sm:$0xff] %v8367_v0 }
 0x1b0 PF: > { %s11857_s27 = sld [smem:[#allocation46_spill]] }
 0x1b6   : > { %p7525_p0 = scmp.ge.s32.totalorder %s11857_s27, 2 }
 0x1b8   : > { %997 = sbr.rel (%p7525_p0) target bundleno = 1311 (0x51f), region = 148 }
 0x1bd   : > { %v1754_v1 = vld [vmem:[%s8939_s1 + $0x788] sm:$0xff]  ;;  %v1756_v2 = vld [vmem:[%s8939_s1 + $0x798] sm:$0xff]  ;;  %v1753_v3 = vld [vmem:[%s8939_s1 + $0x780] sm:$0xff] }
 0x1be   : > { %1769 = vmatprep.subr.mxu0 %v1754_v1  ;;  %1840 = vmatprep.subr.mxu1 %v1756_v2  ;;  %v1755_v4 = vld [vmem:[%s8939_s1 + $0x790] sm:$0xff]  ;;  %v1738_v5 = vld [vmem:[%s8939_s1 + $0x708] sm:$0xff]  ;;  %v1740_v6 = vld [vmem:[%s8939_s1 + $0x718] sm:$0xff] }
 0x1bf   : > { %1770 = vmatpush1.msra.mxu0 %v1753_v3  ;;  %1841 = vmatpush1.msra.mxu1 %v1755_v4  ;;  %v1737_v7 = vld [vmem:[%s8939_s1 + $0x700] sm:$0xff]  ;;  %v1739_v8 = vld [vmem:[%s8939_s1 + $0x710] sm:$0xff]  ;;  %v1722_v9 = vld [vmem:[%s8939_s1 + $0x688] sm:$0xff]  ;;  %v8368_v3 = vmov 0.0  }
 0x1c0   : > { %1771 = vmatprep.subr.mxu0 %v1738_v5  ;;  %1842 = vmatprep.subr.mxu1 %v1740_v6  ;;  %v1724_v10 = vld [vmem:[%s8939_s1 + $0x698] sm:$0xff]  ;;  %v1721_v11 = vld [vmem:[%s8939_s1 + $0x680] sm:$0xff]  ;;  %v1723_v12 = vld [vmem:[%s8939_s1 + $0x690] sm:$0xff] }
 0x1c1   : > { %1772 = vmatpush1.msra.mxu0 %v1737_v7  ;;  %1843 = vmatpush1.msra.mxu1 %v1739_v8  ;;  %v1706_v13 = vld [vmem:[%s8939_s1 + $0x608] sm:$0xff]  ;;  %v1708_v14 = vld [vmem:[%s8939_s1 + $0x618] sm:$0xff]  ;;  %v1705_v15 = vld [vmem:[%s8939_s1 + $0x600] sm:$0xff] }
 0x1c2   : > { %1773 = vmatprep.subr.mxu0 %v1722_v9  ;;  %1844 = vmatprep.subr.mxu1 %v1724_v10  ;;  %v1707_v16 = vld [vmem:[%s8939_s1 + $0x610] sm:$0xff]  ;;  %v1690_v17 = vld [vmem:[%s8939_s1 + $0x588] sm:$0xff]  ;;  %v1692_v18 = vld [vmem:[%s8939_s1 + $0x598] sm:$0xff] }
 0x1c3   : > { %1774 = vmatpush1.msra.mxu0 %v1721_v11  ;;  %1845 = vmatpush1.msra.mxu1 %v1723_v12  ;;  %v1689_v19 = vld [vmem:[%s8939_s1 + $0x580] sm:$0xff]  ;;  %v1691_v20 = vld [vmem:[%s8939_s1 + $0x590] sm:$0xff]  ;;  %v1674_v21 = vld [vmem:[%s8939_s1 + $0x508] sm:$0xff] }
 0x1c4   : > { %1775 = vmatprep.subr.mxu0 %v1706_v13  ;;  %1846 = vmatprep.subr.mxu1 %v1708_v14  ;;  %v1676_v22 = vld [vmem:[%s8939_s1 + $0x518] sm:$0xff]  ;;  %v1673_v23 = vld [vmem:[%s8939_s1 + $0x500] sm:$0xff]  ;;  %v1675_v24 = vld [vmem:[%s8939_s1 + $0x510] sm:$0xff] }
 0x1c5   : > { %1776 = vmatpush1.msra.mxu0 %v1705_v15  ;;  %1847 = vmatpush1.msra.mxu1 %v1707_v16  ;;  %v1658_v25 = vld [vmem:[%s8939_s1 + $0x488] sm:$0xff]  ;;  %v1660_v26 = vld [vmem:[%s8939_s1 + $0x498] sm:$0xff]  ;;  %v1657_v27 = vld [vmem:[%s8939_s1 + $0x480] sm:$0xff] }
 0x1c6   : > { %1777 = vmatprep.subr.mxu0 %v1690_v17  ;;  %1848 = vmatprep.subr.mxu1 %v1692_v18  ;;  %v1659_v28 = vld [vmem:[%s8939_s1 + $0x490] sm:$0xff]  ;;  %v1642_v29 = vld [vmem:[%s8939_s1 + $0x408] sm:$0xff]  ;;  %v1644_v30 = vld [vmem:[%s8939_s1 + $0x418] sm:$0xff] }
 0x1c7   : > { %1778 = vmatpush1.msra.mxu0 %v1689_v19  ;;  %1849 = vmatpush1.msra.mxu1 %v1691_v20  ;;  %v1641_v31 = vld [vmem:[%s8939_s1 + $0x400] sm:$0xff]  ;;  %v1643_v32 = vld [vmem:[%s8939_s1 + $0x410] sm:$0xff]  ;;  %v1626_v33 = vld [vmem:[%s8939_s1 + $0x388] sm:$0xff] }
 0x1c8   : > { %1779 = vmatprep.subr.mxu0 %v1674_v21  ;;  %1850 = vmatprep.subr.mxu1 %v1676_v22  ;;  %v1628_v34 = vld [vmem:[%s8939_s1 + $0x398] sm:$0xff]  ;;  %v1625_v35 = vld [vmem:[%s8939_s1 + $0x380] sm:$0xff]  ;;  %v1627_v36 = vld [vmem:[%s8939_s1 + $0x390] sm:$0xff] }
 0x1c9   : > { %1780 = vmatpush1.msra.mxu0 %v1673_v23  ;;  %1851 = vmatpush1.msra.mxu1 %v1675_v24  ;;  %v1610_v37 = vld [vmem:[%s8939_s1 + $0x308] sm:$0xff]  ;;  %v1612_v38 = vld [vmem:[%s8939_s1 + $0x318] sm:$0xff]  ;;  %v1609_v39 = vld [vmem:[%s8939_s1 + $0x300] sm:$0xff] }
 0x1ca   : > { %1781 = vmatprep.subr.mxu0 %v1658_v25  ;;  %1852 = vmatprep.subr.mxu1 %v1660_v26  ;;  %v1611_v40 = vld [vmem:[%s8939_s1 + $0x310] sm:$0xff]  ;;  %v1594_v41 = vld [vmem:[%s8939_s1 + $0x288] sm:$0xff]  ;;  %v1596_v42 = vld [vmem:[%s8939_s1 + $0x298] sm:$0xff] }
 0x1cb   : > { %1782 = vmatpush1.msra.mxu0 %v1657_v27  ;;  %1853 = vmatpush1.msra.mxu1 %v1659_v28  ;;  %v1593_v43 = vld [vmem:[%s8939_s1 + $0x280] sm:$0xff]  ;;  %v1595_v44 = vld [vmem:[%s8939_s1 + $0x290] sm:$0xff]  ;;  %v1578_v45 = vld [vmem:[%s8939_s1 + $0x208] sm:$0xff] }
 0x1cc   : > { %1783 = vmatprep.subr.mxu0 %v1642_v29  ;;  %1854 = vmatprep.subr.mxu1 %v1644_v30  ;;  %v1580_v46 = vld [vmem:[%s8939_s1 + $0x218] sm:$0xff]  ;;  %v1577_v47 = vld [vmem:[%s8939_s1 + $0x200] sm:$0xff]  ;;  %v1579_v48 = vld [vmem:[%s8939_s1 + $0x210] sm:$0xff] }
 0x1cd   : > { %1784 = vmatpush1.msra.mxu0 %v1641_v31  ;;  %1855 = vmatpush1.msra.mxu1 %v1643_v32  ;;  %v1562_v49 = vld [vmem:[%s8939_s1 + $0x188] sm:$0xff]  ;;  %v1564_v50 = vld [vmem:[%s8939_s1 + $0x198] sm:$0xff]  ;;  %v1561_v51 = vld [vmem:[%s8939_s1 + $0x180] sm:$0xff] }
 0x1ce   : > { %1785 = vmatprep.subr.mxu0 %v1626_v33  ;;  %1856 = vmatprep.subr.mxu1 %v1628_v34  ;;  %v1563_v52 = vld [vmem:[%s8939_s1 + $0x190] sm:$0xff]  ;;  %v1546_v53 = vld [vmem:[%s8939_s1 + $0x108] sm:$0xff]  ;;  %v1548_v54 = vld [vmem:[%s8939_s1 + $0x118] sm:$0xff] }
 0x1cf   : > { %1786 = vmatpush1.msra.mxu0 %v1625_v35  ;;  %1857 = vmatpush1.msra.mxu1 %v1627_v36  ;;  %v1545_v55 = vld [vmem:[%s8939_s1 + $0x100] sm:$0xff]  ;;  %v1547_v56 = vld [vmem:[%s8939_s1 + $0x110] sm:$0xff]  ;;  %v1530_v57 = vld [vmem:[%s8939_s1 + $0x88] sm:$0xff] }
 0x1d0   : > { %1787 = vmatprep.subr.mxu0 %v1610_v37  ;;  %1858 = vmatprep.subr.mxu1 %v1612_v38  ;;  %v1532_v58 = vld [vmem:[%s8939_s1 + $0x98] sm:$0xff]  ;;  %v1529_v59 = vld [vmem:[%s8939_s1 + $0x80] sm:$0xff]  ;;  %v1531_v60 = vld [vmem:[%s8939_s1 + $0x90] sm:$0xff] }
 0x1d1   : > { %1788 = vmatpush1.msra.mxu0 %v1609_v39  ;;  %1859 = vmatpush1.msra.mxu1 %v1611_v40  ;;  %v1514_v61 = vld [vmem:[%s8939_s1 + $0x8] sm:$0xff]  ;;  %v1516_v62 = vld [vmem:[%s8939_s1 + $0x18] sm:$0xff]  ;;  %v1513_v63 = vld [vmem:[%s8939_s1] sm:$0xff] }
 0x1d2   : > { %1789 = vmatprep.subr.mxu0 %v1594_v41  ;;  %1860 = vmatprep.subr.mxu1 %v1596_v42  ;;  %v1515_v0 = vld [vmem:[%s8939_s1 + $0x10] sm:$0xff]  ;;  %v1758_v2 = vld [vmem:[%s8939_s1 + $0x7a8] sm:$0xff]  ;;  %v1760_v4 = vld [vmem:[%s8939_s1 + $0x7b8] sm:$0xff] }
 0x1d3   : > { %1790 = vmatpush1.msra.mxu0 %v1593_v43  ;;  %1861 = vmatpush1.msra.mxu1 %v1595_v44  ;;  %v9057_v1 = vld [vmem:[#allocation8] sm:$0xff]  ;;  %v1757_v5 = vld [vmem:[%s8939_s1 + $0x7a0] sm:$0xff]  ;;  %v1742_v7 = vld [vmem:[%s8939_s1 + $0x728] sm:$0xff] }
 0x1d4   : > { %1791 = vmatprep.subr.mxu0 %v1578_v45  ;;  %1862 = vmatprep.subr.mxu1 %v1580_v46  ;;  %v1759_v6 = vld [vmem:[%s8939_s1 + $0x7b0] sm:$0xff]  ;;  %v1744_v8 = vld [vmem:[%s8939_s1 + $0x738] sm:$0xff]  ;;  %v1741_v9 = vld [vmem:[%s8939_s1 + $0x720] sm:$0xff] }
 0x1d5   : > { %1792 = vmatpush1.msra.mxu0 %v1577_v47  ;;  %1863 = vmatpush1.msra.mxu1 %v1579_v48  ;;  %v1743_v10 = vld [vmem:[%s8939_s1 + $0x730] sm:$0xff]  ;;  %v1726_v11 = vld [vmem:[%s8939_s1 + $0x6a8] sm:$0xff]  ;;  %v1728_v12 = vld [vmem:[%s8939_s1 + $0x6b8] sm:$0xff] }
 0x1d6   : > { %1793 = vmatprep.subr.mxu0 %v1562_v49  ;;  %1864 = vmatprep.subr.mxu1 %v1564_v50  ;;  %v1725_v13 = vld [vmem:[%s8939_s1 + $0x6a0] sm:$0xff]  ;;  %v1727_v14 = vld [vmem:[%s8939_s1 + $0x6b0] sm:$0xff]  ;;  %v1710_v15 = vld [vmem:[%s8939_s1 + $0x628] sm:$0xff] }
 0x1d7   : > { %1794 = vmatpush1.msra.mxu0 %v1561_v51  ;;  %1865 = vmatpush1.msra.mxu1 %v1563_v52  ;;  %v1712_v16 = vld [vmem:[%s8939_s1 + $0x638] sm:$0xff]  ;;  %v1709_v17 = vld [vmem:[%s8939_s1 + $0x620] sm:$0xff]  ;;  %v1711_v18 = vld [vmem:[%s8939_s1 + $0x630] sm:$0xff] }
 0x1d8   : > { %1795 = vmatprep.subr.mxu0 %v1546_v53  ;;  %1866 = vmatprep.subr.mxu1 %v1548_v54  ;;  %v1694_v19 = vld [vmem:[%s8939_s1 + $0x5a8] sm:$0xff]  ;;  %v1696_v20 = vld [vmem:[%s8939_s1 + $0x5b8] sm:$0xff]  ;;  %v1693_v21 = vld [vmem:[%s8939_s1 + $0x5a0] sm:$0xff] }
 0x1d9   : > { %1796 = vmatpush1.msra.mxu0 %v1545_v55  ;;  %1867 = vmatpush1.msra.mxu1 %v1547_v56  ;;  %v1695_v22 = vld [vmem:[%s8939_s1 + $0x5b0] sm:$0xff]  ;;  %v1678_v23 = vld [vmem:[%s8939_s1 + $0x528] sm:$0xff]  ;;  %v1680_v24 = vld [vmem:[%s8939_s1 + $0x538] sm:$0xff] }
 0x1da   : > { %1797 = vmatprep.subr.mxu0 %v1530_v57  ;;  %1868 = vmatprep.subr.mxu1 %v1532_v58  ;;  %v1677_v25 = vld [vmem:[%s8939_s1 + $0x520] sm:$0xff]  ;;  %v1679_v26 = vld [vmem:[%s8939_s1 + $0x530] sm:$0xff]  ;;  %v1662_v27 = vld [vmem:[%s8939_s1 + $0x4a8] sm:$0xff] }
 0x1db   : > { %1798 = vmatpush1.msra.mxu0 %v1529_v59  ;;  %1869 = vmatpush1.msra.mxu1 %v1531_v60  ;;  %v1664_v28 = vld [vmem:[%s8939_s1 + $0x4b8] sm:$0xff]  ;;  %v1661_v29 = vld [vmem:[%s8939_s1 + $0x4a0] sm:$0xff]  ;;  %v1663_v30 = vld [vmem:[%s8939_s1 + $0x4b0] sm:$0xff] }
 0x1dc   : > { %1799 = vmatprep.subr.mxu0 %v1514_v61  ;;  %1870 = vmatprep.subr.mxu1 %v1516_v62  ;;  %v1646_v31 = vld [vmem:[%s8939_s1 + $0x428] sm:$0xff]  ;;  %v1648_v32 = vld [vmem:[%s8939_s1 + $0x438] sm:$0xff]  ;;  %v1645_v33 = vld [vmem:[%s8939_s1 + $0x420] sm:$0xff] }
 0x1dd   : > { %1800 = vmatpush1.msra.mxu0 %v1513_v63  ;;  %1833 = vmatprep.mubr.f32.mxu0 %v8368_v3  ;;  %v1647_v34 = vld [vmem:[%s8939_s1 + $0x430] sm:$0xff]  ;;  %v1630_v35 = vld [vmem:[%s8939_s1 + $0x3a8] sm:$0xff]  ;;  %v1632_v36 = vld [vmem:[%s8939_s1 + $0x3b8] sm:$0xff] }
 0x1de   : > { %1871 = vmatpush1.msra.mxu1 %v1515_v0  ;;  %1834 = vmatmul.mubr.f32.vlgmr.msra.gmra.mxu0 %v9057_v1  ;;  %v1629_v37 = vld [vmem:[%s8939_s1 + $0x3a0] sm:$0xff]  ;;  %v1631_v38 = vld [vmem:[%s8939_s1 + $0x3b0] sm:$0xff]  ;;  %v1614_v39 = vld [vmem:[%s8939_s1 + $0x328] sm:$0xff] }
 0x1df   : > { %1904 = vmatprep.mubr.f32.mxu1 %v8368_v3  ;;  %1911 = vmatprep.subr.mxu0 %v1758_v2  ;;  %v1616_v40 = vld [vmem:[%s8939_s1 + $0x338] sm:$0xff]  ;;  %v1613_v41 = vld [vmem:[%s8939_s1 + $0x320] sm:$0xff]  ;;  %v1615_v42 = vld [vmem:[%s8939_s1 + $0x330] sm:$0xff] }
 0x1e0   : > { %1982 = vmatprep.subr.mxu1 %v1760_v4  ;;  %1905 = vmatmul.mubr.f32.vlgmr.msra.gmra.mxu1 %v9057_v1  ;;  %v1598_v43 = vld [vmem:[%s8939_s1 + $0x2a8] sm:$0xff]  ;;  %v1600_v44 = vld [vmem:[%s8939_s1 + $0x2b8] sm:$0xff]  ;;  %v1597_v45 = vld [vmem:[%s8939_s1 + $0x2a0] sm:$0xff] }
 0x1e1   : > { %1912 = vmatpush1.msra.mxu0 %v1757_v5  ;;  %1983 = vmatpush1.msra.mxu1 %v1759_v6  ;;  %v1599_v46 = vld [vmem:[%s8939_s1 + $0x2b0] sm:$0xff]  ;;  %v1582_v47 = vld [vmem:[%s8939_s1 + $0x228] sm:$0xff]  ;;  %v1584_v48 = vld [vmem:[%s8939_s1 + $0x238] sm:$0xff] }
 0x1e2   : > { %1913 = vmatprep.subr.mxu0 %v1742_v7  ;;  %1984 = vmatprep.subr.mxu1 %v1744_v8  ;;  %v1581_v49 = vld [vmem:[%s8939_s1 + $0x220] sm:$0xff]  ;;  %v1583_v50 = vld [vmem:[%s8939_s1 + $0x230] sm:$0xff]  ;;  %v1566_v51 = vld [vmem:[%s8939_s1 + $0x1a8] sm:$0xff] }
 0x1e3   : > { %1914 = vmatpush1.msra.mxu0 %v1741_v9  ;;  %1985 = vmatpush1.msra.mxu1 %v1743_v10  ;;  %v1568_v52 = vld [vmem:[%s8939_s1 + $0x1b8] sm:$0xff]  ;;  %v1565_v53 = vld [vmem:[%s8939_s1 + $0x1a0] sm:$0xff]  ;;  %v1567_v54 = vld [vmem:[%s8939_s1 + $0x1b0] sm:$0xff] }
 0x1e4   : > { %1915 = vmatprep.subr.mxu0 %v1726_v11  ;;  %1986 = vmatprep.subr.mxu1 %v1728_v12  ;;  %v1550_v55 = vld [vmem:[%s8939_s1 + $0x128] sm:$0xff]  ;;  %v1552_v56 = vld [vmem:[%s8939_s1 + $0x138] sm:$0xff]  ;;  %v1549_v57 = vld [vmem:[%s8939_s1 + $0x120] sm:$0xff] }
 0x1e5   : > { %1916 = vmatpush1.msra.mxu0 %v1725_v13  ;;  %1987 = vmatpush1.msra.mxu1 %v1727_v14  ;;  %v1551_v58 = vld [vmem:[%s8939_s1 + $0x130] sm:$0xff]  ;;  %v1534_v59 = vld [vmem:[%s8939_s1 + $0xa8] sm:$0xff]  ;;  %v1536_v60 = vld [vmem:[%s8939_s1 + $0xb8] sm:$0xff] }
 0x1e6   : > { %1917 = vmatprep.subr.mxu0 %v1710_v15  ;;  %1988 = vmatprep.subr.mxu1 %v1712_v16  ;;  %v1533_v61 = vld [vmem:[%s8939_s1 + $0xa0] sm:$0xff]  ;;  %v1535_v62 = vld [vmem:[%s8939_s1 + $0xb0] sm:$0xff]  ;;  %v1518_v63 = vld [vmem:[%s8939_s1 + $0x28] sm:$0xff] }
 0x1e7   : > { %1918 = vmatpush1.msra.mxu0 %v1709_v17  ;;  %1989 = vmatpush1.msra.mxu1 %v1711_v18  ;;  %v1520_v0 = vld [vmem:[%s8939_s1 + $0x38] sm:$0xff]  ;;  %v1517_v2 = vld [vmem:[%s8939_s1 + $0x20] sm:$0xff]  ;;  %v1519_v4 = vld [vmem:[%s8939_s1 + $0x30] sm:$0xff] }
 0x1e8   : > { %1919 = vmatprep.subr.mxu0 %v1694_v19  ;;  %1990 = vmatprep.subr.mxu1 %v1696_v20  ;;  %v1762_v5 = vld [vmem:[%s8939_s1 + $0x7c8] sm:$0xff]  ;;  %v1764_v6 = vld [vmem:[%s8939_s1 + $0x7d8] sm:$0xff]  ;;  %v1761_v7 = vld [vmem:[%s8939_s1 + $0x7c0] sm:$0xff] }
 0x1e9   : > { %1920 = vmatpush1.msra.mxu0 %v1693_v21  ;;  %1991 = vmatpush1.msra.mxu1 %v1695_v22  ;;  %v1763_v8 = vld [vmem:[%s8939_s1 + $0x7d0] sm:$0xff]  ;;  %v1746_v9 = vld [vmem:[%s8939_s1 + $0x748] sm:$0xff]  ;;  %v1748_v10 = vld [vmem:[%s8939_s1 + $0x758] sm:$0xff] }
 0x1ea   : > { %1921 = vmatprep.subr.mxu0 %v1678_v23  ;;  %1992 = vmatprep.subr.mxu1 %v1680_v24  ;;  %v1745_v11 = vld [vmem:[%s8939_s1 + $0x740] sm:$0xff]  ;;  %v1747_v12 = vld [vmem:[%s8939_s1 + $0x750] sm:$0xff]  ;;  %v1730_v13 = vld [vmem:[%s8939_s1 + $0x6c8] sm:$0xff] }
 0x1eb   : > { %1922 = vmatpush1.msra.mxu0 %v1677_v25  ;;  %1993 = vmatpush1.msra.mxu1 %v1679_v26  ;;  %v1732_v14 = vld [vmem:[%s8939_s1 + $0x6d8] sm:$0xff]  ;;  %v1729_v15 = vld [vmem:[%s8939_s1 + $0x6c0] sm:$0xff]  ;;  %v1731_v16 = vld [vmem:[%s8939_s1 + $0x6d0] sm:$0xff] }
 0x1ec   : > { %1923 = vmatprep.subr.mxu0 %v1662_v27  ;;  %1994 = vmatprep.subr.mxu1 %v1664_v28  ;;  %v1714_v17 = vld [vmem:[%s8939_s1 + $0x648] sm:$0xff]  ;;  %v1716_v18 = vld [vmem:[%s8939_s1 + $0x658] sm:$0xff]  ;;  %v1713_v19 = vld [vmem:[%s8939_s1 + $0x640] sm:$0xff] }
 0x1ed   : > { %1924 = vmatpush1.msra.mxu0 %v1661_v29  ;;  %1995 = vmatpush1.msra.mxu1 %v1663_v30  ;;  %v1715_v20 = vld [vmem:[%s8939_s1 + $0x650] sm:$0xff]  ;;  %v1698_v21 = vld [vmem:[%s8939_s1 + $0x5c8] sm:$0xff]  ;;  %v1700_v22 = vld [vmem:[%s8939_s1 + $0x5d8] sm:$0xff] }
 0x1ee   : > { %1925 = vmatprep.subr.mxu0 %v1646_v31  ;;  %1996 = vmatprep.subr.mxu1 %v1648_v32  ;;  %v1697_v23 = vld [vmem:[%s8939_s1 + $0x5c0] sm:$0xff]  ;;  %v1699_v24 = vld [vmem:[%s8939_s1 + $0x5d0] sm:$0xff]  ;;  %v1682_v25 = vld [vmem:[%s8939_s1 + $0x548] sm:$0xff] }
 0x1ef   : > { %1926 = vmatpush1.msra.mxu0 %v1645_v33  ;;  %1997 = vmatpush1.msra.mxu1 %v1647_v34  ;;  %v1684_v26 = vld [vmem:[%s8939_s1 + $0x558] sm:$0xff]  ;;  %v1681_v27 = vld [vmem:[%s8939_s1 + $0x540] sm:$0xff]  ;;  %v1683_v28 = vld [vmem:[%s8939_s1 + $0x550] sm:$0xff] }
 0x1f0   : > { %1927 = vmatprep.subr.mxu0 %v1630_v35  ;;  %1998 = vmatprep.subr.mxu1 %v1632_v36  ;;  %v1666_v29 = vld [vmem:[%s8939_s1 + $0x4c8] sm:$0xff]  ;;  %v1668_v30 = vld [vmem:[%s8939_s1 + $0x4d8] sm:$0xff]  ;;  %v1665_v31 = vld [vmem:[%s8939_s1 + $0x4c0] sm:$0xff] }
 0x1f1   : > { %1928 = vmatpush1.msra.mxu0 %v1629_v37  ;;  %1999 = vmatpush1.msra.mxu1 %v1631_v38  ;;  %v1667_v32 = vld [vmem:[%s8939_s1 + $0x4d0] sm:$0xff]  ;;  %v1650_v33 = vld [vmem:[%s8939_s1 + $0x448] sm:$0xff]  ;;  %v1652_v34 = vld [vmem:[%s8939_s1 + $0x458] sm:$0xff] }
 0x1f2   : > { %1929 = vmatprep.subr.mxu0 %v1614_v39  ;;  %2000 = vmatprep.subr.mxu1 %v1616_v40  ;;  %v1649_v35 = vld [vmem:[%s8939_s1 + $0x440] sm:$0xff]  ;;  %v1651_v36 = vld [vmem:[%s8939_s1 + $0x450] sm:$0xff]  ;;  %v1634_v37 = vld [vmem:[%s8939_s1 + $0x3c8] sm:$0xff] }
 0x1f3   : > { %1930 = vmatpush1.msra.mxu0 %v1613_v41  ;;  %2001 = vmatpush1.msra.mxu1 %v1615_v42  ;;  %v1636_v38 = vld [vmem:[%s8939_s1 + $0x3d8] sm:$0xff]  ;;  %v1633_v39 = vld [vmem:[%s8939_s1 + $0x3c0] sm:$0xff]  ;;  %v1635_v40 = vld [vmem:[%s8939_s1 + $0x3d0] sm:$0xff] }
 0x1f4   : > { %1931 = vmatprep.subr.mxu0 %v1598_v43  ;;  %2002 = vmatprep.subr.mxu1 %v1600_v44  ;;  %v1618_v41 = vld [vmem:[%s8939_s1 + $0x348] sm:$0xff]  ;;  %v1620_v42 = vld [vmem:[%s8939_s1 + $0x358] sm:$0xff]  ;;  %v1617_v43 = vld [vmem:[%s8939_s1 + $0x340] sm:$0xff] }
 0x1f5   : > { %1932 = vmatpush1.msra.mxu0 %v1597_v45  ;;  %2003 = vmatpush1.msra.mxu1 %v1599_v46  ;;  %v1619_v44 = vld [vmem:[%s8939_s1 + $0x350] sm:$0xff]  ;;  %v1602_v45 = vld [vmem:[%s8939_s1 + $0x2c8] sm:$0xff]  ;;  %v1604_v46 = vld [vmem:[%s8939_s1 + $0x2d8] sm:$0xff] }
 0x1f6   : > { %1933 = vmatprep.subr.mxu0 %v1582_v47  ;;  %2004 = vmatprep.subr.mxu1 %v1584_v48  ;;  %v1601_v47 = vld [vmem:[%s8939_s1 + $0x2c0] sm:$0xff]  ;;  %v1603_v48 = vld [vmem:[%s8939_s1 + $0x2d0] sm:$0xff] }
 0x1f7   : > { %1934 = vmatpush1.msra.mxu0 %v1581_v49  ;;  %2005 = vmatpush1.msra.mxu1 %v1583_v50  ;;  %v1586_v49 = vld [vmem:[%s8939_s1 + $0x248] sm:$0xff]  ;;  %v1588_v50 = vld [vmem:[%s8939_s1 + $0x258] sm:$0xff] }
 0x1f8   : > { %1935 = vmatprep.subr.mxu0 %v1566_v51  ;;  %2006 = vmatprep.subr.mxu1 %v1568_v52  ;;  %v1585_v51 = vld [vmem:[%s8939_s1 + $0x240] sm:$0xff]  ;;  %v1587_v52 = vld [vmem:[%s8939_s1 + $0x250] sm:$0xff] }
 0x1f9   : > { %1936 = vmatpush1.msra.mxu0 %v1565_v53  ;;  %2007 = vmatpush1.msra.mxu1 %v1567_v54  ;;  %v1570_v53 = vld [vmem:[%s8939_s1 + $0x1c8] sm:$0xff]  ;;  %v1572_v54 = vld [vmem:[%s8939_s1 + $0x1d8] sm:$0xff] }
 0x1fa   : > { %1937 = vmatprep.subr.mxu0 %v1550_v55  ;;  %2008 = vmatprep.subr.mxu1 %v1552_v56  ;;  %v1569_v55 = vld [vmem:[%s8939_s1 + $0x1c0] sm:$0xff]  ;;  %v1571_v56 = vld [vmem:[%s8939_s1 + $0x1d0] sm:$0xff] }
 0x1fb   : > { %1938 = vmatpush1.msra.mxu0 %v1549_v57  ;;  %2009 = vmatpush1.msra.mxu1 %v1551_v58  ;;  %v1554_v57 = vld [vmem:[%s8939_s1 + $0x148] sm:$0xff]  ;;  %v1556_v58 = vld [vmem:[%s8939_s1 + $0x158] sm:$0xff] }
 0x1fc   : > { %1939 = vmatprep.subr.mxu0 %v1534_v59  ;;  %2010 = vmatprep.subr.mxu1 %v1536_v60  ;;  %v1553_v59 = vld [vmem:[%s8939_s1 + $0x140] sm:$0xff]  ;;  %v1555_v60 = vld [vmem:[%s8939_s1 + $0x150] sm:$0xff] }
 0x1fd   : > { %1940 = vmatpush1.msra.mxu0 %v1533_v61  ;;  %2011 = vmatpush1.msra.mxu1 %v1535_v62  ;;  %v1538_v61 = vld [vmem:[%s8939_s1 + $0xc8] sm:$0xff]  ;;  %v1540_v62 = vld [vmem:[%s8939_s1 + $0xd8] sm:$0xff] }
 0x1fe   : > { %1941 = vmatprep.subr.mxu0 %v1518_v63  ;;  %2012 = vmatprep.subr.mxu1 %v1520_v0  ;;  %v1537_v63 = vld [vmem:[%s8939_s1 + $0xc0] sm:$0xff]  ;;  %v1539_v0 = vld [vmem:[%s8939_s1 + $0xd0] sm:$0xff] }
 0x1ff   : > { %1942 = vmatpush1.msra.mxu0 %v1517_v2  ;;  %1975 = vmatprep.mubr.f32.mxu0 %v8368_v3  ;;  %v1522_v2 = vld [vmem:[%s8939_s1 + $0x48] sm:$0xff] }
 0x200   : > { %2013 = vmatpush1.msra.mxu1 %v1519_v4  ;;  %1976 = vmatmul.mubr.f32.vlgmr.msra.gmra.mxu0 %v9057_v1  ;;  %v1524_v4 = vld [vmem:[%s8939_s1 + $0x58] sm:$0xff] }
 0x201   : > { %2046 = vmatprep.mubr.f32.mxu1 %v8368_v3  ;;  %2053 = vmatprep.subr.mxu0 %v1762_v5  ;;  %v1521_v5 = vld [vmem:[%s8939_s1 + $0x40] sm:$0xff] }
 0x202   : > { %2124 = vmatprep.subr.mxu1 %v1764_v6  ;;  %2047 = vmatmul.mubr.f32.vlgmr.msra.gmra.mxu1 %v9057_v1  ;;  %v1523_v6 = vld [vmem:[%s8939_s1 + $0x50] sm:$0xff] }
 0x203   : > { %2054 = vmatpush1.msra.mxu0 %v1761_v7  ;;  %2125 = vmatpush1.msra.mxu1 %v1763_v8  ;;  %v1766_v7 = vld [vmem:[%s8939_s1 + $0x7e8] sm:$0xff]  ;;  %v1768_v8 = vld [vmem:[%s8939_s1 + $0x7f8] sm:$0xff] }
 0x204   : > { %2055 = vmatprep.subr.mxu0 %v1746_v9  ;;  %2126 = vmatprep.subr.mxu1 %v1748_v10  ;;  %v1765_v9 = vld [vmem:[%s8939_s1 + $0x7e0] sm:$0xff]  ;;  %v1767_v10 = vld [vmem:[%s8939_s1 + $0x7f0] sm:$0xff] }
 0x205   : > { %2056 = vmatpush1.msra.mxu0 %v1745_v11  ;;  %2127 = vmatpush1.msra.mxu1 %v1747_v12  ;;  %v1750_v11 = vld [vmem:[%s8939_s1 + $0x768] sm:$0xff]  ;;  %v1752_v12 = vld [vmem:[%s8939_s1 + $0x778] sm:$0xff] }
 0x206   : > { %2057 = vmatprep.subr.mxu0 %v1730_v13  ;;  %2128 = vmatprep.subr.mxu1 %v1732_v14  ;;  %v1749_v13 = vld [vmem:[%s8939_s1 + $0x760] sm:$0xff]  ;;  %v1751_v14 = vld [vmem:[%s8939_s1 + $0x770] sm:$0xff] }
 0x207   : > { %2058 = vmatpush1.msra.mxu0 %v1729_v15  ;;  %2129 = vmatpush1.msra.mxu1 %v1731_v16  ;;  %v1734_v15 = vld [vmem:[%s8939_s1 + $0x6e8] sm:$0xff]  ;;  %v1736_v16 = vld [vmem:[%s8939_s1 + $0x6f8] sm:$0xff] }
 0x208   : > { %2059 = vmatprep.subr.mxu0 %v1714_v17  ;;  %2130 = vmatprep.subr.mxu1 %v1716_v18  ;;  %v1733_v17 = vld [vmem:[%s8939_s1 + $0x6e0] sm:$0xff]  ;;  %v1735_v18 = vld [vmem:[%s8939_s1 + $0x6f0] sm:$0xff] }
 0x209   : > { %2060 = vmatpush1.msra.mxu0 %v1713_v19  ;;  %2131 = vmatpush1.msra.mxu1 %v1715_v20  ;;  %v1718_v19 = vld [vmem:[%s8939_s1 + $0x668] sm:$0xff]  ;;  %v1720_v20 = vld [vmem:[%s8939_s1 + $0x678] sm:$0xff] }
 0x20a   : > { %2061 = vmatprep.subr.mxu0 %v1698_v21  ;;  %2132 = vmatprep.subr.mxu1 %v1700_v22  ;;  %v1717_v21 = vld [vmem:[%s8939_s1 + $0x660] sm:$0xff]  ;;  %v1719_v22 = vld [vmem:[%s8939_s1 + $0x670] sm:$0xff] }
 0x20b   : > { %2062 = vmatpush1.msra.mxu0 %v1697_v23  ;;  %2133 = vmatpush1.msra.mxu1 %v1699_v24  ;;  %v1702_v23 = vld [vmem:[%s8939_s1 + $0x5e8] sm:$0xff]  ;;  %v1704_v24 = vld [vmem:[%s8939_s1 + $0x5f8] sm:$0xff] }
 0x20c   : > { %2063 = vmatprep.subr.mxu0 %v1682_v25  ;;  %2134 = vmatprep.subr.mxu1 %v1684_v26  ;;  %v1701_v25 = vld [vmem:[%s8939_s1 + $0x5e0] sm:$0xff]  ;;  %v1703_v26 = vld [vmem:[%s8939_s1 + $0x5f0] sm:$0xff] }
 0x20d   : > { %2064 = vmatpush1.msra.mxu0 %v1681_v27  ;;  %2135 = vmatpush1.msra.mxu1 %v1683_v28  ;;  %v1686_v27 = vld [vmem:[%s8939_s1 + $0x568] sm:$0xff]  ;;  %v1688_v28 = vld [vmem:[%s8939_s1 + $0x578] sm:$0xff] }
 0x20e   : > { %2065 = vmatprep.subr.mxu0 %v1666_v29  ;;  %2136 = vmatprep.subr.mxu1 %v1668_v30  ;;  %v1685_v29 = vld [vmem:[%s8939_s1 + $0x560] sm:$0xff]  ;;  %v1687_v30 = vld [vmem:[%s8939_s1 + $0x570] sm:$0xff] }
 0x20f   : > { %2066 = vmatpush1.msra.mxu0 %v1665_v31  ;;  %2137 = vmatpush1.msra.mxu1 %v1667_v32  ;;  %v1670_v31 = vld [vmem:[%s8939_s1 + $0x4e8] sm:$0xff]  ;;  %v1672_v32 = vld [vmem:[%s8939_s1 + $0x4f8] sm:$0xff] }
 0x210   : > { %2067 = vmatprep.subr.mxu0 %v1650_v33  ;;  %2138 = vmatprep.subr.mxu1 %v1652_v34  ;;  %v1669_v33 = vld [vmem:[%s8939_s1 + $0x4e0] sm:$0xff]  ;;  %v1671_v34 = vld [vmem:[%s8939_s1 + $0x4f0] sm:$0xff] }
 0x211   : > { %2068 = vmatpush1.msra.mxu0 %v1649_v35  ;;  %2139 = vmatpush1.msra.mxu1 %v1651_v36  ;;  %v1654_v35 = vld [vmem:[%s8939_s1 + $0x468] sm:$0xff]  ;;  %v1656_v36 = vld [vmem:[%s8939_s1 + $0x478] sm:$0xff] }
 0x212   : > { %2069 = vmatprep.subr.mxu0 %v1634_v37  ;;  %2140 = vmatprep.subr.mxu1 %v1636_v38  ;;  %v1653_v37 = vld [vmem:[%s8939_s1 + $0x460] sm:$0xff]  ;;  %v1655_v38 = vld [vmem:[%s8939_s1 + $0x470] sm:$0xff] }
 0x213   : > { %2070 = vmatpush1.msra.mxu0 %v1633_v39  ;;  %2141 = vmatpush1.msra.mxu1 %v1635_v40  ;;  %v1638_v39 = vld [vmem:[%s8939_s1 + $0x3e8] sm:$0xff]  ;;  %v1640_v40 = vld [vmem:[%s8939_s1 + $0x3f8] sm:$0xff] }
 0x214   : > { %2071 = vmatprep.subr.mxu0 %v1618_v41  ;;  %2142 = vmatprep.subr.mxu1 %v1620_v42  ;;  %v1637_v41 = vld [vmem:[%s8939_s1 + $0x3e0] sm:$0xff]  ;;  %v1639_v42 = vld [vmem:[%s8939_s1 + $0x3f0] sm:$0xff] }
 0x215   : > { %2072 = vmatpush1.msra.mxu0 %v1617_v43  ;;  %2143 = vmatpush1.msra.mxu1 %v1619_v44  ;;  %v1622_v43 = vld [vmem:[%s8939_s1 + $0x368] sm:$0xff]  ;;  %v1624_v44 = vld [vmem:[%s8939_s1 + $0x378] sm:$0xff] }
 0x216   : > { %2073 = vmatprep.subr.mxu0 %v1602_v45  ;;  %2144 = vmatprep.subr.mxu1 %v1604_v46  ;;  %v1621_v45 = vld [vmem:[%s8939_s1 + $0x360] sm:$0xff]  ;;  %v1623_v46 = vld [vmem:[%s8939_s1 + $0x370] sm:$0xff] }
 0x217   : > { %2074 = vmatpush1.msra.mxu0 %v1601_v47  ;;  %2145 = vmatpush1.msra.mxu1 %v1603_v48  ;;  %v1606_v47 = vld [vmem:[%s8939_s1 + $0x2e8] sm:$0xff]  ;;  %v1608_v48 = vld [vmem:[%s8939_s1 + $0x2f8] sm:$0xff] }
 0x218   : > { %2075 = vmatprep.subr.mxu0 %v1586_v49  ;;  %2146 = vmatprep.subr.mxu1 %v1588_v50  ;;  %v1605_v49 = vld [vmem:[%s8939_s1 + $0x2e0] sm:$0xff]  ;;  %v1607_v50 = vld [vmem:[%s8939_s1 + $0x2f0] sm:$0xff] }
 0x219   : > { %2076 = vmatpush1.msra.mxu0 %v1585_v51  ;;  %2147 = vmatpush1.msra.mxu1 %v1587_v52  ;;  %v1590_v51 = vld [vmem:[%s8939_s1 + $0x268] sm:$0xff]  ;;  %v1592_v52 = vld [vmem:[%s8939_s1 + $0x278] sm:$0xff] }
 0x21a   : > { %2077 = vmatprep.subr.mxu0 %v1570_v53  ;;  %2148 = vmatprep.subr.mxu1 %v1572_v54  ;;  %v1589_v53 = vld [vmem:[%s8939_s1 + $0x260] sm:$0xff]  ;;  %v1591_v54 = vld [vmem:[%s8939_s1 + $0x270] sm:$0xff] }
 0x21b   : > { %2078 = vmatpush1.msra.mxu0 %v1569_v55  ;;  %2149 = vmatpush1.msra.mxu1 %v1571_v56  ;;  %v1574_v55 = vld [vmem:[%s8939_s1 + $0x1e8] sm:$0xff]  ;;  %v1576_v56 = vld [vmem:[%s8939_s1 + $0x1f8] sm:$0xff] }
 0x21c   : > { %2079 = vmatprep.subr.mxu0 %v1554_v57  ;;  %2150 = vmatprep.subr.mxu1 %v1556_v58  ;;  %v1573_v57 = vld [vmem:[%s8939_s1 + $0x1e0] sm:$0xff]  ;;  %v1575_v58 = vld [vmem:[%s8939_s1 + $0x1f0] sm:$0xff] }
 0x21d   : > { %2080 = vmatpush1.msra.mxu0 %v1553_v59  ;;  %2151 = vmatpush1.msra.mxu1 %v1555_v60  ;;  %v1558_v59 = vld [vmem:[%s8939_s1 + $0x168] sm:$0xff]  ;;  %v1560_v60 = vld [vmem:[%s8939_s1 + $0x178] sm:$0xff] }
 0x21e   : > { %2081 = vmatprep.subr.mxu0 %v1538_v61  ;;  %2152 = vmatprep.subr.mxu1 %v1540_v62  ;;  %v1557_v61 = vld [vmem:[%s8939_s1 + $0x160] sm:$0xff]  ;;  %v1559_v62 = vld [vmem:[%s8939_s1 + $0x170] sm:$0xff] }
 0x21f   : > { %2082 = vmatpush1.msra.mxu0 %v1537_v63  ;;  %2153 = vmatpush1.msra.mxu1 %v1539_v0  ;;  %v1542_v63 = vld [vmem:[%s8939_s1 + $0xe8] sm:$0xff]  ;;  %v1544_v0 = vld [vmem:[%s8939_s1 + $0xf8] sm:$0xff] }
 0x220   : > { %2083 = vmatprep.subr.mxu0 %v1522_v2  ;;  %2154 = vmatprep.subr.mxu1 %v1524_v4  ;;  %v1541_v2 = vld [vmem:[%s8939_s1 + $0xe0] sm:$0xff]  ;;  %v1543_v4 = vld [vmem:[%s8939_s1 + $0xf0] sm:$0xff] }
 0x221   : > { %2084 = vmatpush1.msra.mxu0 %v1521_v5  ;;  %2117 = vmatprep.mubr.f32.mxu0 %v8368_v3  ;;  %v1526_v5 = vld [vmem:[%s8939_s1 + $0x68] sm:$0xff] }
 0x222   : > { %2155 = vmatpush1.msra.mxu1 %v1523_v6  ;;  %2118 = vmatmul.mubr.f32.vlgmr.msra.gmra.mxu0 %v9057_v1  ;;  %v1528_v6 = vld [vmem:[%s8939_s1 + $0x78] sm:$0xff] }
 0x223   : > { %2188 = vmatprep.mubr.f32.mxu1 %v8368_v3  ;;  %2195 = vmatprep.subr.mxu0 %v1766_v7  ;;  %v1525_v7 = vld [vmem:[%s8939_s1 + $0x60] sm:$0xff] }
 0x224   : > { %2266 = vmatprep.subr.mxu1 %v1768_v8  ;;  %2189 = vmatmul.mubr.f32.vlgmr.msra.gmra.mxu1 %v9057_v1  ;;  %v1527_v8 = vld [vmem:[%s8939_s1 + $0x70] sm:$0xff] }
 0x225   : > { %2196 = vmatpush1.msra.mxu0 %v1765_v9  ;;  %2267 = vmatpush1.msra.mxu1 %v1767_v10  ;;  %v1241_v9 = vld [vmem:[%s8933_s24 + $0x788] sm:$0xff]  ;;  %v1243_v10 = vld [vmem:[%s8933_s24 + $0x798] sm:$0xff] }
 0x226   : > { %2197 = vmatprep.subr.mxu0 %v1750_v11  ;;  %2268 = vmatprep.subr.mxu1 %v1752_v12  ;;  %v1240_v11 = vld [vmem:[%s8933_s24 + $0x780] sm:$0xff]  ;;  %v1242_v12 = vld [vmem:[%s8933_s24 + $0x790] sm:$0xff] }
 0x227   : > { %2198 = vmatpush1.msra.mxu0 %v1749_v13  ;;  %2269 = vmatpush1.msra.mxu1 %v1751_v14  ;;  %v1225_v13 = vld [vmem:[%s8933_s24 + $0x708] sm:$0xff]  ;;  %v1227_v14 = vld [vmem:[%s8933_s24 + $0x718] sm:$0xff] }
 0x228   : > { %2199 = vmatprep.subr.mxu0 %v1734_v15  ;;  %2270 = vmatprep.subr.mxu1 %v1736_v16  ;;  %v1224_v15 = vld [vmem:[%s8933_s24 + $0x700] sm:$0xff]  ;;  %v1226_v16 = vld [vmem:[%s8933_s24 + $0x710] sm:$0xff] }
 0x229   : > { %2200 = vmatpush1.msra.mxu0 %v1733_v17  ;;  %2271 = vmatpush1.msra.mxu1 %v1735_v18  ;;  %v1209_v17 = vld [vmem:[%s8933_s24 + $0x688] sm:$0xff]  ;;  %v1211_v18 = vld [vmem:[%s8933_s24 + $0x698] sm:$0xff] }
 0x22a   : > { %2201 = vmatprep.subr.mxu0 %v1718_v19  ;;  %2272 = vmatprep.subr.mxu1 %v1720_v20  ;;  %v1210_v19 = vld [vmem:[%s8933_s24 + $0x690] sm:$0xff]  ;;  %v1193_v20 = vld [vmem:[%s8933_s24 + $0x608] sm:$0xff] }
 0x22b   : > { %2202 = vmatpush1.msra.mxu0 %v1717_v21  ;;  %2273 = vmatpush1.msra.mxu1 %v1719_v22  ;;  %v1192_v21 = vld [vmem:[%s8933_s24 + $0x600] sm:$0xff]  ;;  %v1194_v22 = vld [vmem:[%s8933_s24 + $0x610] sm:$0xff] }
 0x22c   : > { %2203 = vmatprep.subr.mxu0 %v1702_v23  ;;  %2274 = vmatprep.subr.mxu1 %v1704_v24  ;;  %v1177_v23 = vld [vmem:[%s8933_s24 + $0x588] sm:$0xff]  ;;  %v1179_v24 = vld [vmem:[%s8933_s24 + $0x598] sm:$0xff] }
 0x22d   : > { %2204 = vmatpush1.msra.mxu0 %v1701_v25  ;;  %2275 = vmatpush1.msra.mxu1 %v1703_v26  ;;  %v1176_v25 = vld [vmem:[%s8933_s24 + $0x580] sm:$0xff]  ;;  %v1178_v26 = vld [vmem:[%s8933_s24 + $0x590] sm:$0xff] }
 0x22e   : > { %2205 = vmatprep.subr.mxu0 %v1686_v27  ;;  %2276 = vmatprep.subr.mxu1 %v1688_v28  ;;  %v1161_v27 = vld [vmem:[%s8933_s24 + $0x508] sm:$0xff]  ;;  %v1163_v28 = vld [vmem:[%s8933_s24 + $0x518] sm:$0xff] }
 0x22f   : > { %2206 = vmatpush1.msra.mxu0 %v1685_v29  ;;  %2277 = vmatpush1.msra.mxu1 %v1687_v30  ;;  %v1160_v29 = vld [vmem:[%s8933_s24 + $0x500] sm:$0xff]  ;;  %v1162_v30 = vld [vmem:[%s8933_s24 + $0x510] sm:$0xff] }
 0x230   : > { %2207 = vmatprep.subr.mxu0 %v1670_v31  ;;  %2278 = vmatprep.subr.mxu1 %v1672_v32  ;;  %v1145_v31 = vld [vmem:[%s8933_s24 + $0x488] sm:$0xff]  ;;  %v1147_v32 = vld [vmem:[%s8933_s24 + $0x498] sm:$0xff] }
 0x231   : > { %2208 = vmatpush1.msra.mxu0 %v1669_v33  ;;  %2279 = vmatpush1.msra.mxu1 %v1671_v34  ;;  %v1144_v33 = vld [vmem:[%s8933_s24 + $0x480] sm:$0xff]  ;;  %v1146_v34 = vld [vmem:[%s8933_s24 + $0x490] sm:$0xff] }
 0x232   : > { %2209 = vmatprep.subr.mxu0 %v1654_v35  ;;  %2280 = vmatprep.subr.mxu1 %v1656_v36  ;;  %v1129_v35 = vld [vmem:[%s8933_s24 + $0x408] sm:$0xff]  ;;  %v1131_v36 = vld [vmem:[%s8933_s24 + $0x418] sm:$0xff] }
 0x233   : > { %2210 = vmatpush1.msra.mxu0 %v1653_v37  ;;  %2281 = vmatpush1.msra.mxu1 %v1655_v38  ;;  %v1128_v37 = vld [vmem:[%s8933_s24 + $0x400] sm:$0xff]  ;;  %v1130_v38 = vld [vmem:[%s8933_s24 + $0x410] sm:$0xff] }
 0x234   : > { %2211 = vmatprep.subr.mxu0 %v1638_v39  ;;  %2282 = vmatprep.subr.mxu1 %v1640_v40  ;;  %v1113_v39 = vld [vmem:[%s8933_s24 + $0x388] sm:$0xff]  ;;  %v1115_v40 = vld [vmem:[%s8933_s24 + $0x398] sm:$0xff] }
 0x235   : > { %2212 = vmatpush1.msra.mxu0 %v1637_v41  ;;  %2283 = vmatpush1.msra.mxu1 %v1639_v42  ;;  %v1112_v41 = vld [vmem:[%s8933_s24 + $0x380] sm:$0xff]  ;;  %v1114_v42 = vld [vmem:[%s8933_s24 + $0x390] sm:$0xff] }
 0x236   : > { %2213 = vmatprep.subr.mxu0 %v1622_v43  ;;  %2284 = vmatprep.subr.mxu1 %v1624_v44  ;;  %v1097_v43 = vld [vmem:[%s8933_s24 + $0x308] sm:$0xff]  ;;  %v1099_v44 = vld [vmem:[%s8933_s24 + $0x318] sm:$0xff] }
 0x237   : > { %2214 = vmatpush1.msra.mxu0 %v1621_v45  ;;  %2285 = vmatpush1.msra.mxu1 %v1623_v46  ;;  %v1096_v45 = vld [vmem:[%s8933_s24 + $0x300] sm:$0xff]  ;;  %v1098_v46 = vld [vmem:[%s8933_s24 + $0x310] sm:$0xff] }
 0x238   : > { %2215 = vmatprep.subr.mxu0 %v1606_v47  ;;  %2286 = vmatprep.subr.mxu1 %v1608_v48  ;;  %v1081_v47 = vld [vmem:[%s8933_s24 + $0x288] sm:$0xff]  ;;  %v1083_v48 = vld [vmem:[%s8933_s24 + $0x298] sm:$0xff] }
 0x239   : > { %2216 = vmatpush1.msra.mxu0 %v1605_v49  ;;  %2287 = vmatpush1.msra.mxu1 %v1607_v50  ;;  %v1080_v49 = vld [vmem:[%s8933_s24 + $0x280] sm:$0xff]  ;;  %v1082_v50 = vld [vmem:[%s8933_s24 + $0x290] sm:$0xff] }
 0x23a   : > { %2217 = vmatprep.subr.mxu0 %v1590_v51  ;;  %2288 = vmatprep.subr.mxu1 %v1592_v52  ;;  %v1065_v51 = vld [vmem:[%s8933_s24 + $0x208] sm:$0xff]  ;;  %v1067_v52 = vld [vmem:[%s8933_s24 + $0x218] sm:$0xff] }
 0x23b   : > { %2218 = vmatpush1.msra.mxu0 %v1589_v53  ;;  %2289 = vmatpush1.msra.mxu1 %v1591_v54  ;;  %v1064_v53 = vld [vmem:[%s8933_s24 + $0x200] sm:$0xff]  ;;  %v1066_v54 = vld [vmem:[%s8933_s24 + $0x210] sm:$0xff] }
 0x23c   : > { %2219 = vmatprep.subr.mxu0 %v1574_v55  ;;  %2290 = vmatprep.subr.mxu1 %v1576_v56  ;;  %v1049_v55 = vld [vmem:[%s8933_s24 + $0x188] sm:$0xff]  ;;  %v1051_v56 = vld [vmem:[%s8933_s24 + $0x198] sm:$0xff] }
 0x23d   : > { %2220 = vmatpush1.msra.mxu0 %v1573_v57  ;;  %2291 = vmatpush1.msra.mxu1 %v1575_v58  ;;  %v1048_v57 = vld [vmem:[%s8933_s24 + $0x180] sm:$0xff]  ;;  %v1050_v58 = vld [vmem:[%s8933_s24 + $0x190] sm:$0xff] }
 0x23e   : > { %2221 = vmatprep.subr.mxu0 %v1558_v59  ;;  %2292 = vmatprep.subr.mxu1 %v1560_v60  ;;  %v1033_v59 = vld [vmem:[%s8933_s24 + $0x108] sm:$0xff]  ;;  %v1035_v60 = vld [vmem:[%s8933_s24 + $0x118] sm:$0xff] }
 0x23f   : > { %2222 = vmatpush1.msra.mxu0 %v1557_v61  ;;  %2293 = vmatpush1.msra.mxu1 %v1559_v62  ;;  %v1032_v61 = vld [vmem:[%s8933_s24 + $0x100] sm:$0xff]  ;;  %v1034_v62 = vld [vmem:[%s8933_s24 + $0x110] sm:$0xff] }
 0x240   : > { %2223 = vmatprep.subr.mxu0 %v1542_v63  ;;  %2294 = vmatprep.subr.mxu1 %v1544_v0  ;;  %v1017_v63 = vld [vmem:[%s8933_s24 + $0x88] sm:$0xff]  ;;  %v1019_v0 = vld [vmem:[%s8933_s24 + $0x98] sm:$0xff] }
 0x241   : > { %2224 = vmatpush1.msra.mxu0 %v1541_v2  ;;  %2295 = vmatpush1.msra.mxu1 %v1543_v4  ;;  %v1016_v2 = vld [vmem:[%s8933_s24 + $0x80] sm:$0xff]  ;;  %v1018_v4 = vld [vmem:[%s8933_s24 + $0x90] sm:$0xff] }
 0x242   : > { %2225 = vmatprep.subr.mxu0 %v1526_v5  ;;  %2296 = vmatprep.subr.mxu1 %v1528_v6  ;;  %v1001_v5 = vld [vmem:[%s8933_s24 + $0x8] sm:$0xff]  ;;  %v1003_v6 = vld [vmem:[%s8933_s24 + $0x18] sm:$0xff] }
 0x243   : > { %2226 = vmatpush1.msra.mxu0 %v1525_v7  ;;  %2259 = vmatprep.mubr.f32.mxu0 %v8368_v3  ;;  %v1000_v7 = vld [vmem:[%s8933_s24] sm:$0xff] }
 0x244   : > { %2297 = vmatpush1.msra.mxu1 %v1527_v8  ;;  %2260 = vmatmul.mubr.f32.vlgmr.msra.gmra.mxu0 %v9057_v1  ;;  %v1002_v8 = vld [vmem:[%s8933_s24 + $0x10] sm:$0xff] }
 0x245   : > { %2330 = vmatprep.mubr.f32.mxu1 %v8368_v3  ;;  %2337 = vmatprep.subr.mxu0 %v1241_v9  ;;  %v1208_v3 = vld [vmem:[%s8933_s24 + $0x680] sm:$0xff]  ;;  %v1497_v9 = vld [vmem:[%s8933_s24 + $0xf88] sm:$0xff] }
 0x246   : > { %2408 = vmatprep.subr.mxu1 %v1243_v10  ;;  %2331 = vmatmul.mubr.f32.vlgmr.msra.gmra.mxu1 %v9057_v1  ;;  %v1195_v1 = vld [vmem:[%s8933_s24 + $0x618] sm:$0xff] }
 0x247   : > { %2338 = vmatpush1.msra.mxu0 %v1240_v11  ;;  %2409 = vmatpush1.msra.mxu1 %v1242_v12  ;;  %v1499_v10 = vld [vmem:[%s8933_s24 + $0xf98] sm:$0xff]  ;;  %v1496_v11 = vld [vmem:[%s8933_s24 + $0xf80] sm:$0xff]  ;;  %v1498_v12 = vld [vmem:[%s8933_s24 + $0xf90] sm:$0xff] }
 0x248   : > { %2339 = vmatprep.subr.mxu0 %v1225_v13  ;;  %2410 = vmatprep.subr.mxu1 %v1227_v14  ;;  %v1481_v13 = vld [vmem:[%s8933_s24 + $0xf08] sm:$0xff]  ;;  %v1483_v14 = vld [vmem:[%s8933_s24 + $0xf18] sm:$0xff] }
 0x249   : > { %2340 = vmatpush1.msra.mxu0 %v1224_v15  ;;  %2411 = vmatpush1.msra.mxu1 %v1226_v16  ;;  %v1480_v15 = vld [vmem:[%s8933_s24 + $0xf00] sm:$0xff]  ;;  %v1482_v16 = vld [vmem:[%s8933_s24 + $0xf10] sm:$0xff] }
 0x24a   : > { %2341 = vmatprep.subr.mxu0 %v1209_v17  ;;  %2412 = vmatprep.subr.mxu1 %v1211_v18  ;;  %v1465_v17 = vld [vmem:[%s8933_s24 + $0xe88] sm:$0xff]  ;;  %v1467_v18 = vld [vmem:[%s8933_s24 + $0xe98] sm:$0xff] }
 0x24b   : > { %2342 = vmatpush1.msra.mxu0 %v1208_v3  ;;  %2413 = vmatpush1.msra.mxu1 %v1210_v19  ;;  %v1464_v3 = vld [vmem:[%s8933_s24 + $0xe80] sm:$0xff]  ;;  %v1466_v19 = vld [vmem:[%s8933_s24 + $0xe90] sm:$0xff] }
 0x24c   : > { %2343 = vmatprep.subr.mxu0 %v1193_v20  ;;  %2414 = vmatprep.subr.mxu1 %v1195_v1  ;;  %v1449_v20 = vld [vmem:[%s8933_s24 + $0xe08] sm:$0xff]  ;;  %v1451_v1 = vld [vmem:[%s8933_s24 + $0xe18] sm:$0xff] }
 0x24d   : > { %2344 = vmatpush1.msra.mxu0 %v1192_v21  ;;  %2415 = vmatpush1.msra.mxu1 %v1194_v22  ;;  %v1448_v21 = vld [vmem:[%s8933_s24 + $0xe00] sm:$0xff]  ;;  %v1450_v22 = vld [vmem:[%s8933_s24 + $0xe10] sm:$0xff] }
 0x24e   : > { %2345 = vmatprep.subr.mxu0 %v1177_v23  ;;  %2416 = vmatprep.subr.mxu1 %v1179_v24  ;;  %v1433_v23 = vld [vmem:[%s8933_s24 + $0xd88] sm:$0xff]  ;;  %v1435_v24 = vld [vmem:[%s8933_s24 + $0xd98] sm:$0xff] }
 0x24f   : > { %2346 = vmatpush1.msra.mxu0 %v1176_v25  ;;  %2417 = vmatpush1.msra.mxu1 %v1178_v26  ;;  %v1432_v25 = vld [vmem:[%s8933_s24 + $0xd80] sm:$0xff]  ;;  %v1434_v26 = vld [vmem:[%s8933_s24 + $0xd90] sm:$0xff] }
 0x250   : > { %2347 = vmatprep.subr.mxu0 %v1161_v27  ;;  %2418 = vmatprep.subr.mxu1 %v1163_v28  ;;  %v1417_v27 = vld [vmem:[%s8933_s24 + $0xd08] sm:$0xff]  ;;  %v1419_v28 = vld [vmem:[%s8933_s24 + $0xd18] sm:$0xff] }
 0x251   : > { %2348 = vmatpush1.msra.mxu0 %v1160_v29  ;;  %2419 = vmatpush1.msra.mxu1 %v1162_v30  ;;  %v1416_v29 = vld [vmem:[%s8933_s24 + $0xd00] sm:$0xff]  ;;  %v1418_v30 = vld [vmem:[%s8933_s24 + $0xd10] sm:$0xff] }
 0x252   : > { %2349 = vmatprep.subr.mxu0 %v1145_v31  ;;  %2420 = vmatprep.subr.mxu1 %v1147_v32  ;;  %v1401_v31 = vld [vmem:[%s8933_s24 + $0xc88] sm:$0xff]  ;;  %v1403_v32 = vld [vmem:[%s8933_s24 + $0xc98] sm:$0xff] }
 0x253   : > { %2350 = vmatpush1.msra.mxu0 %v1144_v33  ;;  %2421 = vmatpush1.msra.mxu1 %v1146_v34  ;;  %v1400_v33 = vld [vmem:[%s8933_s24 + $0xc80] sm:$0xff]  ;;  %v1402_v34 = vld [vmem:[%s8933_s24 + $0xc90] sm:$0xff] }
 0x254   : > { %2351 = vmatprep.subr.mxu0 %v1129_v35  ;;  %2422 = vmatprep.subr.mxu1 %v1131_v36  ;;  %v1385_v35 = vld [vmem:[%s8933_s24 + $0xc08] sm:$0xff]  ;;  %v1387_v36 = vld [vmem:[%s8933_s24 + $0xc18] sm:$0xff] }
 0x255   : > { %2352 = vmatpush1.msra.mxu0 %v1128_v37  ;;  %2423 = vmatpush1.msra.mxu1 %v1130_v38  ;;  %v1384_v37 = vld [vmem:[%s8933_s24 + $0xc00] sm:$0xff]  ;;  %v1386_v38 = vld [vmem:[%s8933_s24 + $0xc10] sm:$0xff] }
 0x256   : > { %2353 = vmatprep.subr.mxu0 %v1113_v39  ;;  %2424 = vmatprep.subr.mxu1 %v1115_v40  ;;  %v1369_v39 = vld [vmem:[%s8933_s24 + $0xb88] sm:$0xff]  ;;  %v1371_v40 = vld [vmem:[%s8933_s24 + $0xb98] sm:$0xff] }
 0x257   : > { %2354 = vmatpush1.msra.mxu0 %v1112_v41  ;;  %2425 = vmatpush1.msra.mxu1 %v1114_v42  ;;  %v1368_v41 = vld [vmem:[%s8933_s24 + $0xb80] sm:$0xff]  ;;  %v1370_v42 = vld [vmem:[%s8933_s24 + $0xb90] sm:$0xff] }
 0x258   : > { %2355 = vmatprep.subr.mxu0 %v1097_v43  ;;  %2426 = vmatprep.subr.mxu1 %v1099_v44  ;;  %v1353_v43 = vld [vmem:[%s8933_s24 + $0xb08] sm:$0xff]  ;;  %v1355_v44 = vld [vmem:[%s8933_s24 + $0xb18] sm:$0xff] }
 0x259   : > { %2356 = vmatpush1.msra.mxu0 %v1096_v45  ;;  %2427 = vmatpush1.msra.mxu1 %v1098_v46  ;;  %v1352_v45 = vld [vmem:[%s8933_s24 + $0xb00] sm:$0xff]  ;;  %v1354_v46 = vld [vmem:[%s8933_s24 + $0xb10] sm:$0xff] }
 0x25a   : > { %2357 = vmatprep.subr.mxu0 %v1081_v47  ;;  %2428 = vmatprep.subr.mxu1 %v1083_v48  ;;  %v1337_v47 = vld [vmem:[%s8933_s24 + $0xa88] sm:$0xff]  ;;  %v1339_v48 = vld [vmem:[%s8933_s24 + $0xa98] sm:$0xff] }
 0x25b   : > { %2358 = vmatpush1.msra.mxu0 %v1080_v49  ;;  %2429 = vmatpush1.msra.mxu1 %v1082_v50  ;;  %v1336_v49 = vld [vmem:[%s8933_s24 + $0xa80] sm:$0xff]  ;;  %v1338_v50 = vld [vmem:[%s8933_s24 + $0xa90] sm:$0xff] }
 0x25c   : > { %2359 = vmatprep.subr.mxu0 %v1065_v51  ;;  %2430 = vmatprep.subr.mxu1 %v1067_v52  ;;  %v1321_v51 = vld [vmem:[%s8933_s24 + $0xa08] sm:$0xff]  ;;  %v1323_v52 = vld [vmem:[%s8933_s24 + $0xa18] sm:$0xff] }
 0x25d   : > { %2360 = vmatpush1.msra.mxu0 %v1064_v53  ;;  %2431 = vmatpush1.msra.mxu1 %v1066_v54  ;;  %v1320_v53 = vld [vmem:[%s8933_s24 + $0xa00] sm:$0xff]  ;;  %v1322_v54 = vld [vmem:[%s8933_s24 + $0xa10] sm:$0xff] }
 0x25e   : > { %2361 = vmatprep.subr.mxu0 %v1049_v55  ;;  %2432 = vmatprep.subr.mxu1 %v1051_v56  ;;  %v1305_v55 = vld [vmem:[%s8933_s24 + $0x988] sm:$0xff]  ;;  %v1307_v56 = vld [vmem:[%s8933_s24 + $0x998] sm:$0xff] }
 0x25f   : > { %2362 = vmatpush1.msra.mxu0 %v1048_v57  ;;  %2433 = vmatpush1.msra.mxu1 %v1050_v58  ;;  %v1304_v57 = vld [vmem:[%s8933_s24 + $0x980] sm:$0xff]  ;;  %v1306_v58 = vld [vmem:[%s8933_s24 + $0x990] sm:$0xff] }
 0x260   : > { %2363 = vmatprep.subr.mxu0 %v1033_v59  ;;  %2434 = vmatprep.subr.mxu1 %v1035_v60  ;;  %v1289_v59 = vld [vmem:[%s8933_s24 + $0x908] sm:$0xff]  ;;  %v1291_v60 = vld [vmem:[%s8933_s24 + $0x918] sm:$0xff] }
 0x261   : > { %2364 = vmatpush1.msra.mxu0 %v1032_v61  ;;  %2435 = vmatpush1.msra.mxu1 %v1034_v62  ;;  %v1288_v61 = vld [vmem:[%s8933_s24 + $0x900] sm:$0xff]  ;;  %v1290_v62 = vld [vmem:[%s8933_s24 + $0x910] sm:$0xff] }
 0x262   : > { %2365 = vmatprep.subr.mxu0 %v1017_v63  ;;  %2436 = vmatprep.subr.mxu1 %v1019_v0  ;;  %v1273_v63 = vld [vmem:[%s8933_s24 + $0x888] sm:$0xff]  ;;  %v1275_v0 = vld [vmem:[%s8933_s24 + $0x898] sm:$0xff] }
 0x263   : > { %2366 = vmatpush1.msra.mxu0 %v1016_v2  ;;  %2437 = vmatpush1.msra.mxu1 %v1018_v4  ;;  %v1272_v2 = vld [vmem:[%s8933_s24 + $0x880] sm:$0xff]  ;;  %v1274_v4 = vld [vmem:[%s8933_s24 + $0x890] sm:$0xff] }
 0x264   : > { %2367 = vmatprep.subr.mxu0 %v1001_v5  ;;  %2438 = vmatprep.subr.mxu1 %v1003_v6  ;;  %v1257_v5 = vld [vmem:[%s8933_s24 + $0x808] sm:$0xff]  ;;  %v1259_v6 = vld [vmem:[%s8933_s24 + $0x818] sm:$0xff] }
 0x265   : > { %2368 = vmatpush1.msra.mxu0 %v1000_v7  ;;  %2439 = vmatpush1.msra.mxu1 %v1002_v8  ;;  %v1256_v7 = vld [vmem:[%s8933_s24 + $0x800] sm:$0xff]  ;;  %v9394_v8 = vld [vmem:[#allocation5 + $0x8] sm:$0xff] }
 0x266   : > { %2369 = vmatprep.subr.mxu0 %v1497_v9  ;;  %2440 = vmatprep.subr.mxu1 %v1499_v10  ;;  %v1258_v9 = vld [vmem:[%s8933_s24 + $0x810] sm:$0xff]  ;;  %v9397_v10 = vld [vmem:[#allocation5] sm:$0xff] }
 0x267   : > { %2370 = vmatpush2.msra.mxu0 %v1496_v11  ;;  %2441 = vmatpush2.msra.mxu1 %v1498_v12  ;;  %v1245_v11 = vld [vmem:[%s8933_s24 + $0x7a8] sm:$0xff]  ;;  %v1247_v12 = vld [vmem:[%s8933_s24 + $0x7b8] sm:$0xff] }
 0x268   : > { %2371 = vmatprep.subr.mxu0 %v1481_v13  ;;  %2442 = vmatprep.subr.mxu1 %v1483_v14  ;;  %v1244_v13 = vld [vmem:[%s8933_s24 + $0x7a0] sm:$0xff]  ;;  %v1246_v14 = vld [vmem:[%s8933_s24 + $0x7b0] sm:$0xff] }
 0x269   : > { %2372 = vmatpush2.msra.mxu0 %v1480_v15  ;;  %2443 = vmatpush2.msra.mxu1 %v1482_v16  ;;  %v1229_v15 = vld [vmem:[%s8933_s24 + $0x728] sm:$0xff]  ;;  %v1231_v16 = vld [vmem:[%s8933_s24 + $0x738] sm:$0xff] }
 0x26a   : > { %2373 = vmatprep.subr.mxu0 %v1465_v17  ;;  %2444 = vmatprep.subr.mxu1 %v1467_v18  ;;  %v1228_v17 = vld [vmem:[%s8933_s24 + $0x720] sm:$0xff]  ;;  %v1230_v18 = vld [vmem:[%s8933_s24 + $0x730] sm:$0xff] }
 0x26b   : > { %2374 = vmatpush2.msra.mxu0 %v1464_v3  ;;  %2445 = vmatpush2.msra.mxu1 %v1466_v19  ;;  %v1213_v3 = vld [vmem:[%s8933_s24 + $0x6a8] sm:$0xff]  ;;  %v1215_v19 = vld [vmem:[%s8933_s24 + $0x6b8] sm:$0xff] }
 0x26c   : > { %2375 = vmatprep.subr.mxu0 %v1449_v20  ;;  %2446 = vmatprep.subr.mxu1 %v1451_v1  ;;  %v1212_v20 = vld [vmem:[%s8933_s24 + $0x6a0] sm:$0xff]  ;;  %v1214_v1 = vld [vmem:[%s8933_s24 + $0x6b0] sm:$0xff] }
 0x26d   : > { %2376 = vmatpush2.msra.mxu0 %v1448_v21  ;;  %2447 = vmatpush2.msra.mxu1 %v1450_v22  ;;  %v1197_v21 = vld [vmem:[%s8933_s24 + $0x628] sm:$0xff]  ;;  %v1199_v22 = vld [vmem:[%s8933_s24 + $0x638] sm:$0xff] }
 0x26e   : > { %2377 = vmatprep.subr.mxu0 %v1433_v23  ;;  %2448 = vmatprep.subr.mxu1 %v1435_v24  ;;  %v1196_v23 = vld [vmem:[%s8933_s24 + $0x620] sm:$0xff]  ;;  %v1198_v24 = vld [vmem:[%s8933_s24 + $0x630] sm:$0xff] }
 0x26f   : > { %2378 = vmatpush2.msra.mxu0 %v1432_v25  ;;  %2449 = vmatpush2.msra.mxu1 %v1434_v26  ;;  %v1181_v25 = vld [vmem:[%s8933_s24 + $0x5a8] sm:$0xff]  ;;  %v1183_v26 = vld [vmem:[%s8933_s24 + $0x5b8] sm:$0xff] }
 0x270   : > { %2379 = vmatprep.subr.mxu0 %v1417_v27  ;;  %2450 = vmatprep.subr.mxu1 %v1419_v28  ;;  %v1180_v27 = vld [vmem:[%s8933_s24 + $0x5a0] sm:$0xff]  ;;  %v1182_v28 = vld [vmem:[%s8933_s24 + $0x5b0] sm:$0xff] }
 0x271   : > { %2380 = vmatpush2.msra.mxu0 %v1416_v29  ;;  %2451 = vmatpush2.msra.mxu1 %v1418_v30  ;;  %v1165_v29 = vld [vmem:[%s8933_s24 + $0x528] sm:$0xff]  ;;  %v1167_v30 = vld [vmem:[%s8933_s24 + $0x538] sm:$0xff] }
 0x272   : > { %2381 = vmatprep.subr.mxu0 %v1401_v31  ;;  %2452 = vmatprep.subr.mxu1 %v1403_v32  ;;  %v1164_v31 = vld [vmem:[%s8933_s24 + $0x520] sm:$0xff]  ;;  %v1166_v32 = vld [vmem:[%s8933_s24 + $0x530] sm:$0xff] }
 0x273   : > { %2382 = vmatpush2.msra.mxu0 %v1400_v33  ;;  %2453 = vmatpush2.msra.mxu1 %v1402_v34  ;;  %v1149_v33 = vld [vmem:[%s8933_s24 + $0x4a8] sm:$0xff]  ;;  %v1151_v34 = vld [vmem:[%s8933_s24 + $0x4b8] sm:$0xff] }
 0x274   : > { %2383 = vmatprep.subr.mxu0 %v1385_v35  ;;  %2454 = vmatprep.subr.mxu1 %v1387_v36  ;;  %v1148_v35 = vld [vmem:[%s8933_s24 + $0x4a0] sm:$0xff]  ;;  %v1150_v36 = vld [vmem:[%s8933_s24 + $0x4b0] sm:$0xff] }
 0x275   : > { %2384 = vmatpush2.msra.mxu0 %v1384_v37  ;;  %2455 = vmatpush2.msra.mxu1 %v1386_v38  ;;  %v1133_v37 = vld [vmem:[%s8933_s24 + $0x428] sm:$0xff]  ;;  %v1135_v38 = vld [vmem:[%s8933_s24 + $0x438] sm:$0xff] }
 0x276   : > { %2385 = vmatprep.subr.mxu0 %v1369_v39  ;;  %2456 = vmatprep.subr.mxu1 %v1371_v40  ;;  %v1132_v39 = vld [vmem:[%s8933_s24 + $0x420] sm:$0xff]  ;;  %v1134_v40 = vld [vmem:[%s8933_s24 + $0x430] sm:$0xff] }
 0x277   : > { %2386 = vmatpush2.msra.mxu0 %v1368_v41  ;;  %2457 = vmatpush2.msra.mxu1 %v1370_v42  ;;  %v1117_v41 = vld [vmem:[%s8933_s24 + $0x3a8] sm:$0xff]  ;;  %v1119_v42 = vld [vmem:[%s8933_s24 + $0x3b8] sm:$0xff] }
 0x278   : > { %2387 = vmatprep.subr.mxu0 %v1353_v43  ;;  %2458 = vmatprep.subr.mxu1 %v1355_v44  ;;  %v1116_v43 = vld [vmem:[%s8933_s24 + $0x3a0] sm:$0xff]  ;;  %v1118_v44 = vld [vmem:[%s8933_s24 + $0x3b0] sm:$0xff] }
 0x279   : > { %2388 = vmatpush2.msra.mxu0 %v1352_v45  ;;  %2459 = vmatpush2.msra.mxu1 %v1354_v46  ;;  %v1101_v45 = vld [vmem:[%s8933_s24 + $0x328] sm:$0xff]  ;;  %v1103_v46 = vld [vmem:[%s8933_s24 + $0x338] sm:$0xff] }
 0x27a   : > { %2389 = vmatprep.subr.mxu0 %v1337_v47  ;;  %2460 = vmatprep.subr.mxu1 %v1339_v48  ;;  %v1100_v47 = vld [vmem:[%s8933_s24 + $0x320] sm:$0xff]  ;;  %v1102_v48 = vld [vmem:[%s8933_s24 + $0x330] sm:$0xff] }
 0x27b   : > { %2390 = vmatpush2.msra.mxu0 %v1336_v49  ;;  %2461 = vmatpush2.msra.mxu1 %v1338_v50  ;;  %v1085_v49 = vld [vmem:[%s8933_s24 + $0x2a8] sm:$0xff]  ;;  %v1087_v50 = vld [vmem:[%s8933_s24 + $0x2b8] sm:$0xff] }
 0x27c   : > { %2391 = vmatprep.subr.mxu0 %v1321_v51  ;;  %2462 = vmatprep.subr.mxu1 %v1323_v52  ;;  %v1084_v51 = vld [vmem:[%s8933_s24 + $0x2a0] sm:$0xff]  ;;  %v1086_v52 = vld [vmem:[%s8933_s24 + $0x2b0] sm:$0xff] }
 0x27d   : > { %2392 = vmatpush2.msra.mxu0 %v1320_v53  ;;  %2463 = vmatpush2.msra.mxu1 %v1322_v54  ;;  %v1069_v53 = vld [vmem:[%s8933_s24 + $0x228] sm:$0xff]  ;;  %v1071_v54 = vld [vmem:[%s8933_s24 + $0x238] sm:$0xff] }
 0x27e   : > { %2393 = vmatprep.subr.mxu0 %v1305_v55  ;;  %2464 = vmatprep.subr.mxu1 %v1307_v56  ;;  %v1068_v55 = vld [vmem:[%s8933_s24 + $0x220] sm:$0xff]  ;;  %v1070_v56 = vld [vmem:[%s8933_s24 + $0x230] sm:$0xff] }
 0x27f   : > { %2394 = vmatpush2.msra.mxu0 %v1304_v57  ;;  %2465 = vmatpush2.msra.mxu1 %v1306_v58  ;;  %v1053_v57 = vld [vmem:[%s8933_s24 + $0x1a8] sm:$0xff]  ;;  %v1055_v58 = vld [vmem:[%s8933_s24 + $0x1b8] sm:$0xff] }
 0x280   : > { %2395 = vmatprep.subr.mxu0 %v1289_v59  ;;  %2466 = vmatprep.subr.mxu1 %v1291_v60  ;;  %v1052_v59 = vld [vmem:[%s8933_s24 + $0x1a0] sm:$0xff]  ;;  %v1054_v60 = vld [vmem:[%s8933_s24 + $0x1b0] sm:$0xff] }
 0x281   : > { %2396 = vmatpush2.msra.mxu0 %v1288_v61  ;;  %2467 = vmatpush2.msra.mxu1 %v1290_v62  ;;  %v1037_v61 = vld [vmem:[%s8933_s24 + $0x128] sm:$0xff]  ;;  %v1039_v62 = vld [vmem:[%s8933_s24 + $0x138] sm:$0xff] }
 0x282   : > { %2397 = vmatprep.subr.mxu0 %v1273_v63  ;;  %2468 = vmatprep.subr.mxu1 %v1275_v0  ;;  %v1036_v63 = vld [vmem:[%s8933_s24 + $0x120] sm:$0xff]  ;;  %v1038_v0 = vld [vmem:[%s8933_s24 + $0x130] sm:$0xff] }
 0x283   : > { %2398 = vmatpush2.msra.mxu0 %v1272_v2  ;;  %2469 = vmatpush2.msra.mxu1 %v1274_v4  ;;  %v1021_v2 = vld [vmem:[%s8933_s24 + $0xa8] sm:$0xff]  ;;  %v1023_v4 = vld [vmem:[%s8933_s24 + $0xb8] sm:$0xff] }
 0x284   : > { %2399 = vmatprep.subr.mxu0 %v1257_v5  ;;  %2470 = vmatprep.subr.mxu1 %v1259_v6  ;;  %v1020_v5 = vld [vmem:[%s8933_s24 + $0xa0] sm:$0xff]  ;;  %v1022_v6 = vld [vmem:[%s8933_s24 + $0xb0] sm:$0xff] }
 0x285   : > { %2400 = vmatpush2.msra.mxu0 %v1256_v7  ;;  %2401 = vmatprep.mubr.f32.mxu0 %v9394_v8  ;;  %v1005_v7 = vld [vmem:[%s8933_s24 + $0x28] sm:$0xff] }
 0x286   : > { %2471 = vmatpush2.msra.mxu1 %v1258_v9  ;;  %2472 = vmatprep.mubr.f32.mxu1 %v9394_v8  ;;  %v1007_v9 = vld [vmem:[%s8933_s24 + $0x38] sm:$0xff] }
 0x287   : > { %2402 = vmatmul.mubr.f32.vlgmr.msra.gmra.mxu0 %v9397_v10  ;;  %2473 = vmatmul.mubr.f32.vlgmr.msra.gmra.mxu1 %v9397_v10 }
 0x288   : > { %2479 = vmatprep.subr.mxu0 %v1245_v11  ;;  %2550 = vmatprep.subr.mxu1 %v1247_v12  ;;  %v1004_v11 = vld [vmem:[%s8933_s24 + $0x20] sm:$0xff]  ;;  %v1006_v12 = vld [vmem:[%s8933_s24 + $0x30] sm:$0xff] }
 0x289   : > { %2480 = vmatpush1.msra.mxu0 %v1244_v13  ;;  %2551 = vmatpush1.msra.mxu1 %v1246_v14  ;;  %v1501_v13 = vld [vmem:[%s8933_s24 + $0xfa8] sm:$0xff]  ;;  %v1503_v14 = vld [vmem:[%s8933_s24 + $0xfb8] sm:$0xff] }
 0x28a   : > { %2481 = vmatprep.subr.mxu0 %v1229_v15  ;;  %2552 = vmatprep.subr.mxu1 %v1231_v16  ;;  %v1500_v15 = vld [vmem:[%s8933_s24 + $0xfa0] sm:$0xff]  ;;  %v1502_v16 = vld [vmem:[%s8933_s24 + $0xfb0] sm:$0xff] }
 0x28b   : > { %2482 = vmatpush1.msra.mxu0 %v1228_v17  ;;  %2553 = vmatpush1.msra.mxu1 %v1230_v18  ;;  %v1485_v17 = vld [vmem:[%s8933_s24 + $0xf28] sm:$0xff]  ;;  %v1487_v18 = vld [vmem:[%s8933_s24 + $0xf38] sm:$0xff] }
 0x28c   : > { %2483 = vmatprep.subr.mxu0 %v1213_v3  ;;  %2554 = vmatprep.subr.mxu1 %v1215_v19  ;;  %v1484_v3 = vld [vmem:[%s8933_s24 + $0xf20] sm:$0xff]  ;;  %v1486_v19 = vld [vmem:[%s8933_s24 + $0xf30] sm:$0xff] }
 0x28d   : > { %2484 = vmatpush1.msra.mxu0 %v1212_v20  ;;  %2555 = vmatpush1.msra.mxu1 %v1214_v1  ;;  %v1469_v20 = vld [vmem:[%s8933_s24 + $0xea8] sm:$0xff]  ;;  %v1471_v1 = vld [vmem:[%s8933_s24 + $0xeb8] sm:$0xff] }
 0x28e   : > { %2485 = vmatprep.subr.mxu0 %v1197_v21  ;;  %2556 = vmatprep.subr.mxu1 %v1199_v22  ;;  %v1468_v21 = vld [vmem:[%s8933_s24 + $0xea0] sm:$0xff]  ;;  %v1470_v22 = vld [vmem:[%s8933_s24 + $0xeb0] sm:$0xff] }
 0x28f   : > { %2486 = vmatpush1.msra.mxu0 %v1196_v23  ;;  %2557 = vmatpush1.msra.mxu1 %v1198_v24  ;;  %v1453_v23 = vld [vmem:[%s8933_s24 + $0xe28] sm:$0xff]  ;;  %v1455_v24 = vld [vmem:[%s8933_s24 + $0xe38] sm:$0xff] }
 0x290   : > { %2487 = vmatprep.subr.mxu0 %v1181_v25  ;;  %2558 = vmatprep.subr.mxu1 %v1183_v26  ;;  %v1452_v25 = vld [vmem:[%s8933_s24 + $0xe20] sm:$0xff]  ;;  %v1454_v26 = vld [vmem:[%s8933_s24 + $0xe30] sm:$0xff] }
 0x291   : > { %2488 = vmatpush1.msra.mxu0 %v1180_v27  ;;  %2559 = vmatpush1.msra.mxu1 %v1182_v28  ;;  %v1437_v27 = vld [vmem:[%s8933_s24 + $0xda8] sm:$0xff]  ;;  %v1439_v28 = vld [vmem:[%s8933_s24 + $0xdb8] sm:$0xff] }
 0x292   : > { %2489 = vmatprep.subr.mxu0 %v1165_v29  ;;  %2560 = vmatprep.subr.mxu1 %v1167_v30  ;;  %v1436_v29 = vld [vmem:[%s8933_s24 + $0xda0] sm:$0xff]  ;;  %v1438_v30 = vld [vmem:[%s8933_s24 + $0xdb0] sm:$0xff] }
 0x293   : > { %2490 = vmatpush1.msra.mxu0 %v1164_v31  ;;  %2561 = vmatpush1.msra.mxu1 %v1166_v32  ;;  %v1421_v31 = vld [vmem:[%s8933_s24 + $0xd28] sm:$0xff]  ;;  %v1423_v32 = vld [vmem:[%s8933_s24 + $0xd38] sm:$0xff] }
 0x294   : > { %2491 = vmatprep.subr.mxu0 %v1149_v33  ;;  %2562 = vmatprep.subr.mxu1 %v1151_v34  ;;  %v1420_v33 = vld [vmem:[%s8933_s24 + $0xd20] sm:$0xff]  ;;  %v1422_v34 = vld [vmem:[%s8933_s24 + $0xd30] sm:$0xff] }
 0x295   : > { %2492 = vmatpush1.msra.mxu0 %v1148_v35  ;;  %2563 = vmatpush1.msra.mxu1 %v1150_v36  ;;  %v1405_v35 = vld [vmem:[%s8933_s24 + $0xca8] sm:$0xff]  ;;  %v1407_v36 = vld [vmem:[%s8933_s24 + $0xcb8] sm:$0xff] }
 0x296   : > { %2493 = vmatprep.subr.mxu0 %v1133_v37  ;;  %2564 = vmatprep.subr.mxu1 %v1135_v38  ;;  %v1404_v37 = vld [vmem:[%s8933_s24 + $0xca0] sm:$0xff]  ;;  %v1406_v38 = vld [vmem:[%s8933_s24 + $0xcb0] sm:$0xff] }
 0x297   : > { %2494 = vmatpush1.msra.mxu0 %v1132_v39  ;;  %2565 = vmatpush1.msra.mxu1 %v1134_v40  ;;  %v1389_v39 = vld [vmem:[%s8933_s24 + $0xc28] sm:$0xff]  ;;  %v1391_v40 = vld [vmem:[%s8933_s24 + $0xc38] sm:$0xff] }
 0x298   : > { %2495 = vmatprep.subr.mxu0 %v1117_v41  ;;  %2566 = vmatprep.subr.mxu1 %v1119_v42  ;;  %v1388_v41 = vld [vmem:[%s8933_s24 + $0xc20] sm:$0xff]  ;;  %v1390_v42 = vld [vmem:[%s8933_s24 + $0xc30] sm:$0xff] }
 0x299   : > { %2496 = vmatpush1.msra.mxu0 %v1116_v43  ;;  %2567 = vmatpush1.msra.mxu1 %v1118_v44  ;;  %v1373_v43 = vld [vmem:[%s8933_s24 + $0xba8] sm:$0xff]  ;;  %v1375_v44 = vld [vmem:[%s8933_s24 + $0xbb8] sm:$0xff] }
 0x29a   : > { %2497 = vmatprep.subr.mxu0 %v1101_v45  ;;  %2568 = vmatprep.subr.mxu1 %v1103_v46  ;;  %v1372_v45 = vld [vmem:[%s8933_s24 + $0xba0] sm:$0xff]  ;;  %v1374_v46 = vld [vmem:[%s8933_s24 + $0xbb0] sm:$0xff] }
 0x29b   : > { %2498 = vmatpush1.msra.mxu0 %v1100_v47  ;;  %2569 = vmatpush1.msra.mxu1 %v1102_v48  ;;  %v1357_v47 = vld [vmem:[%s8933_s24 + $0xb28] sm:$0xff]  ;;  %v1359_v48 = vld [vmem:[%s8933_s24 + $0xb38] sm:$0xff] }
 0x29c   : > { %2499 = vmatprep.subr.mxu0 %v1085_v49  ;;  %2570 = vmatprep.subr.mxu1 %v1087_v50  ;;  %v1356_v49 = vld [vmem:[%s8933_s24 + $0xb20] sm:$0xff]  ;;  %v1358_v50 = vld [vmem:[%s8933_s24 + $0xb30] sm:$0xff] }
 0x29d   : > { %2500 = vmatpush1.msra.mxu0 %v1084_v51  ;;  %2571 = vmatpush1.msra.mxu1 %v1086_v52  ;;  %v1341_v51 = vld [vmem:[%s8933_s24 + $0xaa8] sm:$0xff]  ;;  %v1343_v52 = vld [vmem:[%s8933_s24 + $0xab8] sm:$0xff] }
 0x29e   : > { %2501 = vmatprep.subr.mxu0 %v1069_v53  ;;  %2572 = vmatprep.subr.mxu1 %v1071_v54  ;;  %v1340_v53 = vld [vmem:[%s8933_s24 + $0xaa0] sm:$0xff]  ;;  %v1342_v54 = vld [vmem:[%s8933_s24 + $0xab0] sm:$0xff] }
 0x29f   : > { %2502 = vmatpush1.msra.mxu0 %v1068_v55  ;;  %2573 = vmatpush1.msra.mxu1 %v1070_v56  ;;  %v1325_v55 = vld [vmem:[%s8933_s24 + $0xa28] sm:$0xff]  ;;  %v1327_v56 = vld [vmem:[%s8933_s24 + $0xa38] sm:$0xff] }
 0x2a0   : > { %2503 = vmatprep.subr.mxu0 %v1053_v57  ;;  %2574 = vmatprep.subr.mxu1 %v1055_v58  ;;  %v1324_v57 = vld [vmem:[%s8933_s24 + $0xa20] sm:$0xff]  ;;  %v1326_v58 = vld [vmem:[%s8933_s24 + $0xa30] sm:$0xff] }
 0x2a1   : > { %2504 = vmatpush1.msra.mxu0 %v1052_v59  ;;  %2575 = vmatpush1.msra.mxu1 %v1054_v60  ;;  %v1309_v59 = vld [vmem:[%s8933_s24 + $0x9a8] sm:$0xff]  ;;  %v1311_v60 = vld [vmem:[%s8933_s24 + $0x9b8] sm:$0xff] }
 0x2a2   : > { %2505 = vmatprep.subr.mxu0 %v1037_v61  ;;  %2576 = vmatprep.subr.mxu1 %v1039_v62  ;;  %v1308_v61 = vld [vmem:[%s8933_s24 + $0x9a0] sm:$0xff]  ;;  %v1310_v62 = vld [vmem:[%s8933_s24 + $0x9b0] sm:$0xff] }
 0x2a3   : > { %2506 = vmatpush1.msra.mxu0 %v1036_v63  ;;  %2577 = vmatpush1.msra.mxu1 %v1038_v0  ;;  %v1293_v63 = vld [vmem:[%s8933_s24 + $0x928] sm:$0xff]  ;;  %v1295_v0 = vld [vmem:[%s8933_s24 + $0x938] sm:$0xff] }
 0x2a4   : > { %2507 = vmatprep.subr.mxu0 %v1021_v2  ;;  %2578 = vmatprep.subr.mxu1 %v1023_v4  ;;  %v1292_v2 = vld [vmem:[%s8933_s24 + $0x920] sm:$0xff]  ;;  %v1294_v4 = vld [vmem:[%s8933_s24 + $0x930] sm:$0xff] }
 0x2a5   : > { %2508 = vmatpush1.msra.mxu0 %v1020_v5  ;;  %2579 = vmatpush1.msra.mxu1 %v1022_v6  ;;  %v1277_v5 = vld [vmem:[%s8933_s24 + $0x8a8] sm:$0xff]  ;;  %v1279_v6 = vld [vmem:[%s8933_s24 + $0x8b8] sm:$0xff] }
 0x2a6   : > { %2509 = vmatprep.subr.mxu0 %v1005_v7  ;;  %2580 = vmatprep.subr.mxu1 %v1007_v9  ;;  %v1276_v7 = vld [vmem:[%s8933_s24 + $0x8a0] sm:$0xff]  ;;  %v1278_v9 = vld [vmem:[%s8933_s24 + $0x8b0] sm:$0xff] }
 0x2a7   : > { %2510 = vmatpush1.msra.mxu0 %v1004_v11  ;;  %2581 = vmatpush1.msra.mxu1 %v1006_v12  ;;  %v1261_v11 = vld [vmem:[%s8933_s24 + $0x828] sm:$0xff]  ;;  %v1263_v12 = vld [vmem:[%s8933_s24 + $0x838] sm:$0xff] }
 0x2a8   : > { %2511 = vmatprep.subr.mxu0 %v1501_v13  ;;  %2582 = vmatprep.subr.mxu1 %v1503_v14  ;;  %v1260_v13 = vld [vmem:[%s8933_s24 + $0x820] sm:$0xff]  ;;  %v1262_v14 = vld [vmem:[%s8933_s24 + $0x830] sm:$0xff] }
 0x2a9   : > { %2512 = vmatpush2.msra.mxu0 %v1500_v15  ;;  %2583 = vmatpush2.msra.mxu1 %v1502_v16  ;;  %v1249_v15 = vld [vmem:[%s8933_s24 + $0x7c8] sm:$0xff]  ;;  %v1251_v16 = vld [vmem:[%s8933_s24 + $0x7d8] sm:$0xff] }
 0x2aa   : > { %2513 = vmatprep.subr.mxu0 %v1485_v17  ;;  %2584 = vmatprep.subr.mxu1 %v1487_v18  ;;  %v1248_v17 = vld [vmem:[%s8933_s24 + $0x7c0] sm:$0xff]  ;;  %v1250_v18 = vld [vmem:[%s8933_s24 + $0x7d0] sm:$0xff] }
 0x2ab   : > { %2514 = vmatpush2.msra.mxu0 %v1484_v3  ;;  %2585 = vmatpush2.msra.mxu1 %v1486_v19  ;;  %v1233_v3 = vld [vmem:[%s8933_s24 + $0x748] sm:$0xff]  ;;  %v1235_v19 = vld [vmem:[%s8933_s24 + $0x758] sm:$0xff] }
 0x2ac   : > { %2515 = vmatprep.subr.mxu0 %v1469_v20  ;;  %2586 = vmatprep.subr.mxu1 %v1471_v1  ;;  %v1232_v20 = vld [vmem:[%s8933_s24 + $0x740] sm:$0xff]  ;;  %v1234_v1 = vld [vmem:[%s8933_s24 + $0x750] sm:$0xff] }
 0x2ad   : > { %2516 = vmatpush2.msra.mxu0 %v1468_v21  ;;  %2587 = vmatpush2.msra.mxu1 %v1470_v22  ;;  %v1219_v21 = vld [vmem:[%s8933_s24 + $0x6d8] sm:$0xff]  ;;  %v1216_v22 = vld [vmem:[%s8933_s24 + $0x6c0] sm:$0xff] }
 0x2ae   : > { %2517 = vmatprep.subr.mxu0 %v1453_v23  ;;  %2588 = vmatprep.subr.mxu1 %v1455_v24  ;;  %v1201_v23 = vld [vmem:[%s8933_s24 + $0x648] sm:$0xff]  ;;  %v1203_v24 = vld [vmem:[%s8933_s24 + $0x658] sm:$0xff] }
 0x2af   : > { %2518 = vmatpush2.msra.mxu0 %v1452_v25  ;;  %2589 = vmatpush2.msra.mxu1 %v1454_v26  ;;  %v1200_v25 = vld [vmem:[%s8933_s24 + $0x640] sm:$0xff]  ;;  %v1202_v26 = vld [vmem:[%s8933_s24 + $0x650] sm:$0xff] }
 0x2b0   : > { %2519 = vmatprep.subr.mxu0 %v1437_v27  ;;  %2590 = vmatprep.subr.mxu1 %v1439_v28  ;;  %v1185_v27 = vld [vmem:[%s8933_s24 + $0x5c8] sm:$0xff]  ;;  %v1187_v28 = vld [vmem:[%s8933_s24 + $0x5d8] sm:$0xff] }
 0x2b1   : > { %2520 = vmatpush2.msra.mxu0 %v1436_v29  ;;  %2591 = vmatpush2.msra.mxu1 %v1438_v30  ;;  %v1184_v29 = vld [vmem:[%s8933_s24 + $0x5c0] sm:$0xff]  ;;  %v1186_v30 = vld [vmem:[%s8933_s24 + $0x5d0] sm:$0xff] }
 0x2b2   : > { %2521 = vmatprep.subr.mxu0 %v1421_v31  ;;  %2592 = vmatprep.subr.mxu1 %v1423_v32  ;;  %v1169_v31 = vld [vmem:[%s8933_s24 + $0x548] sm:$0xff]  ;;  %v1171_v32 = vld [vmem:[%s8933_s24 + $0x558] sm:$0xff] }
 0x2b3   : > { %2522 = vmatpush2.msra.mxu0 %v1420_v33  ;;  %2593 = vmatpush2.msra.mxu1 %v1422_v34  ;;  %v1168_v33 = vld [vmem:[%s8933_s24 + $0x540] sm:$0xff]  ;;  %v1170_v34 = vld [vmem:[%s8933_s24 + $0x550] sm:$0xff] }
 0x2b4   : > { %2523 = vmatprep.subr.mxu0 %v1405_v35  ;;  %2594 = vmatprep.subr.mxu1 %v1407_v36  ;;  %v1153_v35 = vld [vmem:[%s8933_s24 + $0x4c8] sm:$0xff]  ;;  %v1155_v36 = vld [vmem:[%s8933_s24 + $0x4d8] sm:$0xff] }
 0x2b5   : > { %2524 = vmatpush2.msra.mxu0 %v1404_v37  ;;  %2595 = vmatpush2.msra.mxu1 %v1406_v38  ;;  %v1152_v37 = vld [vmem:[%s8933_s24 + $0x4c0] sm:$0xff]  ;;  %v1154_v38 = vld [vmem:[%s8933_s24 + $0x4d0] sm:$0xff] }
 0x2b6   : > { %2525 = vmatprep.subr.mxu0 %v1389_v39  ;;  %2596 = vmatprep.subr.mxu1 %v1391_v40  ;;  %v1137_v39 = vld [vmem:[%s8933_s24 + $0x448] sm:$0xff]  ;;  %v1139_v40 = vld [vmem:[%s8933_s24 + $0x458] sm:$0xff] }
 0x2b7   : > { %2526 = vmatpush2.msra.mxu0 %v1388_v41  ;;  %2597 = vmatpush2.msra.mxu1 %v1390_v42  ;;  %v1136_v41 = vld [vmem:[%s8933_s24 + $0x440] sm:$0xff]  ;;  %v1138_v42 = vld [vmem:[%s8933_s24 + $0x450] sm:$0xff] }
 0x2b8   : > { %2527 = vmatprep.subr.mxu0 %v1373_v43  ;;  %2598 = vmatprep.subr.mxu1 %v1375_v44  ;;  %v1121_v43 = vld [vmem:[%s8933_s24 + $0x3c8] sm:$0xff]  ;;  %v1123_v44 = vld [vmem:[%s8933_s24 + $0x3d8] sm:$0xff] }
 0x2b9   : > { %2528 = vmatpush2.msra.mxu0 %v1372_v45  ;;  %2599 = vmatpush2.msra.mxu1 %v1374_v46  ;;  %v1120_v45 = vld [vmem:[%s8933_s24 + $0x3c0] sm:$0xff]  ;;  %v1122_v46 = vld [vmem:[%s8933_s24 + $0x3d0] sm:$0xff] }
 0x2ba   : > { %2529 = vmatprep.subr.mxu0 %v1357_v47  ;;  %2600 = vmatprep.subr.mxu1 %v1359_v48  ;;  %v1105_v47 = vld [vmem:[%s8933_s24 + $0x348] sm:$0xff]  ;;  %v1107_v48 = vld [vmem:[%s8933_s24 + $0x358] sm:$0xff] }
 0x2bb   : > { %2530 = vmatpush2.msra.mxu0 %v1356_v49  ;;  %2601 = vmatpush2.msra.mxu1 %v1358_v50  ;;  %v1104_v49 = vld [vmem:[%s8933_s24 + $0x340] sm:$0xff]  ;;  %v1106_v50 = vld [vmem:[%s8933_s24 + $0x350] sm:$0xff] }
 0x2bc   : > { %2531 = vmatprep.subr.mxu0 %v1341_v51  ;;  %2602 = vmatprep.subr.mxu1 %v1343_v52  ;;  %v1089_v51 = vld [vmem:[%s8933_s24 + $0x2c8] sm:$0xff]  ;;  %v1091_v52 = vld [vmem:[%s8933_s24 + $0x2d8] sm:$0xff] }
 0x2bd   : > { %2532 = vmatpush2.msra.mxu0 %v1340_v53  ;;  %2603 = vmatpush2.msra.mxu1 %v1342_v54  ;;  %v1088_v53 = vld [vmem:[%s8933_s24 + $0x2c0] sm:$0xff]  ;;  %v1090_v54 = vld [vmem:[%s8933_s24 + $0x2d0] sm:$0xff] }
 0x2be   : > { %2533 = vmatprep.subr.mxu0 %v1325_v55  ;;  %2604 = vmatprep.subr.mxu1 %v1327_v56  ;;  %v1073_v55 = vld [vmem:[%s8933_s24 + $0x248] sm:$0xff]  ;;  %v1075_v56 = vld [vmem:[%s8933_s24 + $0x258] sm:$0xff] }
 0x2bf   : > { %2534 = vmatpush2.msra.mxu0 %v1324_v57  ;;  %2605 = vmatpush2.msra.mxu1 %v1326_v58  ;;  %v1072_v57 = vld [vmem:[%s8933_s24 + $0x240] sm:$0xff]  ;;  %v1074_v58 = vld [vmem:[%s8933_s24 + $0x250] sm:$0xff] }
 0x2c0   : > { %2535 = vmatprep.subr.mxu0 %v1309_v59  ;;  %2606 = vmatprep.subr.mxu1 %v1311_v60  ;;  %v1057_v59 = vld [vmem:[%s8933_s24 + $0x1c8] sm:$0xff]  ;;  %v1059_v60 = vld [vmem:[%s8933_s24 + $0x1d8] sm:$0xff] }
 0x2c1   : > { %2536 = vmatpush2.msra.mxu0 %v1308_v61  ;;  %2607 = vmatpush2.msra.mxu1 %v1310_v62  ;;  %v1056_v61 = vld [vmem:[%s8933_s24 + $0x1c0] sm:$0xff]  ;;  %v1058_v62 = vld [vmem:[%s8933_s24 + $0x1d0] sm:$0xff] }
 0x2c2   : > { %2537 = vmatprep.subr.mxu0 %v1293_v63  ;;  %2608 = vmatprep.subr.mxu1 %v1295_v0  ;;  %v1041_v63 = vld [vmem:[%s8933_s24 + $0x148] sm:$0xff]  ;;  %v1043_v0 = vld [vmem:[%s8933_s24 + $0x158] sm:$0xff] }
 0x2c3   : > { %2538 = vmatpush2.msra.mxu0 %v1292_v2  ;;  %2609 = vmatpush2.msra.mxu1 %v1294_v4  ;;  %v1040_v2 = vld [vmem:[%s8933_s24 + $0x140] sm:$0xff]  ;;  %v1042_v4 = vld [vmem:[%s8933_s24 + $0x150] sm:$0xff] }
 0x2c4   : > { %2539 = vmatprep.subr.mxu0 %v1277_v5  ;;  %2610 = vmatprep.subr.mxu1 %v1279_v6  ;;  %v1025_v5 = vld [vmem:[%s8933_s24 + $0xc8] sm:$0xff]  ;;  %v1027_v6 = vld [vmem:[%s8933_s24 + $0xd8] sm:$0xff] }
 0x2c5   : > { %2540 = vmatpush2.msra.mxu0 %v1276_v7  ;;  %2611 = vmatpush2.msra.mxu1 %v1278_v9  ;;  %v1024_v7 = vld [vmem:[%s8933_s24 + $0xc0] sm:$0xff]  ;;  %v1026_v9 = vld [vmem:[%s8933_s24 + $0xd0] sm:$0xff] }
 0x2c6   : > { %2541 = vmatprep.subr.mxu0 %v1261_v11  ;;  %2612 = vmatprep.subr.mxu1 %v1263_v12  ;;  %v1009_v11 = vld [vmem:[%s8933_s24 + $0x48] sm:$0xff]  ;;  %v1011_v12 = vld [vmem:[%s8933_s24 + $0x58] sm:$0xff] }
 0x2c7   : > { %2542 = vmatpush2.msra.mxu0 %v1260_v13  ;;  %2543 = vmatprep.mubr.f32.mxu0 %v9394_v8  ;;  %v1008_v13 = vld [vmem:[%s8933_s24 + $0x40] sm:$0xff] }
 0x2c8   : > { %2613 = vmatpush2.msra.mxu1 %v1262_v14  ;;  %2614 = vmatprep.mubr.f32.mxu1 %v9394_v8  ;;  %v1217_v8 = vld [vmem:[%s8933_s24 + $0x6c8] sm:$0xff]  ;;  %v1010_v14 = vld [vmem:[%s8933_s24 + $0x50] sm:$0xff] }
 0x2c9   : > { %2544 = vmatmul.mubr.f32.vlgmr.msra.gmra.mxu0 %v9397_v10  ;;  %2615 = vmatmul.mubr.f32.vlgmr.msra.gmra.mxu1 %v9397_v10  ;;  %v1218_v10 = vld [vmem:[%s8933_s24 + $0x6d0] sm:$0xff] }
 0x2ca   : > { %2621 = vmatprep.subr.mxu0 %v1249_v15  ;;  %2692 = vmatprep.subr.mxu1 %v1251_v16  ;;  %v1505_v15 = vld [vmem:[%s8933_s24 + $0xfc8] sm:$0xff]  ;;  %v1507_v16 = vld [vmem:[%s8933_s24 + $0xfd8] sm:$0xff] }
 0x2cb   : > { %2622 = vmatpush1.msra.mxu0 %v1248_v17  ;;  %2693 = vmatpush1.msra.mxu1 %v1250_v18  ;;  %v1504_v17 = vld [vmem:[%s8933_s24 + $0xfc0] sm:$0xff]  ;;  %v1506_v18 = vld [vmem:[%s8933_s24 + $0xfd0] sm:$0xff] }
 0x2cc   : > { %2623 = vmatprep.subr.mxu0 %v1233_v3  ;;  %2694 = vmatprep.subr.mxu1 %v1235_v19  ;;  %v1489_v3 = vld [vmem:[%s8933_s24 + $0xf48] sm:$0xff]  ;;  %v1491_v19 = vld [vmem:[%s8933_s24 + $0xf58] sm:$0xff] }
 0x2cd   : > { %2624 = vmatpush1.msra.mxu0 %v1232_v20  ;;  %2695 = vmatpush1.msra.mxu1 %v1234_v1  ;;  %v1488_v20 = vld [vmem:[%s8933_s24 + $0xf40] sm:$0xff]  ;;  %v1490_v1 = vld [vmem:[%s8933_s24 + $0xf50] sm:$0xff] }
 0x2ce   : > { %2625 = vmatprep.subr.mxu0 %v1217_v8  ;;  %2696 = vmatprep.subr.mxu1 %v1219_v21  ;;  %v1473_v8 = vld [vmem:[%s8933_s24 + $0xec8] sm:$0xff]  ;;  %v1475_v21 = vld [vmem:[%s8933_s24 + $0xed8] sm:$0xff] }
 0x2cf   : > { %2626 = vmatpush1.msra.mxu0 %v1216_v22  ;;  %2697 = vmatpush1.msra.mxu1 %v1218_v10  ;;  %v1472_v22 = vld [vmem:[%s8933_s24 + $0xec0] sm:$0xff]  ;;  %v1474_v10 = vld [vmem:[%s8933_s24 + $0xed0] sm:$0xff] }
 0x2d0   : > { %2627 = vmatprep.subr.mxu0 %v1201_v23  ;;  %2698 = vmatprep.subr.mxu1 %v1203_v24  ;;  %v1457_v23 = vld [vmem:[%s8933_s24 + $0xe48] sm:$0xff]  ;;  %v1459_v24 = vld [vmem:[%s8933_s24 + $0xe58] sm:$0xff] }
 0x2d1   : > { %2628 = vmatpush1.msra.mxu0 %v1200_v25  ;;  %2699 = vmatpush1.msra.mxu1 %v1202_v26  ;;  %v1456_v25 = vld [vmem:[%s8933_s24 + $0xe40] sm:$0xff]  ;;  %v1458_v26 = vld [vmem:[%s8933_s24 + $0xe50] sm:$0xff] }
 0x2d2   : > { %2629 = vmatprep.subr.mxu0 %v1185_v27  ;;  %2700 = vmatprep.subr.mxu1 %v1187_v28  ;;  %v1441_v27 = vld [vmem:[%s8933_s24 + $0xdc8] sm:$0xff]  ;;  %v1443_v28 = vld [vmem:[%s8933_s24 + $0xdd8] sm:$0xff] }
 0x2d3   : > { %2630 = vmatpush1.msra.mxu0 %v1184_v29  ;;  %2701 = vmatpush1.msra.mxu1 %v1186_v30  ;;  %v1440_v29 = vld [vmem:[%s8933_s24 + $0xdc0] sm:$0xff]  ;;  %v1442_v30 = vld [vmem:[%s8933_s24 + $0xdd0] sm:$0xff] }
 0x2d4   : > { %2631 = vmatprep.subr.mxu0 %v1169_v31  ;;  %2702 = vmatprep.subr.mxu1 %v1171_v32  ;;  %v1425_v31 = vld [vmem:[%s8933_s24 + $0xd48] sm:$0xff]  ;;  %v1427_v32 = vld [vmem:[%s8933_s24 + $0xd58] sm:$0xff] }
 0x2d5   : > { %2632 = vmatpush1.msra.mxu0 %v1168_v33  ;;  %2703 = vmatpush1.msra.mxu1 %v1170_v34  ;;  %v1424_v33 = vld [vmem:[%s8933_s24 + $0xd40] sm:$0xff]  ;;  %v1426_v34 = vld [vmem:[%s8933_s24 + $0xd50] sm:$0xff] }
 0x2d6   : > { %2633 = vmatprep.subr.mxu0 %v1153_v35  ;;  %2704 = vmatprep.subr.mxu1 %v1155_v36  ;;  %v1409_v35 = vld [vmem:[%s8933_s24 + $0xcc8] sm:$0xff]  ;;  %v1411_v36 = vld [vmem:[%s8933_s24 + $0xcd8] sm:$0xff] }
 0x2d7   : > { %2634 = vmatpush1.msra.mxu0 %v1152_v37  ;;  %2705 = vmatpush1.msra.mxu1 %v1154_v38  ;;  %v1408_v37 = vld [vmem:[%s8933_s24 + $0xcc0] sm:$0xff]  ;;  %v1410_v38 = vld [vmem:[%s8933_s24 + $0xcd0] sm:$0xff] }
 0x2d8   : > { %2635 = vmatprep.subr.mxu0 %v1137_v39  ;;  %2706 = vmatprep.subr.mxu1 %v1139_v40  ;;  %v1393_v39 = vld [vmem:[%s8933_s24 + $0xc48] sm:$0xff]  ;;  %v1395_v40 = vld [vmem:[%s8933_s24 + $0xc58] sm:$0xff] }
 0x2d9   : > { %2636 = vmatpush1.msra.mxu0 %v1136_v41  ;;  %2707 = vmatpush1.msra.mxu1 %v1138_v42  ;;  %v1392_v41 = vld [vmem:[%s8933_s24 + $0xc40] sm:$0xff]  ;;  %v1394_v42 = vld [vmem:[%s8933_s24 + $0xc50] sm:$0xff] }
 0x2da   : > { %2637 = vmatprep.subr.mxu0 %v1121_v43  ;;  %2708 = vmatprep.subr.mxu1 %v1123_v44  ;;  %v1377_v43 = vld [vmem:[%s8933_s24 + $0xbc8] sm:$0xff]  ;;  %v1379_v44 = vld [vmem:[%s8933_s24 + $0xbd8] sm:$0xff] }
 0x2db   : > { %2638 = vmatpush1.msra.mxu0 %v1120_v45  ;;  %2709 = vmatpush1.msra.mxu1 %v1122_v46  ;;  %v1376_v45 = vld [vmem:[%s8933_s24 + $0xbc0] sm:$0xff]  ;;  %v1378_v46 = vld [vmem:[%s8933_s24 + $0xbd0] sm:$0xff] }
 0x2dc   : > { %2639 = vmatprep.subr.mxu0 %v1105_v47  ;;  %2710 = vmatprep.subr.mxu1 %v1107_v48  ;;  %v1361_v47 = vld [vmem:[%s8933_s24 + $0xb48] sm:$0xff]  ;;  %v1363_v48 = vld [vmem:[%s8933_s24 + $0xb58] sm:$0xff] }
 0x2dd   : > { %2640 = vmatpush1.msra.mxu0 %v1104_v49  ;;  %2711 = vmatpush1.msra.mxu1 %v1106_v50  ;;  %v1360_v49 = vld [vmem:[%s8933_s24 + $0xb40] sm:$0xff]  ;;  %v1362_v50 = vld [vmem:[%s8933_s24 + $0xb50] sm:$0xff] }
 0x2de   : > { %2641 = vmatprep.subr.mxu0 %v1089_v51  ;;  %2712 = vmatprep.subr.mxu1 %v1091_v52  ;;  %v1345_v51 = vld [vmem:[%s8933_s24 + $0xac8] sm:$0xff]  ;;  %v1347_v52 = vld [vmem:[%s8933_s24 + $0xad8] sm:$0xff] }
 0x2df   : > { %2642 = vmatpush1.msra.mxu0 %v1088_v53  ;;  %2713 = vmatpush1.msra.mxu1 %v1090_v54  ;;  %v1344_v53 = vld [vmem:[%s8933_s24 + $0xac0] sm:$0xff]  ;;  %v1346_v54 = vld [vmem:[%s8933_s24 + $0xad0] sm:$0xff] }
 0x2e0   : > { %2643 = vmatprep.subr.mxu0 %v1073_v55  ;;  %2714 = vmatprep.subr.mxu1 %v1075_v56  ;;  %v1329_v55 = vld [vmem:[%s8933_s24 + $0xa48] sm:$0xff]  ;;  %v1331_v56 = vld [vmem:[%s8933_s24 + $0xa58] sm:$0xff] }
 0x2e1   : > { %2644 = vmatpush1.msra.mxu0 %v1072_v57  ;;  %2715 = vmatpush1.msra.mxu1 %v1074_v58  ;;  %v1328_v57 = vld [vmem:[%s8933_s24 + $0xa40] sm:$0xff]  ;;  %v1330_v58 = vld [vmem:[%s8933_s24 + $0xa50] sm:$0xff] }
 0x2e2   : > { %2645 = vmatprep.subr.mxu0 %v1057_v59  ;;  %2716 = vmatprep.subr.mxu1 %v1059_v60  ;;  %v1313_v59 = vld [vmem:[%s8933_s24 + $0x9c8] sm:$0xff]  ;;  %v1315_v60 = vld [vmem:[%s8933_s24 + $0x9d8] sm:$0xff] }
 0x2e3   : > { %2646 = vmatpush1.msra.mxu0 %v1056_v61  ;;  %2717 = vmatpush1.msra.mxu1 %v1058_v62  ;;  %v1312_v61 = vld [vmem:[%s8933_s24 + $0x9c0] sm:$0xff]  ;;  %v1314_v62 = vld [vmem:[%s8933_s24 + $0x9d0] sm:$0xff] }
 0x2e4   : > { %2647 = vmatprep.subr.mxu0 %v1041_v63  ;;  %2718 = vmatprep.subr.mxu1 %v1043_v0  ;;  %v1297_v63 = vld [vmem:[%s8933_s24 + $0x948] sm:$0xff]  ;;  %v1299_v0 = vld [vmem:[%s8933_s24 + $0x958] sm:$0xff] }
 0x2e5   : > { %2648 = vmatpush1.msra.mxu0 %v1040_v2  ;;  %2719 = vmatpush1.msra.mxu1 %v1042_v4  ;;  %v1296_v2 = vld [vmem:[%s8933_s24 + $0x940] sm:$0xff]  ;;  %v1298_v4 = vld [vmem:[%s8933_s24 + $0x950] sm:$0xff] }
 0x2e6   : > { %2649 = vmatprep.subr.mxu0 %v1025_v5  ;;  %2720 = vmatprep.subr.mxu1 %v1027_v6  ;;  %v1281_v5 = vld [vmem:[%s8933_s24 + $0x8c8] sm:$0xff]  ;;  %v1283_v6 = vld [vmem:[%s8933_s24 + $0x8d8] sm:$0xff] }
 0x2e7   : > { %2650 = vmatpush1.msra.mxu0 %v1024_v7  ;;  %2721 = vmatpush1.msra.mxu1 %v1026_v9  ;;  %v1280_v7 = vld [vmem:[%s8933_s24 + $0x8c0] sm:$0xff]  ;;  %v1282_v9 = vld [vmem:[%s8933_s24 + $0x8d0] sm:$0xff] }
 0x2e8   : > { %2651 = vmatprep.subr.mxu0 %v1009_v11  ;;  %2722 = vmatprep.subr.mxu1 %v1011_v12  ;;  %v1265_v11 = vld [vmem:[%s8933_s24 + $0x848] sm:$0xff]  ;;  %v1267_v12 = vld [vmem:[%s8933_s24 + $0x858] sm:$0xff] }
 0x2e9   : > { %2652 = vmatpush1.msra.mxu0 %v1008_v13  ;;  %2723 = vmatpush1.msra.mxu1 %v1010_v14  ;;  %v1264_v13 = vld [vmem:[%s8933_s24 + $0x840] sm:$0xff]  ;;  %v1266_v14 = vld [vmem:[%s8933_s24 + $0x850] sm:$0xff] }
 0x2ea   : > { %2653 = vmatprep.subr.mxu0 %v1505_v15  ;;  %2724 = vmatprep.subr.mxu1 %v1507_v16  ;;  %v9663_v15 = vld [vmem:[#allocation5 + $0x8] sm:$0xff] }
 0x2eb   : > { %2654 = vmatpush2.msra.mxu0 %v1504_v17  ;;  %2725 = vmatpush2.msra.mxu1 %v1506_v18  ;;  %v1253_v16 = vld [vmem:[%s8933_s24 + $0x7e8] sm:$0xff]  ;;  %v1255_v17 = vld [vmem:[%s8933_s24 + $0x7f8] sm:$0xff]  ;;  %v1252_v18 = vld [vmem:[%s8933_s24 + $0x7e0] sm:$0xff] }
 0x2ec   : > { %2655 = vmatprep.subr.mxu0 %v1489_v3  ;;  %2726 = vmatprep.subr.mxu1 %v1491_v19  ;;  %v1254_v3 = vld [vmem:[%s8933_s24 + $0x7f0] sm:$0xff]  ;;  %v9671_v19 = vld [vmem:[#allocation5] sm:$0xff] }
 0x2ed   : > { %2656 = vmatpush2.msra.mxu0 %v1488_v20  ;;  %2727 = vmatpush2.msra.mxu1 %v1490_v1  ;;  %v1237_v20 = vld [vmem:[%s8933_s24 + $0x768] sm:$0xff]  ;;  %v1239_v1 = vld [vmem:[%s8933_s24 + $0x778] sm:$0xff] }
 0x2ee   : > { %2657 = vmatprep.subr.mxu0 %v1473_v8  ;;  %2728 = vmatprep.subr.mxu1 %v1475_v21  ;;  %v1236_v8 = vld [vmem:[%s8933_s24 + $0x760] sm:$0xff]  ;;  %v1238_v21 = vld [vmem:[%s8933_s24 + $0x770] sm:$0xff] }
 0x2ef   : > { %2658 = vmatpush2.msra.mxu0 %v1472_v22  ;;  %2729 = vmatpush2.msra.mxu1 %v1474_v10  ;;  %v1221_v22 = vld [vmem:[%s8933_s24 + $0x6e8] sm:$0xff]  ;;  %v1223_v10 = vld [vmem:[%s8933_s24 + $0x6f8] sm:$0xff] }
 0x2f0   : > { %2659 = vmatprep.subr.mxu0 %v1457_v23  ;;  %2730 = vmatprep.subr.mxu1 %v1459_v24  ;;  %v1220_v23 = vld [vmem:[%s8933_s24 + $0x6e0] sm:$0xff]  ;;  %v1222_v24 = vld [vmem:[%s8933_s24 + $0x6f0] sm:$0xff] }
 0x2f1   : > { %2660 = vmatpush2.msra.mxu0 %v1456_v25  ;;  %2731 = vmatpush2.msra.mxu1 %v1458_v26  ;;  %v1205_v25 = vld [vmem:[%s8933_s24 + $0x668] sm:$0xff]  ;;  %v1207_v26 = vld [vmem:[%s8933_s24 + $0x678] sm:$0xff] }
 0x2f2   : > { %2661 = vmatprep.subr.mxu0 %v1441_v27  ;;  %2732 = vmatprep.subr.mxu1 %v1443_v28  ;;  %v1204_v27 = vld [vmem:[%s8933_s24 + $0x660] sm:$0xff]  ;;  %v1206_v28 = vld [vmem:[%s8933_s24 + $0x670] sm:$0xff] }
 0x2f3   : > { %2662 = vmatpush2.msra.mxu0 %v1440_v29  ;;  %2733 = vmatpush2.msra.mxu1 %v1442_v30  ;;  %v1189_v29 = vld [vmem:[%s8933_s24 + $0x5e8] sm:$0xff]  ;;  %v1191_v30 = vld [vmem:[%s8933_s24 + $0x5f8] sm:$0xff] }
 0x2f4   : > { %2663 = vmatprep.subr.mxu0 %v1425_v31  ;;  %2734 = vmatprep.subr.mxu1 %v1427_v32  ;;  %v1188_v31 = vld [vmem:[%s8933_s24 + $0x5e0] sm:$0xff]  ;;  %v1190_v32 = vld [vmem:[%s8933_s24 + $0x5f0] sm:$0xff] }
 0x2f5   : > { %2664 = vmatpush2.msra.mxu0 %v1424_v33  ;;  %2735 = vmatpush2.msra.mxu1 %v1426_v34  ;;  %v1173_v33 = vld [vmem:[%s8933_s24 + $0x568] sm:$0xff]  ;;  %v1175_v34 = vld [vmem:[%s8933_s24 + $0x578] sm:$0xff] }
 0x2f6   : > { %2665 = vmatprep.subr.mxu0 %v1409_v35  ;;  %2736 = vmatprep.subr.mxu1 %v1411_v36  ;;  %v1172_v35 = vld [vmem:[%s8933_s24 + $0x560] sm:$0xff]  ;;  %v1174_v36 = vld [vmem:[%s8933_s24 + $0x570] sm:$0xff] }
 0x2f7   : > { %2666 = vmatpush2.msra.mxu0 %v1408_v37  ;;  %2737 = vmatpush2.msra.mxu1 %v1410_v38  ;;  %v1157_v37 = vld [vmem:[%s8933_s24 + $0x4e8] sm:$0xff]  ;;  %v1159_v38 = vld [vmem:[%s8933_s24 + $0x4f8] sm:$0xff] }
 0x2f8   : > { %2667 = vmatprep.subr.mxu0 %v1393_v39  ;;  %2738 = vmatprep.subr.mxu1 %v1395_v40  ;;  %v1156_v39 = vld [vmem:[%s8933_s24 + $0x4e0] sm:$0xff]  ;;  %v1158_v40 = vld [vmem:[%s8933_s24 + $0x4f0] sm:$0xff] }
 0x2f9   : > { %2668 = vmatpush2.msra.mxu0 %v1392_v41  ;;  %2739 = vmatpush2.msra.mxu1 %v1394_v42  ;;  %v1141_v41 = vld [vmem:[%s8933_s24 + $0x468] sm:$0xff]  ;;  %v1143_v42 = vld [vmem:[%s8933_s24 + $0x478] sm:$0xff] }
 0x2fa   : > { %2669 = vmatprep.subr.mxu0 %v1377_v43  ;;  %2740 = vmatprep.subr.mxu1 %v1379_v44  ;;  %v1140_v43 = vld [vmem:[%s8933_s24 + $0x460] sm:$0xff]  ;;  %v1142_v44 = vld [vmem:[%s8933_s24 + $0x470] sm:$0xff] }
 0x2fb   : > { %2670 = vmatpush2.msra.mxu0 %v1376_v45  ;;  %2741 = vmatpush2.msra.mxu1 %v1378_v46  ;;  %v1125_v45 = vld [vmem:[%s8933_s24 + $0x3e8] sm:$0xff]  ;;  %v1127_v46 = vld [vmem:[%s8933_s24 + $0x3f8] sm:$0xff] }
 0x2fc   : > { %2671 = vmatprep.subr.mxu0 %v1361_v47  ;;  %2742 = vmatprep.subr.mxu1 %v1363_v48  ;;  %v1124_v47 = vld [vmem:[%s8933_s24 + $0x3e0] sm:$0xff]  ;;  %v1126_v48 = vld [vmem:[%s8933_s24 + $0x3f0] sm:$0xff] }
 0x2fd   : > { %2672 = vmatpush2.msra.mxu0 %v1360_v49  ;;  %2743 = vmatpush2.msra.mxu1 %v1362_v50  ;;  %v1109_v49 = vld [vmem:[%s8933_s24 + $0x368] sm:$0xff]  ;;  %v1111_v50 = vld [vmem:[%s8933_s24 + $0x378] sm:$0xff] }
 0x2fe   : > { %2673 = vmatprep.subr.mxu0 %v1345_v51  ;;  %2744 = vmatprep.subr.mxu1 %v1347_v52  ;;  %v1108_v51 = vld [vmem:[%s8933_s24 + $0x360] sm:$0xff]  ;;  %v1110_v52 = vld [vmem:[%s8933_s24 + $0x370] sm:$0xff] }
 0x2ff   : > { %2674 = vmatpush2.msra.mxu0 %v1344_v53  ;;  %2745 = vmatpush2.msra.mxu1 %v1346_v54  ;;  %v1093_v53 = vld [vmem:[%s8933_s24 + $0x2e8] sm:$0xff]  ;;  %v1095_v54 = vld [vmem:[%s8933_s24 + $0x2f8] sm:$0xff] }
 0x300   : > { %2675 = vmatprep.subr.mxu0 %v1329_v55  ;;  %2746 = vmatprep.subr.mxu1 %v1331_v56  ;;  %v1092_v55 = vld [vmem:[%s8933_s24 + $0x2e0] sm:$0xff]  ;;  %v1094_v56 = vld [vmem:[%s8933_s24 + $0x2f0] sm:$0xff] }
 0x301   : > { %2676 = vmatpush2.msra.mxu0 %v1328_v57  ;;  %2747 = vmatpush2.msra.mxu1 %v1330_v58  ;;  %v1077_v57 = vld [vmem:[%s8933_s24 + $0x268] sm:$0xff]  ;;  %v1079_v58 = vld [vmem:[%s8933_s24 + $0x278] sm:$0xff] }
 0x302   : > { %2677 = vmatprep.subr.mxu0 %v1313_v59  ;;  %2748 = vmatprep.subr.mxu1 %v1315_v60  ;;  %v1076_v59 = vld [vmem:[%s8933_s24 + $0x260] sm:$0xff]  ;;  %v1078_v60 = vld [vmem:[%s8933_s24 + $0x270] sm:$0xff] }
 0x303   : > { %2678 = vmatpush2.msra.mxu0 %v1312_v61  ;;  %2749 = vmatpush2.msra.mxu1 %v1314_v62  ;;  %v1061_v61 = vld [vmem:[%s8933_s24 + $0x1e8] sm:$0xff]  ;;  %v1063_v62 = vld [vmem:[%s8933_s24 + $0x1f8] sm:$0xff] }
 0x304   : > { %2679 = vmatprep.subr.mxu0 %v1297_v63  ;;  %2750 = vmatprep.subr.mxu1 %v1299_v0  ;;  %v1060_v63 = vld [vmem:[%s8933_s24 + $0x1e0] sm:$0xff]  ;;  %v1062_v0 = vld [vmem:[%s8933_s24 + $0x1f0] sm:$0xff] }
 0x305   : > { %2680 = vmatpush2.msra.mxu0 %v1296_v2  ;;  %2751 = vmatpush2.msra.mxu1 %v1298_v4  ;;  %v1045_v2 = vld [vmem:[%s8933_s24 + $0x168] sm:$0xff]  ;;  %v1047_v4 = vld [vmem:[%s8933_s24 + $0x178] sm:$0xff] }
 0x306   : > { %2681 = vmatprep.subr.mxu0 %v1281_v5  ;;  %2752 = vmatprep.subr.mxu1 %v1283_v6  ;;  %v1044_v5 = vld [vmem:[%s8933_s24 + $0x160] sm:$0xff]  ;;  %v1046_v6 = vld [vmem:[%s8933_s24 + $0x170] sm:$0xff] }
 0x307   : > { %2682 = vmatpush2.msra.mxu0 %v1280_v7  ;;  %2753 = vmatpush2.msra.mxu1 %v1282_v9  ;;  %v1029_v7 = vld [vmem:[%s8933_s24 + $0xe8] sm:$0xff]  ;;  %v1031_v9 = vld [vmem:[%s8933_s24 + $0xf8] sm:$0xff] }
 0x308   : > { %2683 = vmatprep.subr.mxu0 %v1265_v11  ;;  %2754 = vmatprep.subr.mxu1 %v1267_v12  ;;  %v1028_v11 = vld [vmem:[%s8933_s24 + $0xe0] sm:$0xff]  ;;  %v1030_v12 = vld [vmem:[%s8933_s24 + $0xf0] sm:$0xff] }
 0x309   : > { %2684 = vmatpush2.msra.mxu0 %v1264_v13  ;;  %2685 = vmatprep.mubr.f32.mxu0 %v9663_v15  ;;  %v1013_v13 = vld [vmem:[%s8933_s24 + $0x68] sm:$0xff] }
 0x30a   : > { %2755 = vmatpush2.msra.mxu1 %v1266_v14  ;;  %2756 = vmatprep.mubr.f32.mxu1 %v9663_v15  ;;  %v1015_v14 = vld [vmem:[%s8933_s24 + $0x78] sm:$0xff] }
 0x30b   : > { %2686 = vmatmul.mubr.f32.vlgmr.msra.gmra.mxu0 %v9671_v19  ;;  %2757 = vmatmul.mubr.f32.vlgmr.msra.gmra.mxu1 %v9671_v19 }
 0x30c   : > { %2763 = vmatprep.subr.mxu0 %v1253_v16  ;;  %2834 = vmatprep.subr.mxu1 %v1255_v17  ;;  %v1012_v16 = vld [vmem:[%s8933_s24 + $0x60] sm:$0xff]  ;;  %v1014_v17 = vld [vmem:[%s8933_s24 + $0x70] sm:$0xff] }
 0x30d   : > { %2764 = vmatpush1.msra.mxu0 %v1252_v18  ;;  %2835 = vmatpush1.msra.mxu1 %v1254_v3  ;;  %v1509_v18 = vld [vmem:[%s8933_s24 + $0xfe8] sm:$0xff]  ;;  %v1511_v3 = vld [vmem:[%s8933_s24 + $0xff8] sm:$0xff] }
 0x30e   : > { %2765 = vmatprep.subr.mxu0 %v1237_v20  ;;  %2836 = vmatprep.subr.mxu1 %v1239_v1  ;;  %v1508_v20 = vld [vmem:[%s8933_s24 + $0xfe0] sm:$0xff]  ;;  %v1510_v1 = vld [vmem:[%s8933_s24 + $0xff0] sm:$0xff] }
 0x30f   : > { %2766 = vmatpush1.msra.mxu0 %v1236_v8  ;;  %2837 = vmatpush1.msra.mxu1 %v1238_v21  ;;  %v1493_v8 = vld [vmem:[%s8933_s24 + $0xf68] sm:$0xff]  ;;  %v1495_v21 = vld [vmem:[%s8933_s24 + $0xf78] sm:$0xff] }
 0x310   : > { %2767 = vmatprep.subr.mxu0 %v1221_v22  ;;  %2838 = vmatprep.subr.mxu1 %v1223_v10  ;;  %v1492_v22 = vld [vmem:[%s8933_s24 + $0xf60] sm:$0xff]  ;;  %v1494_v10 = vld [vmem:[%s8933_s24 + $0xf70] sm:$0xff] }
 0x311   : > { %2768 = vmatpush1.msra.mxu0 %v1220_v23  ;;  %2839 = vmatpush1.msra.mxu1 %v1222_v24  ;;  %v1477_v23 = vld [vmem:[%s8933_s24 + $0xee8] sm:$0xff]  ;;  %v1479_v24 = vld [vmem:[%s8933_s24 + $0xef8] sm:$0xff] }
 0x312   : > { %2769 = vmatprep.subr.mxu0 %v1205_v25  ;;  %2840 = vmatprep.subr.mxu1 %v1207_v26  ;;  %v1476_v25 = vld [vmem:[%s8933_s24 + $0xee0] sm:$0xff]  ;;  %v1478_v26 = vld [vmem:[%s8933_s24 + $0xef0] sm:$0xff] }
 0x313   : > { %2770 = vmatpush1.msra.mxu0 %v1204_v27  ;;  %2841 = vmatpush1.msra.mxu1 %v1206_v28  ;;  %v9747_v27 = vpop.f32.mrf.mxu0  ;;  %v9749_v28 = vpop.f32.mrf.mxu1 }
 0x314   : > { %2771 = vmatprep.subr.mxu0 %v1189_v29  ;;  %2842 = vmatprep.subr.mxu1 %v1191_v30  ;;  %v1461_v29 = vld [vmem:[%s8933_s24 + $0xe68] sm:$0xff]  ;;  %v1463_v30 = vld [vmem:[%s8933_s24 + $0xe78] sm:$0xff] }
 0x315   : > { %2772 = vmatpush1.msra.mxu0 %v1188_v31  ;;  %2843 = vmatpush1.msra.mxu1 %v1190_v32  ;;  %v1460_v31 = vld [vmem:[%s8933_s24 + $0xe60] sm:$0xff]  ;;  %v1462_v32 = vld [vmem:[%s8933_s24 + $0xe70] sm:$0xff] }
 0x316   : > { %2773 = vmatprep.subr.mxu0 %v1173_v33  ;;  %2844 = vmatprep.subr.mxu1 %v1175_v34  ;;  %v1445_v33 = vld [vmem:[%s8933_s24 + $0xde8] sm:$0xff]  ;;  %v1447_v34 = vld [vmem:[%s8933_s24 + $0xdf8] sm:$0xff] }
 0x317   : > { %2774 = vmatpush1.msra.mxu0 %v1172_v35  ;;  %2845 = vmatpush1.msra.mxu1 %v1174_v36  ;;  %v1444_v35 = vld [vmem:[%s8933_s24 + $0xde0] sm:$0xff]  ;;  %v1446_v36 = vld [vmem:[%s8933_s24 + $0xdf0] sm:$0xff] }
 0x318   : > { %2775 = vmatprep.subr.mxu0 %v1157_v37  ;;  %2846 = vmatprep.subr.mxu1 %v1159_v38  ;;  %v9759_v37 = vpop.f32.mrf.mxu0  ;;  %v9761_v38 = vpop.f32.mrf.mxu1 }
 0x319   : > { %2776 = vmatpush1.msra.mxu0 %v1156_v39  ;;  %2847 = vmatpush1.msra.mxu1 %v1158_v40  ;;  %v1429_v39 = vld [vmem:[%s8933_s24 + $0xd68] sm:$0xff]  ;;  %v1431_v40 = vld [vmem:[%s8933_s24 + $0xd78] sm:$0xff] }
 0x31a   : > { %2777 = vmatprep.subr.mxu0 %v1141_v41  ;;  %2848 = vmatprep.subr.mxu1 %v1143_v42  ;;  %v1428_v41 = vld [vmem:[%s8933_s24 + $0xd60] sm:$0xff]  ;;  %v1430_v42 = vld [vmem:[%s8933_s24 + $0xd70] sm:$0xff] }
 0x31b   : > { %2778 = vmatpush1.msra.mxu0 %v1140_v43  ;;  %2849 = vmatpush1.msra.mxu1 %v1142_v44  ;;  %v9767_v43 = vpop.f32.mrf.mxu0  ;;  %v9769_v44 = vpop.f32.mrf.mxu1 }
 0x31c   : > { %2779 = vmatprep.subr.mxu0 %v1125_v45  ;;  %2850 = vmatprep.subr.mxu1 %v1127_v46  ;;  %v1413_v45 = vld [vmem:[%s8933_s24 + $0xce8] sm:$0xff]  ;;  %v1415_v46 = vld [vmem:[%s8933_s24 + $0xcf8] sm:$0xff] }
 0x31d   : > { %2780 = vmatpush1.msra.mxu0 %v1124_v47  ;;  %2851 = vmatpush1.msra.mxu1 %v1126_v48  ;;  %v1412_v47 = vld [vmem:[%s8933_s24 + $0xce0] sm:$0xff]  ;;  %v1414_v48 = vld [vmem:[%s8933_s24 + $0xcf0] sm:$0xff] }
 0x31e   : > { %2781 = vmatprep.subr.mxu0 %v1109_v49  ;;  %2852 = vmatprep.subr.mxu1 %v1111_v50  ;;  %v1397_v49 = vld [vmem:[%s8933_s24 + $0xc68] sm:$0xff]  ;;  %v1399_v50 = vld [vmem:[%s8933_s24 + $0xc78] sm:$0xff] }
 0x31f   : > { %2782 = vmatpush1.msra.mxu0 %v1108_v51  ;;  %2853 = vmatpush1.msra.mxu1 %v1110_v52  ;;  %v1396_v51 = vld [vmem:[%s8933_s24 + $0xc60] sm:$0xff]  ;;  %v1398_v52 = vld [vmem:[%s8933_s24 + $0xc70] sm:$0xff] }
 0x320   : > { %2783 = vmatprep.subr.mxu0 %v1093_v53  ;;  %2854 = vmatprep.subr.mxu1 %v1095_v54  ;;  %v9779_v53 = vpop.f32.mrf.mxu0  ;;  %v9781_v54 = vpop.f32.mrf.mxu1 }
 0x321   : > { %2784 = vmatpush1.msra.mxu0 %v1092_v55  ;;  %2855 = vmatpush1.msra.mxu1 %v1094_v56  ;;  %v1381_v55 = vld [vmem:[%s8933_s24 + $0xbe8] sm:$0xff]  ;;  %v1383_v56 = vld [vmem:[%s8933_s24 + $0xbf8] sm:$0xff] }
 0x322   : > { %2785 = vmatprep.subr.mxu0 %v1077_v57  ;;  %2856 = vmatprep.subr.mxu1 %v1079_v58  ;;  %v1380_v57 = vld [vmem:[%s8933_s24 + $0xbe0] sm:$0xff]  ;;  %v1382_v58 = vld [vmem:[%s8933_s24 + $0xbf0] sm:$0xff] }
 0x323   : > { %2786 = vmatpush1.msra.mxu0 %v1076_v59  ;;  %2857 = vmatpush1.msra.mxu1 %v1078_v60  ;;  %v9787_v59 = vpop.f32.mrf.mxu0  ;;  %v9789_v60 = vpop.f32.mrf.mxu1 }
 0x324   : > { %2787 = vmatprep.subr.mxu0 %v1061_v61  ;;  %2858 = vmatprep.subr.mxu1 %v1063_v62  ;;  %v1365_v61 = vld [vmem:[%s8933_s24 + $0xb68] sm:$0xff]  ;;  %v1367_v62 = vld [vmem:[%s8933_s24 + $0xb78] sm:$0xff] }
 0x325   : > { %2788 = vmatpush1.msra.mxu0 %v1060_v63  ;;  %2859 = vmatpush1.msra.mxu1 %v1062_v0  ;;  %v1364_v63 = vld [vmem:[%s8933_s24 + $0xb60] sm:$0xff]  ;;  %v1366_v0 = vld [vmem:[%s8933_s24 + $0xb70] sm:$0xff] }
 0x326   : > { %2789 = vmatprep.subr.mxu0 %v1045_v2  ;;  %2860 = vmatprep.subr.mxu1 %v1047_v4  ;;  %v1349_v2 = vld [vmem:[%s8933_s24 + $0xae8] sm:$0xff]  ;;  %v1351_v4 = vld [vmem:[%s8933_s24 + $0xaf8] sm:$0xff] }
 0x327   : > { %2790 = vmatpush1.msra.mxu0 %v1044_v5  ;;  %2861 = vmatpush1.msra.mxu1 %v1046_v6  ;;  %v1348_v5 = vld [vmem:[%s8933_s24 + $0xae0] sm:$0xff]  ;;  %v1350_v6 = vld [vmem:[%s8933_s24 + $0xaf0] sm:$0xff] }
 0x328   : > { %2791 = vmatprep.subr.mxu0 %v1029_v7  ;;  %2862 = vmatprep.subr.mxu1 %v1031_v9  ;;  %v9799_v7 = vpop.f32.mrf.mxu0  ;;  %v9801_v9 = vpop.f32.mrf.mxu1 }
 0x329   : > { %2792 = vmatpush1.msra.mxu0 %v1028_v11  ;;  %2863 = vmatpush1.msra.mxu1 %v1030_v12  ;;  %v1333_v11 = vld [vmem:[%s8933_s24 + $0xa68] sm:$0xff]  ;;  %v1335_v12 = vld [vmem:[%s8933_s24 + $0xa78] sm:$0xff] }
 0x32a   : > { %2793 = vmatprep.subr.mxu0 %v1013_v13  ;;  %2864 = vmatprep.subr.mxu1 %v1015_v14  ;;  %v2909_v13 = vlaneseq  ;;  %v1332_v14 = vld [vmem:[%s8933_s24 + $0xa60] sm:$0xff] }
 0x32b   : > { %2794 = vmatpush1.msra.mxu0 %v1012_v16  ;;  %2865 = vmatpush1.msra.mxu1 %v1014_v17  ;;  %v1334_v16 = vld [vmem:[%s8933_s24 + $0xa70] sm:$0xff]  ;;  %v9807_v17 = vpop.f32.mrf.mxu0 }
 0x32c   : > { %2795 = vmatprep.subr.mxu0 %v1509_v18  ;;  %2866 = vmatprep.subr.mxu1 %v1511_v3  ;;  %v9809_v18 = vpop.f32.mrf.mxu1  ;;  %v1317_v3 = vld [vmem:[%s8933_s24 + $0x9e8] sm:$0xff] }
 0x32d   : > { %2796 = vmatpush2.msra.mxu0 %v1508_v20  ;;  %2867 = vmatpush2.msra.mxu1 %v1510_v1  ;;  %v1319_v20 = vld [vmem:[%s8933_s24 + $0x9f8] sm:$0xff]  ;;  %v1316_v1 = vld [vmem:[%s8933_s24 + $0x9e0] sm:$0xff] }
 0x32e   : > { %2797 = vmatprep.subr.mxu0 %v1493_v8  ;;  %2868 = vmatprep.subr.mxu1 %v1495_v21  ;;  %v1318_v8 = vld [vmem:[%s8933_s24 + $0x9f0] sm:$0xff]  ;;  %v1301_v21 = vld [vmem:[%s8933_s24 + $0x968] sm:$0xff] }
 0x32f   : > { %2798 = vmatpush2.msra.mxu0 %v1492_v22  ;;  %2869 = vmatpush2.msra.mxu1 %v1494_v10  ;;  %v1303_v22 = vld [vmem:[%s8933_s24 + $0x978] sm:$0xff]  ;;  %v9817_v10 = vshrl.u32 %v2909_v13, 7 }
 0x330   : > { %2799 = vmatprep.subr.mxu0 %v1477_v23  ;;  %2870 = vmatprep.subr.mxu1 %v1479_v24  ;;  %v1300_v23 = vld [vmem:[%s8933_s24 + $0x960] sm:$0xff]  ;;  %v1302_v24 = vld [vmem:[%s8933_s24 + $0x970] sm:$0xff] }
 0x331   : > { %2800 = vmatpush2.msra.mxu0 %v1476_v25  ;;  %2871 = vmatpush2.msra.mxu1 %v1478_v26  ;;  %v9821_v25 = vpop.f32.mrf.mxu0  ;;  %v9823_v26 = vpop.f32.mrf.mxu1 }
 0x332   : > { %2801 = vmatprep.subr.mxu0 %v1461_v29  ;;  %2872 = vmatprep.subr.mxu1 %v1463_v30  ;;  %v1285_v29 = vld [vmem:[%s8933_s24 + $0x8e8] sm:$0xff]  ;;  %v1287_v30 = vld [vmem:[%s8933_s24 + $0x8f8] sm:$0xff] }
 0x333   : > { %2802 = vmatpush2.msra.mxu0 %v1460_v31  ;;  %2873 = vmatpush2.msra.mxu1 %v1462_v32  ;;  %v2915_v31 = vsub.s32 1, %v9817_v10  ;;  %v1284_v32 = vld [vmem:[%s8933_s24 + $0x8e0] sm:$0xff] }
 0x334   : > { %2803 = vmatprep.subr.mxu0 %v1445_v33  ;;  %2874 = vmatprep.subr.mxu1 %v1447_v34  ;;  %v1286_v33 = vld [vmem:[%s8933_s24 + $0x8f0] sm:$0xff]  ;;  %v2923_v34 = vsub.s32 3, %v9817_v10 }
 0x335   : > { %2804 = vmatpush2.msra.mxu0 %v1444_v35  ;;  %2875 = vmatpush2.msra.mxu1 %v1446_v36  ;;  %v1269_v35 = vld [vmem:[%s8933_s24 + $0x868] sm:$0xff]  ;;  %v1271_v36 = vld [vmem:[%s8933_s24 + $0x878] sm:$0xff] }
 0x336   : > { %2805 = vmatprep.subr.mxu0 %v1429_v39  ;;  %2876 = vmatprep.subr.mxu1 %v1431_v40 }
 0x337   : > { %2806 = vmatpush2.msra.mxu0 %v1428_v41  ;;  %2877 = vmatpush2.msra.mxu1 %v1430_v42  ;;  %v1268_v41 = vld [vmem:[%s8933_s24 + $0x860] sm:$0xff] }
 0x338   : > { %2807 = vmatprep.subr.mxu0 %v1413_v45  ;;  %2878 = vmatprep.subr.mxu1 %v1415_v46  ;;  %v9839_v42 = vld [vmem:[%s8941_s0] sm:$0xff] }
 0x339   : > { %2808 = vmatpush2.msra.mxu0 %v1412_v47  ;;  %2879 = vmatpush2.msra.mxu1 %v1414_v48  ;;  %v1270_v45 = vld [vmem:[%s8933_s24 + $0x870] sm:$0xff]  ;;  %v2916_v47 = vrot.slane %v9839_v42, %v2915_v31 }
 0x33a   : > { %2809 = vmatprep.subr.mxu0 %v1397_v49  ;;  %2880 = vmatprep.subr.mxu1 %v1399_v50  ;;  %v2924_v50 = vrot.slane %v9839_v42, %v2923_v34 }
 0x33b   : > { %2810 = vmatpush2.msra.mxu0 %v1396_v51  ;;  %2881 = vmatpush2.msra.mxu1 %v1398_v52  ;;  %v3086_v51 = vld [vmem:[%s8947_s21 + $0xf8] sm:$0xff] }
 0x33c   : > { %2811 = vmatprep.subr.mxu0 %v1381_v55  ;;  %2882 = vmatprep.subr.mxu1 %v1383_v56  ;;  %v3150_v52 = vld [vmem:[%s8947_s21 + $0x2f8] sm:$0xff]  ;;  %v3085_v56 = vld [vmem:[%s8947_s21 + $0xf0] sm:$0xff] }
 0x33d   : > { %2812 = vmatpush2.msra.mxu0 %v1380_v57  ;;  %2883 = vmatpush2.msra.mxu1 %v1382_v58  ;;  %v3084_v58 = vld [vmem:[%s8947_s21 + $0xe8] sm:$0xff] }
 0x33e   : > { %2813 = vmatprep.subr.mxu0 %v1365_v61  ;;  %2884 = vmatprep.subr.mxu1 %v1367_v62  ;;  %v3148_v61 = vld [vmem:[%s8947_s21 + $0x2e8] sm:$0xff]  ;;  %v3083_v62 = vld [vmem:[%s8947_s21 + $0xe0] sm:$0xff] }
 0x33f   : > { %2814 = vmatpush2.msra.mxu0 %v1364_v63  ;;  %2885 = vmatpush2.msra.mxu1 %v1366_v0  ;;  %v3147_v63 = vld [vmem:[%s8947_s21 + $0x2e0] sm:$0xff]  ;;  %v3146_v0 = vld [vmem:[%s8947_s21 + $0x2d8] sm:$0xff] }
 0x340   : > { %2815 = vmatprep.subr.mxu0 %v1349_v2  ;;  %2886 = vmatprep.subr.mxu1 %v1351_v4  ;;  %v3145_v2 = vld [vmem:[%s8947_s21 + $0x2d0] sm:$0xff]  ;;  %v3080_v4 = vld [vmem:[%s8947_s21 + $0xc8] sm:$0xff] }
 0x341   : > { %2816 = vmatpush2.msra.mxu0 %v1348_v5  ;;  %2887 = vmatpush2.msra.mxu1 %v1350_v6  ;;  %v3144_v5 = vld [vmem:[%s8947_s21 + $0x2c8] sm:$0xff] }
 0x342   : > { %2817 = vmatprep.subr.mxu0 %v1333_v11  ;;  %2888 = vmatprep.subr.mxu1 %v1335_v12  ;;  %v3079_v11 = vld [vmem:[%s8947_s21 + $0xc0] sm:$0xff] }
 0x343   : > { %2818 = vmatpush2.msra.mxu0 %v1332_v14  ;;  %2889 = vmatpush2.msra.mxu1 %v1334_v16  ;;  %v3143_v12 = vld [vmem:[%s8947_s21 + $0x2c0] sm:$0xff]  ;;  %v3078_v14 = vld [vmem:[%s8947_s21 + $0xb8] sm:$0xff] }
 0x344   : > { %2819 = vmatprep.subr.mxu0 %v1317_v3  ;;  %2890 = vmatprep.subr.mxu1 %v1319_v20  ;;  %v3142_v16 = vld [vmem:[%s8947_s21 + $0x2b8] sm:$0xff]  ;;  %v3077_v3 = vld [vmem:[%s8947_s21 + $0xb0] sm:$0xff] }
 0x345   : > { %2820 = vmatpush2.msra.mxu0 %v1316_v1  ;;  %2891 = vmatpush2.msra.mxu1 %v1318_v8  ;;  %v3141_v20 = vld [vmem:[%s8947_s21 + $0x2b0] sm:$0xff]  ;;  %v3076_v1 = vld [vmem:[%s8947_s21 + $0xa8] sm:$0xff] }
 0x346   : > { %2821 = vmatprep.subr.mxu0 %v1301_v21  ;;  %2892 = vmatprep.subr.mxu1 %v1303_v22  ;;  %v3140_v21 = vld [vmem:[%s8947_s21 + $0x2a8] sm:$0xff] }
 0x347   : > { %2822 = vmatpush2.msra.mxu0 %v1300_v23  ;;  %2893 = vmatpush2.msra.mxu1 %v1302_v24  ;;  %v9833_v39 = vpop.f32.mrf.mxu0  ;;  %v9835_v40 = vpop.f32.mrf.mxu1  ;;  %v3075_v23 = vld [vmem:[%s8947_s21 + $0xa0] sm:$0xff] }
 0x348   : > { %2823 = vmatprep.subr.mxu0 %v1285_v29  ;;  %2894 = vmatprep.subr.mxu1 %v1287_v30  ;;  %v3139_v24 = vld [vmem:[%s8947_s21 + $0x2a0] sm:$0xff]  ;;  %v3074_v29 = vld [vmem:[%s8947_s21 + $0x98] sm:$0xff] }
 0x349   : > { %2824 = vmatpush2.msra.mxu0 %v1284_v32  ;;  %2895 = vmatpush2.msra.mxu1 %v1286_v33  ;;  %v2405_v46 = vpop.f32.mrf.mxu0  ;;  %v2476_v48 = vpop.f32.mrf.mxu1  ;;  %v3138_v30 = vld [vmem:[%s8947_s21 + $0x298] sm:$0xff]  ;;  %v3073_v32 = vld [vmem:[%s8947_s21 + $0x90] sm:$0xff] }
 0x34a   : > { %2825 = vmatprep.subr.mxu0 %v1269_v35  ;;  %2896 = vmatprep.subr.mxu1 %v1271_v36  ;;  %v2406_v49 = vadd.f32 %v2405_v46, %v9759_v37  ;;  %v2477_v55 = vadd.f32 %v2476_v48, %v9761_v38  ;;  %v3149_v37 = vld [vmem:[%s8947_s21 + $0x2f0] sm:$0xff]  ;;  %v3072_v35 = vld [vmem:[%s8947_s21 + $0x88] sm:$0xff]  ;;  %v3070_v46 = vld [vmem:[%s8947_s21 + $0x78] sm:$0xff] }
 0x34b   : > { %2826 = vmatpush2.msra.mxu0 %v1268_v41  ;;  %2827 = vmatprep.mubr.f32.mxu0 %v9663_v15  ;;  %v3137_v33 = vld [vmem:[%s8947_s21 + $0x290] sm:$0xff]  ;;  %v3136_v36 = vld [vmem:[%s8947_s21 + $0x288] sm:$0xff]  ;;  %v3071_v41 = vld [vmem:[%s8947_s21 + $0x80] sm:$0xff] }
 0x34c   : > { %2897 = vmatpush2.msra.mxu1 %v1270_v45  ;;  %2898 = vmatprep.mubr.f32.mxu1 %v9663_v15  ;;  %v2990_v57 = vadd.f32 %v2916_v47, %v2406_v49  ;;  %v2992_v38 = vadd.f32 %v2924_v50, %v2477_v55  ;;  %v3082_v15 = vld [vmem:[%s8947_s21 + $0xd8] sm:$0xff]  ;;  %v3135_v45 = vld [vmem:[%s8947_s21 + $0x280] sm:$0xff]  ;;  %v3069_v48 = vld [vmem:[%s8947_s21 + $0x70] sm:$0xff] }
 0x34d   : > { %2828 = vmatmul.mubr.f32.vlgmr.msra.gmra.mxu0 %v9671_v19  ;;  %2899 = vmatmul.mubr.f32.vlgmr.msra.gmra.mxu1 %v9671_v19  ;;  %v3081_v19 = vld [vmem:[%s8947_s21 + $0xd0] sm:$0xff]  ;;  %v3134_v47 = vld [vmem:[%s8947_s21 + $0x278] sm:$0xff]  ;;  %v3068_v50 = vld [vmem:[%s8947_s21 + $0x68] sm:$0xff] }
 0x34e   : > { %3567 = vmatprep.subr.mxu0 %v3086_v51  ;;  %3638 = vmatprep.subr.mxu1 %v3150_v52  ;;  %v3022_v6 = vmul.f32 0.01, %v2990_v57  ;;  %vm3006_vm0 = vcmp.gt.f32.partialorder %v2990_v57, 0.0  ;;  %v3024_v13 = vmul.f32 0.01, %v2992_v38  ;;  %vm3008_vm1 = vcmp.gt.f32.partialorder %v2992_v38, 0.0 }
 0x34f   : > { %3568 = vmatpush1.msra.mxu0 %v3085_v56  ;;  %3639 = vmatpush1.msra.mxu1 %v3149_v37  ;;  %v3133_v49 = vld [vmem:[%s8947_s21 + $0x270] sm:$0xff]  ;;  %v3132_v51 = vld [vmem:[%s8947_s21 + $0x268] sm:$0xff]  ;;  %v3067_v52 = vld [vmem:[%s8947_s21 + $0x60] sm:$0xff] }
 0x350   : > { %3569 = vmatprep.subr.mxu0 %v3084_v58  ;;  %3640 = vmatprep.subr.mxu1 %v3148_v61  ;;  %v3038_v8 = vsel %vm3006_vm0, %v2990_v57, %v3022_v6  ;;  %v3040_v22 = vsel %vm3008_vm1, %v2992_v38, %v3024_v13  ;;  %v3131_v55 = vld [vmem:[%s8947_s21 + $0x260] sm:$0xff]  ;;  %v3066_v56 = vld [vmem:[%s8947_s21 + $0x58] sm:$0xff]  ;;  %v3065_v57 = vld [vmem:[%s8947_s21 + $0x50] sm:$0xff] }
 0x351   : > { %3570 = vmatpush1.msra.mxu0 %v3083_v62  ;;  %3641 = vmatpush1.msra.mxu1 %v3147_v63  ;;  %v3130_v37 = vld [vmem:[%s8947_s21 + $0x258] sm:$0xff]  ;;  %v3129_v58 = vld [vmem:[%s8947_s21 + $0x250] sm:$0xff]  ;;  %v3064_v61 = vld [vmem:[%s8947_s21 + $0x48] sm:$0xff] }
 0x352   : > { %3571 = vmatprep.subr.mxu0 %v3082_v15  ;;  %3642 = vmatprep.subr.mxu1 %v3146_v0  ;;  %v3128_v38 = vld [vmem:[%s8947_s21 + $0x248] sm:$0xff]  ;;  %v3063_v62 = vld [vmem:[%s8947_s21 + $0x40] sm:$0xff]  ;;  %v3062_v15 = vld [vmem:[%s8947_s21 + $0x38] sm:$0xff] }
 0x353   : > { %3572 = vmatpush1.msra.mxu0 %v3081_v19  ;;  %3643 = vmatpush1.msra.mxu1 %v3145_v2  ;;  %v3127_v63 = vld [vmem:[%s8947_s21 + $0x240] sm:$0xff]  ;;  %v3126_v0 = vld [vmem:[%s8947_s21 + $0x238] sm:$0xff]  ;;  %v3061_v19 = vld [vmem:[%s8947_s21 + $0x30] sm:$0xff] }
 0x354   : > { %3573 = vmatprep.subr.mxu0 %v3080_v4  ;;  %3644 = vmatprep.subr.mxu1 %v3144_v5  ;;  %v3125_v2 = vld [vmem:[%s8947_s21 + $0x230] sm:$0xff]  ;;  %v3060_v4 = vld [vmem:[%s8947_s21 + $0x28] sm:$0xff]  ;;  %v3059_v6 = vld [vmem:[%s8947_s21 + $0x20] sm:$0xff] }
 0x355   : > { %3574 = vmatpush1.msra.mxu0 %v3079_v11  ;;  %3645 = vmatpush1.msra.mxu1 %v3143_v12  ;;  %v3124_v5 = vld [vmem:[%s8947_s21 + $0x228] sm:$0xff]  ;;  %v3123_v11 = vld [vmem:[%s8947_s21 + $0x220] sm:$0xff]  ;;  %v3058_v12 = vld [vmem:[%s8947_s21 + $0x18] sm:$0xff] }
 0x356   : > { %3575 = vmatprep.subr.mxu0 %v3078_v14  ;;  %3646 = vmatprep.subr.mxu1 %v3142_v16  ;;  %v3122_v13 = vld [vmem:[%s8947_s21 + $0x218] sm:$0xff]  ;;  %v3057_v14 = vld [vmem:[%s8947_s21 + $0x10] sm:$0xff] }
 0x357   : > { %3576 = vmatpush1.msra.mxu0 %v3077_v3  ;;  %3647 = vmatpush1.msra.mxu1 %v3141_v20  ;;  %v3121_v16 = vld [vmem:[%s8947_s21 + $0x210] sm:$0xff]  ;;  %v3056_v3 = vld [vmem:[%s8947_s21 + $0x8] sm:$0xff] }
 0x358   : > { %3577 = vmatprep.subr.mxu0 %v3076_v1  ;;  %3631 = vmatprep.mubr.f32.mxu0 %v3038_v8  ;;  %v3120_v20 = vld [vmem:[%s8947_s21 + $0x208] sm:$0xff]  ;;  %v3055_v1 = vld [vmem:[%s8947_s21] sm:$0xff] }
 0x359   : > { %3648 = vmatprep.subr.mxu1 %v3140_v21  ;;  %3702 = vmatprep.mubr.f32.mxu1 %v3040_v22  ;;  %v3119_v8 = vld [vmem:[%s8947_s21 + $0x200] sm:$0xff]  ;;  %v3118_v21 = vld [vmem:[%s8947_s21 + $0x1f8] sm:$0xff] }
 0x35a   : > { %3578 = vmatpush1.msra.mxu0 %v3075_v23  ;;  %3649 = vmatpush1.msra.mxu1 %v3139_v24  ;;  %v3182_v22 = vld [vmem:[%s8947_s21 + $0x3f8] sm:$0xff]  ;;  %v3117_v23 = vld [vmem:[%s8947_s21 + $0x1f0] sm:$0xff] }
 0x35b   : > { %3579 = vmatprep.subr.mxu0 %v3074_v29  ;;  %3650 = vmatprep.subr.mxu1 %v3138_v30  ;;  %v3181_v24 = vld [vmem:[%s8947_s21 + $0x3f0] sm:$0xff]  ;;  %v3116_v29 = vld [vmem:[%s8947_s21 + $0x1e8] sm:$0xff] }
 0x35c   : > { %3580 = vmatpush1.msra.mxu0 %v3073_v32  ;;  %3651 = vmatpush1.msra.mxu1 %v3137_v33  ;;  %v3180_v30 = vld [vmem:[%s8947_s21 + $0x3e8] sm:$0xff]  ;;  %v3115_v32 = vld [vmem:[%s8947_s21 + $0x1e0] sm:$0xff] }
 0x35d   : > { %3581 = vmatprep.subr.mxu0 %v3072_v35  ;;  %3652 = vmatprep.subr.mxu1 %v3136_v36  ;;  %v3179_v33 = vld [vmem:[%s8947_s21 + $0x3e0] sm:$0xff]  ;;  %v3114_v35 = vld [vmem:[%s8947_s21 + $0x1d8] sm:$0xff] }
 0x35e   : > { %3582 = vmatpush1.msra.mxu0 %v3071_v41  ;;  %3653 = vmatpush1.msra.mxu1 %v3135_v45  ;;  %v3178_v36 = vld [vmem:[%s8947_s21 + $0x3d8] sm:$0xff]  ;;  %v3113_v41 = vld [vmem:[%s8947_s21 + $0x1d0] sm:$0xff] }
 0x35f   : > { %3583 = vmatprep.subr.mxu0 %v3070_v46  ;;  %3654 = vmatprep.subr.mxu1 %v3134_v47  ;;  %v3177_v45 = vld [vmem:[%s8947_s21 + $0x3d0] sm:$0xff]  ;;  %v3112_v46 = vld [vmem:[%s8947_s21 + $0x1c8] sm:$0xff] }
 0x360   : > { %3584 = vmatpush1.msra.mxu0 %v3069_v48  ;;  %3655 = vmatpush1.msra.mxu1 %v3133_v49  ;;  %v3176_v47 = vld [vmem:[%s8947_s21 + $0x3c8] sm:$0xff]  ;;  %v3111_v48 = vld [vmem:[%s8947_s21 + $0x1c0] sm:$0xff] }
 0x361   : > { %3585 = vmatprep.subr.mxu0 %v3068_v50  ;;  %3656 = vmatprep.subr.mxu1 %v3132_v51  ;;  %v3175_v49 = vld [vmem:[%s8947_s21 + $0x3c0] sm:$0xff]  ;;  %v3110_v50 = vld [vmem:[%s8947_s21 + $0x1b8] sm:$0xff] }
 0x362   : > { %3586 = vmatpush1.msra.mxu0 %v3067_v52  ;;  %3657 = vmatpush1.msra.mxu1 %v3131_v55  ;;  %v3174_v51 = vld [vmem:[%s8947_s21 + $0x3b8] sm:$0xff]  ;;  %v3109_v52 = vld [vmem:[%s8947_s21 + $0x1b0] sm:$0xff] }
 0x363   : > { %3587 = vmatprep.subr.mxu0 %v3066_v56  ;;  %3658 = vmatprep.subr.mxu1 %v3130_v37  ;;  %v3173_v55 = vld [vmem:[%s8947_s21 + $0x3b0] sm:$0xff]  ;;  %v3108_v56 = vld [vmem:[%s8947_s21 + $0x1a8] sm:$0xff] }
 0x364   : > { %3588 = vmatpush1.msra.mxu0 %v3065_v57  ;;  %3659 = vmatpush1.msra.mxu1 %v3129_v58  ;;  %v3172_v37 = vld [vmem:[%s8947_s21 + $0x3a8] sm:$0xff]  ;;  %v3107_v57 = vld [vmem:[%s8947_s21 + $0x1a0] sm:$0xff] }
 0x365   : > { %3589 = vmatprep.subr.mxu0 %v3064_v61  ;;  %3660 = vmatprep.subr.mxu1 %v3128_v38  ;;  %v3171_v58 = vld [vmem:[%s8947_s21 + $0x3a0] sm:$0xff]  ;;  %v3106_v61 = vld [vmem:[%s8947_s21 + $0x198] sm:$0xff] }
 0x366   : > { %3590 = vmatpush1.msra.mxu0 %v3063_v62  ;;  %3661 = vmatpush1.msra.mxu1 %v3127_v63  ;;  %v3170_v38 = vld [vmem:[%s8947_s21 + $0x398] sm:$0xff]  ;;  %v3105_v62 = vld [vmem:[%s8947_s21 + $0x190] sm:$0xff] }
 0x367   : > { %3591 = vmatprep.subr.mxu0 %v3062_v15  ;;  %3662 = vmatprep.subr.mxu1 %v3126_v0  ;;  %v3169_v63 = vld [vmem:[%s8947_s21 + $0x390] sm:$0xff]  ;;  %v3104_v15 = vld [vmem:[%s8947_s21 + $0x188] sm:$0xff] }
 0x368   : > { %3592 = vmatpush1.msra.mxu0 %v3061_v19  ;;  %3663 = vmatpush1.msra.mxu1 %v3125_v2  ;;  %v3168_v0 = vld [vmem:[%s8947_s21 + $0x388] sm:$0xff]  ;;  %v3103_v19 = vld [vmem:[%s8947_s21 + $0x180] sm:$0xff] }
 0x369   : > { %3593 = vmatprep.subr.mxu0 %v3060_v4  ;;  %3664 = vmatprep.subr.mxu1 %v3124_v5  ;;  %v3167_v2 = vld [vmem:[%s8947_s21 + $0x380] sm:$0xff]  ;;  %v3102_v4 = vld [vmem:[%s8947_s21 + $0x178] sm:$0xff] }
 0x36a   : > { %3594 = vmatpush1.msra.mxu0 %v3059_v6  ;;  %3665 = vmatpush1.msra.mxu1 %v3123_v11  ;;  %v3166_v5 = vld [vmem:[%s8947_s21 + $0x378] sm:$0xff]  ;;  %v2911_v6 = vsub.s32 0, %v9817_v10  ;;  %v3101_v11 = vld [vmem:[%s8947_s21 + $0x170] sm:$0xff] }
 0x36b   : > { %3595 = vmatprep.subr.mxu0 %v3058_v12  ;;  %3666 = vmatprep.subr.mxu1 %v3122_v13  ;;  %v3165_v12 = vld [vmem:[%s8947_s21 + $0x370] sm:$0xff]  ;;  %v2919_v13 = vsub.s32 2, %v9817_v10 }
 0x36c   : > { %3596 = vmatpush1.msra.mxu0 %v3057_v14  ;;  %3667 = vmatpush1.msra.mxu1 %v3121_v16  ;;  %v3100_v14 = vld [vmem:[%s8947_s21 + $0x168] sm:$0xff] }
 0x36d   : > { %3597 = vmatprep.subr.mxu0 %v3056_v3  ;;  %3668 = vmatprep.subr.mxu1 %v3120_v20  ;;  %v3164_v16 = vld [vmem:[%s8947_s21 + $0x368] sm:$0xff]  ;;  %v3099_v3 = vld [vmem:[%s8947_s21 + $0x160] sm:$0xff] }
 0x36e   : > { %3598 = vmatpush1.msra.mxu0 %v3055_v1  ;;  %3669 = vmatpush1.msra.mxu1 %v3119_v8  ;;  %v3163_v20 = vld [vmem:[%s8947_s21 + $0x360] sm:$0xff]  ;;  %v3098_v1 = vld [vmem:[%s8947_s21 + $0x158] sm:$0xff] }
 0x36f   : > { %3599 = vmatprep.subr.mxu0 %v3118_v21  ;;  %3670 = vmatprep.subr.mxu1 %v3182_v22  ;;  %v3162_v8 = vld [vmem:[%s8947_s21 + $0x358] sm:$0xff]  ;;  %v2912_v21 = vrot.slane %v9839_v42, %v2911_v6  ;;  %v3097_v22 = vld [vmem:[%s8947_s21 + $0x150] sm:$0xff] }
 0x370   : > { %3600 = vmatpush2.msra.mxu0 %v3117_v23  ;;  %3671 = vmatpush2.msra.mxu1 %v3181_v24  ;;  %v3161_v23 = vld [vmem:[%s8947_s21 + $0x350] sm:$0xff]  ;;  %v2404_v24 = vadd.f32 %v9833_v39, %v9747_v27  ;;  %v3094_v27 = vld [vmem:[%s8947_s21 + $0x138] sm:$0xff] }
 0x371   : > { %3601 = vmatprep.subr.mxu0 %v3116_v29  ;;  %3672 = vmatprep.subr.mxu1 %v3180_v30  ;;  %v2475_v29 = vadd.f32 %v9835_v40, %v9749_v28  ;;  %v2920_v30 = vrot.slane %v9839_v42, %v2919_v13  ;;  %v3158_v28 = vld [vmem:[%s8947_s21 + $0x338] sm:$0xff]  ;;  %v3093_v39 = vld [vmem:[%s8947_s21 + $0x130] sm:$0xff] }
 0x372   : > { %3602 = vmatpush2.msra.mxu0 %v3115_v32  ;;  %3673 = vmatpush2.msra.mxu1 %v3179_v33  ;;  %v3096_v32 = vld [vmem:[%s8947_s21 + $0x148] sm:$0xff]  ;;  %v3157_v40 = vld [vmem:[%s8947_s21 + $0x330] sm:$0xff] }
 0x373   : > { %3603 = vmatprep.subr.mxu0 %v3114_v35  ;;  %3674 = vmatprep.subr.mxu1 %v3178_v36  ;;  %v3160_v33 = vld [vmem:[%s8947_s21 + $0x348] sm:$0xff]  ;;  %v3095_v35 = vld [vmem:[%s8947_s21 + $0x140] sm:$0xff] }
 0x374   : > { %3604 = vmatpush2.msra.mxu0 %v3113_v41  ;;  %3675 = vmatpush2.msra.mxu1 %v3177_v45  ;;  %v3159_v36 = vld [vmem:[%s8947_s21 + $0x340] sm:$0xff]  ;;  %v2989_v41 = vadd.f32 %v2912_v21, %v2404_v24  ;;  %v2991_v45 = vadd.f32 %v2920_v30, %v2475_v29  ;;  %v3276_v21 = vld [vmem:[%s8947_s21 + $0x6e8] sm:$0xff]  ;;  %v3210_v24 = vld [vmem:[%s8947_s21 + $0x4d8] sm:$0xff] }
 0x375   : > { %3605 = vmatprep.subr.mxu0 %v3112_v46  ;;  %3676 = vmatprep.subr.mxu1 %v3176_v47  ;;  %v3092_v46 = vld [vmem:[%s8947_s21 + $0x128] sm:$0xff]  ;;  %v3274_v29 = vld [vmem:[%s8947_s21 + $0x6d8] sm:$0xff]  ;;  %v3209_v30 = vld [vmem:[%s8947_s21 + $0x4d0] sm:$0xff] }
 0x376   : > { %3606 = vmatpush2.msra.mxu0 %v3111_v48  ;;  %3677 = vmatpush2.msra.mxu1 %v3175_v49  ;;  %v3156_v47 = vld [vmem:[%s8947_s21 + $0x328] sm:$0xff]  ;;  %v3091_v48 = vld [vmem:[%s8947_s21 + $0x120] sm:$0xff]  ;;  %vm3005_vm2 = vcmp.gt.f32.partialorder %v2989_v41, 0.0  ;;  %vm3007_vm3 = vcmp.gt.f32.partialorder %v2991_v45, 0.0 }
 0x377   : > { %3607 = vmatprep.subr.mxu0 %v3110_v50  ;;  %3678 = vmatprep.subr.mxu1 %v3174_v51  ;;  %v3155_v49 = vld [vmem:[%s8947_s21 + $0x320] sm:$0xff]  ;;  %v2931_v50 = vsub.s32 5, %v9817_v10  ;;  %v3090_v51 = vld [vmem:[%s8947_s21 + $0x118] sm:$0xff] }
 0x378   : > { %3608 = vmatpush2.msra.mxu0 %v3109_v52  ;;  %3679 = vmatpush2.msra.mxu1 %v3173_v55  ;;  %v3154_v52 = vld [vmem:[%s8947_s21 + $0x318] sm:$0xff]  ;;  %v2939_v55 = vsub.s32 7, %v9817_v10 }
 0x379   : > { %3609 = vmatprep.subr.mxu0 %v3108_v56  ;;  %3680 = vmatprep.subr.mxu1 %v3172_v37  ;;  %v3089_v56 = vld [vmem:[%s8947_s21 + $0x110] sm:$0xff] }
 0x37a   : > { %3610 = vmatpush2.msra.mxu0 %v3107_v57  ;;  %3681 = vmatpush2.msra.mxu1 %v3171_v58  ;;  %v3153_v37 = vld [vmem:[%s8947_s21 + $0x310] sm:$0xff] }
 0x37b   : > { %3611 = vmatprep.subr.mxu0 %v3106_v61  ;;  %3682 = vmatprep.subr.mxu1 %v3170_v38  ;;  %v3021_v61 = vmul.f32 0.01, %v2989_v41  ;;  %v3023_v38 = vmul.f32 0.01, %v2991_v45 }
 0x37c   : > { %3612 = vmatpush2.msra.mxu0 %v3105_v62  ;;  %3683 = vmatpush2.msra.mxu1 %v3169_v63  ;;  %v3088_v62 = vld [vmem:[%s8947_s21 + $0x108] sm:$0xff] }
 0x37d   : > { %3613 = vmatprep.subr.mxu0 %v3104_v15  ;;  %3684 = vmatprep.subr.mxu1 %v3168_v0  ;;  %v3152_v63 = vld [vmem:[%s8947_s21 + $0x308] sm:$0xff]  ;;  %v3087_v15 = vld [vmem:[%s8947_s21 + $0x100] sm:$0xff] }
 0x37e   : > { %3614 = vmatpush2.msra.mxu0 %v3103_v19  ;;  %3685 = vmatpush2.msra.mxu1 %v3167_v2  ;;  %v3151_v0 = vld [vmem:[%s8947_s21 + $0x300] sm:$0xff]  ;;  %v2932_v2 = vrot.slane %v9839_v42, %v2931_v50 }
 0x37f   : > { %3615 = vmatprep.subr.mxu0 %v3102_v4  ;;  %3686 = vmatprep.subr.mxu1 %v3166_v5 }
 0x380   : > { %3616 = vmatpush2.msra.mxu0 %v3101_v11  ;;  %3687 = vmatpush2.msra.mxu1 %v3165_v12  ;;  %v2940_v11 = vrot.slane %v9839_v42, %v2939_v55  ;;  %v3214_v12 = vld [vmem:[%s8947_s21 + $0x4f8] sm:$0xff] }
 0x381   : > { %3617 = vmatprep.subr.mxu0 %v3100_v14  ;;  %3688 = vmatprep.subr.mxu1 %v3164_v16  ;;  %v3278_v14 = vld [vmem:[%s8947_s21 + $0x6f8] sm:$0xff] }
 0x382   : > { %3618 = vmatpush2.msra.mxu0 %v3099_v3  ;;  %3689 = vmatpush2.msra.mxu1 %v3163_v20  ;;  %v3037_v3 = vsel %vm3005_vm2, %v2989_v41, %v3021_v61  ;;  %v3213_v20 = vld [vmem:[%s8947_s21 + $0x4f0] sm:$0xff]  ;;  %v3270_v41 = vld [vmem:[%s8947_s21 + $0x6b8] sm:$0xff] }
 0x383   : > { %3619 = vmatprep.subr.mxu0 %v3098_v1  ;;  %3690 = vmatprep.subr.mxu1 %v3162_v8  ;;  %v3277_v1 = vld [vmem:[%s8947_s21 + $0x6f0] sm:$0xff]  ;;  %v3212_v8 = vld [vmem:[%s8947_s21 + $0x4e8] sm:$0xff]  ;;  %v3266_v61 = vld [vmem:[%s8947_s21 + $0x698] sm:$0xff] }
 0x384   : > { %3620 = vmatpush2.msra.mxu0 %v3097_v22  ;;  %3691 = vmatpush2.msra.mxu1 %v3161_v23  ;;  %v3211_v22 = vld [vmem:[%s8947_s21 + $0x4e0] sm:$0xff] }
 0x385   : > { %3621 = vmatprep.subr.mxu0 %v3096_v32  ;;  %3692 = vmatprep.subr.mxu1 %v3160_v33  ;;  %v3275_v23 = vld [vmem:[%s8947_s21 + $0x6e0] sm:$0xff]  ;;  %v3273_v32 = vld [vmem:[%s8947_s21 + $0x6d0] sm:$0xff]  ;;  %v3208_v33 = vld [vmem:[%s8947_s21 + $0x4c8] sm:$0xff] }
 0x386   : > { %3622 = vmatpush2.msra.mxu0 %v3095_v35  ;;  %3693 = vmatpush2.msra.mxu1 %v3159_v36  ;;  %v3272_v35 = vld [vmem:[%s8947_s21 + $0x6c8] sm:$0xff] }
 0x387   : > { %3623 = vmatprep.subr.mxu0 %v3094_v27  ;;  %3694 = vmatprep.subr.mxu1 %v3158_v28  ;;  %v3207_v27 = vld [vmem:[%s8947_s21 + $0x4c0] sm:$0xff] }
 0x388   : > { %3624 = vmatpush2.msra.mxu0 %v3093_v39  ;;  %3695 = vmatpush2.msra.mxu1 %v3157_v40  ;;  %v3271_v28 = vld [vmem:[%s8947_s21 + $0x6c0] sm:$0xff]  ;;  %v3206_v40 = vld [vmem:[%s8947_s21 + $0x4b8] sm:$0xff] }
 0x389   : > { %3625 = vmatprep.subr.mxu0 %v3092_v46  ;;  %3696 = vmatprep.subr.mxu1 %v3156_v47  ;;  %v9992_v57 = vpop.f32.mrf.mxu0  ;;  %v9994_v58 = vpop.f32.mrf.mxu1  ;;  %v3269_v46 = vld [vmem:[%s8947_s21 + $0x6b0] sm:$0xff]  ;;  %v3204_v47 = vld [vmem:[%s8947_s21 + $0x4a8] sm:$0xff] }
 0x38a   : > { %3626 = vmatpush2.msra.mxu0 %v3091_v48  ;;  %3697 = vmatpush2.msra.mxu1 %v3155_v49  ;;  %v3268_v49 = vld [vmem:[%s8947_s21 + $0x6a8] sm:$0xff] }
 0x38b   : > { %3627 = vmatprep.subr.mxu0 %v3090_v51  ;;  %3698 = vmatprep.subr.mxu1 %v3154_v52  ;;  %v2547_v19 = vpop.f32.mrf.mxu0  ;;  %v2618_v4 = vpop.f32.mrf.mxu1  ;;  %v3203_v52 = vld [vmem:[%s8947_s21 + $0x4a0] sm:$0xff] }
 0x38c   : > { %3628 = vmatpush2.msra.mxu0 %v3089_v56  ;;  %3699 = vmatpush2.msra.mxu1 %v3153_v37  ;;  %v2548_v5 = vadd.f32 %v2547_v19, %v9779_v53  ;;  %v2619_v16 = vadd.f32 %v2618_v4, %v9781_v54  ;;  %v3039_v53 = vsel %vm3007_vm3, %v2991_v45, %v3023_v38  ;;  %v3205_v45 = vld [vmem:[%s8947_s21 + $0x4b0] sm:$0xff]  ;;  %v3267_v56 = vld [vmem:[%s8947_s21 + $0x6a0] sm:$0xff]  ;;  %v3202_v37 = vld [vmem:[%s8947_s21 + $0x498] sm:$0xff] }
 0x38d   : > { %3629 = vmatprep.subr.mxu0 %v3088_v62  ;;  %3700 = vmatprep.subr.mxu1 %v3152_v63  ;;  %v3201_v38 = vld [vmem:[%s8947_s21 + $0x490] sm:$0xff]  ;;  %v3200_v63 = vld [vmem:[%s8947_s21 + $0x488] sm:$0xff]  ;;  %v3263_v19 = vld [vmem:[%s8947_s21 + $0x680] sm:$0xff] }
 0x38e   : > { %3630 = vmatpush2.msra.mxu0 %v3087_v15  ;;  %3701 = vmatpush2.msra.mxu1 %v3151_v0  ;;  %v2994_v42 = vadd.f32 %v2932_v2, %v2548_v5  ;;  %v2996_v54 = vadd.f32 %v2940_v11, %v2619_v16  ;;  %v3265_v62 = vld [vmem:[%s8947_s21 + $0x690] sm:$0xff]  ;;  %v3264_v15 = vld [vmem:[%s8947_s21 + $0x688] sm:$0xff]  ;;  %v3199_v0 = vld [vmem:[%s8947_s21 + $0x480] sm:$0xff] }
 0x38f   : > { %3632 = vmatmul.mubr.f32.vlgmr.msra.gmra.mxu0 %v3037_v3  ;;  %3703 = vmatmul.mubr.f32.vlgmr.msra.gmra.mxu1 %v3039_v53  ;;  %v3198_v2 = vld [vmem:[%s8947_s21 + $0x478] sm:$0xff]  ;;  %v3197_v5 = vld [vmem:[%s8947_s21 + $0x470] sm:$0xff]  ;;  %v3195_v16 = vld [vmem:[%s8947_s21 + $0x460] sm:$0xff] }
 0x390   : > { %3709 = vmatprep.subr.mxu0 %v3214_v12  ;;  %3780 = vmatprep.subr.mxu1 %v3278_v14  ;;  %v3026_v36 = vmul.f32 0.01, %v2994_v42  ;;  %vm3010_vm4 = vcmp.gt.f32.partialorder %v2994_v42, 0.0  ;;  %v3028_v39 = vmul.f32 0.01, %v2996_v54  ;;  %vm3012_vm5 = vcmp.gt.f32.partialorder %v2996_v54, 0.0 }
 0x391   : > { %3710 = vmatpush1.msra.mxu0 %v3213_v20  ;;  %3781 = vmatpush1.msra.mxu1 %v3277_v1  ;;  %v3262_v4 = vld [vmem:[%s8947_s21 + $0x678] sm:$0xff]  ;;  %v3261_v11 = vld [vmem:[%s8947_s21 + $0x670] sm:$0xff]  ;;  %v3196_v12 = vld [vmem:[%s8947_s21 + $0x468] sm:$0xff] }
 0x392   : > { %3711 = vmatprep.subr.mxu0 %v3212_v8  ;;  %3782 = vmatprep.subr.mxu1 %v3276_v21  ;;  %v3042_v48 = vsel %vm3010_vm4, %v2994_v42, %v3026_v36  ;;  %v3044_v51 = vsel %vm3012_vm5, %v2996_v54, %v3028_v39  ;;  %v3260_v14 = vld [vmem:[%s8947_s21 + $0x668] sm:$0xff]  ;;  %v3259_v3 = vld [vmem:[%s8947_s21 + $0x660] sm:$0xff]  ;;  %v3194_v53 = vld [vmem:[%s8947_s21 + $0x458] sm:$0xff] }
 0x393   : > { %3712 = vmatpush1.msra.mxu0 %v3211_v22  ;;  %3783 = vmatpush1.msra.mxu1 %v3275_v23  ;;  %v3258_v20 = vld [vmem:[%s8947_s21 + $0x658] sm:$0xff]  ;;  %v3193_v1 = vld [vmem:[%s8947_s21 + $0x450] sm:$0xff]  ;;  %v3192_v8 = vld [vmem:[%s8947_s21 + $0x448] sm:$0xff] }
 0x394   : > { %3713 = vmatprep.subr.mxu0 %v3210_v24  ;;  %3784 = vmatprep.subr.mxu1 %v3274_v29  ;;  %v3257_v42 = vld [vmem:[%s8947_s21 + $0x650] sm:$0xff]  ;;  %v3256_v21 = vld [vmem:[%s8947_s21 + $0x648] sm:$0xff]  ;;  %v3191_v54 = vld [vmem:[%s8947_s21 + $0x440] sm:$0xff] }
 0x395   : > { %3714 = vmatpush1.msra.mxu0 %v3209_v30  ;;  %3785 = vmatpush1.msra.mxu1 %v3273_v32  ;;  %v3255_v22 = vld [vmem:[%s8947_s21 + $0x640] sm:$0xff]  ;;  %v3190_v23 = vld [vmem:[%s8947_s21 + $0x438] sm:$0xff]  ;;  %v3189_v29 = vld [vmem:[%s8947_s21 + $0x430] sm:$0xff] }
 0x396   : > { %3715 = vmatprep.subr.mxu0 %v3208_v33  ;;  %3786 = vmatprep.subr.mxu1 %v3272_v35  ;;  %v3254_v24 = vld [vmem:[%s8947_s21 + $0x638] sm:$0xff]  ;;  %v3253_v30 = vld [vmem:[%s8947_s21 + $0x630] sm:$0xff]  ;;  %v3188_v32 = vld [vmem:[%s8947_s21 + $0x428] sm:$0xff] }
 0x397   : > { %3716 = vmatpush1.msra.mxu0 %v3207_v27  ;;  %3787 = vmatpush1.msra.mxu1 %v3271_v28  ;;  %v3252_v33 = vld [vmem:[%s8947_s21 + $0x628] sm:$0xff]  ;;  %v3187_v35 = vld [vmem:[%s8947_s21 + $0x420] sm:$0xff]  ;;  %v3186_v27 = vld [vmem:[%s8947_s21 + $0x418] sm:$0xff] }
 0x398   : > { %3717 = vmatprep.subr.mxu0 %v3206_v40  ;;  %3788 = vmatprep.subr.mxu1 %v3270_v41  ;;  %v3251_v36 = vld [vmem:[%s8947_s21 + $0x620] sm:$0xff]  ;;  %v3250_v28 = vld [vmem:[%s8947_s21 + $0x618] sm:$0xff]  ;;  %v3185_v39 = vld [vmem:[%s8947_s21 + $0x410] sm:$0xff] }
 0x399   : > { %3718 = vmatpush1.msra.mxu0 %v3205_v45  ;;  %3789 = vmatpush1.msra.mxu1 %v3269_v46  ;;  %v3249_v40 = vld [vmem:[%s8947_s21 + $0x610] sm:$0xff]  ;;  %v3184_v41 = vld [vmem:[%s8947_s21 + $0x408] sm:$0xff]  ;;  %v3183_v46 = vld [vmem:[%s8947_s21 + $0x400] sm:$0xff] }
 0x39a   : > { %3719 = vmatprep.subr.mxu0 %v3204_v47  ;;  %3773 = vmatprep.mubr.f32.mxu0 %v3042_v48  ;;  %v3248_v45 = vld [vmem:[%s8947_s21 + $0x608] sm:$0xff]  ;;  %v3247_v47 = vld [vmem:[%s8947_s21 + $0x600] sm:$0xff]  ;;  %v3246_v48 = vld [vmem:[%s8947_s21 + $0x5f8] sm:$0xff] }
 0x39b   : > { %3790 = vmatprep.subr.mxu1 %v3268_v49  ;;  %3844 = vmatprep.mubr.f32.mxu1 %v3044_v51  ;;  %v3310_v49 = vld [vmem:[%s8947_s21 + $0x7f8] sm:$0xff]  ;;  %v3245_v51 = vld [vmem:[%s8947_s21 + $0x5f0] sm:$0xff] }
 0x39c   : > { %3720 = vmatpush1.msra.mxu0 %v3203_v52  ;;  %3791 = vmatpush1.msra.mxu1 %v3267_v56  ;;  %v3309_v52 = vld [vmem:[%s8947_s21 + $0x7f0] sm:$0xff]  ;;  %v3244_v56 = vld [vmem:[%s8947_s21 + $0x5e8] sm:$0xff] }
 0x39d   : > { %3721 = vmatprep.subr.mxu0 %v3202_v37  ;;  %3792 = vmatprep.subr.mxu1 %v3266_v61  ;;  %v3308_v37 = vld [vmem:[%s8947_s21 + $0x7e8] sm:$0xff]  ;;  %v3243_v61 = vld [vmem:[%s8947_s21 + $0x5e0] sm:$0xff] }
 0x39e   : > { %3722 = vmatpush1.msra.mxu0 %v3201_v38  ;;  %3793 = vmatpush1.msra.mxu1 %v3265_v62  ;;  %v3307_v38 = vld [vmem:[%s8947_s21 + $0x7e0] sm:$0xff]  ;;  %v3242_v62 = vld [vmem:[%s8947_s21 + $0x5d8] sm:$0xff] }
 0x39f   : > { %3723 = vmatprep.subr.mxu0 %v3200_v63  ;;  %3794 = vmatprep.subr.mxu1 %v3264_v15  ;;  %v3306_v63 = vld [vmem:[%s8947_s21 + $0x7d8] sm:$0xff]  ;;  %v3241_v15 = vld [vmem:[%s8947_s21 + $0x5d0] sm:$0xff] }
 0x3a0   : > { %3724 = vmatpush1.msra.mxu0 %v3199_v0  ;;  %3795 = vmatpush1.msra.mxu1 %v3263_v19  ;;  %v3305_v0 = vld [vmem:[%s8947_s21 + $0x7d0] sm:$0xff]  ;;  %v3240_v19 = vld [vmem:[%s8947_s21 + $0x5c8] sm:$0xff] }
 0x3a1   : > { %3725 = vmatprep.subr.mxu0 %v3198_v2  ;;  %3796 = vmatprep.subr.mxu1 %v3262_v4  ;;  %v3304_v2 = vld [vmem:[%s8947_s21 + $0x7c8] sm:$0xff]  ;;  %v3239_v4 = vld [vmem:[%s8947_s21 + $0x5c0] sm:$0xff] }
 0x3a2   : > { %3726 = vmatpush1.msra.mxu0 %v3197_v5  ;;  %3797 = vmatpush1.msra.mxu1 %v3261_v11  ;;  %v3303_v5 = vld [vmem:[%s8947_s21 + $0x7c0] sm:$0xff]  ;;  %v3238_v11 = vld [vmem:[%s8947_s21 + $0x5b8] sm:$0xff] }
 0x3a3   : > { %3727 = vmatprep.subr.mxu0 %v3196_v12  ;;  %3798 = vmatprep.subr.mxu1 %v3260_v14  ;;  %v3302_v12 = vld [vmem:[%s8947_s21 + $0x7b8] sm:$0xff]  ;;  %v3237_v14 = vld [vmem:[%s8947_s21 + $0x5b0] sm:$0xff] }
 0x3a4   : > { %3728 = vmatpush1.msra.mxu0 %v3195_v16  ;;  %3799 = vmatpush1.msra.mxu1 %v3259_v3  ;;  %v3301_v16 = vld [vmem:[%s8947_s21 + $0x7b0] sm:$0xff]  ;;  %v3236_v3 = vld [vmem:[%s8947_s21 + $0x5a8] sm:$0xff] }
 0x3a5   : > { %3729 = vmatprep.subr.mxu0 %v3194_v53  ;;  %3800 = vmatprep.subr.mxu1 %v3258_v20  ;;  %v3300_v53 = vld [vmem:[%s8947_s21 + $0x7a8] sm:$0xff]  ;;  %v3235_v20 = vld [vmem:[%s8947_s21 + $0x5a0] sm:$0xff] }
 0x3a6   : > { %3730 = vmatpush1.msra.mxu0 %v3193_v1  ;;  %3801 = vmatpush1.msra.mxu1 %v3257_v42  ;;  %v3299_v1 = vld [vmem:[%s8947_s21 + $0x7a0] sm:$0xff]  ;;  %v3234_v42 = vld [vmem:[%s8947_s21 + $0x598] sm:$0xff] }
 0x3a7   : > { %3731 = vmatprep.subr.mxu0 %v3192_v8  ;;  %3802 = vmatprep.subr.mxu1 %v3256_v21  ;;  %v3298_v8 = vld [vmem:[%s8947_s21 + $0x798] sm:$0xff]  ;;  %v3233_v21 = vld [vmem:[%s8947_s21 + $0x590] sm:$0xff] }
 0x3a8   : > { %3732 = vmatpush1.msra.mxu0 %v3191_v54  ;;  %3803 = vmatpush1.msra.mxu1 %v3255_v22  ;;  %v3297_v54 = vld [vmem:[%s8947_s21 + $0x790] sm:$0xff]  ;;  %v3232_v22 = vld [vmem:[%s8947_s21 + $0x588] sm:$0xff] }
 0x3a9   : > { %3733 = vmatprep.subr.mxu0 %v3190_v23  ;;  %3804 = vmatprep.subr.mxu1 %v3254_v24  ;;  %v3296_v23 = vld [vmem:[%s8947_s21 + $0x788] sm:$0xff]  ;;  %v3231_v24 = vld [vmem:[%s8947_s21 + $0x580] sm:$0xff] }
 0x3aa   : > { %3734 = vmatpush1.msra.mxu0 %v3189_v29  ;;  %3805 = vmatpush1.msra.mxu1 %v3253_v30  ;;  %v3295_v29 = vld [vmem:[%s8947_s21 + $0x780] sm:$0xff]  ;;  %v3230_v30 = vld [vmem:[%s8947_s21 + $0x578] sm:$0xff] }
 0x3ab   : > { %3735 = vmatprep.subr.mxu0 %v3188_v32  ;;  %3806 = vmatprep.subr.mxu1 %v3252_v33  ;;  %v3294_v32 = vld [vmem:[%s8947_s21 + $0x778] sm:$0xff]  ;;  %v2927_v33 = vsub.s32 4, %v9817_v10 }
 0x3ac   : > { %3736 = vmatpush1.msra.mxu0 %v3187_v35  ;;  %3807 = vmatpush1.msra.mxu1 %v3251_v36  ;;  %v3229_v35 = vld [vmem:[%s8947_s21 + $0x570] sm:$0xff] }
 0x3ad   : > { %3737 = vmatprep.subr.mxu0 %v3186_v27  ;;  %3808 = vmatprep.subr.mxu1 %v3250_v28  ;;  %v3293_v36 = vld [vmem:[%s8947_s21 + $0x770] sm:$0xff]  ;;  %v2935_v27 = vsub.s32 6, %v9817_v10  ;;  %v3228_v28 = vld [vmem:[%s8947_s21 + $0x568] sm:$0xff] }
 0x3ae   : > { %3738 = vmatpush1.msra.mxu0 %v3185_v39  ;;  %3809 = vmatpush1.msra.mxu1 %v3249_v40  ;;  %v3292_v39 = vld [vmem:[%s8947_s21 + $0x768] sm:$0xff]  ;;  %v3227_v40 = vld [vmem:[%s8947_s21 + $0x560] sm:$0xff]  ;;  %v3477_v10 = vld [vmem:[%s8947_s21 + $0xd30] sm:$0xff] }
 0x3af   : > { %3739 = vmatprep.subr.mxu0 %v3184_v41  ;;  %3810 = vmatprep.subr.mxu1 %v3248_v45  ;;  %v3291_v41 = vld [vmem:[%s8947_s21 + $0x760] sm:$0xff]  ;;  %v3226_v45 = vld [vmem:[%s8947_s21 + $0x558] sm:$0xff] }
 0x3b0   : > { %3740 = vmatpush1.msra.mxu0 %v3183_v46  ;;  %3811 = vmatpush1.msra.mxu1 %v3247_v47  ;;  %v3290_v46 = vld [vmem:[%s8947_s21 + $0x758] sm:$0xff]  ;;  %v7747_v47 = vld [vmem:[%s8941_s0] sm:$0xff] }
 0x3b1   : > { %3741 = vmatprep.subr.mxu0 %v3246_v48  ;;  %3812 = vmatprep.subr.mxu1 %v3310_v49  ;;  %v2928_v48 = vrot.slane %v7747_v47, %v2927_v33  ;;  %v3225_v49 = vld [vmem:[%s8947_s21 + $0x550] sm:$0xff] }
 0x3b2   : > { %3742 = vmatpush2.msra.mxu0 %v3245_v51  ;;  %3813 = vmatpush2.msra.mxu1 %v3309_v52  ;;  %v3289_v51 = vld [vmem:[%s8947_s21 + $0x750] sm:$0xff]  ;;  %v2546_v52 = vadd.f32 %v9992_v57, %v9767_v43  ;;  %v3222_v43 = vld [vmem:[%s8947_s21 + $0x538] sm:$0xff] }
 0x3b3   : > { %3743 = vmatprep.subr.mxu0 %v3244_v56  ;;  %3814 = vmatprep.subr.mxu1 %v3308_v37  ;;  %v2617_v56 = vadd.f32 %v9994_v58, %v9769_v44  ;;  %v2936_v37 = vrot.slane %v7747_v47, %v2935_v27  ;;  %v3286_v44 = vld [vmem:[%s8947_s21 + $0x738] sm:$0xff]  ;;  %v3221_v57 = vld [vmem:[%s8947_s21 + $0x530] sm:$0xff]  ;;  %v3403_v47 = vld [vmem:[%s8947_s21 + $0xae0] sm:$0xff] }
 0x3b4   : > { %3744 = vmatpush2.msra.mxu0 %v3243_v61  ;;  %3815 = vmatpush2.msra.mxu1 %v3307_v38  ;;  %v3224_v61 = vld [vmem:[%s8947_s21 + $0x548] sm:$0xff]  ;;  %v3285_v58 = vld [vmem:[%s8947_s21 + $0x730] sm:$0xff] }
 0x3b5   : > { %3745 = vmatprep.subr.mxu0 %v3242_v62  ;;  %3816 = vmatprep.subr.mxu1 %v3306_v63  ;;  %v3288_v38 = vld [vmem:[%s8947_s21 + $0x748] sm:$0xff]  ;;  %v3223_v62 = vld [vmem:[%s8947_s21 + $0x540] sm:$0xff] }
 0x3b6   : > { %3746 = vmatpush2.msra.mxu0 %v3241_v15  ;;  %3817 = vmatpush2.msra.mxu1 %v3305_v0  ;;  %v3287_v63 = vld [vmem:[%s8947_s21 + $0x740] sm:$0xff]  ;;  %v2993_v15 = vadd.f32 %v2928_v48, %v2546_v52  ;;  %v2995_v0 = vadd.f32 %v2936_v37, %v2617_v56  ;;  %v3338_v48 = vld [vmem:[%s8947_s21 + $0x8d8] sm:$0xff]  ;;  %v3401_v52 = vld [vmem:[%s8947_s21 + $0xad0] sm:$0xff] }
 0x3b7   : > { %3747 = vmatprep.subr.mxu0 %v3240_v19  ;;  %3818 = vmatprep.subr.mxu1 %v3304_v2  ;;  %v3220_v19 = vld [vmem:[%s8947_s21 + $0x528] sm:$0xff] }
 0x3b8   : > { %3748 = vmatpush2.msra.mxu0 %v3239_v4  ;;  %3819 = vmatpush2.msra.mxu1 %v3303_v5  ;;  %v3284_v2 = vld [vmem:[%s8947_s21 + $0x728] sm:$0xff]  ;;  %v3219_v4 = vld [vmem:[%s8947_s21 + $0x520] sm:$0xff]  ;;  %vm3009_vm6 = vcmp.gt.f32.partialorder %v2993_v15, 0.0  ;;  %vm3011_vm7 = vcmp.gt.f32.partialorder %v2995_v0, 0.0 }
 0x3b9   : > { %3749 = vmatprep.subr.mxu0 %v3238_v11  ;;  %3820 = vmatprep.subr.mxu1 %v3302_v12  ;;  %v3283_v5 = vld [vmem:[%s8947_s21 + $0x720] sm:$0xff]  ;;  %v3218_v11 = vld [vmem:[%s8947_s21 + $0x518] sm:$0xff]  ;;  %v3336_v56 = vld [vmem:[%s8947_s21 + $0x8c8] sm:$0xff] }
 0x3ba   : > { %3750 = vmatpush2.msra.mxu0 %v3237_v14  ;;  %3821 = vmatpush2.msra.mxu1 %v3301_v16  ;;  %v3282_v12 = vld [vmem:[%s8947_s21 + $0x718] sm:$0xff]  ;;  %v3217_v14 = vld [vmem:[%s8947_s21 + $0x510] sm:$0xff]  ;;  %v3400_v37 = vld [vmem:[%s8947_s21 + $0xac8] sm:$0xff] }
 0x3bb   : > { %3751 = vmatprep.subr.mxu0 %v3236_v3  ;;  %3822 = vmatprep.subr.mxu1 %v3300_v53  ;;  %v3281_v16 = vld [vmem:[%s8947_s21 + $0x710] sm:$0xff]  ;;  %v3216_v3 = vld [vmem:[%s8947_s21 + $0x508] sm:$0xff] }
 0x3bc   : > { %3752 = vmatpush2.msra.mxu0 %v3235_v20  ;;  %3823 = vmatpush2.msra.mxu1 %v3299_v1  ;;  %v3025_v1 = vmul.f32 0.01, %v2993_v15 }
 0x3bd   : > { %3753 = vmatprep.subr.mxu0 %v3234_v42  ;;  %3824 = vmatprep.subr.mxu1 %v3298_v8  ;;  %v3027_v42 = vmul.f32 0.01, %v2995_v0  ;;  %v3280_v8 = vld [vmem:[%s8947_s21 + $0x708] sm:$0xff] }
 0x3be   : > { %3754 = vmatpush2.msra.mxu0 %v3233_v21  ;;  %3825 = vmatpush2.msra.mxu1 %v3297_v54  ;;  %v10152_v21 = vld [vmem:[%s8941_s0 + $0x8] sm:$0xff]  ;;  %v3215_v54 = vld [vmem:[%s8947_s21 + $0x500] sm:$0xff] }
 0x3bf   : > { %3755 = vmatprep.subr.mxu0 %v3232_v22  ;;  %3826 = vmatprep.subr.mxu1 %v3296_v23  ;;  %v3279_v22 = vld [vmem:[%s8947_s21 + $0x700] sm:$0xff] }
 0x3c0   : > { %3756 = vmatpush2.msra.mxu0 %v3231_v24  ;;  %3827 = vmatpush2.msra.mxu1 %v3295_v29  ;;  %v2948_v24 = vrot.slane %v10152_v21, %v2915_v31  ;;  %v3041_v31 = vsel %vm3009_vm6, %v2993_v15, %v3025_v1  ;;  %v3332_v15 = vld [vmem:[%s8947_s21 + $0x8a8] sm:$0xff] }
 0x3c1   : > { %3757 = vmatprep.subr.mxu0 %v3230_v30  ;;  %3828 = vmatprep.subr.mxu1 %v3294_v32  ;;  %v2956_v32 = vrot.slane %v10152_v21, %v2923_v34  ;;  %v3392_v1 = vld [vmem:[%s8947_s21 + $0xa88] sm:$0xff] }
 0x3c2   : > { %3758 = vmatpush2.msra.mxu0 %v3229_v35  ;;  %3829 = vmatpush2.msra.mxu1 %v3293_v36  ;;  %v3342_v35 = vld [vmem:[%s8947_s21 + $0x8f8] sm:$0xff] }
 0x3c3   : > { %3759 = vmatprep.subr.mxu0 %v3228_v28  ;;  %3830 = vmatprep.subr.mxu1 %v3292_v39  ;;  %v3406_v36 = vld [vmem:[%s8947_s21 + $0xaf8] sm:$0xff]  ;;  %v3341_v39 = vld [vmem:[%s8947_s21 + $0x8f0] sm:$0xff] }
 0x3c4   : > { %3760 = vmatpush2.msra.mxu0 %v3227_v40  ;;  %3831 = vmatpush2.msra.mxu1 %v3291_v41  ;;  %v3405_v40 = vld [vmem:[%s8947_s21 + $0xaf0] sm:$0xff]  ;;  %v3340_v41 = vld [vmem:[%s8947_s21 + $0x8e8] sm:$0xff] }
 0x3c5   : > { %3761 = vmatprep.subr.mxu0 %v3226_v45  ;;  %3832 = vmatprep.subr.mxu1 %v3290_v46  ;;  %v3404_v45 = vld [vmem:[%s8947_s21 + $0xae8] sm:$0xff]  ;;  %v3339_v46 = vld [vmem:[%s8947_s21 + $0x8e0] sm:$0xff] }
 0x3c6   : > { %3762 = vmatpush2.msra.mxu0 %v3225_v49  ;;  %3833 = vmatpush2.msra.mxu1 %v3289_v51  ;;  %v3402_v49 = vld [vmem:[%s8947_s21 + $0xad8] sm:$0xff]  ;;  %v3337_v51 = vld [vmem:[%s8947_s21 + $0x8d0] sm:$0xff] }
 0x3c7   : > { %3763 = vmatprep.subr.mxu0 %v3224_v61  ;;  %3834 = vmatprep.subr.mxu1 %v3288_v38  ;;  %v3335_v38 = vld [vmem:[%s8947_s21 + $0x8c0] sm:$0xff] }
 0x3c8   : > { %3764 = vmatpush2.msra.mxu0 %v3223_v62  ;;  %3835 = vmatpush2.msra.mxu1 %v3287_v63  ;;  %v3399_v62 = vld [vmem:[%s8947_s21 + $0xac0] sm:$0xff] }
 0x3c9   : > { %3765 = vmatprep.subr.mxu0 %v3222_v43  ;;  %3836 = vmatprep.subr.mxu1 %v3286_v44  ;;  %v3334_v43 = vld [vmem:[%s8947_s21 + $0x8b8] sm:$0xff] }
 0x3ca   : > { %3766 = vmatpush2.msra.mxu0 %v3221_v57  ;;  %3837 = vmatpush2.msra.mxu1 %v3285_v58  ;;  %v3398_v44 = vld [vmem:[%s8947_s21 + $0xab8] sm:$0xff]  ;;  %v3333_v57 = vld [vmem:[%s8947_s21 + $0x8b0] sm:$0xff] }
 0x3cb   : > { %3767 = vmatprep.subr.mxu0 %v3220_v19  ;;  %3838 = vmatprep.subr.mxu1 %v3284_v2  ;;  %v10146_v53 = vpop.f32.mrf.mxu0  ;;  %v10148_v20 = vpop.f32.mrf.mxu1  ;;  %v3397_v58 = vld [vmem:[%s8947_s21 + $0xab0] sm:$0xff]  ;;  %v3396_v19 = vld [vmem:[%s8947_s21 + $0xaa8] sm:$0xff] }
 0x3cc   : > { %3768 = vmatpush2.msra.mxu0 %v3219_v4  ;;  %3839 = vmatpush2.msra.mxu1 %v3283_v5  ;;  %v3331_v4 = vld [vmem:[%s8947_s21 + $0x8a0] sm:$0xff] }
 0x3cd   : > { %3769 = vmatprep.subr.mxu0 %v3218_v11  ;;  %3840 = vmatprep.subr.mxu1 %v3282_v12  ;;  %v2689_v23 = vpop.f32.mrf.mxu0  ;;  %v2760_v29 = vpop.f32.mrf.mxu1  ;;  %v3395_v5 = vld [vmem:[%s8947_s21 + $0xaa0] sm:$0xff]  ;;  %v3330_v11 = vld [vmem:[%s8947_s21 + $0x898] sm:$0xff] }
 0x3ce   : > { %3770 = vmatpush2.msra.mxu0 %v3217_v14  ;;  %3841 = vmatpush2.msra.mxu1 %v3281_v16  ;;  %v2690_v30 = vadd.f32 %v2689_v23, %v9799_v7  ;;  %v2761_v28 = vadd.f32 %v2760_v29, %v9801_v9  ;;  %v3043_v7 = vsel %vm3011_vm7, %v2995_v0, %v3027_v42  ;;  %v3394_v12 = vld [vmem:[%s8947_s21 + $0xa98] sm:$0xff]  ;;  %v3329_v14 = vld [vmem:[%s8947_s21 + $0x890] sm:$0xff]  ;;  %v3327_v42 = vld [vmem:[%s8947_s21 + $0x880] sm:$0xff] }
 0x3cf   : > { %3771 = vmatprep.subr.mxu0 %v3216_v3  ;;  %3842 = vmatprep.subr.mxu1 %v3280_v8  ;;  %v3393_v16 = vld [vmem:[%s8947_s21 + $0xa90] sm:$0xff]  ;;  %v3328_v3 = vld [vmem:[%s8947_s21 + $0x888] sm:$0xff]  ;;  %v3391_v8 = vld [vmem:[%s8947_s21 + $0xa80] sm:$0xff] }
 0x3d0   : > { %3772 = vmatpush2.msra.mxu0 %v3215_v54  ;;  %3843 = vmatpush2.msra.mxu1 %v3279_v22  ;;  %v2998_v34 = vadd.f32 %v2948_v24, %v2690_v30  ;;  %v3000_v9 = vadd.f32 %v2956_v32, %v2761_v28  ;;  %v3326_v54 = vld [vmem:[%s8947_s21 + $0x878] sm:$0xff]  ;;  %v3325_v23 = vld [vmem:[%s8947_s21 + $0x870] sm:$0xff]  ;;  %v3324_v29 = vld [vmem:[%s8947_s21 + $0x868] sm:$0xff] }
 0x3d1   : > { %3774 = vmatmul.mubr.f32.vlgmr.msra.gmra.mxu0 %v3041_v31  ;;  %3845 = vmatmul.mubr.f32.vlgmr.msra.gmra.mxu1 %v3043_v7  ;;  %v3390_v22 = vld [vmem:[%s8947_s21 + $0xa78] sm:$0xff]  ;;  %v3389_v24 = vld [vmem:[%s8947_s21 + $0xa70] sm:$0xff]  ;;  %v3388_v30 = vld [vmem:[%s8947_s21 + $0xa68] sm:$0xff] }
 0x3d2   : > { %3851 = vmatprep.subr.mxu0 %v3342_v35  ;;  %3922 = vmatprep.subr.mxu1 %v3406_v36  ;;  %v3030_v61 = vmul.f32 0.01, %v2998_v34  ;;  %vm3014_vm8 = vcmp.gt.f32.partialorder %v2998_v34, 0.0  ;;  %v3032_v63 = vmul.f32 0.01, %v3000_v9  ;;  %vm3016_vm9 = vcmp.gt.f32.partialorder %v3000_v9, 0.0 }
 0x3d3   : > { %3852 = vmatpush1.msra.mxu0 %v3341_v39  ;;  %3923 = vmatpush1.msra.mxu1 %v3405_v40  ;;  %v3323_v32 = vld [vmem:[%s8947_s21 + $0x860] sm:$0xff]  ;;  %v3322_v36 = vld [vmem:[%s8947_s21 + $0x858] sm:$0xff]  ;;  %v3321_v31 = vld [vmem:[%s8947_s21 + $0x850] sm:$0xff] }
 0x3d4   : > { %3853 = vmatprep.subr.mxu0 %v3340_v41  ;;  %3924 = vmatprep.subr.mxu1 %v3404_v45  ;;  %v3046_v0 = vsel %vm3014_vm8, %v2998_v34, %v3030_v61  ;;  %v3048_v2 = vsel %vm3016_vm9, %v3000_v9, %v3032_v63  ;;  %v3387_v35 = vld [vmem:[%s8947_s21 + $0xa60] sm:$0xff]  ;;  %v3386_v28 = vld [vmem:[%s8947_s21 + $0xa58] sm:$0xff]  ;;  %v3385_v7 = vld [vmem:[%s8947_s21 + $0xa50] sm:$0xff] }
 0x3d5   : > { %3854 = vmatpush1.msra.mxu0 %v3339_v46  ;;  %3925 = vmatpush1.msra.mxu1 %v3403_v47  ;;  %v3320_v39 = vld [vmem:[%s8947_s21 + $0x848] sm:$0xff]  ;;  %v3319_v34 = vld [vmem:[%s8947_s21 + $0x840] sm:$0xff]  ;;  %v3318_v45 = vld [vmem:[%s8947_s21 + $0x838] sm:$0xff] }
 0x3d6   : > { %3855 = vmatprep.subr.mxu0 %v3338_v48  ;;  %3926 = vmatprep.subr.mxu1 %v3402_v49  ;;  %v3384_v40 = vld [vmem:[%s8947_s21 + $0xa48] sm:$0xff]  ;;  %v3383_v41 = vld [vmem:[%s8947_s21 + $0xa40] sm:$0xff]  ;;  %v3382_v9 = vld [vmem:[%s8947_s21 + $0xa38] sm:$0xff] }
 0x3d7   : > { %3856 = vmatpush1.msra.mxu0 %v3337_v51  ;;  %3927 = vmatpush1.msra.mxu1 %v3401_v52  ;;  %v3317_v46 = vld [vmem:[%s8947_s21 + $0x830] sm:$0xff]  ;;  %v3316_v48 = vld [vmem:[%s8947_s21 + $0x828] sm:$0xff]  ;;  %v3315_v51 = vld [vmem:[%s8947_s21 + $0x820] sm:$0xff] }
 0x3d8   : > { %3857 = vmatprep.subr.mxu0 %v3336_v56  ;;  %3928 = vmatprep.subr.mxu1 %v3400_v37  ;;  %v3381_v47 = vld [vmem:[%s8947_s21 + $0xa30] sm:$0xff]  ;;  %v3380_v49 = vld [vmem:[%s8947_s21 + $0xa28] sm:$0xff]  ;;  %v3379_v52 = vld [vmem:[%s8947_s21 + $0xa20] sm:$0xff] }
 0x3d9   : > { %3858 = vmatpush1.msra.mxu0 %v3335_v38  ;;  %3929 = vmatpush1.msra.mxu1 %v3399_v62  ;;  %v3314_v56 = vld [vmem:[%s8947_s21 + $0x818] sm:$0xff]  ;;  %v3313_v61 = vld [vmem:[%s8947_s21 + $0x810] sm:$0xff]  ;;  %v3312_v62 = vld [vmem:[%s8947_s21 + $0x808] sm:$0xff] }
 0x3da   : > { %3859 = vmatprep.subr.mxu0 %v3334_v43  ;;  %3930 = vmatprep.subr.mxu1 %v3398_v44  ;;  %v3378_v37 = vld [vmem:[%s8947_s21 + $0xa18] sm:$0xff]  ;;  %v3377_v38 = vld [vmem:[%s8947_s21 + $0xa10] sm:$0xff]  ;;  %v3376_v63 = vld [vmem:[%s8947_s21 + $0xa08] sm:$0xff] }
 0x3db   : > { %3860 = vmatpush1.msra.mxu0 %v3333_v57  ;;  %3931 = vmatpush1.msra.mxu1 %v3397_v58  ;;  %v3311_v43 = vld [vmem:[%s8947_s21 + $0x800] sm:$0xff]  ;;  %v3374_v57 = vld [vmem:[%s8947_s21 + $0x9f8] sm:$0xff] }
 0x3dc   : > { %3861 = vmatprep.subr.mxu0 %v3332_v15  ;;  %3915 = vmatprep.mubr.f32.mxu0 %v3046_v0  ;;  %v3375_v44 = vld [vmem:[%s8947_s21 + $0xa00] sm:$0xff]  ;;  %v3438_v58 = vld [vmem:[%s8947_s21 + $0xbf8] sm:$0xff]  ;;  %v3373_v15 = vld [vmem:[%s8947_s21 + $0x9f0] sm:$0xff] }
 0x3dd   : > { %3932 = vmatprep.subr.mxu1 %v3396_v19  ;;  %3986 = vmatprep.mubr.f32.mxu1 %v3048_v2  ;;  %v3437_v0 = vld [vmem:[%s8947_s21 + $0xbf0] sm:$0xff]  ;;  %v3372_v19 = vld [vmem:[%s8947_s21 + $0x9e8] sm:$0xff] }
 0x3de   : > { %3862 = vmatpush1.msra.mxu0 %v3331_v4  ;;  %3933 = vmatpush1.msra.mxu1 %v3395_v5  ;;  %v3436_v2 = vld [vmem:[%s8947_s21 + $0xbe8] sm:$0xff]  ;;  %v3371_v4 = vld [vmem:[%s8947_s21 + $0x9e0] sm:$0xff] }
 0x3df   : > { %3863 = vmatprep.subr.mxu0 %v3330_v11  ;;  %3934 = vmatprep.subr.mxu1 %v3394_v12  ;;  %v3435_v5 = vld [vmem:[%s8947_s21 + $0xbe0] sm:$0xff]  ;;  %v3370_v11 = vld [vmem:[%s8947_s21 + $0x9d8] sm:$0xff] }
 0x3e0   : > { %3864 = vmatpush1.msra.mxu0 %v3329_v14  ;;  %3935 = vmatpush1.msra.mxu1 %v3393_v16  ;;  %v3434_v12 = vld [vmem:[%s8947_s21 + $0xbd8] sm:$0xff]  ;;  %v3369_v14 = vld [vmem:[%s8947_s21 + $0x9d0] sm:$0xff] }
 0x3e1   : > { %3865 = vmatprep.subr.mxu0 %v3328_v3  ;;  %3936 = vmatprep.subr.mxu1 %v3392_v1  ;;  %v3433_v16 = vld [vmem:[%s8947_s21 + $0xbd0] sm:$0xff]  ;;  %v3368_v3 = vld [vmem:[%s8947_s21 + $0x9c8] sm:$0xff] }
 0x3e2   : > { %3866 = vmatpush1.msra.mxu0 %v3327_v42  ;;  %3937 = vmatpush1.msra.mxu1 %v3391_v8  ;;  %v3432_v1 = vld [vmem:[%s8947_s21 + $0xbc8] sm:$0xff]  ;;  %v3367_v42 = vld [vmem:[%s8947_s21 + $0x9c0] sm:$0xff] }
 0x3e3   : > { %3867 = vmatprep.subr.mxu0 %v3326_v54  ;;  %3938 = vmatprep.subr.mxu1 %v3390_v22  ;;  %v3431_v8 = vld [vmem:[%s8947_s21 + $0xbc0] sm:$0xff]  ;;  %v3366_v54 = vld [vmem:[%s8947_s21 + $0x9b8] sm:$0xff] }
 0x3e4   : > { %3868 = vmatpush1.msra.mxu0 %v3325_v23  ;;  %3939 = vmatpush1.msra.mxu1 %v3389_v24  ;;  %v3430_v22 = vld [vmem:[%s8947_s21 + $0xbb8] sm:$0xff]  ;;  %v3365_v23 = vld [vmem:[%s8947_s21 + $0x9b0] sm:$0xff] }
 0x3e5   : > { %3869 = vmatprep.subr.mxu0 %v3324_v29  ;;  %3940 = vmatprep.subr.mxu1 %v3388_v30  ;;  %v3429_v24 = vld [vmem:[%s8947_s21 + $0xbb0] sm:$0xff]  ;;  %v3364_v29 = vld [vmem:[%s8947_s21 + $0x9a8] sm:$0xff] }
 0x3e6   : > { %3870 = vmatpush1.msra.mxu0 %v3323_v32  ;;  %3941 = vmatpush1.msra.mxu1 %v3387_v35  ;;  %v3428_v30 = vld [vmem:[%s8947_s21 + $0xba8] sm:$0xff]  ;;  %v3363_v32 = vld [vmem:[%s8947_s21 + $0x9a0] sm:$0xff] }
 0x3e7   : > { %3871 = vmatprep.subr.mxu0 %v3322_v36  ;;  %3942 = vmatprep.subr.mxu1 %v3386_v28  ;;  %v3427_v35 = vld [vmem:[%s8947_s21 + $0xba0] sm:$0xff]  ;;  %v3362_v36 = vld [vmem:[%s8947_s21 + $0x998] sm:$0xff] }
 0x3e8   : > { %3872 = vmatpush1.msra.mxu0 %v3321_v31  ;;  %3943 = vmatpush1.msra.mxu1 %v3385_v7  ;;  %v3426_v28 = vld [vmem:[%s8947_s21 + $0xb98] sm:$0xff]  ;;  %v3361_v31 = vld [vmem:[%s8947_s21 + $0x990] sm:$0xff] }
 0x3e9   : > { %3873 = vmatprep.subr.mxu0 %v3320_v39  ;;  %3944 = vmatprep.subr.mxu1 %v3384_v40  ;;  %v3425_v7 = vld [vmem:[%s8947_s21 + $0xb90] sm:$0xff]  ;;  %v3360_v39 = vld [vmem:[%s8947_s21 + $0x988] sm:$0xff] }
 0x3ea   : > { %3874 = vmatpush1.msra.mxu0 %v3319_v34  ;;  %3945 = vmatpush1.msra.mxu1 %v3383_v41  ;;  %v3424_v40 = vld [vmem:[%s8947_s21 + $0xb88] sm:$0xff]  ;;  %v3359_v34 = vld [vmem:[%s8947_s21 + $0x980] sm:$0xff] }
 0x3eb   : > { %3875 = vmatprep.subr.mxu0 %v3318_v45  ;;  %3946 = vmatprep.subr.mxu1 %v3382_v9  ;;  %v3423_v41 = vld [vmem:[%s8947_s21 + $0xb80] sm:$0xff]  ;;  %v3358_v45 = vld [vmem:[%s8947_s21 + $0x978] sm:$0xff] }
 0x3ec   : > { %3876 = vmatpush1.msra.mxu0 %v3317_v46  ;;  %3947 = vmatpush1.msra.mxu1 %v3381_v47  ;;  %v3422_v9 = vld [vmem:[%s8947_s21 + $0xb78] sm:$0xff]  ;;  %v3357_v46 = vld [vmem:[%s8947_s21 + $0x970] sm:$0xff] }
 0x3ed   : > { %3877 = vmatprep.subr.mxu0 %v3316_v48  ;;  %3948 = vmatprep.subr.mxu1 %v3380_v49  ;;  %v3421_v47 = vld [vmem:[%s8947_s21 + $0xb70] sm:$0xff]  ;;  %v3356_v48 = vld [vmem:[%s8947_s21 + $0x968] sm:$0xff] }
 0x3ee   : > { %3878 = vmatpush1.msra.mxu0 %v3315_v51  ;;  %3949 = vmatpush1.msra.mxu1 %v3379_v52  ;;  %v3420_v49 = vld [vmem:[%s8947_s21 + $0xb68] sm:$0xff]  ;;  %v3355_v51 = vld [vmem:[%s8947_s21 + $0x960] sm:$0xff] }
 0x3ef   : > { %3879 = vmatprep.subr.mxu0 %v3314_v56  ;;  %3950 = vmatprep.subr.mxu1 %v3378_v37  ;;  %v3419_v52 = vld [vmem:[%s8947_s21 + $0xb60] sm:$0xff]  ;;  %v3354_v56 = vld [vmem:[%s8947_s21 + $0x958] sm:$0xff] }
 0x3f0   : > { %3880 = vmatpush1.msra.mxu0 %v3313_v61  ;;  %3951 = vmatpush1.msra.mxu1 %v3377_v38  ;;  %v3418_v37 = vld [vmem:[%s8947_s21 + $0xb58] sm:$0xff]  ;;  %v2944_v61 = vrot.slane %v10152_v21, %v2911_v6  ;;  %v3353_v38 = vld [vmem:[%s8947_s21 + $0x950] sm:$0xff]  ;;  %v3352_v6 = vld [vmem:[%s8947_s21 + $0x948] sm:$0xff] }
 0x3f1   : > { %3881 = vmatprep.subr.mxu0 %v3312_v62  ;;  %3952 = vmatprep.subr.mxu1 %v3376_v63  ;;  %v3417_v62 = vld [vmem:[%s8947_s21 + $0xb50] sm:$0xff]  ;;  %v2688_v63 = vadd.f32 %v10146_v53, %v9787_v59  ;;  %v3350_v59 = vld [vmem:[%s8947_s21 + $0x938] sm:$0xff] }
 0x3f2   : > { %3882 = vmatpush1.msra.mxu0 %v3311_v43  ;;  %3953 = vmatpush1.msra.mxu1 %v3375_v44  ;;  %v2759_v43 = vadd.f32 %v10148_v20, %v9789_v60  ;;  %v2952_v44 = vrot.slane %v10152_v21, %v2919_v13  ;;  %v3414_v60 = vld [vmem:[%s8947_s21 + $0xb38] sm:$0xff]  ;;  %v3349_v13 = vld [vmem:[%s8947_s21 + $0x930] sm:$0xff] }
 0x3f3   : > { %3883 = vmatprep.subr.mxu0 %v3374_v57  ;;  %3954 = vmatprep.subr.mxu1 %v3438_v58  ;;  %v3416_v57 = vld [vmem:[%s8947_s21 + $0xb48] sm:$0xff]  ;;  %v3351_v58 = vld [vmem:[%s8947_s21 + $0x940] sm:$0xff]  ;;  %v3413_v53 = vld [vmem:[%s8947_s21 + $0xb30] sm:$0xff]  ;;  %v2997_v20 = vadd.f32 %v2944_v61, %v2688_v63 }
 0x3f4   : > { %3884 = vmatpush2.msra.mxu0 %v3373_v15  ;;  %3955 = vmatpush2.msra.mxu1 %v3437_v0  ;;  %v3415_v15 = vld [vmem:[%s8947_s21 + $0xb40] sm:$0xff]  ;;  %v2999_v0 = vadd.f32 %v2952_v44, %v2759_v43  ;;  %v3461_v63 = vld [vmem:[%s8947_s21 + $0xcb0] sm:$0xff]  ;;  %v3460_v44 = vld [vmem:[%s8947_s21 + $0xca8] sm:$0xff] }
 0x3f5   : > { %3885 = vmatprep.subr.mxu0 %v3372_v19  ;;  %3956 = vmatprep.subr.mxu1 %v3436_v2  ;;  %v3348_v19 = vld [vmem:[%s8947_s21 + $0x928] sm:$0xff]  ;;  %vm3013_vm10 = vcmp.gt.f32.partialorder %v2997_v20, 0.0  ;;  %v3525_v43 = vld [vmem:[%s8947_s21 + $0xeb0] sm:$0xff] }
 0x3f6   : > { %3886 = vmatpush2.msra.mxu0 %v3371_v4  ;;  %3957 = vmatpush2.msra.mxu1 %v3435_v5  ;;  %v3412_v2 = vld [vmem:[%s8947_s21 + $0xb28] sm:$0xff]  ;;  %v3347_v4 = vld [vmem:[%s8947_s21 + $0x920] sm:$0xff]  ;;  %vm3015_vm11 = vcmp.gt.f32.partialorder %v2999_v0, 0.0 }
 0x3f7   : > { %3887 = vmatprep.subr.mxu0 %v3370_v11  ;;  %3958 = vmatprep.subr.mxu1 %v3434_v12  ;;  %v3411_v5 = vld [vmem:[%s8947_s21 + $0xb20] sm:$0xff]  ;;  %v3346_v11 = vld [vmem:[%s8947_s21 + $0x918] sm:$0xff] }
 0x3f8   : > { %3888 = vmatpush2.msra.mxu0 %v3369_v14  ;;  %3959 = vmatpush2.msra.mxu1 %v3433_v16  ;;  %v3410_v12 = vld [vmem:[%s8947_s21 + $0xb18] sm:$0xff]  ;;  %v3345_v14 = vld [vmem:[%s8947_s21 + $0x910] sm:$0xff] }
 0x3f9   : > { %3889 = vmatprep.subr.mxu0 %v3368_v3  ;;  %3960 = vmatprep.subr.mxu1 %v3432_v1  ;;  %v3409_v16 = vld [vmem:[%s8947_s21 + $0xb10] sm:$0xff] }
 0x3fa   : > { %3890 = vmatpush2.msra.mxu0 %v3367_v42  ;;  %3961 = vmatpush2.msra.mxu1 %v3431_v8  ;;  %v3029_v42 = vmul.f32 0.01, %v2997_v20  ;;  %v3031_v8 = vmul.f32 0.01, %v2999_v0 }
 0x3fb   : > { %3891 = vmatprep.subr.mxu0 %v3366_v54  ;;  %3962 = vmatprep.subr.mxu1 %v3430_v22  ;;  %v3344_v54 = vld [vmem:[%s8947_s21 + $0x908] sm:$0xff] }
 0x3fc   : > { %3892 = vmatpush2.msra.mxu0 %v3365_v23  ;;  %3963 = vmatpush2.msra.mxu1 %v3429_v24  ;;  %v3408_v22 = vld [vmem:[%s8947_s21 + $0xb08] sm:$0xff]  ;;  %v3343_v23 = vld [vmem:[%s8947_s21 + $0x900] sm:$0xff] }
 0x3fd   : > { %3893 = vmatprep.subr.mxu0 %v3364_v29  ;;  %3964 = vmatprep.subr.mxu1 %v3428_v30  ;;  %v3407_v24 = vld [vmem:[%s8947_s21 + $0xb00] sm:$0xff]  ;;  %v2964_v30 = vrot.slane %v10152_v21, %v2931_v50  ;;  %v3045_v50 = vsel %vm3013_vm10, %v2997_v20, %v3029_v42  ;;  %v3521_v20 = vld [vmem:[%s8947_s21 + $0xe90] sm:$0xff]  ;;  %v3516_v42 = vld [vmem:[%s8947_s21 + $0xe68] sm:$0xff] }
 0x3fe   : > { %3894 = vmatpush2.msra.mxu0 %v3363_v32  ;;  %3965 = vmatpush2.msra.mxu1 %v3427_v35 }
 0x3ff   : > { %3895 = vmatprep.subr.mxu0 %v3362_v36  ;;  %3966 = vmatprep.subr.mxu1 %v3426_v28  ;;  %v2972_v36 = vrot.slane %v10152_v21, %v2939_v55  ;;  %v3470_v28 = vld [vmem:[%s8947_s21 + $0xcf8] sm:$0xff]  ;;  %v3468_v21 = vld [vmem:[%s8947_s21 + $0xce8] sm:$0xff] }
 0x400   : > { %3896 = vmatpush2.msra.mxu0 %v3361_v31  ;;  %3967 = vmatpush2.msra.mxu1 %v3425_v7  ;;  %v3534_v31 = vld [vmem:[%s8947_s21 + $0xef8] sm:$0xff] }
 0x401   : > { %3897 = vmatprep.subr.mxu0 %v3360_v39  ;;  %3968 = vmatprep.subr.mxu1 %v3424_v40  ;;  %v3469_v39 = vld [vmem:[%s8947_s21 + $0xcf0] sm:$0xff] }
 0x402   : > { %3898 = vmatpush2.msra.mxu0 %v3359_v34  ;;  %3969 = vmatpush2.msra.mxu1 %v3423_v41  ;;  %v3533_v40 = vld [vmem:[%s8947_s21 + $0xef0] sm:$0xff]  ;;  %v3532_v34 = vld [vmem:[%s8947_s21 + $0xee8] sm:$0xff]  ;;  %v3467_v41 = vld [vmem:[%s8947_s21 + $0xce0] sm:$0xff] }
 0x403   : > { %3899 = vmatprep.subr.mxu0 %v3358_v45  ;;  %3970 = vmatprep.subr.mxu1 %v3422_v9  ;;  %v3531_v45 = vld [vmem:[%s8947_s21 + $0xee0] sm:$0xff]  ;;  %v3466_v9 = vld [vmem:[%s8947_s21 + $0xcd8] sm:$0xff] }
 0x404   : > { %3900 = vmatpush2.msra.mxu0 %v3357_v46  ;;  %3971 = vmatpush2.msra.mxu1 %v3421_v47  ;;  %v3530_v46 = vld [vmem:[%s8947_s21 + $0xed8] sm:$0xff]  ;;  %v3465_v47 = vld [vmem:[%s8947_s21 + $0xcd0] sm:$0xff] }
 0x405   : > { %3901 = vmatprep.subr.mxu0 %v3356_v48  ;;  %3972 = vmatprep.subr.mxu1 %v3420_v49  ;;  %v3529_v48 = vld [vmem:[%s8947_s21 + $0xed0] sm:$0xff]  ;;  %v3464_v49 = vld [vmem:[%s8947_s21 + $0xcc8] sm:$0xff] }
 0x406   : > { %3902 = vmatpush2.msra.mxu0 %v3355_v51  ;;  %3973 = vmatpush2.msra.mxu1 %v3419_v52  ;;  %v3528_v51 = vld [vmem:[%s8947_s21 + $0xec8] sm:$0xff] }
 0x407   : > { %3903 = vmatprep.subr.mxu0 %v3354_v56  ;;  %3974 = vmatprep.subr.mxu1 %v3418_v37  ;;  %v3463_v56 = vld [vmem:[%s8947_s21 + $0xcc0] sm:$0xff] }
 0x408   : > { %3904 = vmatpush2.msra.mxu0 %v3353_v38  ;;  %3975 = vmatpush2.msra.mxu1 %v3417_v62  ;;  %v3527_v37 = vld [vmem:[%s8947_s21 + $0xec0] sm:$0xff]  ;;  %v3462_v38 = vld [vmem:[%s8947_s21 + $0xcb8] sm:$0xff] }
 0x409   : > { %3905 = vmatprep.subr.mxu0 %v3352_v6  ;;  %3976 = vmatprep.subr.mxu1 %v3416_v57  ;;  %v3526_v62 = vld [vmem:[%s8947_s21 + $0xeb8] sm:$0xff]  ;;  %v3524_v57 = vld [vmem:[%s8947_s21 + $0xea8] sm:$0xff] }
 0x40a   : > { %3906 = vmatpush2.msra.mxu0 %v3351_v58  ;;  %3977 = vmatpush2.msra.mxu1 %v3415_v15  ;;  %v3459_v15 = vld [vmem:[%s8947_s21 + $0xca0] sm:$0xff] }
 0x40b   : > { %3907 = vmatprep.subr.mxu0 %v3350_v59  ;;  %3978 = vmatprep.subr.mxu1 %v3414_v60  ;;  %v3523_v59 = vld [vmem:[%s8947_s21 + $0xea0] sm:$0xff]  ;;  %v3458_v60 = vld [vmem:[%s8947_s21 + $0xc98] sm:$0xff] }
 0x40c   : > { %3908 = vmatpush2.msra.mxu0 %v3349_v13  ;;  %3979 = vmatpush2.msra.mxu1 %v3413_v53  ;;  %v3522_v13 = vld [vmem:[%s8947_s21 + $0xe98] sm:$0xff]  ;;  %v3457_v53 = vld [vmem:[%s8947_s21 + $0xc90] sm:$0xff] }
 0x40d   : > { %3909 = vmatprep.subr.mxu0 %v3348_v19  ;;  %3980 = vmatprep.subr.mxu1 %v3412_v2  ;;  %v10300_v3 = vpop.f32.mrf.mxu0  ;;  %v10302_v1 = vpop.f32.mrf.mxu1  ;;  %v3520_v19 = vld [vmem:[%s8947_s21 + $0xe88] sm:$0xff]  ;;  %v3455_v2 = vld [vmem:[%s8947_s21 + $0xc80] sm:$0xff] }
 0x40e   : > { %3910 = vmatpush2.msra.mxu0 %v3347_v4  ;;  %3981 = vmatpush2.msra.mxu1 %v3411_v5  ;;  %v3519_v4 = vld [vmem:[%s8947_s21 + $0xe80] sm:$0xff]  ;;  %v3454_v5 = vld [vmem:[%s8947_s21 + $0xc78] sm:$0xff] }
 0x40f   : > { %3911 = vmatprep.subr.mxu0 %v3346_v11  ;;  %3982 = vmatprep.subr.mxu1 %v3410_v12  ;;  %v2831_v29 = vpop.f32.mrf.mxu0  ;;  %v2902_v32 = vpop.f32.mrf.mxu1  ;;  %v3518_v11 = vld [vmem:[%s8947_s21 + $0xe78] sm:$0xff]  ;;  %v3453_v12 = vld [vmem:[%s8947_s21 + $0xc70] sm:$0xff] }
 0x410   : > { %3912 = vmatpush2.msra.mxu0 %v3345_v14  ;;  %3983 = vmatpush2.msra.mxu1 %v3409_v16  ;;  %v2832_v35 = vadd.f32 %v2831_v29, %v9821_v25  ;;  %v2903_v7 = vadd.f32 %v2902_v32, %v9823_v26  ;;  %v3047_v25 = vsel %vm3015_vm11, %v2999_v0, %v3031_v8  ;;  %v3456_v0 = vld [vmem:[%s8947_s21 + $0xc88] sm:$0xff]  ;;  %v3517_v14 = vld [vmem:[%s8947_s21 + $0xe70] sm:$0xff]  ;;  %v3451_v8 = vld [vmem:[%s8947_s21 + $0xc60] sm:$0xff] }
 0x411   : > { %3913 = vmatprep.subr.mxu0 %v3344_v54  ;;  %3984 = vmatprep.subr.mxu1 %v3408_v22  ;;  %v3452_v16 = vld [vmem:[%s8947_s21 + $0xc68] sm:$0xff]  ;;  %v3515_v54 = vld [vmem:[%s8947_s21 + $0xe60] sm:$0xff]  ;;  %v3450_v22 = vld [vmem:[%s8947_s21 + $0xc58] sm:$0xff] }
 0x412   : > { %3914 = vmatpush2.msra.mxu0 %v3343_v23  ;;  %3985 = vmatpush2.msra.mxu1 %v3407_v24  ;;  %v3002_v55 = vadd.f32 %v2964_v30, %v2832_v35  ;;  %v3004_v26 = vadd.f32 %v2972_v36, %v2903_v7  ;;  %v3514_v23 = vld [vmem:[%s8947_s21 + $0xe58] sm:$0xff]  ;;  %v3449_v24 = vld [vmem:[%s8947_s21 + $0xc50] sm:$0xff]  ;;  %v3448_v30 = vld [vmem:[%s8947_s21 + $0xc48] sm:$0xff] }
 0x413   : > { %3916 = vmatmul.mubr.f32.vlgmr.msra.gmra.mxu0 %v3045_v50  ;;  %3987 = vmatmul.mubr.f32.vlgmr.msra.gmra.mxu1 %v3047_v25  ;;  %v3513_v29 = vld [vmem:[%s8947_s21 + $0xe50] sm:$0xff]  ;;  %v3512_v32 = vld [vmem:[%s8947_s21 + $0xe48] sm:$0xff]  ;;  %v3447_v35 = vld [vmem:[%s8947_s21 + $0xc40] sm:$0xff] }
 0x414   : > { %3993 = vmatprep.subr.mxu0 %v3470_v28  ;;  %4064 = vmatprep.subr.mxu1 %v3534_v31  ;;  %v3034_v52 = vmul.f32 0.01, %v3002_v55  ;;  %vm3018_vm12 = vcmp.gt.f32.partialorder %v3002_v55, 0.0  ;;  %v3036_v61 = vmul.f32 0.01, %v3004_v26  ;;  %vm3020_vm13 = vcmp.gt.f32.partialorder %v3004_v26, 0.0 }
 0x415   : > { %3994 = vmatpush1.msra.mxu0 %v3469_v39  ;;  %4065 = vmatpush1.msra.mxu1 %v3533_v40  ;;  %v3511_v36 = vld [vmem:[%s8947_s21 + $0xe40] sm:$0xff]  ;;  %v3446_v28 = vld [vmem:[%s8947_s21 + $0xc38] sm:$0xff]  ;;  %v3445_v7 = vld [vmem:[%s8947_s21 + $0xc30] sm:$0xff] }
 0x416   : > { %3995 = vmatprep.subr.mxu0 %v3468_v21  ;;  %4066 = vmatprep.subr.mxu1 %v3532_v34  ;;  %v3050_v6 = vsel %vm3018_vm12, %v3002_v55, %v3034_v52  ;;  %v3052_v58 = vsel %vm3020_vm13, %v3004_v26, %v3036_v61  ;;  %v3510_v31 = vld [vmem:[%s8947_s21 + $0xe38] sm:$0xff]  ;;  %v3509_v50 = vld [vmem:[%s8947_s21 + $0xe30] sm:$0xff]  ;;  %v3444_v25 = vld [vmem:[%s8947_s21 + $0xc28] sm:$0xff] }
 0x417   : > { %3996 = vmatpush1.msra.mxu0 %v3467_v41  ;;  %4067 = vmatpush1.msra.mxu1 %v3531_v45  ;;  %v3508_v39 = vld [vmem:[%s8947_s21 + $0xe28] sm:$0xff]  ;;  %v3443_v40 = vld [vmem:[%s8947_s21 + $0xc20] sm:$0xff]  ;;  %v3442_v21 = vld [vmem:[%s8947_s21 + $0xc18] sm:$0xff] }
 0x418   : > { %3997 = vmatprep.subr.mxu0 %v3466_v9  ;;  %4068 = vmatprep.subr.mxu1 %v3530_v46  ;;  %v3507_v55 = vld [vmem:[%s8947_s21 + $0xe20] sm:$0xff]  ;;  %v3506_v34 = vld [vmem:[%s8947_s21 + $0xe18] sm:$0xff]  ;;  %v3441_v26 = vld [vmem:[%s8947_s21 + $0xc10] sm:$0xff] }
 0x419   : > { %3998 = vmatpush1.msra.mxu0 %v3465_v47  ;;  %4069 = vmatpush1.msra.mxu1 %v3529_v48  ;;  %v3505_v41 = vld [vmem:[%s8947_s21 + $0xe10] sm:$0xff]  ;;  %v3440_v45 = vld [vmem:[%s8947_s21 + $0xc08] sm:$0xff]  ;;  %v3439_v46 = vld [vmem:[%s8947_s21 + $0xc00] sm:$0xff] }
 0x41a   : > { %3999 = vmatprep.subr.mxu0 %v3464_v49  ;;  %4070 = vmatprep.subr.mxu1 %v3528_v51  ;;  %v3504_v9 = vld [vmem:[%s8947_s21 + $0xe08] sm:$0xff]  ;;  %v3503_v47 = vld [vmem:[%s8947_s21 + $0xe00] sm:$0xff]  ;;  %v3502_v48 = vld [vmem:[%s8947_s21 + $0xdf8] sm:$0xff] }
 0x41b   : > { %4000 = vmatpush1.msra.mxu0 %v3463_v56  ;;  %4071 = vmatpush1.msra.mxu1 %v3527_v37  ;;  %v3566_v49 = vld [vmem:[%s8947_s21 + $0xff8] sm:$0xff]  ;;  %v3501_v51 = vld [vmem:[%s8947_s21 + $0xdf0] sm:$0xff]  ;;  %v3500_v56 = vld [vmem:[%s8947_s21 + $0xde8] sm:$0xff] }
 0x41c   : > { %4001 = vmatprep.subr.mxu0 %v3462_v38  ;;  %4072 = vmatprep.subr.mxu1 %v3526_v62  ;;  %v3565_v52 = vld [vmem:[%s8947_s21 + $0xff0] sm:$0xff]  ;;  %v3564_v37 = vld [vmem:[%s8947_s21 + $0xfe8] sm:$0xff]  ;;  %v3499_v61 = vld [vmem:[%s8947_s21 + $0xde0] sm:$0xff] }
 0x41d   : > { %4002 = vmatpush1.msra.mxu0 %v3461_v63  ;;  %4073 = vmatpush1.msra.mxu1 %v3525_v43  ;;  %v3563_v38 = vld [vmem:[%s8947_s21 + $0xfe0] sm:$0xff]  ;;  %v3498_v62 = vld [vmem:[%s8947_s21 + $0xdd8] sm:$0xff]  ;;  %v3497_v43 = vld [vmem:[%s8947_s21 + $0xdd0] sm:$0xff] }
 0x41e   : > { %4003 = vmatprep.subr.mxu0 %v3460_v44  ;;  %4057 = vmatprep.mubr.f32.mxu0 %v3050_v6  ;;  %v3562_v63 = vld [vmem:[%s8947_s21 + $0xfd8] sm:$0xff]  ;;  %v3561_v44 = vld [vmem:[%s8947_s21 + $0xfd0] sm:$0xff]  ;;  %v3496_v6 = vld [vmem:[%s8947_s21 + $0xdc8] sm:$0xff] }
 0x41f   : > { %4074 = vmatprep.subr.mxu1 %v3524_v57  ;;  %4128 = vmatprep.mubr.f32.mxu1 %v3052_v58  ;;  %v3560_v57 = vld [vmem:[%s8947_s21 + $0xfc8] sm:$0xff]  ;;  %v3495_v58 = vld [vmem:[%s8947_s21 + $0xdc0] sm:$0xff] }
 0x420   : > { %4004 = vmatpush1.msra.mxu0 %v3459_v15  ;;  %4075 = vmatpush1.msra.mxu1 %v3523_v59  ;;  %v3559_v15 = vld [vmem:[%s8947_s21 + $0xfc0] sm:$0xff]  ;;  %v3494_v59 = vld [vmem:[%s8947_s21 + $0xdb8] sm:$0xff] }
 0x421   : > { %4005 = vmatprep.subr.mxu0 %v3458_v60  ;;  %4076 = vmatprep.subr.mxu1 %v3522_v13  ;;  %v3558_v60 = vld [vmem:[%s8947_s21 + $0xfb8] sm:$0xff]  ;;  %v3493_v13 = vld [vmem:[%s8947_s21 + $0xdb0] sm:$0xff] }
 0x422   : > { %4006 = vmatpush1.msra.mxu0 %v3457_v53  ;;  %4077 = vmatpush1.msra.mxu1 %v3521_v20  ;;  %v3557_v53 = vld [vmem:[%s8947_s21 + $0xfb0] sm:$0xff]  ;;  %v3492_v20 = vld [vmem:[%s8947_s21 + $0xda8] sm:$0xff] }
 0x423   : > { %4007 = vmatprep.subr.mxu0 %v3456_v0  ;;  %4078 = vmatprep.subr.mxu1 %v3520_v19  ;;  %v3556_v0 = vld [vmem:[%s8947_s21 + $0xfa8] sm:$0xff]  ;;  %v3491_v19 = vld [vmem:[%s8947_s21 + $0xda0] sm:$0xff] }
 0x424   : > { %4008 = vmatpush1.msra.mxu0 %v3455_v2  ;;  %4079 = vmatpush1.msra.mxu1 %v3519_v4  ;;  %v3555_v2 = vld [vmem:[%s8947_s21 + $0xfa0] sm:$0xff]  ;;  %v3490_v4 = vld [vmem:[%s8947_s21 + $0xd98] sm:$0xff] }
 0x425   : > { %4009 = vmatprep.subr.mxu0 %v3454_v5  ;;  %4080 = vmatprep.subr.mxu1 %v3518_v11  ;;  %v3554_v5 = vld [vmem:[%s8947_s21 + $0xf98] sm:$0xff]  ;;  %v3489_v11 = vld [vmem:[%s8947_s21 + $0xd90] sm:$0xff] }
 0x426   : > { %4010 = vmatpush1.msra.mxu0 %v3453_v12  ;;  %4081 = vmatpush1.msra.mxu1 %v3517_v14  ;;  %v3553_v12 = vld [vmem:[%s8947_s21 + $0xf90] sm:$0xff]  ;;  %v3488_v14 = vld [vmem:[%s8947_s21 + $0xd88] sm:$0xff] }
 0x427   : > { %4011 = vmatprep.subr.mxu0 %v3452_v16  ;;  %4082 = vmatprep.subr.mxu1 %v3516_v42  ;;  %v3552_v16 = vld [vmem:[%s8947_s21 + $0xf88] sm:$0xff]  ;;  %v3487_v42 = vld [vmem:[%s8947_s21 + $0xd80] sm:$0xff] }
 0x428   : > { %4012 = vmatpush1.msra.mxu0 %v3451_v8  ;;  %4083 = vmatpush1.msra.mxu1 %v3515_v54  ;;  %v3551_v8 = vld [vmem:[%s8947_s21 + $0xf80] sm:$0xff]  ;;  %v3486_v54 = vld [vmem:[%s8947_s21 + $0xd78] sm:$0xff] }
 0x429   : > { %4013 = vmatprep.subr.mxu0 %v3450_v22  ;;  %4084 = vmatprep.subr.mxu1 %v3514_v23  ;;  %v3550_v22 = vld [vmem:[%s8947_s21 + $0xf78] sm:$0xff]  ;;  %v3485_v23 = vld [vmem:[%s8947_s21 + $0xd70] sm:$0xff] }
 0x42a   : > { %4014 = vmatpush1.msra.mxu0 %v3449_v24  ;;  %4085 = vmatpush1.msra.mxu1 %v3513_v29  ;;  %v3549_v24 = vld [vmem:[%s8947_s21 + $0xf70] sm:$0xff]  ;;  %v3484_v29 = vld [vmem:[%s8947_s21 + $0xd68] sm:$0xff] }
 0x42b   : > { %4015 = vmatprep.subr.mxu0 %v3448_v30  ;;  %4086 = vmatprep.subr.mxu1 %v3512_v32  ;;  %v3548_v30 = vld [vmem:[%s8947_s21 + $0xf68] sm:$0xff]  ;;  %v3483_v32 = vld [vmem:[%s8947_s21 + $0xd60] sm:$0xff] }
 0x42c   : > { %4016 = vmatpush1.msra.mxu0 %v3447_v35  ;;  %4087 = vmatpush1.msra.mxu1 %v3511_v36  ;;  %v3547_v35 = vld [vmem:[%s8947_s21 + $0xf60] sm:$0xff]  ;;  %v3482_v36 = vld [vmem:[%s8947_s21 + $0xd58] sm:$0xff] }
 0x42d   : > { %4017 = vmatprep.subr.mxu0 %v3446_v28  ;;  %4088 = vmatprep.subr.mxu1 %v3510_v31  ;;  %v3546_v28 = vld [vmem:[%s8947_s21 + $0xf58] sm:$0xff] }
 0x42e   : > { %4018 = vmatpush1.msra.mxu0 %v3445_v7  ;;  %4089 = vmatpush1.msra.mxu1 %v3509_v50  ;;  %v7748_v31 = vld [vmem:[%s8941_s0 + $0x8] sm:$0xff]  ;;  %v3481_v50 = vld [vmem:[%s8947_s21 + $0xd50] sm:$0xff] }
 0x42f   : > { %4019 = vmatprep.subr.mxu0 %v3444_v25  ;;  %4090 = vmatprep.subr.mxu1 %v3508_v39  ;;  %v2960_v7 = vrot.slane %v7748_v31, %v2927_v33  ;;  %v3545_v25 = vld [vmem:[%s8947_s21 + $0xf50] sm:$0xff]  ;;  %v2830_v39 = vadd.f32 %v10300_v3, %v9807_v17  ;;  %v3480_v33 = vld [vmem:[%s8947_s21 + $0xd48] sm:$0xff]  ;;  %v3478_v17 = vld [vmem:[%s8947_s21 + $0xd38] sm:$0xff] }
 0x430   : > { %4020 = vmatpush1.msra.mxu0 %v3443_v40  ;;  %4091 = vmatpush1.msra.mxu1 %v3507_v55  ;;  %v2901_v40 = vadd.f32 %v10302_v1, %v9809_v18  ;;  %v2968_v55 = vrot.slane %v7748_v31, %v2935_v27  ;;  %v3542_v18 = vld [vmem:[%s8947_s21 + $0xf38] sm:$0xff]  ;;  %v3541_v27 = vld [vmem:[%s8947_s21 + $0xf30] sm:$0xff] }
 0x431   : > { %4021 = vmatprep.subr.mxu0 %v3442_v21  ;;  %4092 = vmatprep.subr.mxu1 %v3506_v34  ;;  %v3544_v21 = vld [vmem:[%s8947_s21 + $0xf48] sm:$0xff]  ;;  %v3479_v34 = vld [vmem:[%s8947_s21 + $0xd40] sm:$0xff]  ;;  %v3001_v3 = vadd.f32 %v2960_v7, %v2830_v39 }
 0x432   : > { %4022 = vmatpush1.msra.mxu0 %v3441_v26  ;;  %4093 = vmatpush1.msra.mxu1 %v3505_v41  ;;  %v3543_v26 = vld [vmem:[%s8947_s21 + $0xf40] sm:$0xff]  ;;  %v3003_v1 = vadd.f32 %v2968_v55, %v2901_v40  ;;  %v3476_v41 = vld [vmem:[%s8947_s21 + $0xd28] sm:$0xff] }
 0x433   : > { %4023 = vmatprep.subr.mxu0 %v3440_v45  ;;  %4094 = vmatprep.subr.mxu1 %v3504_v9  ;;  %v3540_v45 = vld [vmem:[%s8947_s21 + $0xf28] sm:$0xff]  ;;  %v3475_v9 = vld [vmem:[%s8947_s21 + $0xd20] sm:$0xff]  ;;  %vm3017_vm14 = vcmp.gt.f32.partialorder %v3001_v3, 0.0 }
 0x434   : > { %4024 = vmatpush1.msra.mxu0 %v3439_v46  ;;  %4095 = vmatpush1.msra.mxu1 %v3503_v47  ;;  %v3539_v46 = vld [vmem:[%s8947_s21 + $0xf20] sm:$0xff]  ;;  %v3474_v47 = vld [vmem:[%s8947_s21 + $0xd18] sm:$0xff]  ;;  %vm3019_vm15 = vcmp.gt.f32.partialorder %v3003_v1, 0.0 }
 0x435   : > { %4025 = vmatprep.subr.mxu0 %v3502_v48  ;;  %4096 = vmatprep.subr.mxu1 %v3566_v49  ;;  %v3538_v48 = vld [vmem:[%s8947_s21 + $0xf18] sm:$0xff]  ;;  %v3473_v49 = vld [vmem:[%s8947_s21 + $0xd10] sm:$0xff] }
 0x436   : > { %4026 = vmatpush2.msra.mxu0 %v3501_v51  ;;  %4097 = vmatpush2.msra.mxu1 %v3565_v52  ;;  %v3537_v51 = vld [vmem:[%s8947_s21 + $0xf10] sm:$0xff]  ;;  %v3033_v52 = vmul.f32 0.01, %v3001_v3 }
 0x437   : > { %4027 = vmatprep.subr.mxu0 %v3500_v56  ;;  %4098 = vmatprep.subr.mxu1 %v3564_v37  ;;  %v3035_v56 = vmul.f32 0.01, %v3003_v1  ;;  %v3472_v37 = vld [vmem:[%s8947_s21 + $0xd08] sm:$0xff] }
 0x438   : > { %4028 = vmatpush2.msra.mxu0 %v3499_v61  ;;  %4099 = vmatpush2.msra.mxu1 %v3563_v38  ;;  %v3536_v61 = vld [vmem:[%s8947_s21 + $0xf08] sm:$0xff]  ;;  %v3471_v38 = vld [vmem:[%s8947_s21 + $0xd00] sm:$0xff] }
 0x439   : > { %4029 = vmatprep.subr.mxu0 %v3498_v62  ;;  %4100 = vmatprep.subr.mxu1 %v3562_v63  ;;  %v3535_v62 = vld [vmem:[%s8947_s21 + $0xf00] sm:$0xff]  ;;  %v3049_v63 = vsel %vm3017_vm14, %v3001_v3, %v3033_v52 }
 0x43a   : > { %4030 = vmatpush2.msra.mxu0 %v3497_v43  ;;  %4101 = vmatpush2.msra.mxu1 %v3561_v44  ;;  %v3051_v43 = vsel %vm3019_vm15, %v3003_v1, %v3035_v56 }
 0x43b   : > { %4031 = vmatprep.subr.mxu0 %v3496_v6  ;;  %4102 = vmatprep.subr.mxu1 %v3560_v57 }
 0x43c   : > { %4032 = vmatpush2.msra.mxu0 %v3495_v58  ;;  %4103 = vmatpush2.msra.mxu1 %v3559_v15 }
 0x43d   : > { %4033 = vmatprep.subr.mxu0 %v3494_v59  ;;  %4104 = vmatprep.subr.mxu1 %v3558_v60 }
 0x43e   : > { %4034 = vmatpush2.msra.mxu0 %v3493_v13  ;;  %4105 = vmatpush2.msra.mxu1 %v3557_v53 }
 0x43f   : > { %4035 = vmatprep.subr.mxu0 %v3492_v20  ;;  %4106 = vmatprep.subr.mxu1 %v3556_v0 }
 0x440   : > { %4036 = vmatpush2.msra.mxu0 %v3491_v19  ;;  %4107 = vmatpush2.msra.mxu1 %v3555_v2 }
 0x441   : > { %4037 = vmatprep.subr.mxu0 %v3490_v4  ;;  %4108 = vmatprep.subr.mxu1 %v3554_v5 }
 0x442   : > { %4038 = vmatpush2.msra.mxu0 %v3489_v11  ;;  %4109 = vmatpush2.msra.mxu1 %v3553_v12 }
 0x443   : > { %4039 = vmatprep.subr.mxu0 %v3488_v14  ;;  %4110 = vmatprep.subr.mxu1 %v3552_v16 }
 0x444   : > { %4040 = vmatpush2.msra.mxu0 %v3487_v42  ;;  %4111 = vmatpush2.msra.mxu1 %v3551_v8 }
 0x445   : > { %4041 = vmatprep.subr.mxu0 %v3486_v54  ;;  %4112 = vmatprep.subr.mxu1 %v3550_v22 }
 0x446   : > { %4042 = vmatpush2.msra.mxu0 %v3485_v23  ;;  %4113 = vmatpush2.msra.mxu1 %v3549_v24 }
 0x447   : > { %4043 = vmatprep.subr.mxu0 %v3484_v29  ;;  %4114 = vmatprep.subr.mxu1 %v3548_v30  ;;  %v3053_v29 = vld [vmem:[#allocation2] sm:$0xff] }
 0x448   : > { %4044 = vmatpush2.msra.mxu0 %v3483_v32  ;;  %4115 = vmatpush2.msra.mxu1 %v3547_v35 }
 0x449   : > { %4045 = vmatprep.subr.mxu0 %v3482_v36  ;;  %4116 = vmatprep.subr.mxu1 %v3546_v28  ;;  %v3054_v36 = vld [vmem:[#allocation2 + $0x8] sm:$0xff] }
 0x44a   : > { %4046 = vmatpush2.msra.mxu0 %v3481_v50  ;;  %4117 = vmatpush2.msra.mxu1 %v3545_v25 }
 0x44b   : > { %4047 = vmatprep.subr.mxu0 %v3480_v33  ;;  %4118 = vmatprep.subr.mxu1 %v3544_v21 }
 0x44c   : > { %4048 = vmatpush2.msra.mxu0 %v3479_v34  ;;  %4119 = vmatpush2.msra.mxu1 %v3543_v26 }
 0x44d   : > { %4049 = vmatprep.subr.mxu0 %v3478_v17  ;;  %4120 = vmatprep.subr.mxu1 %v3542_v18 }
 0x44e   : > { %4050 = vmatpush2.msra.mxu0 %v3477_v10  ;;  %4121 = vmatpush2.msra.mxu1 %v3541_v27 }
 0x44f   : > { %4051 = vmatprep.subr.mxu0 %v3476_v41  ;;  %4122 = vmatprep.subr.mxu1 %v3540_v45  ;;  %v3633_v44 = vpop.f32.mrf.mxu0  ;;  %v3704_v6 = vpop.f32.mrf.mxu1 }
 0x450   : > { %4052 = vmatpush2.msra.mxu0 %v3475_v9  ;;  %4123 = vmatpush2.msra.mxu1 %v3539_v46  ;;  %v3705_v59 = vadd.f32 %v3704_v6, %v3633_v44 }
 0x451   : > { %4053 = vmatprep.subr.mxu0 %v3474_v47  ;;  %4124 = vmatprep.subr.mxu1 %v3538_v48  ;;  %v3635_v57 = vpop.f32.mrf.mxu0  ;;  %v3706_v15 = vpop.f32.mrf.mxu1 }
 0x452   : > { %4054 = vmatpush2.msra.mxu0 %v3473_v49  ;;  %4125 = vmatpush2.msra.mxu1 %v3537_v51  ;;  %v3707_v53 = vadd.f32 %v3706_v15, %v3635_v57 }
 0x453   : > { %4055 = vmatprep.subr.mxu0 %v3472_v37  ;;  %4126 = vmatprep.subr.mxu1 %v3536_v61 }
 0x454   : > { %4056 = vmatpush2.msra.mxu0 %v3471_v38  ;;  %4127 = vmatpush2.msra.mxu1 %v3535_v62 }
 0x455   : > { %4058 = vmatmul.mubr.f32.vlgmr.msra.gmra.mxu0 %v3049_v63  ;;  %4129 = vmatmul.mubr.f32.vlgmr.msra.gmra.mxu1 %v3051_v43 }
 0x491   : > { %v3775_v58 = vpop.f32.mrf.mxu0  ;;  %v3846_v60 = vpop.f32.mrf.mxu1 }
 0x492   : > { %v3776_v20 = vadd.f32 %v3775_v58, %v3705_v59 }
 0x493   : > { %v3777_v13 = vpop.f32.mrf.mxu0  ;;  %v3848_v2 = vpop.f32.mrf.mxu1 }
 0x494   : > { %v3778_v19 = vadd.f32 %v3777_v13, %v3707_v53  ;;  %v3847_v4 = vadd.f32 %v3846_v60, %v3776_v20 }
 0x496   : > { %v3849_v12 = vadd.f32 %v3848_v2, %v3778_v19 }
 0x4d3   : > { %v3917_v0 = vpop.f32.mrf.mxu0  ;;  %v3988_v5 = vpop.f32.mrf.mxu1 }
 0x4d4   : > { %v3918_v14 = vadd.f32 %v3917_v0, %v3847_v4 }
 0x4d5   : > { %v3919_v11 = vpop.f32.mrf.mxu0  ;;  %v3990_v42 = vpop.f32.mrf.mxu1 }
 0x4d6   : > { %v3920_v16 = vadd.f32 %v3919_v11, %v3849_v12  ;;  %v3989_v8 = vadd.f32 %v3988_v5, %v3918_v14 }
 0x4d8   : > { %v3991_v23 = vadd.f32 %v3990_v42, %v3920_v16 }
 0x515   : > { %v4059_v54 = vpop.f32.mrf.mxu0  ;;  %v4130_v22 = vpop.f32.mrf.mxu1 }
 0x516   : > { %v4060_v24 = vadd.f32 %v4059_v54, %v3989_v8 }
 0x517   : > { %v4061_v30 = vpop.f32.mrf.mxu0  ;;  %v4132_v28 = vpop.f32.mrf.mxu1 }
 0x518   : > { %v4131_v32 = vadd.f32 %v4130_v22, %v4060_v24  ;;  %v4062_v35 = vadd.f32 %v4061_v30, %v3991_v23 }
 0x51a   : > { %v4135_v31 = vadd.f32 %v4131_v32, %v3053_v29  ;;  %v4133_v7 = vadd.f32 %v4132_v28, %v4062_v35 }
 0x51c   : > { %4137 = vst [vmem:[#allocation2] sm:$0xff] %v4135_v31  ;;  %v4136_v50 = vadd.f32 %v4133_v7, %v3054_v36 }
 0x51e   : > { %4138 = vst [vmem:[#allocation2 + $0x8] sm:$0xff] %v4136_v50 }
 0x51f PF: > { %s11858_s4 = sld [smem:[#allocation46_spill]] }
 0x525   : > { %p7526_p5 = scmp.ne.s32.totalorder %s11858_s4, 1 }
 0x527   : > { %4142 = sbr.rel (%p7526_p5) target bundleno = 1359 (0x54f), region = 152 }
 0x52c   : > { %v4147_v25 = vlaneseq  ;;  %v4145_v40 = vld [vmem:[#allocation17] sm:$0x3]  ;;  %v4143_v21 = vld [vmem:[#allocation2] sm:$0xff] }
 0x52d   : > { %v4144_v34 = vld [vmem:[#allocation2 + $0x8] sm:$0xff]  ;;  %v4163_v45 = vld [vmem:[#allocation10] sm:$0xff] }
 0x52e   : > { %v4148_v39 = vshrl.u32 %v4147_v25, 7 }
 0x530   : > { %v4149_v55 = vsub.s32 0, %v4148_v39  ;;  %v4153_v33 = vsub.s32 1, %v4148_v39 }
 0x532   : > { %v4150_v26 = vrot.slane %v4145_v40, %v4149_v55  ;;  %v4154_v17 = vrot.slane %v4145_v40, %v4153_v33 }
 0x534   : > { %v4157_v18 = vadd.f32 %v4150_v26, %v4143_v21  ;;  %v4158_v10 = vadd.f32 %v4154_v17, %v4144_v34 }
 0x536   : > { %v4159_v27 = vmax.f32 %v4157_v18, 0.0  ;;  %v4160_v3 = vmax.f32 %v4158_v10, 0.0 }
 0x538   : > { %4161 = vst [vmem:[#allocation26] sm:$0xff] %v4159_v27  ;;  %4162 = vst [vmem:[#allocation27] sm:$0xff] %v4160_v3  ;;  %v4164_v1 = vmul.f32 0.5, %v4160_v3 }
 0x53a   : > { %v4165_v41 = vmul.f32 1.442695, %v4164_v1 }
 0x53c   : > { %7749 = vpow2.f32 %v4165_v41 }
 0x549   : > { %v7750_v9 = vpop.eup %7749 }
 0x54a   : > { %v4167_v46 = vmul.f32 %v7750_v9, %v4163_v45 }
 0x54c   : > { %v4168_v47 = vadd.f32 %v4167_v46, %v4159_v27 }
 0x54e   : > { %4169 = vst [vmem:[#allocation3] sm:$0xff] %v4168_v47 }
 0x54f PF: > { %s11859_s15 = sld [smem:[#allocation46_spill]] }
 0x555   : > { %p7527_p6 = scmp.lt.s32.totalorder %s11859_s15, 2 }
 0x557   : > { %4173 = sbr.rel (%p7527_p6) target bundleno = 2144 (0x860), region = 156 }
 0x55c   : > { %v4673_v48 = vld [vmem:[%s8960_s29 + $0x788] sm:$0xff]  ;;  %v4675_v49 = vld [vmem:[%s8960_s29 + $0x798] sm:$0xff]  ;;  %v4672_v51 = vld [vmem:[%s8960_s29 + $0x780] sm:$0xff] }
 0x55d   : > { %4688 = vmatprep.subr.mxu0 %v4673_v48  ;;  %4759 = vmatprep.subr.mxu1 %v4675_v49  ;;  %v4674_v52 = vld [vmem:[%s8960_s29 + $0x790] sm:$0xff]  ;;  %v4657_v56 = vld [vmem:[%s8960_s29 + $0x708] sm:$0xff]  ;;  %v4659_v37 = vld [vmem:[%s8960_s29 + $0x718] sm:$0xff] }
 0x55e   : > { %4689 = vmatpush1.msra.mxu0 %v4672_v51  ;;  %4760 = vmatpush1.msra.mxu1 %v4674_v52  ;;  %v4656_v61 = vld [vmem:[%s8960_s29 + $0x700] sm:$0xff]  ;;  %v4658_v38 = vld [vmem:[%s8960_s29 + $0x710] sm:$0xff]  ;;  %v4641_v62 = vld [vmem:[%s8960_s29 + $0x688] sm:$0xff]  ;;  %v8369_v51 = vmov 0.0  }
 0x55f   : > { %4690 = vmatprep.subr.mxu0 %v4657_v56  ;;  %4761 = vmatprep.subr.mxu1 %v4659_v37  ;;  %v4643_v63 = vld [vmem:[%s8960_s29 + $0x698] sm:$0xff]  ;;  %v4640_v43 = vld [vmem:[%s8960_s29 + $0x680] sm:$0xff]  ;;  %v4642_v44 = vld [vmem:[%s8960_s29 + $0x690] sm:$0xff] }
 0x560   : > { %4691 = vmatpush1.msra.mxu0 %v4656_v61  ;;  %4762 = vmatpush1.msra.mxu1 %v4658_v38  ;;  %v4625_v6 = vld [vmem:[%s8960_s29 + $0x608] sm:$0xff]  ;;  %v4627_v57 = vld [vmem:[%s8960_s29 + $0x618] sm:$0xff]  ;;  %v4624_v58 = vld [vmem:[%s8960_s29 + $0x600] sm:$0xff] }
 0x561   : > { %4692 = vmatprep.subr.mxu0 %v4641_v62  ;;  %4763 = vmatprep.subr.mxu1 %v4643_v63  ;;  %v4626_v15 = vld [vmem:[%s8960_s29 + $0x610] sm:$0xff]  ;;  %v4609_v59 = vld [vmem:[%s8960_s29 + $0x588] sm:$0xff]  ;;  %v4611_v60 = vld [vmem:[%s8960_s29 + $0x598] sm:$0xff] }
 0x562   : > { %4693 = vmatpush1.msra.mxu0 %v4640_v43  ;;  %4764 = vmatpush1.msra.mxu1 %v4642_v44  ;;  %v4608_v13 = vld [vmem:[%s8960_s29 + $0x580] sm:$0xff]  ;;  %v4610_v53 = vld [vmem:[%s8960_s29 + $0x590] sm:$0xff]  ;;  %v4593_v20 = vld [vmem:[%s8960_s29 + $0x508] sm:$0xff] }
 0x563   : > { %4694 = vmatprep.subr.mxu0 %v4625_v6  ;;  %4765 = vmatprep.subr.mxu1 %v4627_v57  ;;  %v4595_v0 = vld [vmem:[%s8960_s29 + $0x518] sm:$0xff]  ;;  %v4592_v19 = vld [vmem:[%s8960_s29 + $0x500] sm:$0xff]  ;;  %v4594_v2 = vld [vmem:[%s8960_s29 + $0x510] sm:$0xff] }
 0x564   : > { %4695 = vmatpush1.msra.mxu0 %v4624_v58  ;;  %4766 = vmatpush1.msra.mxu1 %v4626_v15  ;;  %v4577_v4 = vld [vmem:[%s8960_s29 + $0x488] sm:$0xff]  ;;  %v4579_v5 = vld [vmem:[%s8960_s29 + $0x498] sm:$0xff]  ;;  %v4576_v11 = vld [vmem:[%s8960_s29 + $0x480] sm:$0xff] }
 0x565   : > { %4696 = vmatprep.subr.mxu0 %v4609_v59  ;;  %4767 = vmatprep.subr.mxu1 %v4611_v60  ;;  %v4578_v12 = vld [vmem:[%s8960_s29 + $0x490] sm:$0xff]  ;;  %v4561_v14 = vld [vmem:[%s8960_s29 + $0x408] sm:$0xff]  ;;  %v4563_v16 = vld [vmem:[%s8960_s29 + $0x418] sm:$0xff] }
 0x566   : > { %4697 = vmatpush1.msra.mxu0 %v4608_v13  ;;  %4768 = vmatpush1.msra.mxu1 %v4610_v53  ;;  %v4560_v42 = vld [vmem:[%s8960_s29 + $0x400] sm:$0xff]  ;;  %v4562_v8 = vld [vmem:[%s8960_s29 + $0x410] sm:$0xff]  ;;  %v4545_v54 = vld [vmem:[%s8960_s29 + $0x388] sm:$0xff] }
 0x567   : > { %4698 = vmatprep.subr.mxu0 %v4593_v20  ;;  %4769 = vmatprep.subr.mxu1 %v4595_v0  ;;  %v4547_v22 = vld [vmem:[%s8960_s29 + $0x398] sm:$0xff]  ;;  %v4544_v23 = vld [vmem:[%s8960_s29 + $0x380] sm:$0xff]  ;;  %v4546_v24 = vld [vmem:[%s8960_s29 + $0x390] sm:$0xff] }
 0x568   : > { %4699 = vmatpush1.msra.mxu0 %v4592_v19  ;;  %4770 = vmatpush1.msra.mxu1 %v4594_v2  ;;  %v4529_v29 = vld [vmem:[%s8960_s29 + $0x308] sm:$0xff]  ;;  %v4531_v30 = vld [vmem:[%s8960_s29 + $0x318] sm:$0xff]  ;;  %v4528_v32 = vld [vmem:[%s8960_s29 + $0x300] sm:$0xff] }
 0x569   : > { %4700 = vmatprep.subr.mxu0 %v4577_v4  ;;  %4771 = vmatprep.subr.mxu1 %v4579_v5  ;;  %v4530_v35 = vld [vmem:[%s8960_s29 + $0x310] sm:$0xff]  ;;  %v4513_v36 = vld [vmem:[%s8960_s29 + $0x288] sm:$0xff]  ;;  %v4515_v28 = vld [vmem:[%s8960_s29 + $0x298] sm:$0xff] }
 0x56a   : > { %4701 = vmatpush1.msra.mxu0 %v4576_v11  ;;  %4772 = vmatpush1.msra.mxu1 %v4578_v12  ;;  %v4512_v31 = vld [vmem:[%s8960_s29 + $0x280] sm:$0xff]  ;;  %v4514_v7 = vld [vmem:[%s8960_s29 + $0x290] sm:$0xff]  ;;  %v4497_v50 = vld [vmem:[%s8960_s29 + $0x208] sm:$0xff] }
 0x56b   : > { %4702 = vmatprep.subr.mxu0 %v4561_v14  ;;  %4773 = vmatprep.subr.mxu1 %v4563_v16  ;;  %v4499_v25 = vld [vmem:[%s8960_s29 + $0x218] sm:$0xff]  ;;  %v4496_v39 = vld [vmem:[%s8960_s29 + $0x200] sm:$0xff]  ;;  %v4498_v40 = vld [vmem:[%s8960_s29 + $0x210] sm:$0xff] }
 0x56c   : > { %4703 = vmatpush1.msra.mxu0 %v4560_v42  ;;  %4774 = vmatpush1.msra.mxu1 %v4562_v8  ;;  %v4481_v55 = vld [vmem:[%s8960_s29 + $0x188] sm:$0xff]  ;;  %v4483_v33 = vld [vmem:[%s8960_s29 + $0x198] sm:$0xff]  ;;  %v4480_v21 = vld [vmem:[%s8960_s29 + $0x180] sm:$0xff] }
 0x56d   : > { %4704 = vmatprep.subr.mxu0 %v4545_v54  ;;  %4775 = vmatprep.subr.mxu1 %v4547_v22  ;;  %v4482_v34 = vld [vmem:[%s8960_s29 + $0x190] sm:$0xff]  ;;  %v4465_v26 = vld [vmem:[%s8960_s29 + $0x108] sm:$0xff]  ;;  %v4467_v17 = vld [vmem:[%s8960_s29 + $0x118] sm:$0xff] }
 0x56e   : > { %4705 = vmatpush1.msra.mxu0 %v4544_v23  ;;  %4776 = vmatpush1.msra.mxu1 %v4546_v24  ;;  %v4464_v18 = vld [vmem:[%s8960_s29 + $0x100] sm:$0xff]  ;;  %v4466_v10 = vld [vmem:[%s8960_s29 + $0x110] sm:$0xff]  ;;  %v4449_v27 = vld [vmem:[%s8960_s29 + $0x88] sm:$0xff] }
 0x56f   : > { %4706 = vmatprep.subr.mxu0 %v4529_v29  ;;  %4777 = vmatprep.subr.mxu1 %v4531_v30  ;;  %v4451_v3 = vld [vmem:[%s8960_s29 + $0x98] sm:$0xff]  ;;  %v4448_v1 = vld [vmem:[%s8960_s29 + $0x80] sm:$0xff]  ;;  %v4450_v41 = vld [vmem:[%s8960_s29 + $0x90] sm:$0xff] }
 0x570   : > { %4707 = vmatpush1.msra.mxu0 %v4528_v32  ;;  %4778 = vmatpush1.msra.mxu1 %v4530_v35  ;;  %v4433_v45 = vld [vmem:[%s8960_s29 + $0x8] sm:$0xff]  ;;  %v4435_v9 = vld [vmem:[%s8960_s29 + $0x18] sm:$0xff]  ;;  %v4432_v46 = vld [vmem:[%s8960_s29] sm:$0xff] }
 0x571   : > { %4708 = vmatprep.subr.mxu0 %v4513_v36  ;;  %4779 = vmatprep.subr.mxu1 %v4515_v28  ;;  %v4434_v47 = vld [vmem:[%s8960_s29 + $0x10] sm:$0xff]  ;;  %v4677_v49 = vld [vmem:[%s8960_s29 + $0x7a8] sm:$0xff]  ;;  %v4679_v52 = vld [vmem:[%s8960_s29 + $0x7b8] sm:$0xff] }
 0x572   : > { %4709 = vmatpush1.msra.mxu0 %v4512_v31  ;;  %4780 = vmatpush1.msra.mxu1 %v4514_v7  ;;  %v10521_v48 = vld [vmem:[#allocation8] sm:$0xff]  ;;  %v4676_v56 = vld [vmem:[%s8960_s29 + $0x7a0] sm:$0xff]  ;;  %v4663_v38 = vld [vmem:[%s8960_s29 + $0x738] sm:$0xff] }
 0x573   : > { %4710 = vmatprep.subr.mxu0 %v4497_v50  ;;  %4781 = vmatprep.subr.mxu1 %v4499_v25  ;;  %v4678_v37 = vld [vmem:[%s8960_s29 + $0x7b0] sm:$0xff]  ;;  %v4661_v61 = vld [vmem:[%s8960_s29 + $0x728] sm:$0xff]  ;;  %v4660_v62 = vld [vmem:[%s8960_s29 + $0x720] sm:$0xff] }
 0x574   : > { %4711 = vmatpush1.msra.mxu0 %v4496_v39  ;;  %4782 = vmatpush1.msra.mxu1 %v4498_v40  ;;  %v4662_v63 = vld [vmem:[%s8960_s29 + $0x730] sm:$0xff]  ;;  %v4645_v43 = vld [vmem:[%s8960_s29 + $0x6a8] sm:$0xff]  ;;  %v4647_v44 = vld [vmem:[%s8960_s29 + $0x6b8] sm:$0xff] }
 0x575   : > { %4712 = vmatprep.subr.mxu0 %v4481_v55  ;;  %4783 = vmatprep.subr.mxu1 %v4483_v33  ;;  %v4644_v6 = vld [vmem:[%s8960_s29 + $0x6a0] sm:$0xff]  ;;  %v4646_v57 = vld [vmem:[%s8960_s29 + $0x6b0] sm:$0xff]  ;;  %v4629_v58 = vld [vmem:[%s8960_s29 + $0x628] sm:$0xff] }
 0x576   : > { %4713 = vmatpush1.msra.mxu0 %v4480_v21  ;;  %4784 = vmatpush1.msra.mxu1 %v4482_v34  ;;  %v4631_v15 = vld [vmem:[%s8960_s29 + $0x638] sm:$0xff]  ;;  %v4628_v59 = vld [vmem:[%s8960_s29 + $0x620] sm:$0xff]  ;;  %v4630_v60 = vld [vmem:[%s8960_s29 + $0x630] sm:$0xff] }
 0x577   : > { %4714 = vmatprep.subr.mxu0 %v4465_v26  ;;  %4785 = vmatprep.subr.mxu1 %v4467_v17  ;;  %v4613_v13 = vld [vmem:[%s8960_s29 + $0x5a8] sm:$0xff]  ;;  %v4615_v53 = vld [vmem:[%s8960_s29 + $0x5b8] sm:$0xff]  ;;  %v4612_v20 = vld [vmem:[%s8960_s29 + $0x5a0] sm:$0xff] }
 0x578   : > { %4715 = vmatpush1.msra.mxu0 %v4464_v18  ;;  %4786 = vmatpush1.msra.mxu1 %v4466_v10  ;;  %v4614_v0 = vld [vmem:[%s8960_s29 + $0x5b0] sm:$0xff]  ;;  %v4597_v19 = vld [vmem:[%s8960_s29 + $0x528] sm:$0xff]  ;;  %v4599_v2 = vld [vmem:[%s8960_s29 + $0x538] sm:$0xff] }
 0x579   : > { %4716 = vmatprep.subr.mxu0 %v4449_v27  ;;  %4787 = vmatprep.subr.mxu1 %v4451_v3  ;;  %v4596_v4 = vld [vmem:[%s8960_s29 + $0x520] sm:$0xff]  ;;  %v4598_v5 = vld [vmem:[%s8960_s29 + $0x530] sm:$0xff]  ;;  %v4581_v11 = vld [vmem:[%s8960_s29 + $0x4a8] sm:$0xff] }
 0x57a   : > { %4717 = vmatpush1.msra.mxu0 %v4448_v1  ;;  %4788 = vmatpush1.msra.mxu1 %v4450_v41  ;;  %v4583_v12 = vld [vmem:[%s8960_s29 + $0x4b8] sm:$0xff]  ;;  %v4580_v14 = vld [vmem:[%s8960_s29 + $0x4a0] sm:$0xff]  ;;  %v4582_v16 = vld [vmem:[%s8960_s29 + $0x4b0] sm:$0xff] }
 0x57b   : > { %4718 = vmatprep.subr.mxu0 %v4433_v45  ;;  %4789 = vmatprep.subr.mxu1 %v4435_v9  ;;  %v4565_v42 = vld [vmem:[%s8960_s29 + $0x428] sm:$0xff]  ;;  %v4567_v8 = vld [vmem:[%s8960_s29 + $0x438] sm:$0xff]  ;;  %v4564_v54 = vld [vmem:[%s8960_s29 + $0x420] sm:$0xff] }
 0x57c   : > { %4719 = vmatpush1.msra.mxu0 %v4432_v46  ;;  %4752 = vmatprep.mubr.f32.mxu0 %v8369_v51  ;;  %v4566_v22 = vld [vmem:[%s8960_s29 + $0x430] sm:$0xff]  ;;  %v4549_v23 = vld [vmem:[%s8960_s29 + $0x3a8] sm:$0xff]  ;;  %v4551_v24 = vld [vmem:[%s8960_s29 + $0x3b8] sm:$0xff] }
 0x57d   : > { %4790 = vmatpush1.msra.mxu1 %v4434_v47  ;;  %4753 = vmatmul.mubr.f32.vlgmr.msra.gmra.mxu0 %v10521_v48  ;;  %v4548_v29 = vld [vmem:[%s8960_s29 + $0x3a0] sm:$0xff]  ;;  %v4550_v30 = vld [vmem:[%s8960_s29 + $0x3b0] sm:$0xff]  ;;  %v4533_v32 = vld [vmem:[%s8960_s29 + $0x328] sm:$0xff] }
 0x57e   : > { %4823 = vmatprep.mubr.f32.mxu1 %v8369_v51  ;;  %4830 = vmatprep.subr.mxu0 %v4677_v49  ;;  %v4535_v35 = vld [vmem:[%s8960_s29 + $0x338] sm:$0xff]  ;;  %v4532_v36 = vld [vmem:[%s8960_s29 + $0x320] sm:$0xff]  ;;  %v4534_v28 = vld [vmem:[%s8960_s29 + $0x330] sm:$0xff] }
 0x57f   : > { %4901 = vmatprep.subr.mxu1 %v4679_v52  ;;  %4824 = vmatmul.mubr.f32.vlgmr.msra.gmra.mxu1 %v10521_v48  ;;  %v4517_v31 = vld [vmem:[%s8960_s29 + $0x2a8] sm:$0xff]  ;;  %v4519_v7 = vld [vmem:[%s8960_s29 + $0x2b8] sm:$0xff]  ;;  %v4516_v50 = vld [vmem:[%s8960_s29 + $0x2a0] sm:$0xff] }
 0x580   : > { %4831 = vmatpush1.msra.mxu0 %v4676_v56  ;;  %4902 = vmatpush1.msra.mxu1 %v4678_v37  ;;  %v4518_v25 = vld [vmem:[%s8960_s29 + $0x2b0] sm:$0xff]  ;;  %v4501_v39 = vld [vmem:[%s8960_s29 + $0x228] sm:$0xff]  ;;  %v4503_v40 = vld [vmem:[%s8960_s29 + $0x238] sm:$0xff] }
 0x581   : > { %4832 = vmatprep.subr.mxu0 %v4661_v61  ;;  %4903 = vmatprep.subr.mxu1 %v4663_v38  ;;  %v4500_v55 = vld [vmem:[%s8960_s29 + $0x220] sm:$0xff]  ;;  %v4502_v33 = vld [vmem:[%s8960_s29 + $0x230] sm:$0xff]  ;;  %v4485_v21 = vld [vmem:[%s8960_s29 + $0x1a8] sm:$0xff] }
 0x582   : > { %4833 = vmatpush1.msra.mxu0 %v4660_v62  ;;  %4904 = vmatpush1.msra.mxu1 %v4662_v63  ;;  %v4487_v34 = vld [vmem:[%s8960_s29 + $0x1b8] sm:$0xff]  ;;  %v4484_v26 = vld [vmem:[%s8960_s29 + $0x1a0] sm:$0xff]  ;;  %v4486_v17 = vld [vmem:[%s8960_s29 + $0x1b0] sm:$0xff] }
 0x583   : > { %4834 = vmatprep.subr.mxu0 %v4645_v43  ;;  %4905 = vmatprep.subr.mxu1 %v4647_v44  ;;  %v4469_v18 = vld [vmem:[%s8960_s29 + $0x128] sm:$0xff]  ;;  %v4471_v10 = vld [vmem:[%s8960_s29 + $0x138] sm:$0xff]  ;;  %v4468_v27 = vld [vmem:[%s8960_s29 + $0x120] sm:$0xff] }
 0x584   : > { %4835 = vmatpush1.msra.mxu0 %v4644_v6  ;;  %4906 = vmatpush1.msra.mxu1 %v4646_v57  ;;  %v4470_v3 = vld [vmem:[%s8960_s29 + $0x130] sm:$0xff]  ;;  %v4453_v1 = vld [vmem:[%s8960_s29 + $0xa8] sm:$0xff]  ;;  %v4455_v41 = vld [vmem:[%s8960_s29 + $0xb8] sm:$0xff] }
 0x585   : > { %4836 = vmatprep.subr.mxu0 %v4629_v58  ;;  %4907 = vmatprep.subr.mxu1 %v4631_v15  ;;  %v4452_v45 = vld [vmem:[%s8960_s29 + $0xa0] sm:$0xff]  ;;  %v4454_v9 = vld [vmem:[%s8960_s29 + $0xb0] sm:$0xff]  ;;  %v4437_v46 = vld [vmem:[%s8960_s29 + $0x28] sm:$0xff] }
 0x586   : > { %4837 = vmatpush1.msra.mxu0 %v4628_v59  ;;  %4908 = vmatpush1.msra.mxu1 %v4630_v60  ;;  %v4439_v47 = vld [vmem:[%s8960_s29 + $0x38] sm:$0xff]  ;;  %v4436_v49 = vld [vmem:[%s8960_s29 + $0x20] sm:$0xff]  ;;  %v4438_v52 = vld [vmem:[%s8960_s29 + $0x30] sm:$0xff] }
 0x587   : > { %4838 = vmatprep.subr.mxu0 %v4613_v13  ;;  %4909 = vmatprep.subr.mxu1 %v4615_v53  ;;  %v4681_v56 = vld [vmem:[%s8960_s29 + $0x7c8] sm:$0xff]  ;;  %v4683_v37 = vld [vmem:[%s8960_s29 + $0x7d8] sm:$0xff]  ;;  %v4680_v61 = vld [vmem:[%s8960_s29 + $0x7c0] sm:$0xff] }
 0x588   : > { %4839 = vmatpush1.msra.mxu0 %v4612_v20  ;;  %4910 = vmatpush1.msra.mxu1 %v4614_v0  ;;  %v4682_v38 = vld [vmem:[%s8960_s29 + $0x7d0] sm:$0xff]  ;;  %v4665_v62 = vld [vmem:[%s8960_s29 + $0x748] sm:$0xff]  ;;  %v4667_v63 = vld [vmem:[%s8960_s29 + $0x758] sm:$0xff] }
 0x589   : > { %4840 = vmatprep.subr.mxu0 %v4597_v19  ;;  %4911 = vmatprep.subr.mxu1 %v4599_v2  ;;  %v4664_v43 = vld [vmem:[%s8960_s29 + $0x740] sm:$0xff]  ;;  %v4666_v44 = vld [vmem:[%s8960_s29 + $0x750] sm:$0xff]  ;;  %v4649_v6 = vld [vmem:[%s8960_s29 + $0x6c8] sm:$0xff] }
 0x58a   : > { %4841 = vmatpush1.msra.mxu0 %v4596_v4  ;;  %4912 = vmatpush1.msra.mxu1 %v4598_v5  ;;  %v4651_v57 = vld [vmem:[%s8960_s29 + $0x6d8] sm:$0xff]  ;;  %v4648_v58 = vld [vmem:[%s8960_s29 + $0x6c0] sm:$0xff]  ;;  %v4650_v15 = vld [vmem:[%s8960_s29 + $0x6d0] sm:$0xff] }
 0x58b   : > { %4842 = vmatprep.subr.mxu0 %v4581_v11  ;;  %4913 = vmatprep.subr.mxu1 %v4583_v12  ;;  %v4633_v59 = vld [vmem:[%s8960_s29 + $0x648] sm:$0xff]  ;;  %v4635_v60 = vld [vmem:[%s8960_s29 + $0x658] sm:$0xff]  ;;  %v4632_v13 = vld [vmem:[%s8960_s29 + $0x640] sm:$0xff] }
 0x58c   : > { %4843 = vmatpush1.msra.mxu0 %v4580_v14  ;;  %4914 = vmatpush1.msra.mxu1 %v4582_v16  ;;  %v4634_v53 = vld [vmem:[%s8960_s29 + $0x650] sm:$0xff]  ;;  %v4617_v20 = vld [vmem:[%s8960_s29 + $0x5c8] sm:$0xff]  ;;  %v4619_v0 = vld [vmem:[%s8960_s29 + $0x5d8] sm:$0xff] }
 0x58d   : > { %4844 = vmatprep.subr.mxu0 %v4565_v42  ;;  %4915 = vmatprep.subr.mxu1 %v4567_v8  ;;  %v4616_v19 = vld [vmem:[%s8960_s29 + $0x5c0] sm:$0xff]  ;;  %v4618_v2 = vld [vmem:[%s8960_s29 + $0x5d0] sm:$0xff]  ;;  %v4601_v4 = vld [vmem:[%s8960_s29 + $0x548] sm:$0xff] }
 0x58e   : > { %4845 = vmatpush1.msra.mxu0 %v4564_v54  ;;  %4916 = vmatpush1.msra.mxu1 %v4566_v22  ;;  %v4603_v5 = vld [vmem:[%s8960_s29 + $0x558] sm:$0xff]  ;;  %v4600_v11 = vld [vmem:[%s8960_s29 + $0x540] sm:$0xff]  ;;  %v4602_v12 = vld [vmem:[%s8960_s29 + $0x550] sm:$0xff] }
 0x58f   : > { %4846 = vmatprep.subr.mxu0 %v4549_v23  ;;  %4917 = vmatprep.subr.mxu1 %v4551_v24  ;;  %v4585_v14 = vld [vmem:[%s8960_s29 + $0x4c8] sm:$0xff]  ;;  %v4587_v16 = vld [vmem:[%s8960_s29 + $0x4d8] sm:$0xff]  ;;  %v4584_v42 = vld [vmem:[%s8960_s29 + $0x4c0] sm:$0xff] }
 0x590   : > { %4847 = vmatpush1.msra.mxu0 %v4548_v29  ;;  %4918 = vmatpush1.msra.mxu1 %v4550_v30  ;;  %v4586_v8 = vld [vmem:[%s8960_s29 + $0x4d0] sm:$0xff]  ;;  %v4569_v54 = vld [vmem:[%s8960_s29 + $0x448] sm:$0xff]  ;;  %v4571_v22 = vld [vmem:[%s8960_s29 + $0x458] sm:$0xff] }
 0x591   : > { %4848 = vmatprep.subr.mxu0 %v4533_v32  ;;  %4919 = vmatprep.subr.mxu1 %v4535_v35  ;;  %v4568_v23 = vld [vmem:[%s8960_s29 + $0x440] sm:$0xff]  ;;  %v4570_v24 = vld [vmem:[%s8960_s29 + $0x450] sm:$0xff]  ;;  %v4553_v29 = vld [vmem:[%s8960_s29 + $0x3c8] sm:$0xff] }
 0x592   : > { %4849 = vmatpush1.msra.mxu0 %v4532_v36  ;;  %4920 = vmatpush1.msra.mxu1 %v4534_v28  ;;  %v4555_v30 = vld [vmem:[%s8960_s29 + $0x3d8] sm:$0xff]  ;;  %v4552_v32 = vld [vmem:[%s8960_s29 + $0x3c0] sm:$0xff]  ;;  %v4554_v35 = vld [vmem:[%s8960_s29 + $0x3d0] sm:$0xff] }
 0x593   : > { %4850 = vmatprep.subr.mxu0 %v4517_v31  ;;  %4921 = vmatprep.subr.mxu1 %v4519_v7  ;;  %v4537_v36 = vld [vmem:[%s8960_s29 + $0x348] sm:$0xff]  ;;  %v4539_v28 = vld [vmem:[%s8960_s29 + $0x358] sm:$0xff]  ;;  %v4536_v31 = vld [vmem:[%s8960_s29 + $0x340] sm:$0xff] }
 0x594   : > { %4851 = vmatpush1.msra.mxu0 %v4516_v50  ;;  %4922 = vmatpush1.msra.mxu1 %v4518_v25  ;;  %v4538_v7 = vld [vmem:[%s8960_s29 + $0x350] sm:$0xff]  ;;  %v4521_v50 = vld [vmem:[%s8960_s29 + $0x2c8] sm:$0xff]  ;;  %v4523_v25 = vld [vmem:[%s8960_s29 + $0x2d8] sm:$0xff] }
 0x595   : > { %4852 = vmatprep.subr.mxu0 %v4501_v39  ;;  %4923 = vmatprep.subr.mxu1 %v4503_v40  ;;  %v4520_v39 = vld [vmem:[%s8960_s29 + $0x2c0] sm:$0xff]  ;;  %v4522_v40 = vld [vmem:[%s8960_s29 + $0x2d0] sm:$0xff] }
 0x596   : > { %4853 = vmatpush1.msra.mxu0 %v4500_v55  ;;  %4924 = vmatpush1.msra.mxu1 %v4502_v33  ;;  %v4505_v55 = vld [vmem:[%s8960_s29 + $0x248] sm:$0xff]  ;;  %v4507_v33 = vld [vmem:[%s8960_s29 + $0x258] sm:$0xff] }
 0x597   : > { %4854 = vmatprep.subr.mxu0 %v4485_v21  ;;  %4925 = vmatprep.subr.mxu1 %v4487_v34  ;;  %v4504_v21 = vld [vmem:[%s8960_s29 + $0x240] sm:$0xff]  ;;  %v4506_v34 = vld [vmem:[%s8960_s29 + $0x250] sm:$0xff] }
 0x598   : > { %4855 = vmatpush1.msra.mxu0 %v4484_v26  ;;  %4926 = vmatpush1.msra.mxu1 %v4486_v17  ;;  %v4489_v26 = vld [vmem:[%s8960_s29 + $0x1c8] sm:$0xff]  ;;  %v4491_v17 = vld [vmem:[%s8960_s29 + $0x1d8] sm:$0xff] }
 0x599   : > { %4856 = vmatprep.subr.mxu0 %v4469_v18  ;;  %4927 = vmatprep.subr.mxu1 %v4471_v10  ;;  %v4488_v18 = vld [vmem:[%s8960_s29 + $0x1c0] sm:$0xff]  ;;  %v4490_v10 = vld [vmem:[%s8960_s29 + $0x1d0] sm:$0xff] }
 0x59a   : > { %4857 = vmatpush1.msra.mxu0 %v4468_v27  ;;  %4928 = vmatpush1.msra.mxu1 %v4470_v3  ;;  %v4473_v27 = vld [vmem:[%s8960_s29 + $0x148] sm:$0xff]  ;;  %v4475_v3 = vld [vmem:[%s8960_s29 + $0x158] sm:$0xff] }
 0x59b   : > { %4858 = vmatprep.subr.mxu0 %v4453_v1  ;;  %4929 = vmatprep.subr.mxu1 %v4455_v41  ;;  %v4472_v1 = vld [vmem:[%s8960_s29 + $0x140] sm:$0xff]  ;;  %v4474_v41 = vld [vmem:[%s8960_s29 + $0x150] sm:$0xff] }
 0x59c   : > { %4859 = vmatpush1.msra.mxu0 %v4452_v45  ;;  %4930 = vmatpush1.msra.mxu1 %v4454_v9  ;;  %v4457_v45 = vld [vmem:[%s8960_s29 + $0xc8] sm:$0xff]  ;;  %v4459_v9 = vld [vmem:[%s8960_s29 + $0xd8] sm:$0xff] }
 0x59d   : > { %4860 = vmatprep.subr.mxu0 %v4437_v46  ;;  %4931 = vmatprep.subr.mxu1 %v4439_v47  ;;  %v4456_v46 = vld [vmem:[%s8960_s29 + $0xc0] sm:$0xff]  ;;  %v4458_v47 = vld [vmem:[%s8960_s29 + $0xd0] sm:$0xff] }
 0x59e   : > { %4861 = vmatpush1.msra.mxu0 %v4436_v49  ;;  %4894 = vmatprep.mubr.f32.mxu0 %v8369_v51  ;;  %v4441_v49 = vld [vmem:[%s8960_s29 + $0x48] sm:$0xff] }
 0x59f   : > { %4932 = vmatpush1.msra.mxu1 %v4438_v52  ;;  %4895 = vmatmul.mubr.f32.vlgmr.msra.gmra.mxu0 %v10521_v48  ;;  %v4443_v52 = vld [vmem:[%s8960_s29 + $0x58] sm:$0xff] }
 0x5a0   : > { %4965 = vmatprep.mubr.f32.mxu1 %v8369_v51  ;;  %4972 = vmatprep.subr.mxu0 %v4681_v56  ;;  %v4440_v56 = vld [vmem:[%s8960_s29 + $0x40] sm:$0xff] }
 0x5a1   : > { %5043 = vmatprep.subr.mxu1 %v4683_v37  ;;  %4966 = vmatmul.mubr.f32.vlgmr.msra.gmra.mxu1 %v10521_v48  ;;  %v4442_v37 = vld [vmem:[%s8960_s29 + $0x50] sm:$0xff] }
 0x5a2   : > { %4973 = vmatpush1.msra.mxu0 %v4680_v61  ;;  %5044 = vmatpush1.msra.mxu1 %v4682_v38  ;;  %v4685_v61 = vld [vmem:[%s8960_s29 + $0x7e8] sm:$0xff]  ;;  %v4687_v38 = vld [vmem:[%s8960_s29 + $0x7f8] sm:$0xff] }
 0x5a3   : > { %4974 = vmatprep.subr.mxu0 %v4665_v62  ;;  %5045 = vmatprep.subr.mxu1 %v4667_v63  ;;  %v4684_v62 = vld [vmem:[%s8960_s29 + $0x7e0] sm:$0xff]  ;;  %v4686_v63 = vld [vmem:[%s8960_s29 + $0x7f0] sm:$0xff] }
 0x5a4   : > { %4975 = vmatpush1.msra.mxu0 %v4664_v43  ;;  %5046 = vmatpush1.msra.mxu1 %v4666_v44  ;;  %v4669_v43 = vld [vmem:[%s8960_s29 + $0x768] sm:$0xff]  ;;  %v4671_v44 = vld [vmem:[%s8960_s29 + $0x778] sm:$0xff] }
 0x5a5   : > { %4976 = vmatprep.subr.mxu0 %v4649_v6  ;;  %5047 = vmatprep.subr.mxu1 %v4651_v57  ;;  %v4668_v6 = vld [vmem:[%s8960_s29 + $0x760] sm:$0xff]  ;;  %v4670_v57 = vld [vmem:[%s8960_s29 + $0x770] sm:$0xff] }
 0x5a6   : > { %4977 = vmatpush1.msra.mxu0 %v4648_v58  ;;  %5048 = vmatpush1.msra.mxu1 %v4650_v15  ;;  %v4653_v58 = vld [vmem:[%s8960_s29 + $0x6e8] sm:$0xff]  ;;  %v4655_v15 = vld [vmem:[%s8960_s29 + $0x6f8] sm:$0xff] }
 0x5a7   : > { %4978 = vmatprep.subr.mxu0 %v4633_v59  ;;  %5049 = vmatprep.subr.mxu1 %v4635_v60  ;;  %v4652_v59 = vld [vmem:[%s8960_s29 + $0x6e0] sm:$0xff]  ;;  %v4654_v60 = vld [vmem:[%s8960_s29 + $0x6f0] sm:$0xff] }
 0x5a8   : > { %4979 = vmatpush1.msra.mxu0 %v4632_v13  ;;  %5050 = vmatpush1.msra.mxu1 %v4634_v53  ;;  %v4637_v13 = vld [vmem:[%s8960_s29 + $0x668] sm:$0xff]  ;;  %v4639_v53 = vld [vmem:[%s8960_s29 + $0x678] sm:$0xff] }
 0x5a9   : > { %4980 = vmatprep.subr.mxu0 %v4617_v20  ;;  %5051 = vmatprep.subr.mxu1 %v4619_v0  ;;  %v4636_v20 = vld [vmem:[%s8960_s29 + $0x660] sm:$0xff]  ;;  %v4638_v0 = vld [vmem:[%s8960_s29 + $0x670] sm:$0xff] }
 0x5aa   : > { %4981 = vmatpush1.msra.mxu0 %v4616_v19  ;;  %5052 = vmatpush1.msra.mxu1 %v4618_v2  ;;  %v4621_v19 = vld [vmem:[%s8960_s29 + $0x5e8] sm:$0xff]  ;;  %v4623_v2 = vld [vmem:[%s8960_s29 + $0x5f8] sm:$0xff] }
 0x5ab   : > { %4982 = vmatprep.subr.mxu0 %v4601_v4  ;;  %5053 = vmatprep.subr.mxu1 %v4603_v5  ;;  %v4620_v4 = vld [vmem:[%s8960_s29 + $0x5e0] sm:$0xff]  ;;  %v4622_v5 = vld [vmem:[%s8960_s29 + $0x5f0] sm:$0xff] }
 0x5ac   : > { %4983 = vmatpush1.msra.mxu0 %v4600_v11  ;;  %5054 = vmatpush1.msra.mxu1 %v4602_v12  ;;  %v4605_v11 = vld [vmem:[%s8960_s29 + $0x568] sm:$0xff]  ;;  %v4607_v12 = vld [vmem:[%s8960_s29 + $0x578] sm:$0xff] }
 0x5ad   : > { %4984 = vmatprep.subr.mxu0 %v4585_v14  ;;  %5055 = vmatprep.subr.mxu1 %v4587_v16  ;;  %v4604_v14 = vld [vmem:[%s8960_s29 + $0x560] sm:$0xff]  ;;  %v4606_v16 = vld [vmem:[%s8960_s29 + $0x570] sm:$0xff] }
 0x5ae   : > { %4985 = vmatpush1.msra.mxu0 %v4584_v42  ;;  %5056 = vmatpush1.msra.mxu1 %v4586_v8  ;;  %v4589_v42 = vld [vmem:[%s8960_s29 + $0x4e8] sm:$0xff]  ;;  %v4591_v8 = vld [vmem:[%s8960_s29 + $0x4f8] sm:$0xff] }
 0x5af   : > { %4986 = vmatprep.subr.mxu0 %v4569_v54  ;;  %5057 = vmatprep.subr.mxu1 %v4571_v22  ;;  %v4588_v54 = vld [vmem:[%s8960_s29 + $0x4e0] sm:$0xff]  ;;  %v4590_v22 = vld [vmem:[%s8960_s29 + $0x4f0] sm:$0xff] }
 0x5b0   : > { %4987 = vmatpush1.msra.mxu0 %v4568_v23  ;;  %5058 = vmatpush1.msra.mxu1 %v4570_v24  ;;  %v4573_v23 = vld [vmem:[%s8960_s29 + $0x468] sm:$0xff]  ;;  %v4575_v24 = vld [vmem:[%s8960_s29 + $0x478] sm:$0xff] }
 0x5b1   : > { %4988 = vmatprep.subr.mxu0 %v4553_v29  ;;  %5059 = vmatprep.subr.mxu1 %v4555_v30  ;;  %v4572_v29 = vld [vmem:[%s8960_s29 + $0x460] sm:$0xff]  ;;  %v4574_v30 = vld [vmem:[%s8960_s29 + $0x470] sm:$0xff] }
 0x5b2   : > { %4989 = vmatpush1.msra.mxu0 %v4552_v32  ;;  %5060 = vmatpush1.msra.mxu1 %v4554_v35  ;;  %v4557_v32 = vld [vmem:[%s8960_s29 + $0x3e8] sm:$0xff]  ;;  %v4559_v35 = vld [vmem:[%s8960_s29 + $0x3f8] sm:$0xff] }
 0x5b3   : > { %4990 = vmatprep.subr.mxu0 %v4537_v36  ;;  %5061 = vmatprep.subr.mxu1 %v4539_v28  ;;  %v4556_v36 = vld [vmem:[%s8960_s29 + $0x3e0] sm:$0xff]  ;;  %v4558_v28 = vld [vmem:[%s8960_s29 + $0x3f0] sm:$0xff] }
 0x5b4   : > { %4991 = vmatpush1.msra.mxu0 %v4536_v31  ;;  %5062 = vmatpush1.msra.mxu1 %v4538_v7  ;;  %v4541_v31 = vld [vmem:[%s8960_s29 + $0x368] sm:$0xff]  ;;  %v4543_v7 = vld [vmem:[%s8960_s29 + $0x378] sm:$0xff] }
 0x5b5   : > { %4992 = vmatprep.subr.mxu0 %v4521_v50  ;;  %5063 = vmatprep.subr.mxu1 %v4523_v25  ;;  %v4540_v50 = vld [vmem:[%s8960_s29 + $0x360] sm:$0xff]  ;;  %v4542_v25 = vld [vmem:[%s8960_s29 + $0x370] sm:$0xff] }
 0x5b6   : > { %4993 = vmatpush1.msra.mxu0 %v4520_v39  ;;  %5064 = vmatpush1.msra.mxu1 %v4522_v40  ;;  %v4525_v39 = vld [vmem:[%s8960_s29 + $0x2e8] sm:$0xff]  ;;  %v4527_v40 = vld [vmem:[%s8960_s29 + $0x2f8] sm:$0xff] }
 0x5b7   : > { %4994 = vmatprep.subr.mxu0 %v4505_v55  ;;  %5065 = vmatprep.subr.mxu1 %v4507_v33  ;;  %v4524_v55 = vld [vmem:[%s8960_s29 + $0x2e0] sm:$0xff]  ;;  %v4526_v33 = vld [vmem:[%s8960_s29 + $0x2f0] sm:$0xff] }
 0x5b8   : > { %4995 = vmatpush1.msra.mxu0 %v4504_v21  ;;  %5066 = vmatpush1.msra.mxu1 %v4506_v34  ;;  %v4509_v21 = vld [vmem:[%s8960_s29 + $0x268] sm:$0xff]  ;;  %v4511_v34 = vld [vmem:[%s8960_s29 + $0x278] sm:$0xff] }
 0x5b9   : > { %4996 = vmatprep.subr.mxu0 %v4489_v26  ;;  %5067 = vmatprep.subr.mxu1 %v4491_v17  ;;  %v4508_v26 = vld [vmem:[%s8960_s29 + $0x260] sm:$0xff]  ;;  %v4510_v17 = vld [vmem:[%s8960_s29 + $0x270] sm:$0xff] }
 0x5ba   : > { %4997 = vmatpush1.msra.mxu0 %v4488_v18  ;;  %5068 = vmatpush1.msra.mxu1 %v4490_v10  ;;  %v4493_v18 = vld [vmem:[%s8960_s29 + $0x1e8] sm:$0xff]  ;;  %v4495_v10 = vld [vmem:[%s8960_s29 + $0x1f8] sm:$0xff] }
 0x5bb   : > { %4998 = vmatprep.subr.mxu0 %v4473_v27  ;;  %5069 = vmatprep.subr.mxu1 %v4475_v3  ;;  %v4492_v27 = vld [vmem:[%s8960_s29 + $0x1e0] sm:$0xff]  ;;  %v4494_v3 = vld [vmem:[%s8960_s29 + $0x1f0] sm:$0xff] }
 0x5bc   : > { %4999 = vmatpush1.msra.mxu0 %v4472_v1  ;;  %5070 = vmatpush1.msra.mxu1 %v4474_v41  ;;  %v4477_v1 = vld [vmem:[%s8960_s29 + $0x168] sm:$0xff]  ;;  %v4479_v41 = vld [vmem:[%s8960_s29 + $0x178] sm:$0xff] }
 0x5bd   : > { %5000 = vmatprep.subr.mxu0 %v4457_v45  ;;  %5071 = vmatprep.subr.mxu1 %v4459_v9  ;;  %v4476_v45 = vld [vmem:[%s8960_s29 + $0x160] sm:$0xff]  ;;  %v4478_v9 = vld [vmem:[%s8960_s29 + $0x170] sm:$0xff] }
 0x5be   : > { %5001 = vmatpush1.msra.mxu0 %v4456_v46  ;;  %5072 = vmatpush1.msra.mxu1 %v4458_v47  ;;  %v4461_v46 = vld [vmem:[%s8960_s29 + $0xe8] sm:$0xff]  ;;  %v4463_v47 = vld [vmem:[%s8960_s29 + $0xf8] sm:$0xff] }
 0x5bf   : > { %5002 = vmatprep.subr.mxu0 %v4441_v49  ;;  %5073 = vmatprep.subr.mxu1 %v4443_v52  ;;  %v4460_v49 = vld [vmem:[%s8960_s29 + $0xe0] sm:$0xff]  ;;  %v4462_v52 = vld [vmem:[%s8960_s29 + $0xf0] sm:$0xff] }
 0x5c0   : > { %5003 = vmatpush1.msra.mxu0 %v4440_v56  ;;  %5036 = vmatprep.mubr.f32.mxu0 %v8369_v51  ;;  %v4445_v56 = vld [vmem:[%s8960_s29 + $0x68] sm:$0xff] }
 0x5c1   : > { %5074 = vmatpush1.msra.mxu1 %v4442_v37  ;;  %5037 = vmatmul.mubr.f32.vlgmr.msra.gmra.mxu0 %v10521_v48  ;;  %v4447_v37 = vld [vmem:[%s8960_s29 + $0x78] sm:$0xff] }
 0x5c2   : > { %5107 = vmatprep.mubr.f32.mxu1 %v8369_v51  ;;  %5114 = vmatprep.subr.mxu0 %v4685_v61  ;;  %v4444_v61 = vld [vmem:[%s8960_s29 + $0x60] sm:$0xff] }
 0x5c3   : > { %5185 = vmatprep.subr.mxu1 %v4687_v38  ;;  %5108 = vmatmul.mubr.f32.vlgmr.msra.gmra.mxu1 %v10521_v48  ;;  %v4446_v38 = vld [vmem:[%s8960_s29 + $0x70] sm:$0xff] }
 0x5c4   : > { %5115 = vmatpush1.msra.mxu0 %v4684_v62  ;;  %5186 = vmatpush1.msra.mxu1 %v4686_v63  ;;  %v4416_v62 = vld [vmem:[%s8954_s10 + $0x788] sm:$0xff]  ;;  %v4418_v63 = vld [vmem:[%s8954_s10 + $0x798] sm:$0xff] }
 0x5c5   : > { %5116 = vmatprep.subr.mxu0 %v4669_v43  ;;  %5187 = vmatprep.subr.mxu1 %v4671_v44  ;;  %v4415_v43 = vld [vmem:[%s8954_s10 + $0x780] sm:$0xff]  ;;  %v4417_v44 = vld [vmem:[%s8954_s10 + $0x790] sm:$0xff] }
 0x5c6   : > { %5117 = vmatpush1.msra.mxu0 %v4668_v6  ;;  %5188 = vmatpush1.msra.mxu1 %v4670_v57  ;;  %v4400_v6 = vld [vmem:[%s8954_s10 + $0x708] sm:$0xff]  ;;  %v4402_v57 = vld [vmem:[%s8954_s10 + $0x718] sm:$0xff] }
 0x5c7   : > { %5118 = vmatprep.subr.mxu0 %v4653_v58  ;;  %5189 = vmatprep.subr.mxu1 %v4655_v15  ;;  %v4399_v58 = vld [vmem:[%s8954_s10 + $0x700] sm:$0xff]  ;;  %v4401_v15 = vld [vmem:[%s8954_s10 + $0x710] sm:$0xff] }
 0x5c8   : > { %5119 = vmatpush1.msra.mxu0 %v4652_v59  ;;  %5190 = vmatpush1.msra.mxu1 %v4654_v60  ;;  %v4384_v59 = vld [vmem:[%s8954_s10 + $0x688] sm:$0xff]  ;;  %v4386_v60 = vld [vmem:[%s8954_s10 + $0x698] sm:$0xff] }
 0x5c9   : > { %5120 = vmatprep.subr.mxu0 %v4637_v13  ;;  %5191 = vmatprep.subr.mxu1 %v4639_v53  ;;  %v4383_v13 = vld [vmem:[%s8954_s10 + $0x680] sm:$0xff]  ;;  %v4385_v53 = vld [vmem:[%s8954_s10 + $0x690] sm:$0xff] }
 0x5ca   : > { %5121 = vmatpush1.msra.mxu0 %v4636_v20  ;;  %5192 = vmatpush1.msra.mxu1 %v4638_v0  ;;  %v4368_v20 = vld [vmem:[%s8954_s10 + $0x608] sm:$0xff]  ;;  %v4367_v0 = vld [vmem:[%s8954_s10 + $0x600] sm:$0xff] }
 0x5cb   : > { %5122 = vmatprep.subr.mxu0 %v4621_v19  ;;  %5193 = vmatprep.subr.mxu1 %v4623_v2  ;;  %v4369_v19 = vld [vmem:[%s8954_s10 + $0x610] sm:$0xff]  ;;  %v4352_v2 = vld [vmem:[%s8954_s10 + $0x588] sm:$0xff] }
 0x5cc   : > { %5123 = vmatpush1.msra.mxu0 %v4620_v4  ;;  %5194 = vmatpush1.msra.mxu1 %v4622_v5  ;;  %v4354_v4 = vld [vmem:[%s8954_s10 + $0x598] sm:$0xff]  ;;  %v4351_v5 = vld [vmem:[%s8954_s10 + $0x580] sm:$0xff] }
 0x5cd   : > { %5124 = vmatprep.subr.mxu0 %v4605_v11  ;;  %5195 = vmatprep.subr.mxu1 %v4607_v12  ;;  %v4353_v11 = vld [vmem:[%s8954_s10 + $0x590] sm:$0xff]  ;;  %v4336_v12 = vld [vmem:[%s8954_s10 + $0x508] sm:$0xff] }
 0x5ce   : > { %5125 = vmatpush1.msra.mxu0 %v4604_v14  ;;  %5196 = vmatpush1.msra.mxu1 %v4606_v16  ;;  %v4338_v14 = vld [vmem:[%s8954_s10 + $0x518] sm:$0xff]  ;;  %v4335_v16 = vld [vmem:[%s8954_s10 + $0x500] sm:$0xff] }
 0x5cf   : > { %5126 = vmatprep.subr.mxu0 %v4589_v42  ;;  %5197 = vmatprep.subr.mxu1 %v4591_v8  ;;  %v4337_v42 = vld [vmem:[%s8954_s10 + $0x510] sm:$0xff]  ;;  %v4320_v8 = vld [vmem:[%s8954_s10 + $0x488] sm:$0xff] }
 0x5d0   : > { %5127 = vmatpush1.msra.mxu0 %v4588_v54  ;;  %5198 = vmatpush1.msra.mxu1 %v4590_v22  ;;  %v4322_v54 = vld [vmem:[%s8954_s10 + $0x498] sm:$0xff]  ;;  %v4319_v22 = vld [vmem:[%s8954_s10 + $0x480] sm:$0xff] }
 0x5d1   : > { %5128 = vmatprep.subr.mxu0 %v4573_v23  ;;  %5199 = vmatprep.subr.mxu1 %v4575_v24  ;;  %v4321_v23 = vld [vmem:[%s8954_s10 + $0x490] sm:$0xff]  ;;  %v4304_v24 = vld [vmem:[%s8954_s10 + $0x408] sm:$0xff] }
 0x5d2   : > { %5129 = vmatpush1.msra.mxu0 %v4572_v29  ;;  %5200 = vmatpush1.msra.mxu1 %v4574_v30  ;;  %v4306_v29 = vld [vmem:[%s8954_s10 + $0x418] sm:$0xff]  ;;  %v4303_v30 = vld [vmem:[%s8954_s10 + $0x400] sm:$0xff] }
 0x5d3   : > { %5130 = vmatprep.subr.mxu0 %v4557_v32  ;;  %5201 = vmatprep.subr.mxu1 %v4559_v35  ;;  %v4305_v32 = vld [vmem:[%s8954_s10 + $0x410] sm:$0xff]  ;;  %v4288_v35 = vld [vmem:[%s8954_s10 + $0x388] sm:$0xff] }
 0x5d4   : > { %5131 = vmatpush1.msra.mxu0 %v4556_v36  ;;  %5202 = vmatpush1.msra.mxu1 %v4558_v28  ;;  %v4290_v36 = vld [vmem:[%s8954_s10 + $0x398] sm:$0xff]  ;;  %v4287_v28 = vld [vmem:[%s8954_s10 + $0x380] sm:$0xff] }
 0x5d5   : > { %5132 = vmatprep.subr.mxu0 %v4541_v31  ;;  %5203 = vmatprep.subr.mxu1 %v4543_v7  ;;  %v4289_v31 = vld [vmem:[%s8954_s10 + $0x390] sm:$0xff]  ;;  %v4272_v7 = vld [vmem:[%s8954_s10 + $0x308] sm:$0xff] }
 0x5d6   : > { %5133 = vmatpush1.msra.mxu0 %v4540_v50  ;;  %5204 = vmatpush1.msra.mxu1 %v4542_v25  ;;  %v4274_v50 = vld [vmem:[%s8954_s10 + $0x318] sm:$0xff]  ;;  %v4271_v25 = vld [vmem:[%s8954_s10 + $0x300] sm:$0xff] }
 0x5d7   : > { %5134 = vmatprep.subr.mxu0 %v4525_v39  ;;  %5205 = vmatprep.subr.mxu1 %v4527_v40  ;;  %v4273_v39 = vld [vmem:[%s8954_s10 + $0x310] sm:$0xff]  ;;  %v4256_v40 = vld [vmem:[%s8954_s10 + $0x288] sm:$0xff] }
 0x5d8   : > { %5135 = vmatpush1.msra.mxu0 %v4524_v55  ;;  %5206 = vmatpush1.msra.mxu1 %v4526_v33  ;;  %v4258_v55 = vld [vmem:[%s8954_s10 + $0x298] sm:$0xff]  ;;  %v4255_v33 = vld [vmem:[%s8954_s10 + $0x280] sm:$0xff] }
 0x5d9   : > { %5136 = vmatprep.subr.mxu0 %v4509_v21  ;;  %5207 = vmatprep.subr.mxu1 %v4511_v34  ;;  %v4257_v21 = vld [vmem:[%s8954_s10 + $0x290] sm:$0xff]  ;;  %v4240_v34 = vld [vmem:[%s8954_s10 + $0x208] sm:$0xff] }
 0x5da   : > { %5137 = vmatpush1.msra.mxu0 %v4508_v26  ;;  %5208 = vmatpush1.msra.mxu1 %v4510_v17  ;;  %v4242_v26 = vld [vmem:[%s8954_s10 + $0x218] sm:$0xff]  ;;  %v4239_v17 = vld [vmem:[%s8954_s10 + $0x200] sm:$0xff] }
 0x5db   : > { %5138 = vmatprep.subr.mxu0 %v4493_v18  ;;  %5209 = vmatprep.subr.mxu1 %v4495_v10  ;;  %v4241_v18 = vld [vmem:[%s8954_s10 + $0x210] sm:$0xff]  ;;  %v4224_v10 = vld [vmem:[%s8954_s10 + $0x188] sm:$0xff] }
 0x5dc   : > { %5139 = vmatpush1.msra.mxu0 %v4492_v27  ;;  %5210 = vmatpush1.msra.mxu1 %v4494_v3  ;;  %v4226_v27 = vld [vmem:[%s8954_s10 + $0x198] sm:$0xff]  ;;  %v4223_v3 = vld [vmem:[%s8954_s10 + $0x180] sm:$0xff] }
 0x5dd   : > { %5140 = vmatprep.subr.mxu0 %v4477_v1  ;;  %5211 = vmatprep.subr.mxu1 %v4479_v41  ;;  %v4225_v1 = vld [vmem:[%s8954_s10 + $0x190] sm:$0xff]  ;;  %v4208_v41 = vld [vmem:[%s8954_s10 + $0x108] sm:$0xff] }
 0x5de   : > { %5141 = vmatpush1.msra.mxu0 %v4476_v45  ;;  %5212 = vmatpush1.msra.mxu1 %v4478_v9  ;;  %v4210_v45 = vld [vmem:[%s8954_s10 + $0x118] sm:$0xff]  ;;  %v4207_v9 = vld [vmem:[%s8954_s10 + $0x100] sm:$0xff] }
 0x5df   : > { %5142 = vmatprep.subr.mxu0 %v4461_v46  ;;  %5213 = vmatprep.subr.mxu1 %v4463_v47  ;;  %v4209_v46 = vld [vmem:[%s8954_s10 + $0x110] sm:$0xff]  ;;  %v4192_v47 = vld [vmem:[%s8954_s10 + $0x88] sm:$0xff] }
 0x5e0   : > { %5143 = vmatpush1.msra.mxu0 %v4460_v49  ;;  %5214 = vmatpush1.msra.mxu1 %v4462_v52  ;;  %v4194_v49 = vld [vmem:[%s8954_s10 + $0x98] sm:$0xff]  ;;  %v4191_v52 = vld [vmem:[%s8954_s10 + $0x80] sm:$0xff] }
 0x5e1   : > { %5144 = vmatprep.subr.mxu0 %v4445_v56  ;;  %5215 = vmatprep.subr.mxu1 %v4447_v37  ;;  %v4193_v56 = vld [vmem:[%s8954_s10 + $0x90] sm:$0xff]  ;;  %v4176_v37 = vld [vmem:[%s8954_s10 + $0x8] sm:$0xff] }
 0x5e2   : > { %5145 = vmatpush1.msra.mxu0 %v4444_v61  ;;  %5178 = vmatprep.mubr.f32.mxu0 %v8369_v51  ;;  %v4178_v61 = vld [vmem:[%s8954_s10 + $0x18] sm:$0xff] }
 0x5e3   : > { %5216 = vmatpush1.msra.mxu1 %v4446_v38  ;;  %5179 = vmatmul.mubr.f32.vlgmr.msra.gmra.mxu0 %v10521_v48  ;;  %v4175_v38 = vld [vmem:[%s8954_s10] sm:$0xff] }
 0x5e4   : > { %5249 = vmatprep.mubr.f32.mxu1 %v8369_v51  ;;  %5256 = vmatprep.subr.mxu0 %v4416_v62  ;;  %v4177_v62 = vld [vmem:[%s8954_s10 + $0x10] sm:$0xff] }
 0x5e5   : > { %5327 = vmatprep.subr.mxu1 %v4418_v63  ;;  %5250 = vmatmul.mubr.f32.vlgmr.msra.gmra.mxu1 %v10521_v48  ;;  %v4370_v48 = vld [vmem:[%s8954_s10 + $0x618] sm:$0xff]  ;;  %v10795_v63 = vld [vmem:[#allocation3] sm:$0xff] }
 0x5e6   : > { %5257 = vmatpush1.msra.mxu0 %v4415_v43  ;;  %5328 = vmatpush1.msra.mxu1 %v4417_v44  ;;  %v4420_v43 = vld [vmem:[%s8954_s10 + $0x7a8] sm:$0xff]  ;;  %v4422_v44 = vld [vmem:[%s8954_s10 + $0x7b8] sm:$0xff] }
 0x5e7   : > { %5258 = vmatprep.subr.mxu0 %v4400_v6  ;;  %5329 = vmatprep.subr.mxu1 %v4402_v57  ;;  %v4419_v6 = vld [vmem:[%s8954_s10 + $0x7a0] sm:$0xff]  ;;  %v4421_v57 = vld [vmem:[%s8954_s10 + $0x7b0] sm:$0xff] }
 0x5e8   : > { %5259 = vmatpush1.msra.mxu0 %v4399_v58  ;;  %5330 = vmatpush1.msra.mxu1 %v4401_v15  ;;  %v4404_v58 = vld [vmem:[%s8954_s10 + $0x728] sm:$0xff]  ;;  %v4406_v15 = vld [vmem:[%s8954_s10 + $0x738] sm:$0xff] }
 0x5e9   : > { %5260 = vmatprep.subr.mxu0 %v4384_v59  ;;  %5331 = vmatprep.subr.mxu1 %v4386_v60  ;;  %v4403_v59 = vld [vmem:[%s8954_s10 + $0x720] sm:$0xff]  ;;  %v4405_v60 = vld [vmem:[%s8954_s10 + $0x730] sm:$0xff] }
 0x5ea   : > { %5261 = vmatpush1.msra.mxu0 %v4383_v13  ;;  %5332 = vmatpush1.msra.mxu1 %v4385_v53  ;;  %v4388_v13 = vld [vmem:[%s8954_s10 + $0x6a8] sm:$0xff]  ;;  %v4390_v53 = vld [vmem:[%s8954_s10 + $0x6b8] sm:$0xff] }
 0x5eb   : > { %5262 = vmatprep.subr.mxu0 %v4368_v20  ;;  %5333 = vmatprep.subr.mxu1 %v4370_v48  ;;  %v4387_v20 = vld [vmem:[%s8954_s10 + $0x6a0] sm:$0xff]  ;;  %v4389_v48 = vld [vmem:[%s8954_s10 + $0x6b0] sm:$0xff] }
 0x5ec   : > { %5263 = vmatpush1.msra.mxu0 %v4367_v0  ;;  %5334 = vmatpush1.msra.mxu1 %v4369_v19  ;;  %v4372_v0 = vld [vmem:[%s8954_s10 + $0x628] sm:$0xff]  ;;  %v4374_v19 = vld [vmem:[%s8954_s10 + $0x638] sm:$0xff] }
 0x5ed   : > { %5264 = vmatprep.subr.mxu0 %v4352_v2  ;;  %5335 = vmatprep.subr.mxu1 %v4354_v4  ;;  %v4371_v2 = vld [vmem:[%s8954_s10 + $0x620] sm:$0xff]  ;;  %v4373_v4 = vld [vmem:[%s8954_s10 + $0x630] sm:$0xff] }
 0x5ee   : > { %5265 = vmatpush1.msra.mxu0 %v4351_v5  ;;  %5336 = vmatpush1.msra.mxu1 %v4353_v11  ;;  %v4356_v5 = vld [vmem:[%s8954_s10 + $0x5a8] sm:$0xff]  ;;  %v4358_v11 = vld [vmem:[%s8954_s10 + $0x5b8] sm:$0xff] }
 0x5ef   : > { %5266 = vmatprep.subr.mxu0 %v4336_v12  ;;  %5337 = vmatprep.subr.mxu1 %v4338_v14  ;;  %v4355_v12 = vld [vmem:[%s8954_s10 + $0x5a0] sm:$0xff]  ;;  %v4357_v14 = vld [vmem:[%s8954_s10 + $0x5b0] sm:$0xff] }
 0x5f0   : > { %5267 = vmatpush1.msra.mxu0 %v4335_v16  ;;  %5338 = vmatpush1.msra.mxu1 %v4337_v42  ;;  %v4340_v16 = vld [vmem:[%s8954_s10 + $0x528] sm:$0xff]  ;;  %v4342_v42 = vld [vmem:[%s8954_s10 + $0x538] sm:$0xff] }
 0x5f1   : > { %5268 = vmatprep.subr.mxu0 %v4320_v8  ;;  %5339 = vmatprep.subr.mxu1 %v4322_v54  ;;  %v4339_v8 = vld [vmem:[%s8954_s10 + $0x520] sm:$0xff]  ;;  %v4341_v54 = vld [vmem:[%s8954_s10 + $0x530] sm:$0xff] }
 0x5f2   : > { %5269 = vmatpush1.msra.mxu0 %v4319_v22  ;;  %5340 = vmatpush1.msra.mxu1 %v4321_v23  ;;  %v4324_v22 = vld [vmem:[%s8954_s10 + $0x4a8] sm:$0xff]  ;;  %v4326_v23 = vld [vmem:[%s8954_s10 + $0x4b8] sm:$0xff] }
 0x5f3   : > { %5270 = vmatprep.subr.mxu0 %v4304_v24  ;;  %5341 = vmatprep.subr.mxu1 %v4306_v29  ;;  %v4323_v24 = vld [vmem:[%s8954_s10 + $0x4a0] sm:$0xff]  ;;  %v4325_v29 = vld [vmem:[%s8954_s10 + $0x4b0] sm:$0xff] }
 0x5f4   : > { %5271 = vmatpush1.msra.mxu0 %v4303_v30  ;;  %5342 = vmatpush1.msra.mxu1 %v4305_v32  ;;  %v4308_v30 = vld [vmem:[%s8954_s10 + $0x428] sm:$0xff]  ;;  %v4310_v32 = vld [vmem:[%s8954_s10 + $0x438] sm:$0xff] }
 0x5f5   : > { %5272 = vmatprep.subr.mxu0 %v4288_v35  ;;  %5343 = vmatprep.subr.mxu1 %v4290_v36  ;;  %v4307_v35 = vld [vmem:[%s8954_s10 + $0x420] sm:$0xff]  ;;  %v4309_v36 = vld [vmem:[%s8954_s10 + $0x430] sm:$0xff] }
 0x5f6   : > { %5273 = vmatpush1.msra.mxu0 %v4287_v28  ;;  %5344 = vmatpush1.msra.mxu1 %v4289_v31  ;;  %v4292_v28 = vld [vmem:[%s8954_s10 + $0x3a8] sm:$0xff]  ;;  %v4294_v31 = vld [vmem:[%s8954_s10 + $0x3b8] sm:$0xff] }
 0x5f7   : > { %5274 = vmatprep.subr.mxu0 %v4272_v7  ;;  %5345 = vmatprep.subr.mxu1 %v4274_v50  ;;  %v4291_v7 = vld [vmem:[%s8954_s10 + $0x3a0] sm:$0xff]  ;;  %v4293_v50 = vld [vmem:[%s8954_s10 + $0x3b0] sm:$0xff] }
 0x5f8   : > { %5275 = vmatpush1.msra.mxu0 %v4271_v25  ;;  %5346 = vmatpush1.msra.mxu1 %v4273_v39  ;;  %v4276_v25 = vld [vmem:[%s8954_s10 + $0x328] sm:$0xff]  ;;  %v4278_v39 = vld [vmem:[%s8954_s10 + $0x338] sm:$0xff] }
 0x5f9   : > { %5276 = vmatprep.subr.mxu0 %v4256_v40  ;;  %5347 = vmatprep.subr.mxu1 %v4258_v55  ;;  %v4275_v40 = vld [vmem:[%s8954_s10 + $0x320] sm:$0xff]  ;;  %v4277_v55 = vld [vmem:[%s8954_s10 + $0x330] sm:$0xff] }
 0x5fa   : > { %5277 = vmatpush1.msra.mxu0 %v4255_v33  ;;  %5348 = vmatpush1.msra.mxu1 %v4257_v21  ;;  %v4260_v33 = vld [vmem:[%s8954_s10 + $0x2a8] sm:$0xff]  ;;  %v4262_v21 = vld [vmem:[%s8954_s10 + $0x2b8] sm:$0xff] }
 0x5fb   : > { %5278 = vmatprep.subr.mxu0 %v4240_v34  ;;  %5349 = vmatprep.subr.mxu1 %v4242_v26  ;;  %v4259_v34 = vld [vmem:[%s8954_s10 + $0x2a0] sm:$0xff]  ;;  %v4261_v26 = vld [vmem:[%s8954_s10 + $0x2b0] sm:$0xff] }
 0x5fc   : > { %5279 = vmatpush1.msra.mxu0 %v4239_v17  ;;  %5350 = vmatpush1.msra.mxu1 %v4241_v18  ;;  %v4244_v17 = vld [vmem:[%s8954_s10 + $0x228] sm:$0xff]  ;;  %v4246_v18 = vld [vmem:[%s8954_s10 + $0x238] sm:$0xff] }
 0x5fd   : > { %5280 = vmatprep.subr.mxu0 %v4224_v10  ;;  %5351 = vmatprep.subr.mxu1 %v4226_v27  ;;  %v4243_v10 = vld [vmem:[%s8954_s10 + $0x220] sm:$0xff]  ;;  %v4245_v27 = vld [vmem:[%s8954_s10 + $0x230] sm:$0xff] }
 0x5fe   : > { %5281 = vmatpush1.msra.mxu0 %v4223_v3  ;;  %5352 = vmatpush1.msra.mxu1 %v4225_v1  ;;  %v4228_v3 = vld [vmem:[%s8954_s10 + $0x1a8] sm:$0xff]  ;;  %v4230_v1 = vld [vmem:[%s8954_s10 + $0x1b8] sm:$0xff] }
 0x5ff   : > { %5282 = vmatprep.subr.mxu0 %v4208_v41  ;;  %5353 = vmatprep.subr.mxu1 %v4210_v45  ;;  %v4227_v41 = vld [vmem:[%s8954_s10 + $0x1a0] sm:$0xff]  ;;  %v4229_v45 = vld [vmem:[%s8954_s10 + $0x1b0] sm:$0xff] }
 0x600   : > { %5283 = vmatpush1.msra.mxu0 %v4207_v9  ;;  %5354 = vmatpush1.msra.mxu1 %v4209_v46  ;;  %v4212_v9 = vld [vmem:[%s8954_s10 + $0x128] sm:$0xff]  ;;  %v4214_v46 = vld [vmem:[%s8954_s10 + $0x138] sm:$0xff] }
 0x601   : > { %5284 = vmatprep.subr.mxu0 %v4192_v47  ;;  %5355 = vmatprep.subr.mxu1 %v4194_v49  ;;  %v4211_v47 = vld [vmem:[%s8954_s10 + $0x120] sm:$0xff]  ;;  %v4213_v49 = vld [vmem:[%s8954_s10 + $0x130] sm:$0xff] }
 0x602   : > { %5285 = vmatpush1.msra.mxu0 %v4191_v52  ;;  %5356 = vmatpush1.msra.mxu1 %v4193_v56  ;;  %v4196_v52 = vld [vmem:[%s8954_s10 + $0xa8] sm:$0xff]  ;;  %v4198_v56 = vld [vmem:[%s8954_s10 + $0xb8] sm:$0xff] }
 0x603   : > { %5286 = vmatprep.subr.mxu0 %v4176_v37  ;;  %5357 = vmatprep.subr.mxu1 %v4178_v61  ;;  %v4195_v37 = vld [vmem:[%s8954_s10 + $0xa0] sm:$0xff]  ;;  %v4197_v61 = vld [vmem:[%s8954_s10 + $0xb0] sm:$0xff] }
 0x604   : > { %5287 = vmatpush1.msra.mxu0 %v4175_v38  ;;  %5320 = vmatprep.mubr.f32.mxu0 %v8369_v51  ;;  %v4180_v38 = vld [vmem:[%s8954_s10 + $0x28] sm:$0xff] }
 0x605   : > { %5358 = vmatpush1.msra.mxu1 %v4177_v62  ;;  %5391 = vmatprep.mubr.f32.mxu1 %v8369_v51  ;;  %v4182_v62 = vld [vmem:[%s8954_s10 + $0x38] sm:$0xff] }
 0x606   : > { %5321 = vmatmul.mubr.f32.vlgmr.msra.gmra.mxu0 %v10795_v63  ;;  %5392 = vmatmul.mubr.f32.vlgmr.msra.gmra.mxu1 %v10795_v63 }
 0x607   : > { %5398 = vmatprep.subr.mxu0 %v4420_v43  ;;  %5469 = vmatprep.subr.mxu1 %v4422_v44  ;;  %v4179_v43 = vld [vmem:[%s8954_s10 + $0x20] sm:$0xff]  ;;  %v4181_v44 = vld [vmem:[%s8954_s10 + $0x30] sm:$0xff] }
 0x608   : > { %5399 = vmatpush1.msra.mxu0 %v4419_v6  ;;  %5470 = vmatpush1.msra.mxu1 %v4421_v57  ;;  %v4424_v6 = vld [vmem:[%s8954_s10 + $0x7c8] sm:$0xff]  ;;  %v4426_v57 = vld [vmem:[%s8954_s10 + $0x7d8] sm:$0xff] }
 0x609   : > { %5400 = vmatprep.subr.mxu0 %v4404_v58  ;;  %5471 = vmatprep.subr.mxu1 %v4406_v15  ;;  %v4423_v58 = vld [vmem:[%s8954_s10 + $0x7c0] sm:$0xff]  ;;  %v4425_v15 = vld [vmem:[%s8954_s10 + $0x7d0] sm:$0xff] }
 0x60a   : > { %5401 = vmatpush1.msra.mxu0 %v4403_v59  ;;  %5472 = vmatpush1.msra.mxu1 %v4405_v60  ;;  %v4408_v59 = vld [vmem:[%s8954_s10 + $0x748] sm:$0xff]  ;;  %v4410_v60 = vld [vmem:[%s8954_s10 + $0x758] sm:$0xff] }
 0x60b   : > { %5402 = vmatprep.subr.mxu0 %v4388_v13  ;;  %5473 = vmatprep.subr.mxu1 %v4390_v53  ;;  %v4407_v13 = vld [vmem:[%s8954_s10 + $0x740] sm:$0xff]  ;;  %v4409_v53 = vld [vmem:[%s8954_s10 + $0x750] sm:$0xff] }
 0x60c   : > { %5403 = vmatpush1.msra.mxu0 %v4387_v20  ;;  %5474 = vmatpush1.msra.mxu1 %v4389_v48  ;;  %v4392_v20 = vld [vmem:[%s8954_s10 + $0x6c8] sm:$0xff]  ;;  %v4394_v48 = vld [vmem:[%s8954_s10 + $0x6d8] sm:$0xff] }
 0x60d   : > { %5404 = vmatprep.subr.mxu0 %v4372_v0  ;;  %5475 = vmatprep.subr.mxu1 %v4374_v19  ;;  %v4391_v0 = vld [vmem:[%s8954_s10 + $0x6c0] sm:$0xff]  ;;  %v4393_v19 = vld [vmem:[%s8954_s10 + $0x6d0] sm:$0xff] }
 0x60e   : > { %5405 = vmatpush1.msra.mxu0 %v4371_v2  ;;  %5476 = vmatpush1.msra.mxu1 %v4373_v4  ;;  %v4376_v2 = vld [vmem:[%s8954_s10 + $0x648] sm:$0xff]  ;;  %v4378_v4 = vld [vmem:[%s8954_s10 + $0x658] sm:$0xff] }
 0x60f   : > { %5406 = vmatprep.subr.mxu0 %v4356_v5  ;;  %5477 = vmatprep.subr.mxu1 %v4358_v11  ;;  %v4375_v5 = vld [vmem:[%s8954_s10 + $0x640] sm:$0xff]  ;;  %v4377_v11 = vld [vmem:[%s8954_s10 + $0x650] sm:$0xff] }
 0x610   : > { %5407 = vmatpush1.msra.mxu0 %v4355_v12  ;;  %5478 = vmatpush1.msra.mxu1 %v4357_v14  ;;  %v4360_v12 = vld [vmem:[%s8954_s10 + $0x5c8] sm:$0xff]  ;;  %v4362_v14 = vld [vmem:[%s8954_s10 + $0x5d8] sm:$0xff] }
 0x611   : > { %5408 = vmatprep.subr.mxu0 %v4340_v16  ;;  %5479 = vmatprep.subr.mxu1 %v4342_v42  ;;  %v4359_v16 = vld [vmem:[%s8954_s10 + $0x5c0] sm:$0xff]  ;;  %v4361_v42 = vld [vmem:[%s8954_s10 + $0x5d0] sm:$0xff] }
 0x612   : > { %5409 = vmatpush1.msra.mxu0 %v4339_v8  ;;  %5480 = vmatpush1.msra.mxu1 %v4341_v54  ;;  %v4344_v8 = vld [vmem:[%s8954_s10 + $0x548] sm:$0xff]  ;;  %v4346_v54 = vld [vmem:[%s8954_s10 + $0x558] sm:$0xff] }
 0x613   : > { %5410 = vmatprep.subr.mxu0 %v4324_v22  ;;  %5481 = vmatprep.subr.mxu1 %v4326_v23  ;;  %v4343_v22 = vld [vmem:[%s8954_s10 + $0x540] sm:$0xff]  ;;  %v4345_v23 = vld [vmem:[%s8954_s10 + $0x550] sm:$0xff] }
 0x614   : > { %5411 = vmatpush1.msra.mxu0 %v4323_v24  ;;  %5482 = vmatpush1.msra.mxu1 %v4325_v29  ;;  %v4328_v24 = vld [vmem:[%s8954_s10 + $0x4c8] sm:$0xff]  ;;  %v4330_v29 = vld [vmem:[%s8954_s10 + $0x4d8] sm:$0xff] }
 0x615   : > { %5412 = vmatprep.subr.mxu0 %v4308_v30  ;;  %5483 = vmatprep.subr.mxu1 %v4310_v32  ;;  %v4327_v30 = vld [vmem:[%s8954_s10 + $0x4c0] sm:$0xff]  ;;  %v4329_v32 = vld [vmem:[%s8954_s10 + $0x4d0] sm:$0xff] }
 0x616   : > { %5413 = vmatpush1.msra.mxu0 %v4307_v35  ;;  %5484 = vmatpush1.msra.mxu1 %v4309_v36  ;;  %v4312_v35 = vld [vmem:[%s8954_s10 + $0x448] sm:$0xff]  ;;  %v4314_v36 = vld [vmem:[%s8954_s10 + $0x458] sm:$0xff] }
 0x617   : > { %5414 = vmatprep.subr.mxu0 %v4292_v28  ;;  %5485 = vmatprep.subr.mxu1 %v4294_v31  ;;  %v4311_v28 = vld [vmem:[%s8954_s10 + $0x440] sm:$0xff]  ;;  %v4313_v31 = vld [vmem:[%s8954_s10 + $0x450] sm:$0xff] }
 0x618   : > { %5415 = vmatpush1.msra.mxu0 %v4291_v7  ;;  %5486 = vmatpush1.msra.mxu1 %v4293_v50  ;;  %v4296_v7 = vld [vmem:[%s8954_s10 + $0x3c8] sm:$0xff]  ;;  %v4298_v50 = vld [vmem:[%s8954_s10 + $0x3d8] sm:$0xff] }
 0x619   : > { %5416 = vmatprep.subr.mxu0 %v4276_v25  ;;  %5487 = vmatprep.subr.mxu1 %v4278_v39  ;;  %v4295_v25 = vld [vmem:[%s8954_s10 + $0x3c0] sm:$0xff]  ;;  %v4297_v39 = vld [vmem:[%s8954_s10 + $0x3d0] sm:$0xff] }
 0x61a   : > { %5417 = vmatpush1.msra.mxu0 %v4275_v40  ;;  %5488 = vmatpush1.msra.mxu1 %v4277_v55  ;;  %v4280_v40 = vld [vmem:[%s8954_s10 + $0x348] sm:$0xff]  ;;  %v4282_v55 = vld [vmem:[%s8954_s10 + $0x358] sm:$0xff] }
 0x61b   : > { %5418 = vmatprep.subr.mxu0 %v4260_v33  ;;  %5489 = vmatprep.subr.mxu1 %v4262_v21  ;;  %v4279_v33 = vld [vmem:[%s8954_s10 + $0x340] sm:$0xff]  ;;  %v4281_v21 = vld [vmem:[%s8954_s10 + $0x350] sm:$0xff] }
 0x61c   : > { %5419 = vmatpush1.msra.mxu0 %v4259_v34  ;;  %5490 = vmatpush1.msra.mxu1 %v4261_v26  ;;  %v4264_v34 = vld [vmem:[%s8954_s10 + $0x2c8] sm:$0xff]  ;;  %v4266_v26 = vld [vmem:[%s8954_s10 + $0x2d8] sm:$0xff] }
 0x61d   : > { %5420 = vmatprep.subr.mxu0 %v4244_v17  ;;  %5491 = vmatprep.subr.mxu1 %v4246_v18  ;;  %v4263_v17 = vld [vmem:[%s8954_s10 + $0x2c0] sm:$0xff]  ;;  %v4265_v18 = vld [vmem:[%s8954_s10 + $0x2d0] sm:$0xff] }
 0x61e   : > { %5421 = vmatpush1.msra.mxu0 %v4243_v10  ;;  %5492 = vmatpush1.msra.mxu1 %v4245_v27  ;;  %v4248_v10 = vld [vmem:[%s8954_s10 + $0x248] sm:$0xff]  ;;  %v4250_v27 = vld [vmem:[%s8954_s10 + $0x258] sm:$0xff] }
 0x61f   : > { %5422 = vmatprep.subr.mxu0 %v4228_v3  ;;  %5493 = vmatprep.subr.mxu1 %v4230_v1  ;;  %v4247_v3 = vld [vmem:[%s8954_s10 + $0x240] sm:$0xff]  ;;  %v4249_v1 = vld [vmem:[%s8954_s10 + $0x250] sm:$0xff] }
 0x620   : > { %5423 = vmatpush1.msra.mxu0 %v4227_v41  ;;  %5494 = vmatpush1.msra.mxu1 %v4229_v45  ;;  %v4232_v41 = vld [vmem:[%s8954_s10 + $0x1c8] sm:$0xff]  ;;  %v4234_v45 = vld [vmem:[%s8954_s10 + $0x1d8] sm:$0xff] }
 0x621   : > { %5424 = vmatprep.subr.mxu0 %v4212_v9  ;;  %5495 = vmatprep.subr.mxu1 %v4214_v46  ;;  %v4231_v9 = vld [vmem:[%s8954_s10 + $0x1c0] sm:$0xff]  ;;  %v4233_v46 = vld [vmem:[%s8954_s10 + $0x1d0] sm:$0xff] }
 0x622   : > { %5425 = vmatpush1.msra.mxu0 %v4211_v47  ;;  %5496 = vmatpush1.msra.mxu1 %v4213_v49  ;;  %v4216_v47 = vld [vmem:[%s8954_s10 + $0x148] sm:$0xff]  ;;  %v4218_v49 = vld [vmem:[%s8954_s10 + $0x158] sm:$0xff] }
 0x623   : > { %5426 = vmatprep.subr.mxu0 %v4196_v52  ;;  %5497 = vmatprep.subr.mxu1 %v4198_v56  ;;  %v4215_v52 = vld [vmem:[%s8954_s10 + $0x140] sm:$0xff]  ;;  %v4217_v56 = vld [vmem:[%s8954_s10 + $0x150] sm:$0xff] }
 0x624   : > { %5427 = vmatpush1.msra.mxu0 %v4195_v37  ;;  %5498 = vmatpush1.msra.mxu1 %v4197_v61  ;;  %v4200_v37 = vld [vmem:[%s8954_s10 + $0xc8] sm:$0xff]  ;;  %v4202_v61 = vld [vmem:[%s8954_s10 + $0xd8] sm:$0xff] }
 0x625   : > { %5428 = vmatprep.subr.mxu0 %v4180_v38  ;;  %5499 = vmatprep.subr.mxu1 %v4182_v62  ;;  %v4199_v38 = vld [vmem:[%s8954_s10 + $0xc0] sm:$0xff]  ;;  %v4201_v62 = vld [vmem:[%s8954_s10 + $0xd0] sm:$0xff] }
 0x626   : > { %5429 = vmatpush1.msra.mxu0 %v4179_v43  ;;  %5462 = vmatprep.mubr.f32.mxu0 %v8369_v51  ;;  %v4184_v43 = vld [vmem:[%s8954_s10 + $0x48] sm:$0xff] }
 0x627   : > { %5500 = vmatpush1.msra.mxu1 %v4181_v44  ;;  %5533 = vmatprep.mubr.f32.mxu1 %v8369_v51  ;;  %v4186_v44 = vld [vmem:[%s8954_s10 + $0x58] sm:$0xff] }
 0x628   : > { %5463 = vmatmul.mubr.f32.vlgmr.msra.gmra.mxu0 %v10795_v63  ;;  %5534 = vmatmul.mubr.f32.vlgmr.msra.gmra.mxu1 %v10795_v63 }
 0x629   : > { %5540 = vmatprep.subr.mxu0 %v4424_v6  ;;  %5611 = vmatprep.subr.mxu1 %v4426_v57  ;;  %v4183_v6 = vld [vmem:[%s8954_s10 + $0x40] sm:$0xff]  ;;  %v4185_v57 = vld [vmem:[%s8954_s10 + $0x50] sm:$0xff] }
 0x62a   : > { %5541 = vmatpush1.msra.mxu0 %v4423_v58  ;;  %5612 = vmatpush1.msra.mxu1 %v4425_v15  ;;  %v4428_v58 = vld [vmem:[%s8954_s10 + $0x7e8] sm:$0xff]  ;;  %v4430_v15 = vld [vmem:[%s8954_s10 + $0x7f8] sm:$0xff] }
 0x62b   : > { %5542 = vmatprep.subr.mxu0 %v4408_v59  ;;  %5613 = vmatprep.subr.mxu1 %v4410_v60  ;;  %v4427_v59 = vld [vmem:[%s8954_s10 + $0x7e0] sm:$0xff]  ;;  %v4429_v60 = vld [vmem:[%s8954_s10 + $0x7f0] sm:$0xff] }
 0x62c   : > { %5543 = vmatpush1.msra.mxu0 %v4407_v13  ;;  %5614 = vmatpush1.msra.mxu1 %v4409_v53  ;;  %v4412_v13 = vld [vmem:[%s8954_s10 + $0x768] sm:$0xff]  ;;  %v4414_v53 = vld [vmem:[%s8954_s10 + $0x778] sm:$0xff] }
 0x62d   : > { %5544 = vmatprep.subr.mxu0 %v4392_v20  ;;  %5615 = vmatprep.subr.mxu1 %v4394_v48  ;;  %v4411_v20 = vld [vmem:[%s8954_s10 + $0x760] sm:$0xff]  ;;  %v4413_v48 = vld [vmem:[%s8954_s10 + $0x770] sm:$0xff] }
 0x62e   : > { %5545 = vmatpush1.msra.mxu0 %v4391_v0  ;;  %5616 = vmatpush1.msra.mxu1 %v4393_v19  ;;  %v4396_v0 = vld [vmem:[%s8954_s10 + $0x6e8] sm:$0xff]  ;;  %v4398_v19 = vld [vmem:[%s8954_s10 + $0x6f8] sm:$0xff] }
 0x62f   : > { %5546 = vmatprep.subr.mxu0 %v4376_v2  ;;  %5617 = vmatprep.subr.mxu1 %v4378_v4  ;;  %v4395_v2 = vld [vmem:[%s8954_s10 + $0x6e0] sm:$0xff]  ;;  %v4397_v4 = vld [vmem:[%s8954_s10 + $0x6f0] sm:$0xff] }
 0x630   : > { %5547 = vmatpush1.msra.mxu0 %v4375_v5  ;;  %5618 = vmatpush1.msra.mxu1 %v4377_v11  ;;  %v4380_v5 = vld [vmem:[%s8954_s10 + $0x668] sm:$0xff]  ;;  %v4382_v11 = vld [vmem:[%s8954_s10 + $0x678] sm:$0xff] }
 0x631   : > { %5548 = vmatprep.subr.mxu0 %v4360_v12  ;;  %5619 = vmatprep.subr.mxu1 %v4362_v14  ;;  %v4379_v12 = vld [vmem:[%s8954_s10 + $0x660] sm:$0xff]  ;;  %v4381_v14 = vld [vmem:[%s8954_s10 + $0x670] sm:$0xff] }
 0x632   : > { %5549 = vmatpush1.msra.mxu0 %v4359_v16  ;;  %5620 = vmatpush1.msra.mxu1 %v4361_v42  ;;  %v4364_v16 = vld [vmem:[%s8954_s10 + $0x5e8] sm:$0xff]  ;;  %v4366_v42 = vld [vmem:[%s8954_s10 + $0x5f8] sm:$0xff] }
 0x633   : > { %5550 = vmatprep.subr.mxu0 %v4344_v8  ;;  %5621 = vmatprep.subr.mxu1 %v4346_v54  ;;  %v4363_v8 = vld [vmem:[%s8954_s10 + $0x5e0] sm:$0xff]  ;;  %v4365_v54 = vld [vmem:[%s8954_s10 + $0x5f0] sm:$0xff] }
 0x634   : > { %5551 = vmatpush1.msra.mxu0 %v4343_v22  ;;  %5622 = vmatpush1.msra.mxu1 %v4345_v23  ;;  %v4348_v22 = vld [vmem:[%s8954_s10 + $0x568] sm:$0xff]  ;;  %v4350_v23 = vld [vmem:[%s8954_s10 + $0x578] sm:$0xff] }
 0x635   : > { %5552 = vmatprep.subr.mxu0 %v4328_v24  ;;  %5623 = vmatprep.subr.mxu1 %v4330_v29  ;;  %v4347_v24 = vld [vmem:[%s8954_s10 + $0x560] sm:$0xff]  ;;  %v4349_v29 = vld [vmem:[%s8954_s10 + $0x570] sm:$0xff] }
 0x636   : > { %5553 = vmatpush1.msra.mxu0 %v4327_v30  ;;  %5624 = vmatpush1.msra.mxu1 %v4329_v32  ;;  %v4332_v30 = vld [vmem:[%s8954_s10 + $0x4e8] sm:$0xff]  ;;  %v4334_v32 = vld [vmem:[%s8954_s10 + $0x4f8] sm:$0xff] }
 0x637   : > { %5554 = vmatprep.subr.mxu0 %v4312_v35  ;;  %5625 = vmatprep.subr.mxu1 %v4314_v36  ;;  %v4331_v35 = vld [vmem:[%s8954_s10 + $0x4e0] sm:$0xff]  ;;  %v4333_v36 = vld [vmem:[%s8954_s10 + $0x4f0] sm:$0xff] }
 0x638   : > { %5555 = vmatpush1.msra.mxu0 %v4311_v28  ;;  %5626 = vmatpush1.msra.mxu1 %v4313_v31  ;;  %v4316_v28 = vld [vmem:[%s8954_s10 + $0x468] sm:$0xff]  ;;  %v4318_v31 = vld [vmem:[%s8954_s10 + $0x478] sm:$0xff] }
 0x639   : > { %5556 = vmatprep.subr.mxu0 %v4296_v7  ;;  %5627 = vmatprep.subr.mxu1 %v4298_v50  ;;  %v4315_v7 = vld [vmem:[%s8954_s10 + $0x460] sm:$0xff]  ;;  %v4317_v50 = vld [vmem:[%s8954_s10 + $0x470] sm:$0xff] }
 0x63a   : > { %5557 = vmatpush1.msra.mxu0 %v4295_v25  ;;  %5628 = vmatpush1.msra.mxu1 %v4297_v39  ;;  %v4300_v25 = vld [vmem:[%s8954_s10 + $0x3e8] sm:$0xff]  ;;  %v4302_v39 = vld [vmem:[%s8954_s10 + $0x3f8] sm:$0xff] }
 0x63b   : > { %5558 = vmatprep.subr.mxu0 %v4280_v40  ;;  %5629 = vmatprep.subr.mxu1 %v4282_v55  ;;  %v4299_v40 = vld [vmem:[%s8954_s10 + $0x3e0] sm:$0xff]  ;;  %v4301_v55 = vld [vmem:[%s8954_s10 + $0x3f0] sm:$0xff] }
 0x63c   : > { %5559 = vmatpush1.msra.mxu0 %v4279_v33  ;;  %5630 = vmatpush1.msra.mxu1 %v4281_v21  ;;  %v4284_v33 = vld [vmem:[%s8954_s10 + $0x368] sm:$0xff]  ;;  %v4286_v21 = vld [vmem:[%s8954_s10 + $0x378] sm:$0xff] }
 0x63d   : > { %5560 = vmatprep.subr.mxu0 %v4264_v34  ;;  %5631 = vmatprep.subr.mxu1 %v4266_v26  ;;  %v4283_v34 = vld [vmem:[%s8954_s10 + $0x360] sm:$0xff]  ;;  %v4285_v26 = vld [vmem:[%s8954_s10 + $0x370] sm:$0xff] }
 0x63e   : > { %5561 = vmatpush1.msra.mxu0 %v4263_v17  ;;  %5632 = vmatpush1.msra.mxu1 %v4265_v18  ;;  %v4268_v17 = vld [vmem:[%s8954_s10 + $0x2e8] sm:$0xff]  ;;  %v4270_v18 = vld [vmem:[%s8954_s10 + $0x2f8] sm:$0xff] }
 0x63f   : > { %5562 = vmatprep.subr.mxu0 %v4248_v10  ;;  %5633 = vmatprep.subr.mxu1 %v4250_v27  ;;  %v4267_v10 = vld [vmem:[%s8954_s10 + $0x2e0] sm:$0xff]  ;;  %v4269_v27 = vld [vmem:[%s8954_s10 + $0x2f0] sm:$0xff] }
 0x640   : > { %5563 = vmatpush1.msra.mxu0 %v4247_v3  ;;  %5634 = vmatpush1.msra.mxu1 %v4249_v1  ;;  %v4252_v3 = vld [vmem:[%s8954_s10 + $0x268] sm:$0xff]  ;;  %v4254_v1 = vld [vmem:[%s8954_s10 + $0x278] sm:$0xff] }
 0x641   : > { %5564 = vmatprep.subr.mxu0 %v4232_v41  ;;  %5635 = vmatprep.subr.mxu1 %v4234_v45  ;;  %v4251_v41 = vld [vmem:[%s8954_s10 + $0x260] sm:$0xff]  ;;  %v4253_v45 = vld [vmem:[%s8954_s10 + $0x270] sm:$0xff] }
 0x642   : > { %5565 = vmatpush1.msra.mxu0 %v4231_v9  ;;  %5636 = vmatpush1.msra.mxu1 %v4233_v46  ;;  %v4236_v9 = vld [vmem:[%s8954_s10 + $0x1e8] sm:$0xff]  ;;  %v4238_v46 = vld [vmem:[%s8954_s10 + $0x1f8] sm:$0xff] }
 0x643   : > { %5566 = vmatprep.subr.mxu0 %v4216_v47  ;;  %5637 = vmatprep.subr.mxu1 %v4218_v49  ;;  %v4235_v47 = vld [vmem:[%s8954_s10 + $0x1e0] sm:$0xff]  ;;  %v4237_v49 = vld [vmem:[%s8954_s10 + $0x1f0] sm:$0xff] }
 0x644   : > { %5567 = vmatpush1.msra.mxu0 %v4215_v52  ;;  %5638 = vmatpush1.msra.mxu1 %v4217_v56  ;;  %v4220_v52 = vld [vmem:[%s8954_s10 + $0x168] sm:$0xff]  ;;  %v4222_v56 = vld [vmem:[%s8954_s10 + $0x178] sm:$0xff] }
 0x645   : > { %5568 = vmatprep.subr.mxu0 %v4200_v37  ;;  %5639 = vmatprep.subr.mxu1 %v4202_v61  ;;  %v4219_v37 = vld [vmem:[%s8954_s10 + $0x160] sm:$0xff]  ;;  %v4221_v61 = vld [vmem:[%s8954_s10 + $0x170] sm:$0xff] }
 0x646   : > { %5569 = vmatpush1.msra.mxu0 %v4199_v38  ;;  %5640 = vmatpush1.msra.mxu1 %v4201_v62  ;;  %v4204_v38 = vld [vmem:[%s8954_s10 + $0xe8] sm:$0xff]  ;;  %v4206_v62 = vld [vmem:[%s8954_s10 + $0xf8] sm:$0xff] }
 0x647   : > { %5570 = vmatprep.subr.mxu0 %v4184_v43  ;;  %5641 = vmatprep.subr.mxu1 %v4186_v44  ;;  %v4203_v43 = vld [vmem:[%s8954_s10 + $0xe0] sm:$0xff]  ;;  %v4205_v44 = vld [vmem:[%s8954_s10 + $0xf0] sm:$0xff] }
 0x648   : > { %5571 = vmatpush1.msra.mxu0 %v4183_v6  ;;  %5604 = vmatprep.mubr.f32.mxu0 %v8369_v51  ;;  %v5828_v6 = vlaneseq }
 0x649   : > { %5642 = vmatpush1.msra.mxu1 %v4185_v57  ;;  %5675 = vmatprep.mubr.f32.mxu1 %v8369_v51  ;;  %v4188_v57 = vld [vmem:[%s8954_s10 + $0x68] sm:$0xff] }
 0x64a   : > { %5605 = vmatmul.mubr.f32.vlgmr.msra.gmra.mxu0 %v10795_v63  ;;  %5676 = vmatmul.mubr.f32.vlgmr.msra.gmra.mxu1 %v10795_v63 }
 0x64b   : > { %5682 = vmatprep.subr.mxu0 %v4428_v58  ;;  %5753 = vmatprep.subr.mxu1 %v4430_v15  ;;  %v4190_v58 = vld [vmem:[%s8954_s10 + $0x78] sm:$0xff]  ;;  %v4187_v15 = vld [vmem:[%s8954_s10 + $0x60] sm:$0xff] }
 0x64c   : > { %5683 = vmatpush1.msra.mxu0 %v4427_v59  ;;  %5754 = vmatpush1.msra.mxu1 %v4429_v60  ;;  %v4189_v59 = vld [vmem:[%s8954_s10 + $0x70] sm:$0xff]  ;;  %v11001_v60 = vshrl.u32 %v5828_v6, 7  ;;  %v6042_v6 = vld [vmem:[%s8972_s17 + $0x220] sm:$0xff] }
 0x64d   : > { %5684 = vmatprep.subr.mxu0 %v4412_v13  ;;  %5755 = vmatprep.subr.mxu1 %v4414_v53  ;;  %v6005_v13 = vld [vmem:[%s8972_s17 + $0xf8] sm:$0xff] }
 0x64e   : > { %5685 = vmatpush1.msra.mxu0 %v4411_v20  ;;  %5756 = vmatpush1.msra.mxu1 %v4413_v48  ;;  %v6069_v53 = vld [vmem:[%s8972_s17 + $0x2f8] sm:$0xff]  ;;  %v6004_v20 = vld [vmem:[%s8972_s17 + $0xf0] sm:$0xff] }
 0x64f   : > { %5686 = vmatprep.subr.mxu0 %v4396_v0  ;;  %5757 = vmatprep.subr.mxu1 %v4398_v19  ;;  %v6068_v48 = vld [vmem:[%s8972_s17 + $0x2f0] sm:$0xff]  ;;  %v5854_v0 = vsub.s32 6, %v11001_v60  ;;  %v6003_v19 = vld [vmem:[%s8972_s17 + $0xe8] sm:$0xff] }
 0x650   : > { %5687 = vmatpush1.msra.mxu0 %v4395_v2  ;;  %5758 = vmatpush1.msra.mxu1 %v4397_v4  ;;  %v6067_v2 = vld [vmem:[%s8972_s17 + $0x2e8] sm:$0xff]  ;;  %v11015_v4 = vld [vmem:[%s8966_s13] sm:$0xff] }
 0x651   : > { %5688 = vmatprep.subr.mxu0 %v4380_v5  ;;  %5759 = vmatprep.subr.mxu1 %v4382_v11  ;;  %v6066_v5 = vld [vmem:[%s8972_s17 + $0x2e0] sm:$0xff]  ;;  %v11022_v11 = vrot.slane %v11015_v4, %v5854_v0 }
 0x652   : > { %5689 = vmatpush1.msra.mxu0 %v4379_v12  ;;  %5760 = vmatpush1.msra.mxu1 %v4381_v14  ;;  %v6065_v12 = vld [vmem:[%s8972_s17 + $0x2d8] sm:$0xff]  ;;  %v6000_v14 = vld [vmem:[%s8972_s17 + $0xd0] sm:$0xff] }
 0x653   : > { %5690 = vmatprep.subr.mxu0 %v4364_v16  ;;  %5761 = vmatprep.subr.mxu1 %v4366_v42  ;;  %v6064_v16 = vld [vmem:[%s8972_s17 + $0x2d0] sm:$0xff]  ;;  %v5999_v42 = vld [vmem:[%s8972_s17 + $0xc8] sm:$0xff] }
 0x654   : > { %5691 = vmatpush1.msra.mxu0 %v4363_v8  ;;  %5762 = vmatpush1.msra.mxu1 %v4365_v54  ;;  %v6063_v8 = vld [vmem:[%s8972_s17 + $0x2c8] sm:$0xff]  ;;  %v5998_v54 = vld [vmem:[%s8972_s17 + $0xc0] sm:$0xff] }
 0x655   : > { %5692 = vmatprep.subr.mxu0 %v4348_v22  ;;  %5763 = vmatprep.subr.mxu1 %v4350_v23  ;;  %v6062_v22 = vld [vmem:[%s8972_s17 + $0x2c0] sm:$0xff]  ;;  %v5997_v23 = vld [vmem:[%s8972_s17 + $0xb8] sm:$0xff] }
 0x656   : > { %5693 = vmatpush1.msra.mxu0 %v4347_v24  ;;  %5764 = vmatpush1.msra.mxu1 %v4349_v29  ;;  %v6061_v24 = vld [vmem:[%s8972_s17 + $0x2b8] sm:$0xff]  ;;  %v5996_v29 = vld [vmem:[%s8972_s17 + $0xb0] sm:$0xff] }
 0x657   : > { %5694 = vmatprep.subr.mxu0 %v4332_v30  ;;  %5765 = vmatprep.subr.mxu1 %v4334_v32  ;;  %v6060_v30 = vld [vmem:[%s8972_s17 + $0x2b0] sm:$0xff]  ;;  %v5995_v32 = vld [vmem:[%s8972_s17 + $0xa8] sm:$0xff] }
 0x658   : > { %5695 = vmatpush1.msra.mxu0 %v4331_v35  ;;  %5766 = vmatpush1.msra.mxu1 %v4333_v36  ;;  %v6059_v35 = vld [vmem:[%s8972_s17 + $0x2a8] sm:$0xff]  ;;  %v5994_v36 = vld [vmem:[%s8972_s17 + $0xa0] sm:$0xff] }
 0x659   : > { %5696 = vmatprep.subr.mxu0 %v4316_v28  ;;  %5767 = vmatprep.subr.mxu1 %v4318_v31  ;;  %v6058_v28 = vld [vmem:[%s8972_s17 + $0x2a0] sm:$0xff]  ;;  %v5993_v31 = vld [vmem:[%s8972_s17 + $0x98] sm:$0xff] }
 0x65a   : > { %5697 = vmatpush1.msra.mxu0 %v4315_v7  ;;  %5768 = vmatpush1.msra.mxu1 %v4317_v50  ;;  %v6057_v7 = vld [vmem:[%s8972_s17 + $0x298] sm:$0xff]  ;;  %v5992_v50 = vld [vmem:[%s8972_s17 + $0x90] sm:$0xff] }
 0x65b   : > { %5698 = vmatprep.subr.mxu0 %v4300_v25  ;;  %5769 = vmatprep.subr.mxu1 %v4302_v39  ;;  %v6056_v25 = vld [vmem:[%s8972_s17 + $0x290] sm:$0xff]  ;;  %v5991_v39 = vld [vmem:[%s8972_s17 + $0x88] sm:$0xff] }
 0x65c   : > { %5699 = vmatpush1.msra.mxu0 %v4299_v40  ;;  %5770 = vmatpush1.msra.mxu1 %v4301_v55  ;;  %v6055_v40 = vld [vmem:[%s8972_s17 + $0x288] sm:$0xff]  ;;  %v5990_v55 = vld [vmem:[%s8972_s17 + $0x80] sm:$0xff] }
 0x65d   : > { %5700 = vmatprep.subr.mxu0 %v4284_v33  ;;  %5771 = vmatprep.subr.mxu1 %v4286_v21  ;;  %v6054_v33 = vld [vmem:[%s8972_s17 + $0x280] sm:$0xff]  ;;  %v5989_v21 = vld [vmem:[%s8972_s17 + $0x78] sm:$0xff] }
 0x65e   : > { %5701 = vmatpush1.msra.mxu0 %v4283_v34  ;;  %5772 = vmatpush1.msra.mxu1 %v4285_v26  ;;  %v6053_v34 = vld [vmem:[%s8972_s17 + $0x278] sm:$0xff]  ;;  %v5988_v26 = vld [vmem:[%s8972_s17 + $0x70] sm:$0xff] }
 0x65f   : > { %5702 = vmatprep.subr.mxu0 %v4268_v17  ;;  %5773 = vmatprep.subr.mxu1 %v4270_v18  ;;  %v6052_v17 = vld [vmem:[%s8972_s17 + $0x270] sm:$0xff]  ;;  %v5987_v18 = vld [vmem:[%s8972_s17 + $0x68] sm:$0xff] }
 0x660   : > { %5703 = vmatpush1.msra.mxu0 %v4267_v10  ;;  %5774 = vmatpush1.msra.mxu1 %v4269_v27  ;;  %v6051_v10 = vld [vmem:[%s8972_s17 + $0x268] sm:$0xff]  ;;  %v5986_v27 = vld [vmem:[%s8972_s17 + $0x60] sm:$0xff] }
 0x661   : > { %5704 = vmatprep.subr.mxu0 %v4252_v3  ;;  %5775 = vmatprep.subr.mxu1 %v4254_v1  ;;  %v6050_v3 = vld [vmem:[%s8972_s17 + $0x260] sm:$0xff]  ;;  %v5985_v1 = vld [vmem:[%s8972_s17 + $0x58] sm:$0xff] }
 0x662   : > { %5705 = vmatpush1.msra.mxu0 %v4251_v41  ;;  %5776 = vmatpush1.msra.mxu1 %v4253_v45  ;;  %v6049_v41 = vld [vmem:[%s8972_s17 + $0x258] sm:$0xff]  ;;  %v5984_v45 = vld [vmem:[%s8972_s17 + $0x50] sm:$0xff] }
 0x663   : > { %5706 = vmatprep.subr.mxu0 %v4236_v9  ;;  %5777 = vmatprep.subr.mxu1 %v4238_v46  ;;  %v6048_v9 = vld [vmem:[%s8972_s17 + $0x250] sm:$0xff]  ;;  %v5983_v46 = vld [vmem:[%s8972_s17 + $0x48] sm:$0xff] }
 0x664   : > { %5707 = vmatpush1.msra.mxu0 %v4235_v47  ;;  %5778 = vmatpush1.msra.mxu1 %v4237_v49  ;;  %v6047_v47 = vld [vmem:[%s8972_s17 + $0x248] sm:$0xff]  ;;  %v5982_v49 = vld [vmem:[%s8972_s17 + $0x40] sm:$0xff] }
 0x665   : > { %5708 = vmatprep.subr.mxu0 %v4220_v52  ;;  %5779 = vmatprep.subr.mxu1 %v4222_v56  ;;  %v6046_v52 = vld [vmem:[%s8972_s17 + $0x240] sm:$0xff]  ;;  %v5981_v56 = vld [vmem:[%s8972_s17 + $0x38] sm:$0xff] }
 0x666   : > { %5709 = vmatpush1.msra.mxu0 %v4219_v37  ;;  %5780 = vmatpush1.msra.mxu1 %v4221_v61  ;;  %v6045_v37 = vld [vmem:[%s8972_s17 + $0x238] sm:$0xff]  ;;  %v5980_v61 = vld [vmem:[%s8972_s17 + $0x30] sm:$0xff] }
 0x667   : > { %5710 = vmatprep.subr.mxu0 %v4204_v38  ;;  %5781 = vmatprep.subr.mxu1 %v4206_v62  ;;  %v6044_v38 = vld [vmem:[%s8972_s17 + $0x230] sm:$0xff]  ;;  %v5979_v62 = vld [vmem:[%s8972_s17 + $0x28] sm:$0xff] }
 0x668   : > { %5711 = vmatpush1.msra.mxu0 %v4203_v43  ;;  %5782 = vmatpush1.msra.mxu1 %v4205_v44  ;;  %v6043_v43 = vld [vmem:[%s8972_s17 + $0x228] sm:$0xff]  ;;  %v5978_v44 = vld [vmem:[%s8972_s17 + $0x20] sm:$0xff] }
 0x669   : > { %5712 = vmatprep.subr.mxu0 %v4188_v57  ;;  %5783 = vmatprep.subr.mxu1 %v4190_v58  ;;  %v5977_v57 = vld [vmem:[%s8972_s17 + $0x18] sm:$0xff] }
 0x66a   : > { %5713 = vmatpush1.msra.mxu0 %v4187_v15  ;;  %5746 = vmatprep.mubr.f32.mxu0 %v8369_v51  ;;  %v6041_v58 = vld [vmem:[%s8972_s17 + $0x218] sm:$0xff]  ;;  %v5976_v15 = vld [vmem:[%s8972_s17 + $0x10] sm:$0xff] }
 0x66b   : > { %5784 = vmatpush1.msra.mxu1 %v4189_v59  ;;  %5817 = vmatprep.mubr.f32.mxu1 %v8369_v51  ;;  %v6002_v51 = vld [vmem:[%s8972_s17 + $0xe0] sm:$0xff]  ;;  %v6040_v59 = vld [vmem:[%s8972_s17 + $0x210] sm:$0xff] }
 0x66c   : > { %5747 = vmatmul.mubr.f32.vlgmr.msra.gmra.mxu0 %v10795_v63  ;;  %5818 = vmatmul.mubr.f32.vlgmr.msra.gmra.mxu1 %v10795_v63  ;;  %v6001_v63 = vld [vmem:[%s8972_s17 + $0xd8] sm:$0xff] }
 0x66d   : > { %6486 = vmatprep.subr.mxu0 %v6005_v13  ;;  %6557 = vmatprep.subr.mxu1 %v6069_v53  ;;  %v5975_v13 = vld [vmem:[%s8972_s17 + $0x8] sm:$0xff] }
 0x66e   : > { %6487 = vmatpush1.msra.mxu0 %v6004_v20  ;;  %6558 = vmatpush1.msra.mxu1 %v6068_v48  ;;  %v6039_v53 = vld [vmem:[%s8972_s17 + $0x208] sm:$0xff]  ;;  %v5974_v20 = vld [vmem:[%s8972_s17] sm:$0xff] }
 0x66f   : > { %6488 = vmatprep.subr.mxu0 %v6003_v19  ;;  %6559 = vmatprep.subr.mxu1 %v6067_v2  ;;  %v6038_v48 = vld [vmem:[%s8972_s17 + $0x200] sm:$0xff]  ;;  %v6037_v19 = vld [vmem:[%s8972_s17 + $0x1f8] sm:$0xff] }
 0x670   : > { %6489 = vmatpush1.msra.mxu0 %v6002_v51  ;;  %6560 = vmatpush1.msra.mxu1 %v6066_v5  ;;  %v6101_v2 = vld [vmem:[%s8972_s17 + $0x3f8] sm:$0xff]  ;;  %v5830_v51 = vsub.s32 0, %v11001_v60  ;;  %v6036_v5 = vld [vmem:[%s8972_s17 + $0x1f0] sm:$0xff] }
 0x671   : > { %6490 = vmatprep.subr.mxu0 %v6001_v63  ;;  %6561 = vmatprep.subr.mxu1 %v6065_v12  ;;  %v6100_v63 = vld [vmem:[%s8972_s17 + $0x3f0] sm:$0xff]  ;;  %v5838_v12 = vsub.s32 2, %v11001_v60 }
 0x672   : > { %6491 = vmatpush1.msra.mxu0 %v6000_v14  ;;  %6562 = vmatpush1.msra.mxu1 %v6064_v16  ;;  %v11087_v14 = vld [vmem:[%s8966_s13 + $0x8] sm:$0xff] }
 0x673   : > { %6492 = vmatprep.subr.mxu0 %v5999_v42  ;;  %6563 = vmatprep.subr.mxu1 %v6063_v8  ;;  %v6035_v16 = vld [vmem:[%s8972_s17 + $0x1e8] sm:$0xff]  ;;  %v11094_v8 = vrot.slane %v11087_v14, %v5830_v51 }
 0x674   : > { %6493 = vmatpush1.msra.mxu0 %v5998_v54  ;;  %6564 = vmatpush1.msra.mxu1 %v6062_v22  ;;  %v6099_v42 = vld [vmem:[%s8972_s17 + $0x3e8] sm:$0xff]  ;;  %v6034_v54 = vld [vmem:[%s8972_s17 + $0x1e0] sm:$0xff] }
 0x675   : > { %6494 = vmatprep.subr.mxu0 %v5997_v23  ;;  %6565 = vmatprep.subr.mxu1 %v6061_v24  ;;  %v6098_v22 = vld [vmem:[%s8972_s17 + $0x3e0] sm:$0xff]  ;;  %v11101_v23 = vrot.slane %v11087_v14, %v5838_v12  ;;  %v6033_v24 = vld [vmem:[%s8972_s17 + $0x1d8] sm:$0xff] }
 0x676   : > { %6495 = vmatpush1.msra.mxu0 %v5996_v29  ;;  %6566 = vmatpush1.msra.mxu1 %v6060_v30  ;;  %v6097_v29 = vld [vmem:[%s8972_s17 + $0x3d8] sm:$0xff]  ;;  %v6032_v30 = vld [vmem:[%s8972_s17 + $0x1d0] sm:$0xff] }
 0x677   : > { %6496 = vmatprep.subr.mxu0 %v5995_v32  ;;  %6567 = vmatprep.subr.mxu1 %v6059_v35  ;;  %v6096_v32 = vld [vmem:[%s8972_s17 + $0x3d0] sm:$0xff]  ;;  %v6031_v35 = vld [vmem:[%s8972_s17 + $0x1c8] sm:$0xff] }
 0x678   : > { %6497 = vmatpush1.msra.mxu0 %v5994_v36  ;;  %6568 = vmatpush1.msra.mxu1 %v6058_v28  ;;  %v6095_v36 = vld [vmem:[%s8972_s17 + $0x3c8] sm:$0xff]  ;;  %v6030_v28 = vld [vmem:[%s8972_s17 + $0x1c0] sm:$0xff] }
 0x679   : > { %6498 = vmatprep.subr.mxu0 %v5993_v31  ;;  %6569 = vmatprep.subr.mxu1 %v6057_v7  ;;  %v6094_v31 = vld [vmem:[%s8972_s17 + $0x3c0] sm:$0xff]  ;;  %v6029_v7 = vld [vmem:[%s8972_s17 + $0x1b8] sm:$0xff] }
 0x67a   : > { %6499 = vmatpush1.msra.mxu0 %v5992_v50  ;;  %6570 = vmatpush1.msra.mxu1 %v6056_v25  ;;  %v6093_v50 = vld [vmem:[%s8972_s17 + $0x3b8] sm:$0xff]  ;;  %v6028_v25 = vld [vmem:[%s8972_s17 + $0x1b0] sm:$0xff] }
 0x67b   : > { %6500 = vmatprep.subr.mxu0 %v5991_v39  ;;  %6571 = vmatprep.subr.mxu1 %v6055_v40  ;;  %v6092_v39 = vld [vmem:[%s8972_s17 + $0x3b0] sm:$0xff]  ;;  %v6027_v40 = vld [vmem:[%s8972_s17 + $0x1a8] sm:$0xff] }
 0x67c   : > { %6501 = vmatpush1.msra.mxu0 %v5990_v55  ;;  %6572 = vmatpush1.msra.mxu1 %v6054_v33  ;;  %v6091_v55 = vld [vmem:[%s8972_s17 + $0x3a8] sm:$0xff]  ;;  %v6026_v33 = vld [vmem:[%s8972_s17 + $0x1a0] sm:$0xff] }
 0x67d   : > { %6502 = vmatprep.subr.mxu0 %v5989_v21  ;;  %6573 = vmatprep.subr.mxu1 %v6053_v34  ;;  %v6090_v21 = vld [vmem:[%s8972_s17 + $0x3a0] sm:$0xff]  ;;  %v6025_v34 = vld [vmem:[%s8972_s17 + $0x198] sm:$0xff] }
 0x67e   : > { %6503 = vmatpush1.msra.mxu0 %v5988_v26  ;;  %6574 = vmatpush1.msra.mxu1 %v6052_v17  ;;  %v6089_v26 = vld [vmem:[%s8972_s17 + $0x398] sm:$0xff]  ;;  %v6024_v17 = vld [vmem:[%s8972_s17 + $0x190] sm:$0xff] }
 0x67f   : > { %6504 = vmatprep.subr.mxu0 %v5987_v18  ;;  %6575 = vmatprep.subr.mxu1 %v6051_v10  ;;  %v6088_v18 = vld [vmem:[%s8972_s17 + $0x390] sm:$0xff]  ;;  %v6023_v10 = vld [vmem:[%s8972_s17 + $0x188] sm:$0xff] }
 0x680   : > { %6505 = vmatpush1.msra.mxu0 %v5986_v27  ;;  %6576 = vmatpush1.msra.mxu1 %v6050_v3  ;;  %v6087_v27 = vld [vmem:[%s8972_s17 + $0x388] sm:$0xff]  ;;  %v6022_v3 = vld [vmem:[%s8972_s17 + $0x180] sm:$0xff] }
 0x681   : > { %6506 = vmatprep.subr.mxu0 %v5985_v1  ;;  %6577 = vmatprep.subr.mxu1 %v6049_v41  ;;  %v6086_v1 = vld [vmem:[%s8972_s17 + $0x380] sm:$0xff]  ;;  %v6021_v41 = vld [vmem:[%s8972_s17 + $0x178] sm:$0xff] }
 0x682   : > { %6507 = vmatpush1.msra.mxu0 %v5984_v45  ;;  %6578 = vmatpush1.msra.mxu1 %v6048_v9  ;;  %v6085_v45 = vld [vmem:[%s8972_s17 + $0x378] sm:$0xff]  ;;  %v6020_v9 = vld [vmem:[%s8972_s17 + $0x170] sm:$0xff] }
 0x683   : > { %6508 = vmatprep.subr.mxu0 %v5983_v46  ;;  %6579 = vmatprep.subr.mxu1 %v6047_v47  ;;  %v6084_v46 = vld [vmem:[%s8972_s17 + $0x370] sm:$0xff]  ;;  %v6019_v47 = vld [vmem:[%s8972_s17 + $0x168] sm:$0xff] }
 0x684   : > { %6509 = vmatpush1.msra.mxu0 %v5982_v49  ;;  %6580 = vmatpush1.msra.mxu1 %v6046_v52  ;;  %v6083_v49 = vld [vmem:[%s8972_s17 + $0x368] sm:$0xff]  ;;  %v6018_v52 = vld [vmem:[%s8972_s17 + $0x160] sm:$0xff] }
 0x685   : > { %6510 = vmatprep.subr.mxu0 %v5981_v56  ;;  %6581 = vmatprep.subr.mxu1 %v6045_v37  ;;  %v6082_v56 = vld [vmem:[%s8972_s17 + $0x360] sm:$0xff]  ;;  %v6017_v37 = vld [vmem:[%s8972_s17 + $0x158] sm:$0xff] }
 0x686   : > { %6511 = vmatpush1.msra.mxu0 %v5980_v61  ;;  %6582 = vmatpush1.msra.mxu1 %v6044_v38  ;;  %v6081_v61 = vld [vmem:[%s8972_s17 + $0x358] sm:$0xff]  ;;  %v6016_v38 = vld [vmem:[%s8972_s17 + $0x150] sm:$0xff] }
 0x687   : > { %6512 = vmatprep.subr.mxu0 %v5979_v62  ;;  %6583 = vmatprep.subr.mxu1 %v6043_v43  ;;  %v6080_v62 = vld [vmem:[%s8972_s17 + $0x350] sm:$0xff]  ;;  %v6015_v43 = vld [vmem:[%s8972_s17 + $0x148] sm:$0xff] }
 0x688   : > { %6513 = vmatpush1.msra.mxu0 %v5978_v44  ;;  %6584 = vmatpush1.msra.mxu1 %v6042_v6  ;;  %v6079_v44 = vld [vmem:[%s8972_s17 + $0x348] sm:$0xff]  ;;  %v6014_v6 = vld [vmem:[%s8972_s17 + $0x140] sm:$0xff] }
 0x689   : > { %6514 = vmatprep.subr.mxu0 %v5977_v57  ;;  %6585 = vmatprep.subr.mxu1 %v6041_v58  ;;  %v6078_v57 = vld [vmem:[%s8972_s17 + $0x340] sm:$0xff]  ;;  %v6013_v58 = vld [vmem:[%s8972_s17 + $0x138] sm:$0xff] }
 0x68a   : > { %6515 = vmatpush1.msra.mxu0 %v5976_v15  ;;  %6586 = vmatpush1.msra.mxu1 %v6040_v59  ;;  %v6077_v15 = vld [vmem:[%s8972_s17 + $0x338] sm:$0xff]  ;;  %v6012_v59 = vld [vmem:[%s8972_s17 + $0x130] sm:$0xff] }
 0x68b   : > { %6516 = vmatprep.subr.mxu0 %v5975_v13  ;;  %6587 = vmatprep.subr.mxu1 %v6039_v53  ;;  %v6076_v13 = vld [vmem:[%s8972_s17 + $0x330] sm:$0xff]  ;;  %v6011_v53 = vld [vmem:[%s8972_s17 + $0x128] sm:$0xff] }
 0x68c   : > { %6517 = vmatpush1.msra.mxu0 %v5974_v20  ;;  %6588 = vmatpush1.msra.mxu1 %v6038_v48  ;;  %v6075_v20 = vld [vmem:[%s8972_s17 + $0x328] sm:$0xff]  ;;  %v6010_v48 = vld [vmem:[%s8972_s17 + $0x120] sm:$0xff] }
 0x68d   : > { %6518 = vmatprep.subr.mxu0 %v6037_v19  ;;  %6589 = vmatprep.subr.mxu1 %v6101_v2  ;;  %v6074_v19 = vld [vmem:[%s8972_s17 + $0x320] sm:$0xff]  ;;  %v6009_v2 = vld [vmem:[%s8972_s17 + $0x118] sm:$0xff] }
 0x68e   : > { %6519 = vmatpush2.msra.mxu0 %v6036_v5  ;;  %6590 = vmatpush2.msra.mxu1 %v6100_v63  ;;  %v6073_v5 = vld [vmem:[%s8972_s17 + $0x318] sm:$0xff]  ;;  %v6008_v63 = vld [vmem:[%s8972_s17 + $0x110] sm:$0xff] }
 0x68f   : > { %6520 = vmatprep.subr.mxu0 %v6035_v16  ;;  %6591 = vmatprep.subr.mxu1 %v6099_v42  ;;  %v6072_v16 = vld [vmem:[%s8972_s17 + $0x310] sm:$0xff]  ;;  %v6007_v42 = vld [vmem:[%s8972_s17 + $0x108] sm:$0xff] }
 0x690   : > { %6521 = vmatpush2.msra.mxu0 %v6034_v54  ;;  %6592 = vmatpush2.msra.mxu1 %v6098_v22  ;;  %v6071_v54 = vld [vmem:[%s8972_s17 + $0x308] sm:$0xff]  ;;  %v6006_v22 = vld [vmem:[%s8972_s17 + $0x100] sm:$0xff] }
 0x691   : > { %6522 = vmatprep.subr.mxu0 %v6033_v24  ;;  %6593 = vmatprep.subr.mxu1 %v6097_v29  ;;  %v6070_v24 = vld [vmem:[%s8972_s17 + $0x300] sm:$0xff]  ;;  %v6133_v29 = vld [vmem:[%s8972_s17 + $0x4f8] sm:$0xff] }
 0x692   : > { %6523 = vmatpush2.msra.mxu0 %v6032_v30  ;;  %6594 = vmatpush2.msra.mxu1 %v6096_v32  ;;  %v6197_v30 = vld [vmem:[%s8972_s17 + $0x6f8] sm:$0xff]  ;;  %v5850_v32 = vsub.s32 5, %v11001_v60 }
 0x693   : > { %6524 = vmatprep.subr.mxu0 %v6031_v35  ;;  %6595 = vmatprep.subr.mxu1 %v6095_v36  ;;  %v5858_v35 = vsub.s32 7, %v11001_v60  ;;  %v11166_v36 = vrot.slane %v11087_v14, %v5854_v0 }
 0x694   : > { %6525 = vmatpush2.msra.mxu0 %v6030_v28  ;;  %6596 = vmatpush2.msra.mxu1 %v6094_v31  ;;  %v4754_v28 = vpop.f32.mrf.mxu0  ;;  %v4825_v31 = vpop.f32.mrf.mxu1 }
 0x695   : > { %6526 = vmatprep.subr.mxu0 %v6029_v7  ;;  %6597 = vmatprep.subr.mxu1 %v6093_v50  ;;  %v11171_v7 = vrot.slane %v11087_v14, %v5850_v32  ;;  %v11176_v50 = vrot.slane %v11087_v14, %v5858_v35 }
 0x696   : > { %6527 = vmatpush2.msra.mxu0 %v6028_v25  ;;  %6598 = vmatpush2.msra.mxu1 %v6092_v39  ;;  %v4756_v25 = vpop.f32.mrf.mxu0  ;;  %v4827_v39 = vpop.f32.mrf.mxu1 }
 0x697   : > { %6528 = vmatprep.subr.mxu0 %v6027_v40  ;;  %6599 = vmatprep.subr.mxu1 %v6091_v55 }
 0x698   : > { %6529 = vmatpush2.msra.mxu0 %v6026_v33  ;;  %6600 = vmatpush2.msra.mxu1 %v6090_v21  ;;  %v11178_v40 = vpop.f32.mrf.mxu0  ;;  %v11180_v55 = vpop.f32.mrf.mxu1 }
 0x699   : > { %6530 = vmatprep.subr.mxu0 %v6025_v34  ;;  %6601 = vmatprep.subr.mxu1 %v6089_v26 }
 0x69a   : > { %6531 = vmatpush2.msra.mxu0 %v6024_v17  ;;  %6602 = vmatpush2.msra.mxu1 %v6088_v18  ;;  %v11182_v0 = vpop.f32.mrf.mxu0  ;;  %v11184_v33 = vpop.f32.mrf.mxu1 }
 0x69b   : > { %6532 = vmatprep.subr.mxu0 %v6023_v10  ;;  %6603 = vmatprep.subr.mxu1 %v6087_v27  ;;  %v5834_v27 = vsub.s32 1, %v11001_v60 }
 0x69c   : > { %6533 = vmatpush2.msra.mxu0 %v6022_v3  ;;  %6604 = vmatpush2.msra.mxu1 %v6086_v1  ;;  %v11186_v21 = vpop.f32.mrf.mxu0  ;;  %v11188_v34 = vpop.f32.mrf.mxu1  ;;  %v5842_v3 = vsub.s32 3, %v11001_v60 }
 0x69d   : > { %6534 = vmatprep.subr.mxu0 %v6021_v41  ;;  %6605 = vmatprep.subr.mxu1 %v6085_v45  ;;  %v5831_v45 = vrot.slane %v11015_v4, %v5830_v51 }
 0x69e   : > { %6535 = vmatpush2.msra.mxu0 %v6020_v9  ;;  %6606 = vmatpush2.msra.mxu1 %v6084_v46  ;;  %v11190_v26 = vpop.f32.mrf.mxu0  ;;  %v11192_v17 = vpop.f32.mrf.mxu1  ;;  %v5839_v9 = vrot.slane %v11015_v4, %v5838_v12 }
 0x69f   : > { %6536 = vmatprep.subr.mxu0 %v6019_v47  ;;  %6607 = vmatprep.subr.mxu1 %v6083_v49 }
 0x6a0   : > { %6537 = vmatpush2.msra.mxu0 %v6018_v52  ;;  %6608 = vmatpush2.msra.mxu1 %v6082_v56  ;;  %v5835_v56 = vrot.slane %v11015_v4, %v5834_v27 }
 0x6a1   : > { %6538 = vmatprep.subr.mxu0 %v6017_v37  ;;  %6609 = vmatprep.subr.mxu1 %v6081_v61  ;;  %v5843_v37 = vrot.slane %v11015_v4, %v5842_v3 }
 0x6a2   : > { %6539 = vmatpush2.msra.mxu0 %v6016_v38  ;;  %6610 = vmatpush2.msra.mxu1 %v6080_v62 }
 0x6a3   : > { %6540 = vmatprep.subr.mxu0 %v6015_v43  ;;  %6611 = vmatprep.subr.mxu1 %v6079_v44  ;;  %v11194_v18 = vpop.f32.mrf.mxu0 }
 0x6a4   : > { %6541 = vmatpush2.msra.mxu0 %v6014_v6  ;;  %6612 = vmatpush2.msra.mxu1 %v6078_v57 }
 0x6a5   : > { %6542 = vmatprep.subr.mxu0 %v6013_v58  ;;  %6613 = vmatprep.subr.mxu1 %v6077_v15  ;;  %v11196_v10 = vpop.f32.mrf.mxu1  ;;  %v11200_v1 = vpop.f32.mrf.mxu0 }
 0x6a6   : > { %6543 = vmatpush2.msra.mxu0 %v6012_v59  ;;  %6614 = vmatpush2.msra.mxu1 %v6076_v13 }
 0x6a7   : > { %6544 = vmatprep.subr.mxu0 %v6011_v53  ;;  %6615 = vmatprep.subr.mxu1 %v6075_v20  ;;  %v11202_v41 = vpop.f32.mrf.mxu1  ;;  %v6132_v20 = vld [vmem:[%s8972_s17 + $0x4f0] sm:$0xff] }
 0x6a8   : > { %6545 = vmatpush2.msra.mxu0 %v6010_v48  ;;  %6616 = vmatpush2.msra.mxu1 %v6074_v19  ;;  %v6196_v48 = vld [vmem:[%s8972_s17 + $0x6f0] sm:$0xff] }
 0x6a9   : > { %6546 = vmatprep.subr.mxu0 %v6009_v2  ;;  %6617 = vmatprep.subr.mxu1 %v6073_v5  ;;  %v6131_v5 = vld [vmem:[%s8972_s17 + $0x4e8] sm:$0xff] }
 0x6aa   : > { %6547 = vmatpush2.msra.mxu0 %v6008_v63  ;;  %6618 = vmatpush2.msra.mxu1 %v6072_v16  ;;  %v6195_v63 = vld [vmem:[%s8972_s17 + $0x6e8] sm:$0xff]  ;;  %v6130_v16 = vld [vmem:[%s8972_s17 + $0x4e0] sm:$0xff] }
 0x6ab   : > { %6548 = vmatprep.subr.mxu0 %v6007_v42  ;;  %6619 = vmatprep.subr.mxu1 %v6071_v54  ;;  %v6194_v42 = vld [vmem:[%s8972_s17 + $0x6e0] sm:$0xff]  ;;  %v6129_v54 = vld [vmem:[%s8972_s17 + $0x4d8] sm:$0xff] }
 0x6ac   : > { %6549 = vmatpush2.msra.mxu0 %v6006_v22  ;;  %6620 = vmatpush2.msra.mxu1 %v6070_v24  ;;  %v6193_v22 = vld [vmem:[%s8972_s17 + $0x6d8] sm:$0xff]  ;;  %v6128_v24 = vld [vmem:[%s8972_s17 + $0x4d0] sm:$0xff] }
 0x6ad   : > { %6628 = vmatprep.subr.mxu0 %v6133_v29  ;;  %6699 = vmatprep.subr.mxu1 %v6197_v30  ;;  %v6192_v29 = vld [vmem:[%s8972_s17 + $0x6d0] sm:$0xff]  ;;  %v6127_v30 = vld [vmem:[%s8972_s17 + $0x4c8] sm:$0xff] }
 0x6c6   : > { %v5322_v46 = vpop.f32.mrf.mxu0  ;;  %v5393_v47 = vpop.f32.mrf.mxu1 }
 0x6c7   : > { %v5323_v49 = vadd.f32 %v5322_v46, %v4754_v28  ;;  %v5394_v52 = vadd.f32 %v5393_v47, %v4825_v31  ;;  %v6191_v28 = vld [vmem:[%s8972_s17 + $0x6c8] sm:$0xff]  ;;  %v6126_v31 = vld [vmem:[%s8972_s17 + $0x4c0] sm:$0xff]  ;;  %v6188_v46 = vld [vmem:[%s8972_s17 + $0x6b0] sm:$0xff] }
 0x6c8   : > { %v5324_v61 = vpop.f32.mrf.mxu0  ;;  %v5395_v38 = vpop.f32.mrf.mxu1  ;;  %v6123_v47 = vld [vmem:[%s8972_s17 + $0x4a8] sm:$0xff] }
 0x6c9   : > { %v5908_v62 = vadd.f32 %v5831_v45, %v5323_v49  ;;  %v5910_v51 = vadd.f32 %v5839_v9, %v5394_v52  ;;  %v5325_v43 = vadd.f32 %v5324_v61, %v4756_v25  ;;  %v5396_v12 = vadd.f32 %v5395_v38, %v4827_v39  ;;  %v6190_v25 = vld [vmem:[%s8972_s17 + $0x6c0] sm:$0xff]  ;;  %v6125_v39 = vld [vmem:[%s8972_s17 + $0x4b8] sm:$0xff]  ;;  %v6124_v9 = vld [vmem:[%s8972_s17 + $0x4b0] sm:$0xff] }
 0x6ca   : > { %v6189_v45 = vld [vmem:[%s8972_s17 + $0x6b8] sm:$0xff]  ;;  %v6187_v49 = vld [vmem:[%s8972_s17 + $0x6a8] sm:$0xff]  ;;  %v6122_v52 = vld [vmem:[%s8972_s17 + $0x4a0] sm:$0xff] }
 0x6cb   : > { %v5909_v44 = vadd.f32 %v5835_v56, %v5325_v43  ;;  %v5911_v6 = vadd.f32 %v5843_v37, %v5396_v12  ;;  %v5940_v57 = vmul.f32 0.01, %v5908_v62  ;;  %v5942_v58 = vmul.f32 0.01, %v5910_v51  ;;  %v6186_v56 = vld [vmem:[%s8972_s17 + $0x6a0] sm:$0xff]  ;;  %v6121_v37 = vld [vmem:[%s8972_s17 + $0x498] sm:$0xff] }
 0x6cc   : > { %vm5924_vm0 = vcmp.gt.f32.partialorder %v5908_v62, 0.0  ;;  %vm5926_vm1 = vcmp.gt.f32.partialorder %v5910_v51, 0.0  ;;  %v6185_v61 = vld [vmem:[%s8972_s17 + $0x698] sm:$0xff]  ;;  %v6120_v38 = vld [vmem:[%s8972_s17 + $0x490] sm:$0xff]  ;;  %v6183_v43 = vld [vmem:[%s8972_s17 + $0x688] sm:$0xff] }
 0x6cd   : > { %vm5925_vm2 = vcmp.gt.f32.partialorder %v5909_v44, 0.0  ;;  %v5941_v15 = vmul.f32 0.01, %v5909_v44  ;;  %vm5927_vm3 = vcmp.gt.f32.partialorder %v5911_v6, 0.0  ;;  %v5943_v59 = vmul.f32 0.01, %v5911_v6 }
 0x6ce   : > { %v5956_v19 = vsel %vm5924_vm0, %v5908_v62, %v5940_v57  ;;  %v5958_v2 = vsel %vm5926_vm1, %v5910_v51, %v5942_v58  ;;  %v6184_v62 = vld [vmem:[%s8972_s17 + $0x690] sm:$0xff]  ;;  %v6119_v51 = vld [vmem:[%s8972_s17 + $0x488] sm:$0xff]  ;;  %v6118_v12 = vld [vmem:[%s8972_s17 + $0x480] sm:$0xff] }
 0x6cf   : > { %v5957_v13 = vsel %vm5925_vm2, %v5909_v44, %v5941_v15  ;;  %v5959_v53 = vsel %vm5927_vm3, %v5911_v6, %v5943_v59  ;;  %v6182_v44 = vld [vmem:[%s8972_s17 + $0x680] sm:$0xff]  ;;  %v6117_v6 = vld [vmem:[%s8972_s17 + $0x478] sm:$0xff]  ;;  %v6116_v58 = vld [vmem:[%s8972_s17 + $0x470] sm:$0xff] }
 0x6d0   : > { %6550 = vmatprep.mubr.f32.mxu0 %v5957_v13  ;;  %6621 = vmatprep.mubr.f32.mxu1 %v5959_v53  ;;  %v6181_v57 = vld [vmem:[%s8972_s17 + $0x678] sm:$0xff]  ;;  %v6180_v15 = vld [vmem:[%s8972_s17 + $0x670] sm:$0xff]  ;;  %v6115_v59 = vld [vmem:[%s8972_s17 + $0x468] sm:$0xff] }
 0x6d1   : > { %6551 = vmatmul.mubr.f32.vlgmr.msra.gmra.mxu0 %v5956_v19  ;;  %6622 = vmatmul.mubr.f32.vlgmr.msra.gmra.mxu1 %v5958_v2  ;;  %v6179_v13 = vld [vmem:[%s8972_s17 + $0x668] sm:$0xff]  ;;  %v6114_v53 = vld [vmem:[%s8972_s17 + $0x460] sm:$0xff]  ;;  %v6177_v19 = vld [vmem:[%s8972_s17 + $0x658] sm:$0xff] }
 0x6d2   : > { %6629 = vmatpush1.msra.mxu0 %v6132_v20  ;;  %6700 = vmatpush1.msra.mxu1 %v6196_v48  ;;  %v6178_v20 = vld [vmem:[%s8972_s17 + $0x660] sm:$0xff]  ;;  %v6113_v48 = vld [vmem:[%s8972_s17 + $0x458] sm:$0xff]  ;;  %v6112_v2 = vld [vmem:[%s8972_s17 + $0x450] sm:$0xff] }
 0x6d3   : > { %6630 = vmatprep.subr.mxu0 %v6131_v5  ;;  %6701 = vmatprep.subr.mxu1 %v6195_v63  ;;  %v6176_v5 = vld [vmem:[%s8972_s17 + $0x650] sm:$0xff]  ;;  %v6111_v63 = vld [vmem:[%s8972_s17 + $0x448] sm:$0xff] }
 0x6d4   : > { %6631 = vmatpush1.msra.mxu0 %v6130_v16  ;;  %6702 = vmatpush1.msra.mxu1 %v6194_v42  ;;  %v6175_v16 = vld [vmem:[%s8972_s17 + $0x648] sm:$0xff]  ;;  %v6110_v42 = vld [vmem:[%s8972_s17 + $0x440] sm:$0xff] }
 0x6d5   : > { %6632 = vmatprep.subr.mxu0 %v6129_v54  ;;  %6703 = vmatprep.subr.mxu1 %v6193_v22  ;;  %v6174_v54 = vld [vmem:[%s8972_s17 + $0x640] sm:$0xff]  ;;  %v6109_v22 = vld [vmem:[%s8972_s17 + $0x438] sm:$0xff] }
 0x6d6   : > { %6633 = vmatpush1.msra.mxu0 %v6128_v24  ;;  %6704 = vmatpush1.msra.mxu1 %v6192_v29  ;;  %v6173_v24 = vld [vmem:[%s8972_s17 + $0x638] sm:$0xff]  ;;  %v6108_v29 = vld [vmem:[%s8972_s17 + $0x430] sm:$0xff] }
 0x6d7   : > { %6634 = vmatprep.subr.mxu0 %v6127_v30  ;;  %6705 = vmatprep.subr.mxu1 %v6191_v28  ;;  %v6172_v30 = vld [vmem:[%s8972_s17 + $0x630] sm:$0xff] }
 0x6d8   : > { %6635 = vmatpush1.msra.mxu0 %v6126_v31  ;;  %6706 = vmatpush1.msra.mxu1 %v6190_v25  ;;  %v6107_v25 = vld [vmem:[%s8972_s17 + $0x428] sm:$0xff] }
 0x6d9   : > { %6636 = vmatprep.subr.mxu0 %v6125_v39  ;;  %6707 = vmatprep.subr.mxu1 %v6189_v45  ;;  %v5851_v39 = vrot.slane %v11015_v4, %v5850_v32  ;;  %v5859_v45 = vrot.slane %v11015_v4, %v5858_v35  ;;  %v6169_v4 = vld [vmem:[%s8972_s17 + $0x618] sm:$0xff]  ;;  %v6104_v35 = vld [vmem:[%s8972_s17 + $0x410] sm:$0xff] }
 0x6da   : > { %6637 = vmatpush1.msra.mxu0 %v6124_v9  ;;  %6708 = vmatpush1.msra.mxu1 %v6188_v46  ;;  %v6171_v9 = vld [vmem:[%s8972_s17 + $0x628] sm:$0xff]  ;;  %v6106_v46 = vld [vmem:[%s8972_s17 + $0x420] sm:$0xff] }
 0x6db   : > { %6638 = vmatprep.subr.mxu0 %v6123_v47  ;;  %6709 = vmatprep.subr.mxu1 %v6187_v49 }
 0x6dc   : > { %6639 = vmatpush1.msra.mxu0 %v6122_v52  ;;  %6710 = vmatpush1.msra.mxu1 %v6186_v56  ;;  %v6170_v52 = vld [vmem:[%s8972_s17 + $0x620] sm:$0xff]  ;;  %v6105_v56 = vld [vmem:[%s8972_s17 + $0x418] sm:$0xff] }
 0x6dd   : > { %6640 = vmatprep.subr.mxu0 %v6121_v37  ;;  %6711 = vmatprep.subr.mxu1 %v6185_v61  ;;  %v6168_v61 = vld [vmem:[%s8972_s17 + $0x610] sm:$0xff] }
 0x6de   : > { %6641 = vmatpush1.msra.mxu0 %v6120_v38  ;;  %6712 = vmatpush1.msra.mxu1 %v6184_v62  ;;  %v6103_v38 = vld [vmem:[%s8972_s17 + $0x408] sm:$0xff] }
 0x6df   : > { %6642 = vmatprep.subr.mxu0 %v6119_v51  ;;  %6713 = vmatprep.subr.mxu1 %v6183_v43  ;;  %v6167_v43 = vld [vmem:[%s8972_s17 + $0x608] sm:$0xff] }
 0x6e0   : > { %6643 = vmatpush1.msra.mxu0 %v6118_v12  ;;  %6714 = vmatpush1.msra.mxu1 %v6182_v44  ;;  %v6102_v12 = vld [vmem:[%s8972_s17 + $0x400] sm:$0xff]  ;;  %v6229_v44 = vld [vmem:[%s8972_s17 + $0x7f8] sm:$0xff] }
 0x6e1   : > { %6644 = vmatprep.subr.mxu0 %v6117_v6  ;;  %6715 = vmatprep.subr.mxu1 %v6181_v57 }
 0x6e2   : > { %6645 = vmatpush1.msra.mxu0 %v6116_v58  ;;  %6716 = vmatpush1.msra.mxu1 %v6180_v15  ;;  %v6164_v58 = vld [vmem:[%s8972_s17 + $0x5f0] sm:$0xff] }
 0x6e3   : > { %6646 = vmatprep.subr.mxu0 %v6115_v59  ;;  %6717 = vmatprep.subr.mxu1 %v6179_v13  ;;  %v6228_v13 = vld [vmem:[%s8972_s17 + $0x7f0] sm:$0xff] }
 0x6e4   : > { %6647 = vmatpush1.msra.mxu0 %v6114_v53  ;;  %6718 = vmatpush1.msra.mxu1 %v6178_v20  ;;  %v6163_v53 = vld [vmem:[%s8972_s17 + $0x5e8] sm:$0xff] }
 0x6e5   : > { %6648 = vmatprep.subr.mxu0 %v6113_v48  ;;  %6719 = vmatprep.subr.mxu1 %v6177_v19  ;;  %v6227_v20 = vld [vmem:[%s8972_s17 + $0x7e8] sm:$0xff]  ;;  %v6162_v48 = vld [vmem:[%s8972_s17 + $0x5e0] sm:$0xff] }
 0x6e6   : > { %6649 = vmatpush1.msra.mxu0 %v6112_v2  ;;  %6720 = vmatpush1.msra.mxu1 %v6176_v5  ;;  %v6226_v19 = vld [vmem:[%s8972_s17 + $0x7e0] sm:$0xff]  ;;  %v6161_v2 = vld [vmem:[%s8972_s17 + $0x5d8] sm:$0xff] }
 0x6e7   : > { %6650 = vmatprep.subr.mxu0 %v6111_v63  ;;  %6721 = vmatprep.subr.mxu1 %v6175_v16  ;;  %v6225_v5 = vld [vmem:[%s8972_s17 + $0x7d8] sm:$0xff]  ;;  %v6160_v63 = vld [vmem:[%s8972_s17 + $0x5d0] sm:$0xff] }
 0x6e8   : > { %v11266_v28 = vpop.f32.mrf.mxu0  ;;  %v11268_v31 = vpop.f32.mrf.mxu1  ;;  %6651 = vmatpush1.msra.mxu0 %v6110_v42  ;;  %6722 = vmatpush1.msra.mxu1 %v6174_v54  ;;  %v6224_v16 = vld [vmem:[%s8972_s17 + $0x7d0] sm:$0xff]  ;;  %v6159_v42 = vld [vmem:[%s8972_s17 + $0x5c8] sm:$0xff] }
 0x6e9   : > { %6652 = vmatprep.subr.mxu0 %v6109_v22  ;;  %6723 = vmatprep.subr.mxu1 %v6173_v24  ;;  %v6223_v54 = vld [vmem:[%s8972_s17 + $0x7c8] sm:$0xff]  ;;  %v6158_v22 = vld [vmem:[%s8972_s17 + $0x5c0] sm:$0xff] }
 0x6ea   : > { %v5466_v47 = vpop.f32.mrf.mxu0  ;;  %v5537_v49 = vpop.f32.mrf.mxu1  ;;  %6653 = vmatpush1.msra.mxu0 %v6108_v29  ;;  %6724 = vmatpush1.msra.mxu1 %v6172_v30  ;;  %v6222_v24 = vld [vmem:[%s8972_s17 + $0x7c0] sm:$0xff]  ;;  %v6157_v29 = vld [vmem:[%s8972_s17 + $0x5b8] sm:$0xff] }
 0x6eb   : > { %v5467_v32 = vadd.f32 %v5466_v47, %v11182_v0  ;;  %v5538_v37 = vadd.f32 %v5537_v49, %v11184_v33  ;;  %6654 = vmatprep.subr.mxu0 %v6107_v25  ;;  %6725 = vmatprep.subr.mxu1 %v6171_v9  ;;  %v6166_v0 = vld [vmem:[%s8972_s17 + $0x600] sm:$0xff]  ;;  %v6165_v33 = vld [vmem:[%s8972_s17 + $0x5f8] sm:$0xff]  ;;  %v6156_v25 = vld [vmem:[%s8972_s17 + $0x5b0] sm:$0xff] }
 0x6ec   : > { %6655 = vmatpush1.msra.mxu0 %v6106_v46  ;;  %6726 = vmatpush1.msra.mxu1 %v6170_v52  ;;  %v6221_v30 = vld [vmem:[%s8972_s17 + $0x7b8] sm:$0xff]  ;;  %v6219_v9 = vld [vmem:[%s8972_s17 + $0x7a8] sm:$0xff]  ;;  %v6154_v46 = vld [vmem:[%s8972_s17 + $0x5a0] sm:$0xff] }
 0x6ed   : > { %v5913_v62 = vadd.f32 %v5851_v39, %v5467_v32  ;;  %v5915_v51 = vadd.f32 %v5859_v45, %v5538_v37  ;;  %6656 = vmatprep.subr.mxu0 %v6105_v56  ;;  %6727 = vmatprep.subr.mxu1 %v6169_v4  ;;  %v6220_v39 = vld [vmem:[%s8972_s17 + $0x7b0] sm:$0xff]  ;;  %v6155_v45 = vld [vmem:[%s8972_s17 + $0x5a8] sm:$0xff]  ;;  %v6218_v47 = vld [vmem:[%s8972_s17 + $0x7a0] sm:$0xff] }
 0x6ee   : > { %6657 = vmatpush1.msra.mxu0 %v6104_v35  ;;  %6728 = vmatpush1.msra.mxu1 %v6168_v61  ;;  %v6153_v49 = vld [vmem:[%s8972_s17 + $0x598] sm:$0xff]  ;;  %v6152_v56 = vld [vmem:[%s8972_s17 + $0x590] sm:$0xff]  ;;  %v6151_v37 = vld [vmem:[%s8972_s17 + $0x588] sm:$0xff] }
 0x6ef   : > { %6658 = vmatprep.subr.mxu0 %v6103_v38  ;;  %vm5929_vm4 = vcmp.gt.f32.partialorder %v5913_v62, 0.0  ;;  %v5945_v6 = vmul.f32 0.01, %v5913_v62  ;;  %vm5931_vm5 = vcmp.gt.f32.partialorder %v5915_v51, 0.0  ;;  %v5947_v57 = vmul.f32 0.01, %v5915_v51  ;;  %6729 = vmatprep.subr.mxu1 %v6167_v43 }
 0x6f0   : > { %6659 = vmatpush1.msra.mxu0 %v6102_v12  ;;  %6730 = vmatpush1.msra.mxu1 %v6166_v0  ;;  %v6217_v52 = vld [vmem:[%s8972_s17 + $0x798] sm:$0xff]  ;;  %v6216_v32 = vld [vmem:[%s8972_s17 + $0x790] sm:$0xff]  ;;  %v6215_v4 = vld [vmem:[%s8972_s17 + $0x788] sm:$0xff]  ;;  %v5846_v0 = vsub.s32 4, %v11001_v60 }
 0x6f1   : > { %6660 = vmatprep.subr.mxu0 %v6165_v33  ;;  %v5961_v15 = vsel %vm5929_vm4, %v5913_v62, %v5945_v6  ;;  %v5963_v59 = vsel %vm5931_vm5, %v5915_v51, %v5947_v57  ;;  %6731 = vmatprep.subr.mxu1 %v6229_v44  ;;  %v6150_v35 = vld [vmem:[%s8972_s17 + $0x580] sm:$0xff]  ;;  %v6149_v38 = vld [vmem:[%s8972_s17 + $0x578] sm:$0xff]  ;;  %v6148_v51 = vld [vmem:[%s8972_s17 + $0x570] sm:$0xff] }
 0x6f2   : > { %6692 = vmatprep.mubr.f32.mxu0 %v5961_v15  ;;  %6763 = vmatprep.mubr.f32.mxu1 %v5963_v59  ;;  %v6214_v61 = vld [vmem:[%s8972_s17 + $0x780] sm:$0xff]  ;;  %v6213_v62 = vld [vmem:[%s8972_s17 + $0x778] sm:$0xff]  ;;  %v6212_v43 = vld [vmem:[%s8972_s17 + $0x770] sm:$0xff] }
 0x6f3   : > { %6661 = vmatpush2.msra.mxu0 %v6164_v58  ;;  %6732 = vmatpush2.msra.mxu1 %v6228_v13  ;;  %v6147_v12 = vld [vmem:[%s8972_s17 + $0x568] sm:$0xff]  ;;  %v6146_v44 = vld [vmem:[%s8972_s17 + $0x560] sm:$0xff]  ;;  %v6145_v57 = vld [vmem:[%s8972_s17 + $0x558] sm:$0xff] }
 0x6f4   : > { %6662 = vmatprep.subr.mxu0 %v6163_v53  ;;  %6733 = vmatprep.subr.mxu1 %v6227_v20  ;;  %v6211_v33 = vld [vmem:[%s8972_s17 + $0x768] sm:$0xff]  ;;  %v6210_v6 = vld [vmem:[%s8972_s17 + $0x760] sm:$0xff]  ;;  %v6209_v58 = vld [vmem:[%s8972_s17 + $0x758] sm:$0xff]  ;;  %v5465_v53 = vadd.f32 %v11266_v28, %v11178_v40 }
 0x6f5   : > { %6663 = vmatpush2.msra.mxu0 %v6162_v48  ;;  %6734 = vmatpush2.msra.mxu1 %v6226_v19  ;;  %v6144_v15 = vld [vmem:[%s8972_s17 + $0x550] sm:$0xff]  ;;  %v6143_v13 = vld [vmem:[%s8972_s17 + $0x548] sm:$0xff]  ;;  %v5536_v19 = vadd.f32 %v11268_v31, %v11180_v55  ;;  %v6205_v40 = vld [vmem:[%s8972_s17 + $0x738] sm:$0xff] }
 0x6f6   : > { %6664 = vmatprep.subr.mxu0 %v6161_v2  ;;  %6735 = vmatprep.subr.mxu1 %v6225_v5  ;;  %v6208_v59 = vld [vmem:[%s8972_s17 + $0x750] sm:$0xff]  ;;  %v6207_v2 = vld [vmem:[%s8972_s17 + $0x748] sm:$0xff]  ;;  %v6142_v5 = vld [vmem:[%s8972_s17 + $0x540] sm:$0xff] }
 0x6f7   : > { %6665 = vmatpush2.msra.mxu0 %v6160_v63  ;;  %6736 = vmatpush2.msra.mxu1 %v6224_v16  ;;  %v7751_v20 = vld [vmem:[%s8966_s13] sm:$0xff]  ;;  %v6141_v16 = vld [vmem:[%s8972_s17 + $0x538] sm:$0xff]  ;;  %v6139_v55 = vld [vmem:[%s8972_s17 + $0x528] sm:$0xff] }
 0x6f8   : > { %6666 = vmatprep.subr.mxu0 %v6159_v42  ;;  %6737 = vmatprep.subr.mxu1 %v6223_v54  ;;  %v5847_v48 = vrot.slane %v7751_v20, %v5846_v0  ;;  %v6206_v63 = vld [vmem:[%s8972_s17 + $0x740] sm:$0xff]  ;;  %v6140_v28 = vld [vmem:[%s8972_s17 + $0x530] sm:$0xff]  ;;  %v5914_v54 = vadd.f32 %v11022_v11, %v5536_v19  ;;  %v6321_v20 = vld [vmem:[%s8972_s17 + $0xad8] sm:$0xff] }
 0x6f9   : > { %6667 = vmatpush2.msra.mxu0 %v6158_v22  ;;  %6738 = vmatpush2.msra.mxu1 %v6222_v24  ;;  %v6204_v42 = vld [vmem:[%s8972_s17 + $0x730] sm:$0xff]  ;;  %v6138_v11 = vld [vmem:[%s8972_s17 + $0x520] sm:$0xff]  ;;  %v6299_v60 = vld [vmem:[%s8972_s17 + $0xa28] sm:$0xff] }
 0x6fa   : > { %6668 = vmatprep.subr.mxu0 %v6157_v29  ;;  %6739 = vmatprep.subr.mxu1 %v6221_v30  ;;  %v5912_v31 = vadd.f32 %v5847_v48, %v5465_v53  ;;  %v5867_v29 = vrot.slane %v11087_v14, %v5834_v27  ;;  %v6203_v30 = vld [vmem:[%s8972_s17 + $0x728] sm:$0xff]  ;;  %v6137_v27 = vld [vmem:[%s8972_s17 + $0x518] sm:$0xff]  ;;  %vm5930_vm7 = vcmp.gt.f32.partialorder %v5914_v54, 0.0  ;;  %v6256_v48 = vld [vmem:[%s8972_s17 + $0x8d0] sm:$0xff] }
 0x6fb   : > { %6669 = vmatpush2.msra.mxu0 %v6156_v25  ;;  %6740 = vmatpush2.msra.mxu1 %v6220_v39  ;;  %v6257_v53 = vld [vmem:[%s8972_s17 + $0x8d8] sm:$0xff]  ;;  %v6320_v19 = vld [vmem:[%s8972_s17 + $0xad0] sm:$0xff] }
 0x6fc   : > { %6670 = vmatprep.subr.mxu0 %v6155_v45  ;;  %6741 = vmatprep.subr.mxu1 %v6219_v9  ;;  %v5875_v45 = vrot.slane %v11087_v14, %v5842_v3  ;;  %v6202_v9 = vld [vmem:[%s8972_s17 + $0x720] sm:$0xff]  ;;  %vm5928_vm6 = vcmp.gt.f32.partialorder %v5912_v31, 0.0 }
 0x6fd   : > { %6671 = vmatpush2.msra.mxu0 %v6154_v46  ;;  %6742 = vmatpush2.msra.mxu1 %v6218_v47 }
 0x6fe   : > { %6672 = vmatprep.subr.mxu0 %v6153_v49  ;;  %6743 = vmatprep.subr.mxu1 %v6217_v52  ;;  %v6136_v52 = vld [vmem:[%s8972_s17 + $0x510] sm:$0xff] }
 0x6ff   : > { %6673 = vmatpush2.msra.mxu0 %v6152_v56  ;;  %6744 = vmatpush2.msra.mxu1 %v6216_v32  ;;  %v6200_v56 = vld [vmem:[%s8972_s17 + $0x710] sm:$0xff]  ;;  %v5944_v32 = vmul.f32 0.01, %v5912_v31 }
 0x700   : > { %6674 = vmatprep.subr.mxu0 %v6151_v37  ;;  %6745 = vmatprep.subr.mxu1 %v6215_v4  ;;  %v5946_v37 = vmul.f32 0.01, %v5914_v54  ;;  %v6199_v4 = vld [vmem:[%s8972_s17 + $0x708] sm:$0xff] }
 0x701   : > { %6675 = vmatpush2.msra.mxu0 %v6150_v35  ;;  %6746 = vmatpush2.msra.mxu1 %v6214_v61  ;;  %v6134_v61 = vld [vmem:[%s8972_s17 + $0x500] sm:$0xff] }
 0x702   : > { %6676 = vmatprep.subr.mxu0 %v6149_v38  ;;  %6747 = vmatprep.subr.mxu1 %v6213_v62  ;;  %v6325_v38 = vld [vmem:[%s8972_s17 + $0xaf8] sm:$0xff] }
 0x703   : > { %6677 = vmatpush2.msra.mxu0 %v6148_v51  ;;  %6748 = vmatpush2.msra.mxu1 %v6212_v43  ;;  %v5960_v43 = vsel %vm5928_vm6, %v5912_v31, %v5944_v32  ;;  %v6251_v31 = vld [vmem:[%s8972_s17 + $0x8a8] sm:$0xff]  ;;  %v6306_v32 = vld [vmem:[%s8972_s17 + $0xa60] sm:$0xff] }
 0x704   : > { %6678 = vmatprep.subr.mxu0 %v6147_v12  ;;  %6749 = vmatprep.subr.mxu1 %v6211_v33  ;;  %v5962_v12 = vsel %vm5930_vm7, %v5914_v54, %v5946_v37  ;;  %v6260_v33 = vld [vmem:[%s8972_s17 + $0x8f0] sm:$0xff]  ;;  %v6315_v54 = vld [vmem:[%s8972_s17 + $0xaa8] sm:$0xff]  ;;  %v6241_v37 = vld [vmem:[%s8972_s17 + $0x858] sm:$0xff] }
 0x705   : > { %6679 = vmatpush2.msra.mxu0 %v6146_v44  ;;  %6750 = vmatpush2.msra.mxu1 %v6210_v6  ;;  %v6324_v6 = vld [vmem:[%s8972_s17 + $0xaf0] sm:$0xff] }
 0x706   : > { %6680 = vmatprep.subr.mxu0 %v6145_v57  ;;  %6751 = vmatprep.subr.mxu1 %v6209_v58  ;;  %v6259_v58 = vld [vmem:[%s8972_s17 + $0x8e8] sm:$0xff] }
 0x707   : > { %6681 = vmatpush2.msra.mxu0 %v6144_v15  ;;  %6752 = vmatpush2.msra.mxu1 %v6208_v59  ;;  %v6323_v15 = vld [vmem:[%s8972_s17 + $0xae8] sm:$0xff]  ;;  %v6258_v59 = vld [vmem:[%s8972_s17 + $0x8e0] sm:$0xff] }
 0x708   : > { %6682 = vmatprep.subr.mxu0 %v6143_v13  ;;  %6753 = vmatprep.subr.mxu1 %v6207_v2  ;;  %v6322_v13 = vld [vmem:[%s8972_s17 + $0xae0] sm:$0xff]  ;;  %v6255_v2 = vld [vmem:[%s8972_s17 + $0x8c8] sm:$0xff] }
 0x709   : > { %6683 = vmatpush2.msra.mxu0 %v6142_v5  ;;  %6754 = vmatpush2.msra.mxu1 %v6206_v63  ;;  %v6319_v5 = vld [vmem:[%s8972_s17 + $0xac8] sm:$0xff]  ;;  %v6254_v63 = vld [vmem:[%s8972_s17 + $0x8c0] sm:$0xff] }
 0x70a   : > { %v5606_v22 = vpop.f32.mrf.mxu0  ;;  %v5677_v24 = vpop.f32.mrf.mxu1  ;;  %6684 = vmatprep.subr.mxu0 %v6141_v16  ;;  %6755 = vmatprep.subr.mxu1 %v6205_v40  ;;  %v6318_v16 = vld [vmem:[%s8972_s17 + $0xac0] sm:$0xff]  ;;  %v6253_v40 = vld [vmem:[%s8972_s17 + $0x8b8] sm:$0xff] }
 0x70b   : > { %v5607_v25 = vadd.f32 %v5606_v22, %v11186_v21  ;;  %v5678_v39 = vadd.f32 %v5677_v24, %v11188_v34  ;;  %6685 = vmatpush2.msra.mxu0 %v6140_v28  ;;  %6756 = vmatpush2.msra.mxu1 %v6204_v42  ;;  %v6201_v21 = vld [vmem:[%s8972_s17 + $0x718] sm:$0xff]  ;;  %v6252_v42 = vld [vmem:[%s8972_s17 + $0x8b0] sm:$0xff]  ;;  %v6250_v22 = vld [vmem:[%s8972_s17 + $0x8a0] sm:$0xff] }
 0x70c   : > { %v5608_v46 = vpop.f32.mrf.mxu0  ;;  %v5679_v47 = vpop.f32.mrf.mxu1  ;;  %6686 = vmatprep.subr.mxu0 %v6139_v55  ;;  %6757 = vmatprep.subr.mxu1 %v6203_v30  ;;  %v6317_v28 = vld [vmem:[%s8972_s17 + $0xab8] sm:$0xff]  ;;  %v6316_v55 = vld [vmem:[%s8972_s17 + $0xab0] sm:$0xff]  ;;  %v6314_v24 = vld [vmem:[%s8972_s17 + $0xaa0] sm:$0xff] }
 0x70d   : > { %v11366_v34 = vadd.f32 %v11094_v8, %v5607_v25  ;;  %v11369_v49 = vadd.f32 %v11101_v23, %v5678_v39  ;;  %v5609_v14 = vadd.f32 %v5608_v46, %v11190_v26  ;;  %v5680_v3 = vadd.f32 %v5679_v47, %v11192_v17  ;;  %6687 = vmatpush2.msra.mxu0 %v6138_v11  ;;  %v6135_v8 = vld [vmem:[%s8972_s17 + $0x508] sm:$0xff]  ;;  %v6198_v26 = vld [vmem:[%s8972_s17 + $0x700] sm:$0xff]  ;;  %v6261_v17 = vld [vmem:[%s8972_s17 + $0x8f8] sm:$0xff] }
 0x70e   : > { %6758 = vmatpush2.msra.mxu1 %v6202_v9  ;;  %6688 = vmatprep.subr.mxu0 %v6137_v27  ;;  %v6313_v30 = vld [vmem:[%s8972_s17 + $0xa98] sm:$0xff]  ;;  %v6248_v25 = vld [vmem:[%s8972_s17 + $0x890] sm:$0xff]  ;;  %v6311_v11 = vld [vmem:[%s8972_s17 + $0xa88] sm:$0xff] }
 0x70f   : > { %v5917_v35 = vadd.f32 %v5867_v29, %v5609_v14  ;;  %v5919_v23 = vadd.f32 %v5875_v45, %v5680_v3  ;;  %6759 = vmatprep.subr.mxu1 %v6201_v21  ;;  %6689 = vmatpush2.msra.mxu0 %v6136_v52  ;;  %v6249_v29 = vld [vmem:[%s8972_s17 + $0x898] sm:$0xff]  ;;  %v6312_v39 = vld [vmem:[%s8972_s17 + $0xa90] sm:$0xff]  ;;  %v6247_v45 = vld [vmem:[%s8972_s17 + $0x888] sm:$0xff]  ;;  %vm5932_vm10 = vcmp.gt.f32.partialorder %v11366_v34, 0.0  ;;  %vm5934_vm11 = vcmp.gt.f32.partialorder %v11369_v49, 0.0 }
 0x710   : > { %6760 = vmatpush2.msra.mxu1 %v6200_v56  ;;  %6690 = vmatprep.subr.mxu0 %v6135_v8  ;;  %v6246_v9 = vld [vmem:[%s8972_s17 + $0x880] sm:$0xff]  ;;  %v6245_v47 = vld [vmem:[%s8972_s17 + $0x878] sm:$0xff]  ;;  %v6244_v21 = vld [vmem:[%s8972_s17 + $0x870] sm:$0xff] }
 0x711   : > { %6761 = vmatprep.subr.mxu1 %v6199_v4  ;;  %vm5933_vm8 = vcmp.gt.f32.partialorder %v5917_v35, 0.0  ;;  %v5949_v62 = vmul.f32 0.01, %v5917_v35  ;;  %vm5935_vm9 = vcmp.gt.f32.partialorder %v5919_v23, 0.0  ;;  %v5951_v51 = vmul.f32 0.01, %v5919_v23  ;;  %6691 = vmatpush2.msra.mxu0 %v6134_v61 }
 0x712   : > { %6762 = vmatpush2.msra.mxu1 %v6198_v26  ;;  %6693 = vmatmul.mubr.f32.vlgmr.msra.gmra.mxu0 %v5960_v43  ;;  %v6310_v46 = vld [vmem:[%s8972_s17 + $0xa80] sm:$0xff]  ;;  %v6309_v27 = vld [vmem:[%s8972_s17 + $0xa78] sm:$0xff]  ;;  %v6308_v14 = vld [vmem:[%s8972_s17 + $0xa70] sm:$0xff] }
 0x713   : > { %6764 = vmatmul.mubr.f32.vlgmr.msra.gmra.mxu1 %v5962_v12  ;;  %v5965_v44 = vsel %vm5933_vm8, %v5917_v35, %v5949_v62  ;;  %v5967_v57 = vsel %vm5935_vm9, %v5919_v23, %v5951_v51  ;;  %6770 = vmatprep.subr.mxu0 %v6261_v17  ;;  %v6243_v3 = vld [vmem:[%s8972_s17 + $0x868] sm:$0xff]  ;;  %v6242_v56 = vld [vmem:[%s8972_s17 + $0x860] sm:$0xff]  ;;  %v6305_v8 = vld [vmem:[%s8972_s17 + $0xa58] sm:$0xff] }
 0x714   : > { %6841 = vmatprep.subr.mxu1 %v6325_v38  ;;  %6771 = vmatpush1.msra.mxu0 %v6260_v33  ;;  %v6307_v52 = vld [vmem:[%s8972_s17 + $0xa68] sm:$0xff]  ;;  %v6240_v4 = vld [vmem:[%s8972_s17 + $0x850] sm:$0xff]  ;;  %v6238_v26 = vld [vmem:[%s8972_s17 + $0x840] sm:$0xff] }
 0x715   : > { %6834 = vmatprep.mubr.f32.mxu0 %v5965_v44  ;;  %6842 = vmatpush1.msra.mxu1 %v6324_v6  ;;  %v6304_v35 = vld [vmem:[%s8972_s17 + $0xa50] sm:$0xff]  ;;  %v6239_v23 = vld [vmem:[%s8972_s17 + $0x848] sm:$0xff]  ;;  %v6302_v17 = vld [vmem:[%s8972_s17 + $0xa40] sm:$0xff] }
 0x716   : > { %6905 = vmatprep.mubr.f32.mxu1 %v5967_v57  ;;  %6772 = vmatprep.subr.mxu0 %v6259_v58  ;;  %v6303_v61 = vld [vmem:[%s8972_s17 + $0xa48] sm:$0xff]  ;;  %v6237_v38 = vld [vmem:[%s8972_s17 + $0x838] sm:$0xff]  ;;  %v6236_v12 = vld [vmem:[%s8972_s17 + $0x830] sm:$0xff] }
 0x717   : > { %6843 = vmatprep.subr.mxu1 %v6323_v15  ;;  %6773 = vmatpush1.msra.mxu0 %v6258_v59  ;;  %v6301_v62 = vld [vmem:[%s8972_s17 + $0xa38] sm:$0xff]  ;;  %v6300_v33 = vld [vmem:[%s8972_s17 + $0xa30] sm:$0xff]  ;;  %v6235_v57 = vld [vmem:[%s8972_s17 + $0x828] sm:$0xff] }
 0x718   : > { %6844 = vmatpush1.msra.mxu1 %v6322_v13  ;;  %6774 = vmatprep.subr.mxu0 %v6257_v53  ;;  %v7752_v51 = vld [vmem:[%s8966_s13 + $0x8] sm:$0xff]  ;;  %v6298_v59 = vld [vmem:[%s8972_s17 + $0xa20] sm:$0xff] }
 0x719   : > { %6845 = vmatprep.subr.mxu1 %v6321_v20  ;;  %6775 = vmatpush1.msra.mxu0 %v6256_v48  ;;  %v5879_v43 = vrot.slane %v7752_v51, %v5846_v0  ;;  %v6234_v0 = vld [vmem:[%s8972_s17 + $0x820] sm:$0xff]  ;;  %v6233_v13 = vld [vmem:[%s8972_s17 + $0x818] sm:$0xff]  ;;  %v6232_v20 = vld [vmem:[%s8972_s17 + $0x810] sm:$0xff] }
 0x71a   : > { %6846 = vmatpush1.msra.mxu1 %v6320_v19  ;;  %6776 = vmatprep.subr.mxu0 %v6255_v2  ;;  %v6296_v48 = vld [vmem:[%s8972_s17 + $0xa10] sm:$0xff]  ;;  %v6231_v19 = vld [vmem:[%s8972_s17 + $0x808] sm:$0xff] }
 0x71b   : > { %6847 = vmatprep.subr.mxu1 %v6319_v5  ;;  %6777 = vmatpush1.msra.mxu0 %v6254_v63  ;;  %v6295_v2 = vld [vmem:[%s8972_s17 + $0xa08] sm:$0xff]  ;;  %v6230_v5 = vld [vmem:[%s8972_s17 + $0x800] sm:$0xff]  ;;  %v6293_v63 = vld [vmem:[%s8972_s17 + $0x9f8] sm:$0xff] }
 0x71c   : > { %6848 = vmatpush1.msra.mxu1 %v6318_v16  ;;  %6778 = vmatprep.subr.mxu0 %v6253_v40  ;;  %v6357_v16 = vld [vmem:[%s8972_s17 + $0xbf8] sm:$0xff]  ;;  %v6292_v40 = vld [vmem:[%s8972_s17 + $0x9f0] sm:$0xff]  ;;  %v6275_v51 = vld [vmem:[%s8972_s17 + $0x968] sm:$0xff] }
 0x71d   : > { %6849 = vmatprep.subr.mxu1 %v6317_v28  ;;  %6779 = vmatpush1.msra.mxu0 %v6252_v42  ;;  %v6356_v28 = vld [vmem:[%s8972_s17 + $0xbf0] sm:$0xff]  ;;  %v6291_v42 = vld [vmem:[%s8972_s17 + $0x9e8] sm:$0xff] }
 0x71e   : > { %6850 = vmatpush1.msra.mxu1 %v6316_v55  ;;  %6780 = vmatprep.subr.mxu0 %v6251_v31  ;;  %v6355_v55 = vld [vmem:[%s8972_s17 + $0xbe8] sm:$0xff]  ;;  %v6290_v31 = vld [vmem:[%s8972_s17 + $0x9e0] sm:$0xff] }
 0x71f   : > { %6851 = vmatprep.subr.mxu1 %v6315_v54  ;;  %6781 = vmatpush1.msra.mxu0 %v6250_v22  ;;  %v6354_v54 = vld [vmem:[%s8972_s17 + $0xbe0] sm:$0xff]  ;;  %v6289_v22 = vld [vmem:[%s8972_s17 + $0x9d8] sm:$0xff] }
 0x720   : > { %6852 = vmatpush1.msra.mxu1 %v6314_v24  ;;  %6782 = vmatprep.subr.mxu0 %v6249_v29  ;;  %v6353_v24 = vld [vmem:[%s8972_s17 + $0xbd8] sm:$0xff]  ;;  %v6288_v29 = vld [vmem:[%s8972_s17 + $0x9d0] sm:$0xff] }
 0x721   : > { %6853 = vmatprep.subr.mxu1 %v6313_v30  ;;  %6783 = vmatpush1.msra.mxu0 %v6248_v25  ;;  %v6352_v30 = vld [vmem:[%s8972_s17 + $0xbd0] sm:$0xff]  ;;  %v6287_v25 = vld [vmem:[%s8972_s17 + $0x9c8] sm:$0xff] }
 0x722   : > { %6854 = vmatpush1.msra.mxu1 %v6312_v39  ;;  %6784 = vmatprep.subr.mxu0 %v6247_v45  ;;  %v6351_v39 = vld [vmem:[%s8972_s17 + $0xbc8] sm:$0xff]  ;;  %v6286_v45 = vld [vmem:[%s8972_s17 + $0x9c0] sm:$0xff] }
 0x723   : > { %6855 = vmatprep.subr.mxu1 %v6311_v11  ;;  %6785 = vmatpush1.msra.mxu0 %v6246_v9  ;;  %v6350_v11 = vld [vmem:[%s8972_s17 + $0xbc0] sm:$0xff]  ;;  %v6285_v9 = vld [vmem:[%s8972_s17 + $0x9b8] sm:$0xff] }
 0x724   : > { %6856 = vmatpush1.msra.mxu1 %v6310_v46  ;;  %6786 = vmatprep.subr.mxu0 %v6245_v47  ;;  %v6349_v46 = vld [vmem:[%s8972_s17 + $0xbb8] sm:$0xff]  ;;  %v6284_v47 = vld [vmem:[%s8972_s17 + $0x9b0] sm:$0xff] }
 0x725   : > { %6857 = vmatprep.subr.mxu1 %v6309_v27  ;;  %6787 = vmatpush1.msra.mxu0 %v6244_v21  ;;  %v6348_v27 = vld [vmem:[%s8972_s17 + $0xbb0] sm:$0xff]  ;;  %v6283_v21 = vld [vmem:[%s8972_s17 + $0x9a8] sm:$0xff] }
 0x726   : > { %6858 = vmatpush1.msra.mxu1 %v6308_v14  ;;  %6788 = vmatprep.subr.mxu0 %v6243_v3  ;;  %v6347_v14 = vld [vmem:[%s8972_s17 + $0xba8] sm:$0xff]  ;;  %v6282_v3 = vld [vmem:[%s8972_s17 + $0x9a0] sm:$0xff] }
 0x727   : > { %6859 = vmatprep.subr.mxu1 %v6307_v52  ;;  %6789 = vmatpush1.msra.mxu0 %v6242_v56  ;;  %v6346_v52 = vld [vmem:[%s8972_s17 + $0xba0] sm:$0xff]  ;;  %v6281_v56 = vld [vmem:[%s8972_s17 + $0x998] sm:$0xff] }
 0x728   : > { %6860 = vmatpush1.msra.mxu1 %v6306_v32  ;;  %6790 = vmatprep.subr.mxu0 %v6241_v37  ;;  %v6345_v32 = vld [vmem:[%s8972_s17 + $0xb98] sm:$0xff]  ;;  %v6280_v37 = vld [vmem:[%s8972_s17 + $0x990] sm:$0xff] }
 0x729   : > { %6861 = vmatprep.subr.mxu1 %v6305_v8  ;;  %6791 = vmatpush1.msra.mxu0 %v6240_v4  ;;  %v6344_v8 = vld [vmem:[%s8972_s17 + $0xb90] sm:$0xff]  ;;  %v6279_v4 = vld [vmem:[%s8972_s17 + $0x988] sm:$0xff] }
 0x72a   : > { %6862 = vmatpush1.msra.mxu1 %v6304_v35  ;;  %6792 = vmatprep.subr.mxu0 %v6239_v23  ;;  %v6343_v35 = vld [vmem:[%s8972_s17 + $0xb88] sm:$0xff]  ;;  %v6278_v23 = vld [vmem:[%s8972_s17 + $0x980] sm:$0xff] }
 0x72b   : > { %6863 = vmatprep.subr.mxu1 %v6303_v61  ;;  %6793 = vmatpush1.msra.mxu0 %v6238_v26  ;;  %v6342_v61 = vld [vmem:[%s8972_s17 + $0xb80] sm:$0xff]  ;;  %v6277_v26 = vld [vmem:[%s8972_s17 + $0x978] sm:$0xff] }
 0x72c   : > { %v5748_v44 = vpop.f32.mrf.mxu0  ;;  %v5819_v6 = vpop.f32.mrf.mxu1  ;;  %6864 = vmatpush1.msra.mxu1 %v6302_v17  ;;  %6794 = vmatprep.subr.mxu0 %v6237_v38  ;;  %v6341_v17 = vld [vmem:[%s8972_s17 + $0xb78] sm:$0xff]  ;;  %v6276_v38 = vld [vmem:[%s8972_s17 + $0x970] sm:$0xff] }
 0x72d   : > { %v5749_v58 = vadd.f32 %v5748_v44, %v11194_v18  ;;  %v5820_v15 = vadd.f32 %v5819_v6, %v11196_v10  ;;  %6865 = vmatprep.subr.mxu1 %v6301_v62  ;;  %6795 = vmatpush1.msra.mxu0 %v6236_v12  ;;  %v6297_v10 = vld [vmem:[%s8972_s17 + $0xa18] sm:$0xff]  ;;  %v6340_v62 = vld [vmem:[%s8972_s17 + $0xb70] sm:$0xff]  ;;  %v6274_v12 = vld [vmem:[%s8972_s17 + $0x960] sm:$0xff] }
 0x72e   : > { %6866 = vmatpush1.msra.mxu1 %v6300_v33  ;;  %6796 = vmatprep.subr.mxu0 %v6235_v57  ;;  %v6338_v33 = vld [vmem:[%s8972_s17 + $0xb60] sm:$0xff]  ;;  %v6273_v44 = vld [vmem:[%s8972_s17 + $0x958] sm:$0xff]  ;;  %v6272_v57 = vld [vmem:[%s8972_s17 + $0x950] sm:$0xff] }
 0x72f   : > { %v11441_v53 = vadd.f32 %v5879_v43, %v5749_v58  ;;  %v11444_v18 = vadd.f32 %v11166_v36, %v5820_v15  ;;  %6867 = vmatprep.subr.mxu1 %v6299_v60  ;;  %6797 = vmatpush1.msra.mxu0 %v6234_v0  ;;  %v6294_v36 = vld [vmem:[%s8972_s17 + $0xa00] sm:$0xff]  ;;  %v6339_v43 = vld [vmem:[%s8972_s17 + $0xb68] sm:$0xff]  ;;  %v6337_v6 = vld [vmem:[%s8972_s17 + $0xb58] sm:$0xff]  ;;  %v5750_v58 = vpop.f32.mrf.mxu0  ;;  %v5821_v0 = vpop.f32.mrf.mxu1 }
 0x730   : > { %6868 = vmatpush1.msra.mxu1 %v6298_v59  ;;  %6798 = vmatprep.subr.mxu0 %v6233_v13  ;;  %v6336_v15 = vld [vmem:[%s8972_s17 + $0xb50] sm:$0xff]  ;;  %v6271_v60 = vld [vmem:[%s8972_s17 + $0x948] sm:$0xff]  ;;  %v6270_v13 = vld [vmem:[%s8972_s17 + $0x940] sm:$0xff] }
 0x731   : > { %6869 = vmatprep.subr.mxu1 %v6297_v10  ;;  %6799 = vmatpush1.msra.mxu0 %v6232_v20  ;;  %v6335_v59 = vld [vmem:[%s8972_s17 + $0xb48] sm:$0xff]  ;;  %v6334_v10 = vld [vmem:[%s8972_s17 + $0xb40] sm:$0xff]  ;;  %v6269_v20 = vld [vmem:[%s8972_s17 + $0x938] sm:$0xff]  ;;  %vm5936_vm14 = vcmp.gt.f32.partialorder %v11441_v53, 0.0  ;;  %vm5938_vm15 = vcmp.gt.f32.partialorder %v11444_v18, 0.0 }
 0x732   : > { %6870 = vmatpush1.msra.mxu1 %v6296_v48  ;;  %6800 = vmatprep.subr.mxu0 %v6231_v19  ;;  %v5751_v48 = vadd.f32 %v5750_v58, %v11200_v1  ;;  %v6333_v19 = vld [vmem:[%s8972_s17 + $0xb38] sm:$0xff]  ;;  %v6266_v1 = vld [vmem:[%s8972_s17 + $0x920] sm:$0xff]  ;;  %v6440_v58 = vld [vmem:[%s8972_s17 + $0xe90] sm:$0xff] }
 0x733   : > { %6871 = vmatprep.subr.mxu1 %v6295_v2  ;;  %6801 = vmatpush1.msra.mxu0 %v6230_v5  ;;  %v6268_v2 = vld [vmem:[%s8972_s17 + $0x930] sm:$0xff]  ;;  %v5822_v5 = vadd.f32 %v5821_v0, %v11202_v41  ;;  %v6374_v0 = vld [vmem:[%s8972_s17 + $0xc80] sm:$0xff] }
 0x734   : > { %6872 = vmatpush1.msra.mxu1 %v6294_v36  ;;  %6802 = vmatprep.subr.mxu0 %v6293_v63  ;;  %v6332_v36 = vld [vmem:[%s8972_s17 + $0xb30] sm:$0xff]  ;;  %v6267_v63 = vld [vmem:[%s8972_s17 + $0x928] sm:$0xff]  ;;  %v5921_v41 = vadd.f32 %v11171_v7, %v5751_v48 }
 0x735   : > { %6873 = vmatprep.subr.mxu1 %v6357_v16  ;;  %6803 = vmatpush2.msra.mxu0 %v6292_v40  ;;  %v6331_v16 = vld [vmem:[%s8972_s17 + $0xb28] sm:$0xff]  ;;  %v6330_v40 = vld [vmem:[%s8972_s17 + $0xb20] sm:$0xff]  ;;  %v6436_v48 = vld [vmem:[%s8972_s17 + $0xe70] sm:$0xff] }
 0x736   : > { %6874 = vmatpush2.msra.mxu1 %v6356_v28  ;;  %6804 = vmatprep.subr.mxu0 %v6291_v42  ;;  %v6265_v28 = vld [vmem:[%s8972_s17 + $0x918] sm:$0xff]  ;;  %v6327_v7 = vld [vmem:[%s8972_s17 + $0xb08] sm:$0xff]  ;;  %vm5937_vm12 = vcmp.gt.f32.partialorder %v5921_v41, 0.0 }
 0x737   : > { %6875 = vmatprep.subr.mxu1 %v6355_v55  ;;  %6805 = vmatpush2.msra.mxu0 %v6290_v31  ;;  %v6329_v42 = vld [vmem:[%s8972_s17 + $0xb18] sm:$0xff]  ;;  %v6264_v55 = vld [vmem:[%s8972_s17 + $0x910] sm:$0xff]  ;;  %v5948_v31 = vmul.f32 0.01, %v11366_v34 }
 0x738   : > { %6876 = vmatpush2.msra.mxu1 %v6354_v54  ;;  %6806 = vmatprep.subr.mxu0 %v6289_v22  ;;  %v5923_v54 = vadd.f32 %v11176_v50, %v5822_v5  ;;  %v6328_v22 = vld [vmem:[%s8972_s17 + $0xb10] sm:$0xff]  ;;  %v6389_v50 = vld [vmem:[%s8972_s17 + $0xcf8] sm:$0xff]  ;;  %v6370_v5 = vld [vmem:[%s8972_s17 + $0xc60] sm:$0xff] }
 0x739   : > { %6877 = vmatprep.subr.mxu1 %v6353_v24  ;;  %6807 = vmatpush2.msra.mxu0 %v6288_v29  ;;  %v6263_v24 = vld [vmem:[%s8972_s17 + $0x908] sm:$0xff]  ;;  %v5950_v29 = vmul.f32 0.01, %v11369_v49 }
 0x73a   : > { %6878 = vmatpush2.msra.mxu1 %v6352_v30  ;;  %6808 = vmatprep.subr.mxu0 %v6287_v25  ;;  %v6262_v30 = vld [vmem:[%s8972_s17 + $0x900] sm:$0xff]  ;;  %vm5939_vm13 = vcmp.gt.f32.partialorder %v5923_v54, 0.0 }
 0x73b   : > { %6879 = vmatprep.subr.mxu1 %v6351_v39  ;;  %6809 = vmatpush2.msra.mxu0 %v6286_v45  ;;  %v6326_v25 = vld [vmem:[%s8972_s17 + $0xb00] sm:$0xff]  ;;  %v5953_v39 = vmul.f32 0.01, %v5921_v41  ;;  %v5964_v45 = vsel %vm5932_vm10, %v11366_v34, %v5948_v31  ;;  %v6365_v31 = vld [vmem:[%s8972_s17 + $0xc38] sm:$0xff] }
 0x73c   : > { %6880 = vmatpush2.msra.mxu1 %v6350_v11  ;;  %6810 = vmatprep.subr.mxu0 %v6285_v9  ;;  %v6453_v11 = vld [vmem:[%s8972_s17 + $0xef8] sm:$0xff]  ;;  %v6388_v9 = vld [vmem:[%s8972_s17 + $0xcf0] sm:$0xff] }
 0x73d   : > { %6881 = vmatprep.subr.mxu1 %v6349_v46  ;;  %6811 = vmatpush2.msra.mxu0 %v6284_v47  ;;  %v5955_v46 = vmul.f32 0.01, %v5923_v54  ;;  %v5966_v47 = vsel %vm5934_vm11, %v11369_v49, %v5950_v29  ;;  %v5969_v34 = vsel %vm5937_vm12, %v5921_v41, %v5953_v39  ;;  %v6450_v49 = vld [vmem:[%s8972_s17 + $0xee0] sm:$0xff]  ;;  %v6431_v41 = vld [vmem:[%s8972_s17 + $0xe48] sm:$0xff]  ;;  %v6425_v39 = vld [vmem:[%s8972_s17 + $0xe18] sm:$0xff] }
 0x73e   : > { %6882 = vmatpush2.msra.mxu1 %v6348_v27  ;;  %6812 = vmatprep.subr.mxu0 %v6283_v21  ;;  %v6452_v27 = vld [vmem:[%s8972_s17 + $0xef0] sm:$0xff]  ;;  %v6387_v21 = vld [vmem:[%s8972_s17 + $0xce8] sm:$0xff] }
 0x73f   : > { %6883 = vmatprep.subr.mxu1 %v6347_v14  ;;  %6813 = vmatpush2.msra.mxu0 %v6282_v3  ;;  %v6451_v14 = vld [vmem:[%s8972_s17 + $0xee8] sm:$0xff]  ;;  %v6386_v3 = vld [vmem:[%s8972_s17 + $0xce0] sm:$0xff] }
 0x740   : > { %6884 = vmatpush2.msra.mxu1 %v6346_v52  ;;  %6814 = vmatprep.subr.mxu0 %v6281_v56  ;;  %v5971_v52 = vsel %vm5939_vm13, %v5923_v54, %v5955_v46  ;;  %v6385_v56 = vld [vmem:[%s8972_s17 + $0xcd8] sm:$0xff]  ;;  %v6363_v29 = vld [vmem:[%s8972_s17 + $0xc28] sm:$0xff] }
 0x741   : > { %6885 = vmatprep.subr.mxu1 %v6345_v32  ;;  %6815 = vmatpush2.msra.mxu0 %v6280_v37  ;;  %v6449_v32 = vld [vmem:[%s8972_s17 + $0xed8] sm:$0xff]  ;;  %v6384_v37 = vld [vmem:[%s8972_s17 + $0xcd0] sm:$0xff]  ;;  %v6423_v46 = vld [vmem:[%s8972_s17 + $0xe08] sm:$0xff] }
 0x742   : > { %6886 = vmatpush2.msra.mxu1 %v6344_v8  ;;  %6816 = vmatprep.subr.mxu0 %v6279_v4  ;;  %v6448_v8 = vld [vmem:[%s8972_s17 + $0xed0] sm:$0xff]  ;;  %v6383_v4 = vld [vmem:[%s8972_s17 + $0xcc8] sm:$0xff]  ;;  %v6429_v54 = vld [vmem:[%s8972_s17 + $0xe38] sm:$0xff] }
 0x743   : > { %6887 = vmatprep.subr.mxu1 %v6343_v35  ;;  %6817 = vmatpush2.msra.mxu0 %v6278_v23  ;;  %v6447_v35 = vld [vmem:[%s8972_s17 + $0xec8] sm:$0xff]  ;;  %v6382_v23 = vld [vmem:[%s8972_s17 + $0xcc0] sm:$0xff] }
 0x744   : > { %6888 = vmatpush2.msra.mxu1 %v6342_v61  ;;  %6818 = vmatprep.subr.mxu0 %v6277_v26  ;;  %v6446_v61 = vld [vmem:[%s8972_s17 + $0xec0] sm:$0xff]  ;;  %v6381_v26 = vld [vmem:[%s8972_s17 + $0xcb8] sm:$0xff] }
 0x745   : > { %6889 = vmatprep.subr.mxu1 %v6341_v17  ;;  %6819 = vmatpush2.msra.mxu0 %v6276_v38  ;;  %v6445_v17 = vld [vmem:[%s8972_s17 + $0xeb8] sm:$0xff]  ;;  %v6380_v38 = vld [vmem:[%s8972_s17 + $0xcb0] sm:$0xff] }
 0x746   : > { %6890 = vmatpush2.msra.mxu1 %v6340_v62  ;;  %6820 = vmatprep.subr.mxu0 %v6275_v51  ;;  %v6444_v62 = vld [vmem:[%s8972_s17 + $0xeb0] sm:$0xff]  ;;  %v6379_v51 = vld [vmem:[%s8972_s17 + $0xca8] sm:$0xff] }
 0x747   : > { %6891 = vmatprep.subr.mxu1 %v6339_v43  ;;  %6821 = vmatpush2.msra.mxu0 %v6274_v12  ;;  %v6443_v43 = vld [vmem:[%s8972_s17 + $0xea8] sm:$0xff]  ;;  %v6378_v12 = vld [vmem:[%s8972_s17 + $0xca0] sm:$0xff] }
 0x748   : > { %6892 = vmatpush2.msra.mxu1 %v6338_v33  ;;  %6822 = vmatprep.subr.mxu0 %v6273_v44  ;;  %v6442_v33 = vld [vmem:[%s8972_s17 + $0xea0] sm:$0xff]  ;;  %v6377_v44 = vld [vmem:[%s8972_s17 + $0xc98] sm:$0xff] }
 0x749   : > { %6893 = vmatprep.subr.mxu1 %v6337_v6  ;;  %6823 = vmatpush2.msra.mxu0 %v6272_v57  ;;  %v6441_v6 = vld [vmem:[%s8972_s17 + $0xe98] sm:$0xff]  ;;  %v6376_v57 = vld [vmem:[%s8972_s17 + $0xc90] sm:$0xff] }
 0x74a   : > { %6894 = vmatpush2.msra.mxu1 %v6336_v15  ;;  %6824 = vmatprep.subr.mxu0 %v6271_v60  ;;  %v6375_v15 = vld [vmem:[%s8972_s17 + $0xc88] sm:$0xff] }
 0x74b   : > { %6895 = vmatprep.subr.mxu1 %v6335_v59  ;;  %6825 = vmatpush2.msra.mxu0 %v6270_v13  ;;  %v6439_v60 = vld [vmem:[%s8972_s17 + $0xe88] sm:$0xff]  ;;  %v6438_v59 = vld [vmem:[%s8972_s17 + $0xe80] sm:$0xff]  ;;  %v6373_v13 = vld [vmem:[%s8972_s17 + $0xc78] sm:$0xff] }
 0x74c   : > { %6896 = vmatpush2.msra.mxu1 %v6334_v10  ;;  %6826 = vmatprep.subr.mxu0 %v6269_v20  ;;  %v6437_v10 = vld [vmem:[%s8972_s17 + $0xe78] sm:$0xff]  ;;  %v6372_v20 = vld [vmem:[%s8972_s17 + $0xc70] sm:$0xff] }
 0x74d   : > { %6897 = vmatprep.subr.mxu1 %v6333_v19  ;;  %6827 = vmatpush2.msra.mxu0 %v6268_v2  ;;  %v6371_v19 = vld [vmem:[%s8972_s17 + $0xc68] sm:$0xff] }
 0x74e   : > { %6898 = vmatpush2.msra.mxu1 %v6332_v36  ;;  %6828 = vmatprep.subr.mxu0 %v6267_v63  ;;  %v6435_v2 = vld [vmem:[%s8972_s17 + $0xe68] sm:$0xff]  ;;  %v6434_v36 = vld [vmem:[%s8972_s17 + $0xe60] sm:$0xff]  ;;  %v6369_v63 = vld [vmem:[%s8972_s17 + $0xc58] sm:$0xff] }
 0x74f   : > { %6899 = vmatprep.subr.mxu1 %v6331_v16  ;;  %6829 = vmatpush2.msra.mxu0 %v6266_v1  ;;  %v6433_v16 = vld [vmem:[%s8972_s17 + $0xe58] sm:$0xff]  ;;  %v6368_v1 = vld [vmem:[%s8972_s17 + $0xc50] sm:$0xff] }
 0x750   : > { %6900 = vmatpush2.msra.mxu1 %v6330_v40  ;;  %6830 = vmatprep.subr.mxu0 %v6265_v28  ;;  %v6432_v40 = vld [vmem:[%s8972_s17 + $0xe50] sm:$0xff]  ;;  %v6367_v28 = vld [vmem:[%s8972_s17 + $0xc48] sm:$0xff] }
 0x751   : > { %6901 = vmatprep.subr.mxu1 %v6329_v42  ;;  %6831 = vmatpush2.msra.mxu0 %v6264_v55  ;;  %v6366_v42 = vld [vmem:[%s8972_s17 + $0xc40] sm:$0xff] }
 0x752   : > { %6902 = vmatpush2.msra.mxu1 %v6328_v22  ;;  %6832 = vmatprep.subr.mxu0 %v6263_v24  ;;  %v6430_v55 = vld [vmem:[%s8972_s17 + $0xe40] sm:$0xff]  ;;  %v6364_v22 = vld [vmem:[%s8972_s17 + $0xc30] sm:$0xff] }
 0x753   : > { %6903 = vmatprep.subr.mxu1 %v6327_v7  ;;  %6833 = vmatpush2.msra.mxu0 %v6262_v30  ;;  %v6428_v24 = vld [vmem:[%s8972_s17 + $0xe30] sm:$0xff]  ;;  %v6427_v7 = vld [vmem:[%s8972_s17 + $0xe28] sm:$0xff]  ;;  %v6362_v30 = vld [vmem:[%s8972_s17 + $0xc20] sm:$0xff] }
 0x754   : > { %6904 = vmatpush2.msra.mxu1 %v6326_v25  ;;  %6835 = vmatmul.mubr.f32.vlgmr.msra.gmra.mxu0 %v5964_v45  ;;  %v6426_v25 = vld [vmem:[%s8972_s17 + $0xe20] sm:$0xff]  ;;  %v6360_v45 = vld [vmem:[%s8972_s17 + $0xc10] sm:$0xff] }
 0x755   : > { %6906 = vmatmul.mubr.f32.vlgmr.msra.gmra.mxu1 %v5966_v47  ;;  %6912 = vmatprep.subr.mxu0 %v6389_v50  ;;  %v6361_v50 = vld [vmem:[%s8972_s17 + $0xc18] sm:$0xff]  ;;  %v6358_v47 = vld [vmem:[%s8972_s17 + $0xc00] sm:$0xff] }
 0x756   : > { %6983 = vmatprep.subr.mxu1 %v6453_v11  ;;  %6913 = vmatpush1.msra.mxu0 %v6388_v9  ;;  %v6424_v11 = vld [vmem:[%s8972_s17 + $0xe10] sm:$0xff]  ;;  %v6359_v9 = vld [vmem:[%s8972_s17 + $0xc08] sm:$0xff] }
 0x757   : > { %6976 = vmatprep.mubr.f32.mxu0 %v5969_v34  ;;  %6984 = vmatpush1.msra.mxu1 %v6452_v27  ;;  %v6422_v27 = vld [vmem:[%s8972_s17 + $0xe00] sm:$0xff]  ;;  %v6485_v34 = vld [vmem:[%s8972_s17 + $0xff8] sm:$0xff] }
 0x758   : > { %7047 = vmatprep.mubr.f32.mxu1 %v5971_v52  ;;  %6914 = vmatprep.subr.mxu0 %v6387_v21  ;;  %v6421_v21 = vld [vmem:[%s8972_s17 + $0xdf8] sm:$0xff]  ;;  %v6419_v52 = vld [vmem:[%s8972_s17 + $0xde8] sm:$0xff] }
 0x759   : > { %6985 = vmatprep.subr.mxu1 %v6451_v14  ;;  %6915 = vmatpush1.msra.mxu0 %v6386_v3  ;;  %v6420_v14 = vld [vmem:[%s8972_s17 + $0xdf0] sm:$0xff] }
 0x75a   : > { %6986 = vmatpush1.msra.mxu1 %v6450_v49  ;;  %6916 = vmatprep.subr.mxu0 %v6385_v56  ;;  %v6484_v3 = vld [vmem:[%s8972_s17 + $0xff0] sm:$0xff]  ;;  %v6483_v49 = vld [vmem:[%s8972_s17 + $0xfe8] sm:$0xff]  ;;  %v6418_v56 = vld [vmem:[%s8972_s17 + $0xde0] sm:$0xff] }
 0x75b   : > { %6987 = vmatprep.subr.mxu1 %v6449_v32  ;;  %6917 = vmatpush1.msra.mxu0 %v6384_v37  ;;  %v6482_v32 = vld [vmem:[%s8972_s17 + $0xfe0] sm:$0xff]  ;;  %v6417_v37 = vld [vmem:[%s8972_s17 + $0xdd8] sm:$0xff] }
 0x75c   : > { %6988 = vmatpush1.msra.mxu1 %v6448_v8  ;;  %6918 = vmatprep.subr.mxu0 %v6383_v4  ;;  %v6481_v8 = vld [vmem:[%s8972_s17 + $0xfd8] sm:$0xff]  ;;  %v6416_v4 = vld [vmem:[%s8972_s17 + $0xdd0] sm:$0xff] }
 0x75d   : > { %6989 = vmatprep.subr.mxu1 %v6447_v35  ;;  %6919 = vmatpush1.msra.mxu0 %v6382_v23  ;;  %v6480_v35 = vld [vmem:[%s8972_s17 + $0xfd0] sm:$0xff]  ;;  %v6415_v23 = vld [vmem:[%s8972_s17 + $0xdc8] sm:$0xff] }
 0x75e   : > { %6990 = vmatpush1.msra.mxu1 %v6446_v61  ;;  %6920 = vmatprep.subr.mxu0 %v6381_v26  ;;  %v6479_v61 = vld [vmem:[%s8972_s17 + $0xfc8] sm:$0xff]  ;;  %v6414_v26 = vld [vmem:[%s8972_s17 + $0xdc0] sm:$0xff] }
 0x75f   : > { %6991 = vmatprep.subr.mxu1 %v6445_v17  ;;  %6921 = vmatpush1.msra.mxu0 %v6380_v38  ;;  %v6478_v17 = vld [vmem:[%s8972_s17 + $0xfc0] sm:$0xff]  ;;  %v6413_v38 = vld [vmem:[%s8972_s17 + $0xdb8] sm:$0xff] }
 0x760   : > { %6992 = vmatpush1.msra.mxu1 %v6444_v62  ;;  %6922 = vmatprep.subr.mxu0 %v6379_v51  ;;  %v6477_v62 = vld [vmem:[%s8972_s17 + $0xfb8] sm:$0xff]  ;;  %v6412_v51 = vld [vmem:[%s8972_s17 + $0xdb0] sm:$0xff] }
 0x761   : > { %6993 = vmatprep.subr.mxu1 %v6443_v43  ;;  %6923 = vmatpush1.msra.mxu0 %v6378_v12  ;;  %v6476_v43 = vld [vmem:[%s8972_s17 + $0xfb0] sm:$0xff]  ;;  %v6411_v12 = vld [vmem:[%s8972_s17 + $0xda8] sm:$0xff] }
 0x762   : > { %6994 = vmatpush1.msra.mxu1 %v6442_v33  ;;  %6924 = vmatprep.subr.mxu0 %v6377_v44  ;;  %v6475_v33 = vld [vmem:[%s8972_s17 + $0xfa8] sm:$0xff]  ;;  %v6410_v44 = vld [vmem:[%s8972_s17 + $0xda0] sm:$0xff] }
 0x763   : > { %6995 = vmatprep.subr.mxu1 %v6441_v6  ;;  %6925 = vmatpush1.msra.mxu0 %v6376_v57  ;;  %v6474_v6 = vld [vmem:[%s8972_s17 + $0xfa0] sm:$0xff]  ;;  %v6409_v57 = vld [vmem:[%s8972_s17 + $0xd98] sm:$0xff] }
 0x764   : > { %6996 = vmatpush1.msra.mxu1 %v6440_v58  ;;  %6926 = vmatprep.subr.mxu0 %v6375_v15  ;;  %v6473_v58 = vld [vmem:[%s8972_s17 + $0xf98] sm:$0xff]  ;;  %v6408_v15 = vld [vmem:[%s8972_s17 + $0xd90] sm:$0xff] }
 0x765   : > { %6997 = vmatprep.subr.mxu1 %v6439_v60  ;;  %6927 = vmatpush1.msra.mxu0 %v6374_v0  ;;  %v6472_v60 = vld [vmem:[%s8972_s17 + $0xf90] sm:$0xff]  ;;  %v6407_v0 = vld [vmem:[%s8972_s17 + $0xd88] sm:$0xff] }
 0x766   : > { %6998 = vmatpush1.msra.mxu1 %v6438_v59  ;;  %6928 = vmatprep.subr.mxu0 %v6373_v13  ;;  %v6471_v59 = vld [vmem:[%s8972_s17 + $0xf88] sm:$0xff]  ;;  %v6406_v13 = vld [vmem:[%s8972_s17 + $0xd80] sm:$0xff] }
 0x767   : > { %6999 = vmatprep.subr.mxu1 %v6437_v10  ;;  %6929 = vmatpush1.msra.mxu0 %v6372_v20  ;;  %v6470_v10 = vld [vmem:[%s8972_s17 + $0xf80] sm:$0xff]  ;;  %v6405_v20 = vld [vmem:[%s8972_s17 + $0xd78] sm:$0xff] }
 0x768   : > { %7000 = vmatpush1.msra.mxu1 %v6436_v48  ;;  %6930 = vmatprep.subr.mxu0 %v6371_v19  ;;  %v6469_v48 = vld [vmem:[%s8972_s17 + $0xf78] sm:$0xff]  ;;  %v6404_v19 = vld [vmem:[%s8972_s17 + $0xd70] sm:$0xff] }
 0x769   : > { %7001 = vmatprep.subr.mxu1 %v6435_v2  ;;  %6931 = vmatpush1.msra.mxu0 %v6370_v5  ;;  %v6468_v2 = vld [vmem:[%s8972_s17 + $0xf70] sm:$0xff]  ;;  %v6403_v5 = vld [vmem:[%s8972_s17 + $0xd68] sm:$0xff] }
 0x76a   : > { %7002 = vmatpush1.msra.mxu1 %v6434_v36  ;;  %6932 = vmatprep.subr.mxu0 %v6369_v63  ;;  %v6467_v36 = vld [vmem:[%s8972_s17 + $0xf68] sm:$0xff]  ;;  %v6402_v63 = vld [vmem:[%s8972_s17 + $0xd60] sm:$0xff] }
 0x76b   : > { %7003 = vmatprep.subr.mxu1 %v6433_v16  ;;  %6933 = vmatpush1.msra.mxu0 %v6368_v1  ;;  %v6466_v16 = vld [vmem:[%s8972_s17 + $0xf60] sm:$0xff]  ;;  %v6401_v1 = vld [vmem:[%s8972_s17 + $0xd58] sm:$0xff] }
 0x76c   : > { %7004 = vmatpush1.msra.mxu1 %v6432_v40  ;;  %6934 = vmatprep.subr.mxu0 %v6367_v28  ;;  %v6465_v40 = vld [vmem:[%s8972_s17 + $0xf58] sm:$0xff]  ;;  %v6400_v28 = vld [vmem:[%s8972_s17 + $0xd50] sm:$0xff] }
 0x76d   : > { %7005 = vmatprep.subr.mxu1 %v6431_v41  ;;  %6935 = vmatpush1.msra.mxu0 %v6366_v42  ;;  %v6464_v41 = vld [vmem:[%s8972_s17 + $0xf50] sm:$0xff]  ;;  %v6399_v42 = vld [vmem:[%s8972_s17 + $0xd48] sm:$0xff] }
 0x76e   : > { %7006 = vmatpush1.msra.mxu1 %v6430_v55  ;;  %6936 = vmatprep.subr.mxu0 %v6365_v31  ;;  %v6463_v55 = vld [vmem:[%s8972_s17 + $0xf48] sm:$0xff]  ;;  %v6398_v31 = vld [vmem:[%s8972_s17 + $0xd40] sm:$0xff] }
 0x76f   : > { %7007 = vmatprep.subr.mxu1 %v6429_v54  ;;  %6937 = vmatpush1.msra.mxu0 %v6364_v22  ;;  %v6462_v54 = vld [vmem:[%s8972_s17 + $0xf40] sm:$0xff]  ;;  %v6397_v22 = vld [vmem:[%s8972_s17 + $0xd38] sm:$0xff] }
 0x770   : > { %7008 = vmatpush1.msra.mxu1 %v6428_v24  ;;  %6938 = vmatprep.subr.mxu0 %v6363_v29  ;;  %v6461_v24 = vld [vmem:[%s8972_s17 + $0xf38] sm:$0xff]  ;;  %v6396_v29 = vld [vmem:[%s8972_s17 + $0xd30] sm:$0xff] }
 0x771   : > { %7009 = vmatprep.subr.mxu1 %v6427_v7  ;;  %6939 = vmatpush1.msra.mxu0 %v6362_v30  ;;  %v6460_v7 = vld [vmem:[%s8972_s17 + $0xf30] sm:$0xff]  ;;  %v6395_v30 = vld [vmem:[%s8972_s17 + $0xd28] sm:$0xff] }
 0x772   : > { %7010 = vmatpush1.msra.mxu1 %v6426_v25  ;;  %6940 = vmatprep.subr.mxu0 %v6361_v50  ;;  %v6459_v25 = vld [vmem:[%s8972_s17 + $0xf28] sm:$0xff]  ;;  %v6394_v50 = vld [vmem:[%s8972_s17 + $0xd20] sm:$0xff] }
 0x773   : > { %7011 = vmatprep.subr.mxu1 %v6425_v39  ;;  %6941 = vmatpush1.msra.mxu0 %v6360_v45  ;;  %v6458_v39 = vld [vmem:[%s8972_s17 + $0xf20] sm:$0xff]  ;;  %v6393_v45 = vld [vmem:[%s8972_s17 + $0xd18] sm:$0xff] }
 0x774   : > { %7012 = vmatpush1.msra.mxu1 %v6424_v11  ;;  %6942 = vmatprep.subr.mxu0 %v6359_v9  ;;  %v6457_v11 = vld [vmem:[%s8972_s17 + $0xf18] sm:$0xff]  ;;  %v6392_v9 = vld [vmem:[%s8972_s17 + $0xd10] sm:$0xff] }
 0x775   : > { %7013 = vmatprep.subr.mxu1 %v6423_v46  ;;  %6943 = vmatpush1.msra.mxu0 %v6358_v47  ;;  %v5952_v46 = vmul.f32 0.01, %v11441_v53  ;;  %v6456_v47 = vld [vmem:[%s8972_s17 + $0xf10] sm:$0xff] }
 0x776   : > { %7014 = vmatpush1.msra.mxu1 %v6422_v27  ;;  %6944 = vmatprep.subr.mxu0 %v6421_v21  ;;  %v6391_v27 = vld [vmem:[%s8972_s17 + $0xd08] sm:$0xff]  ;;  %v5954_v21 = vmul.f32 0.01, %v11444_v18 }
 0x777   : > { %7015 = vmatprep.subr.mxu1 %v6485_v34  ;;  %6945 = vmatpush2.msra.mxu0 %v6420_v14  ;;  %v6455_v34 = vld [vmem:[%s8972_s17 + $0xf08] sm:$0xff]  ;;  %v6390_v14 = vld [vmem:[%s8972_s17 + $0xd00] sm:$0xff] }
 0x778   : > { %7016 = vmatpush2.msra.mxu1 %v6484_v3  ;;  %6946 = vmatprep.subr.mxu0 %v6419_v52  ;;  %v6454_v3 = vld [vmem:[%s8972_s17 + $0xf00] sm:$0xff]  ;;  %v5968_v52 = vsel %vm5936_vm14, %v11441_v53, %v5952_v46 }
 0x779   : > { %7017 = vmatprep.subr.mxu1 %v6483_v49  ;;  %6947 = vmatpush2.msra.mxu0 %v6418_v56  ;;  %v5970_v49 = vsel %vm5938_vm15, %v11444_v18, %v5954_v21 }
 0x77a   : > { %7018 = vmatpush2.msra.mxu1 %v6482_v32  ;;  %6948 = vmatprep.subr.mxu0 %v6417_v37 }
 0x77b   : > { %7019 = vmatprep.subr.mxu1 %v6481_v8  ;;  %6949 = vmatpush2.msra.mxu0 %v6416_v4 }
 0x77c   : > { %7020 = vmatpush2.msra.mxu1 %v6480_v35  ;;  %6950 = vmatprep.subr.mxu0 %v6415_v23 }
 0x77d   : > { %7021 = vmatprep.subr.mxu1 %v6479_v61  ;;  %6951 = vmatpush2.msra.mxu0 %v6414_v26 }
 0x77e   : > { %7022 = vmatpush2.msra.mxu1 %v6478_v17  ;;  %6952 = vmatprep.subr.mxu0 %v6413_v38 }
 0x77f   : > { %7023 = vmatprep.subr.mxu1 %v6477_v62  ;;  %6953 = vmatpush2.msra.mxu0 %v6412_v51 }
 0x780   : > { %7024 = vmatpush2.msra.mxu1 %v6476_v43  ;;  %6954 = vmatprep.subr.mxu0 %v6411_v12 }
 0x781   : > { %7025 = vmatprep.subr.mxu1 %v6475_v33  ;;  %6955 = vmatpush2.msra.mxu0 %v6410_v44 }
 0x782   : > { %7026 = vmatpush2.msra.mxu1 %v6474_v6  ;;  %6956 = vmatprep.subr.mxu0 %v6409_v57 }
 0x783   : > { %7027 = vmatprep.subr.mxu1 %v6473_v58  ;;  %6957 = vmatpush2.msra.mxu0 %v6408_v15 }
 0x784   : > { %7028 = vmatpush2.msra.mxu1 %v6472_v60  ;;  %6958 = vmatprep.subr.mxu0 %v6407_v0 }
 0x785   : > { %7029 = vmatprep.subr.mxu1 %v6471_v59  ;;  %6959 = vmatpush2.msra.mxu0 %v6406_v13  ;;  %v5972_v59 = vld [vmem:[#allocation4 + $0x8] sm:$0xff] }
 0x786   : > { %7030 = vmatpush2.msra.mxu1 %v6470_v10  ;;  %6960 = vmatprep.subr.mxu0 %v6405_v20 }
 0x787   : > { %7031 = vmatprep.subr.mxu1 %v6469_v48  ;;  %6961 = vmatpush2.msra.mxu0 %v6404_v19  ;;  %v5973_v48 = vld [vmem:[#allocation4] sm:$0xff] }
 0x788   : > { %7032 = vmatpush2.msra.mxu1 %v6468_v2  ;;  %6962 = vmatprep.subr.mxu0 %v6403_v5 }
 0x789   : > { %7033 = vmatprep.subr.mxu1 %v6467_v36  ;;  %6963 = vmatpush2.msra.mxu0 %v6402_v63 }
 0x78a   : > { %7034 = vmatpush2.msra.mxu1 %v6466_v16  ;;  %6964 = vmatprep.subr.mxu0 %v6401_v1 }
 0x78b   : > { %7035 = vmatprep.subr.mxu1 %v6465_v40  ;;  %6965 = vmatpush2.msra.mxu0 %v6400_v28 }
 0x78c   : > { %7036 = vmatpush2.msra.mxu1 %v6464_v41  ;;  %6966 = vmatprep.subr.mxu0 %v6399_v42 }
 0x78d   : > { %7037 = vmatprep.subr.mxu1 %v6463_v55  ;;  %6967 = vmatpush2.msra.mxu0 %v6398_v31 }
 0x78e   : > { %7038 = vmatpush2.msra.mxu1 %v6462_v54  ;;  %6968 = vmatprep.subr.mxu0 %v6397_v22 }
 0x78f   : > { %7039 = vmatprep.subr.mxu1 %v6461_v24  ;;  %6969 = vmatpush2.msra.mxu0 %v6396_v29 }
 0x790   : > { %7040 = vmatpush2.msra.mxu1 %v6460_v7  ;;  %6970 = vmatprep.subr.mxu0 %v6395_v30 }
 0x791   : > { %7041 = vmatprep.subr.mxu1 %v6459_v25  ;;  %6971 = vmatpush2.msra.mxu0 %v6394_v50  ;;  %v6552_v56 = vpop.f32.mrf.mxu0  ;;  %v6623_v32 = vpop.f32.mrf.mxu1 }
 0x792   : > { %7042 = vmatpush2.msra.mxu1 %v6458_v39  ;;  %6972 = vmatprep.subr.mxu0 %v6393_v45  ;;  %v6624_v35 = vadd.f32 %v6623_v32, %v6552_v56 }
 0x793   : > { %7043 = vmatprep.subr.mxu1 %v6457_v11  ;;  %6973 = vmatpush2.msra.mxu0 %v6392_v9  ;;  %v6554_v37 = vpop.f32.mrf.mxu0  ;;  %v6625_v4 = vpop.f32.mrf.mxu1 }
 0x794   : > { %7044 = vmatpush2.msra.mxu1 %v6456_v47  ;;  %6974 = vmatprep.subr.mxu0 %v6391_v27  ;;  %v6626_v61 = vadd.f32 %v6625_v4, %v6554_v37 }
 0x795   : > { %7045 = vmatprep.subr.mxu1 %v6455_v34  ;;  %6975 = vmatpush2.msra.mxu0 %v6390_v14 }
 0x796   : > { %7046 = vmatpush2.msra.mxu1 %v6454_v3  ;;  %6977 = vmatmul.mubr.f32.vlgmr.msra.gmra.mxu0 %v5968_v52 }
 0x797   : > { %7048 = vmatmul.mubr.f32.vlgmr.msra.gmra.mxu1 %v5970_v49 }
 0x7d2   : > { %v6694_v8 = vpop.f32.mrf.mxu0 }
 0x7d3   : > { %v6695_v26 = vadd.f32 %v6694_v8, %v6624_v35  ;;  %v6765_v17 = vpop.f32.mrf.mxu1 }
 0x7d4   : > { %v6696_v23 = vpop.f32.mrf.mxu0 }
 0x7d5   : > { %v6697_v62 = vadd.f32 %v6696_v23, %v6626_v61  ;;  %v6766_v51 = vadd.f32 %v6765_v17, %v6695_v26  ;;  %v6767_v43 = vpop.f32.mrf.mxu1 }
 0x7d7   : > { %v6768_v12 = vadd.f32 %v6767_v43, %v6697_v62 }
 0x814   : > { %v6836_v38 = vpop.f32.mrf.mxu0 }
 0x815   : > { %v6837_v33 = vadd.f32 %v6836_v38, %v6766_v51  ;;  %v6907_v44 = vpop.f32.mrf.mxu1 }
 0x816   : > { %v6838_v53 = vpop.f32.mrf.mxu0 }
 0x817   : > { %v6839_v18 = vadd.f32 %v6838_v53, %v6768_v12  ;;  %v6908_v6 = vadd.f32 %v6907_v44, %v6837_v33  ;;  %v6909_v57 = vpop.f32.mrf.mxu1 }
 0x819   : > { %v6910_v15 = vadd.f32 %v6909_v57, %v6839_v18 }
 0x856   : > { %v6978_v58 = vpop.f32.mrf.mxu0 }
 0x857   : > { %v6979_v60 = vadd.f32 %v6978_v58, %v6908_v6  ;;  %v7049_v0 = vpop.f32.mrf.mxu1 }
 0x858   : > { %v6980_v13 = vpop.f32.mrf.mxu0 }
 0x859   : > { %v7050_v10 = vadd.f32 %v7049_v0, %v6979_v60  ;;  %v6981_v20 = vadd.f32 %v6980_v13, %v6910_v15  ;;  %v7051_v19 = vpop.f32.mrf.mxu1 }
 0x85b   : > { %v7054_v2 = vadd.f32 %v7050_v10, %v5972_v59  ;;  %v7052_v5 = vadd.f32 %v7051_v19, %v6981_v20 }
 0x85d   : > { %7056 = vst [vmem:[#allocation4 + $0x8] sm:$0xff] %v7054_v2  ;;  %v7055_v36 = vadd.f32 %v7052_v5, %v5973_v48 }
 0x85f   : > { %7057 = vst [vmem:[#allocation4] sm:$0xff] %v7055_v36 }
 0x860 PF: > { %s11860_s9 = sld [smem:[#allocation46_spill]] }
 0x866   : > { %p7528_p7 = scmp.ne.s32.totalorder %s11860_s9, 3 }
 0x868   : > { %7061 = sbr.rel (%p7528_p7) target bundleno = 2225 (0x8b1), region = 160 }
 0x86d   : > { %v7066_v63 = vlaneseq  ;;  %v7064_v1 = vld [vmem:[#allocation23] sm:$0x3]  ;;  %v7062_v41 = vld [vmem:[#allocation4 + $0x8] sm:$0xff]  ;;  %v7063_v42 = vld [vmem:[#allocation4] sm:$0xff] }
 0x86e   : > { %v7117_v12 = vld [vmem:[#allocation24] sm:$0x3]  ;;  %v7131_v33 = vld [vmem:[#allocation25] sm:$0x3] }
 0x86f   : > { %v7067_v16 = vshrl.u32 %v7066_v63, 7 }
 0x871   : > { %v7068_v40 = vsub.s32 0, %v7067_v16  ;;  %v7072_v28 = vsub.s32 1, %v7067_v16 }
 0x873   : > { %v7069_v55 = vrot.slane %v7064_v1, %v7068_v40  ;;  %v7073_v31 = vrot.slane %v7064_v1, %v7072_v28  ;;  %v7122_v44 = vrot.slane %v7117_v12, %v7068_v40  ;;  %v7126_v6 = vrot.slane %v7117_v12, %v7072_v28 }
 0x874   : > { %v7136_v15 = vrot.slane %v7131_v33, %v7068_v40  ;;  %v7140_v0 = vrot.slane %v7131_v33, %v7072_v28 }
 0x875   : > { %v7076_v54 = vadd.f32 %v7069_v55, %v7062_v41  ;;  %v7077_v22 = vadd.f32 %v7073_v31, %v7063_v42 }
 0x877   : > { %v7078_v24 = vrot.slane %v7076_v54, 4  ;;  %v7084_v29 = vrot.slane %v7077_v22, 4 }
 0x879   : > { %v7079_v7 = vadd.f32 %v7078_v24, %v7076_v54  ;;  %v7085_v30 = vadd.f32 %v7084_v29, %v7077_v22 }
 0x87b   : > { %v7080_v25 = vrot.slane %v7079_v7, 2  ;;  %v7086_v50 = vrot.slane %v7085_v30, 2 }
 0x87d   : > { %v7081_v39 = vadd.f32 %v7080_v25, %v7079_v7  ;;  %v7087_v45 = vadd.f32 %v7086_v50, %v7085_v30 }
 0x87f   : > { %v7082_v11 = vrot.slane %v7081_v39, 1  ;;  %v7088_v9 = vrot.slane %v7087_v45, 1 }
 0x881   : > { %v7083_v46 = vadd.f32 %v7082_v11, %v7081_v39  ;;  %v7089_v47 = vadd.f32 %v7088_v9, %v7087_v45 }
 0x883   : > { %v7091_v27 = vmul.f32 0.125, %v7083_v46  ;;  %v7092_v21 = vmul.f32 0.125, %v7089_v47 }
 0x885   : > { %v7093_v34 = vsub.f32 %v7076_v54, %v7091_v27  ;;  %v7094_v14 = vsub.f32 %v7077_v22, %v7092_v21 }
 0x887   : > { %v7095_v3 = vmul.f32 %v7093_v34, %v7093_v34  ;;  %v7096_v52 = vmul.f32 %v7094_v14, %v7094_v14 }
 0x889   : > { %v7097_v49 = vrot.slane %v7095_v3, 4  ;;  %v7103_v56 = vrot.slane %v7096_v52, 4 }
 0x88b   : > { %v7098_v32 = vadd.f32 %v7097_v49, %v7095_v3  ;;  %v7104_v37 = vadd.f32 %v7103_v56, %v7096_v52 }
 0x88d   : > { %v7099_v8 = vrot.slane %v7098_v32, 2  ;;  %v7105_v4 = vrot.slane %v7104_v37, 2 }
 0x88f   : > { %v7100_v35 = vadd.f32 %v7099_v8, %v7098_v32  ;;  %v7106_v23 = vadd.f32 %v7105_v4, %v7104_v37 }
 0x891   : > { %v7101_v61 = vrot.slane %v7100_v35, 1  ;;  %v7107_v26 = vrot.slane %v7106_v23, 1 }
 0x893   : > { %v7102_v17 = vadd.f32 %v7101_v61, %v7100_v35  ;;  %v7108_v38 = vadd.f32 %v7107_v26, %v7106_v23 }
 0x895   : > { %v7109_v62 = vmul.f32 0.125, %v7102_v17  ;;  %v7110_v51 = vmul.f32 0.125, %v7108_v38 }
 0x897   : > { %v7111_v43 = vadd.f32 1e-05, %v7109_v62  ;;  %v7112_v53 = vadd.f32 1e-05, %v7110_v51 }
 0x899   : > { %7753 = vrsqrt.f32 %v7111_v43 }
 0x89a   : > { %7755 = vrsqrt.f32 %v7112_v53 }
 0x8a6   : > { %v7754_v18 = vpop.eup %7753 }
 0x8a7   : > { %v7756_v57 = vpop.eup %7755  ;;  %v7115_v58 = vmul.f32 %v7754_v18, %v7093_v34 }
 0x8a8   : > { %v7116_v60 = vmul.f32 %v7756_v57, %v7094_v14 }
 0x8a9   : > { %v7129_v59 = vmul.f32 %v7122_v44, %v7115_v58 }
 0x8aa   : > { %v7130_v13 = vmul.f32 %v7126_v6, %v7116_v60 }
 0x8ab   : > { %v7143_v10 = vadd.f32 %v7136_v15, %v7129_v59 }
 0x8ac   : > { %v7144_v20 = vadd.f32 %v7140_v0, %v7130_v13 }
 0x8ad   : > { %v7145_v48 = vmax.f32 %v7143_v10, 0.0 }
 0x8ae   : > { %v7146_v19 = vmax.f32 %v7144_v20, 0.0 }
 0x8af   : > { %7147 = vst [vmem:[#allocation29] sm:$0xff] %v7145_v48 }
 0x8b0   : > { %7148 = vst [vmem:[#allocation29 + $0x8] sm:$0xff] %v7146_v19 }
 0x8b1 PF: > { %s11861_s19 = sld [smem:[#allocation46_spill]]  ;;  %s8370_s24 = smov [#allocation27]  }
 0x8b2   : > { %s7167_s30 = sshll.u32 %s8370_s24, 4  ;;  %s8371_s8 = smov [#allocation26]   ;;  %s7168_s30 = int_to_ptr.vmem [resolvable:$true] %s7167_s30 }
 0x8b3   : > { %s7156_s1 = sshll.u32 %s8371_s8, 4  ;;  %s8163_s16 = scalar_lea.vmem %s7168_s30, 128  ;;  %s7157_s1 = int_to_ptr.vmem [resolvable:$true] %s7156_s1 }
 0x8b4   : > { %p8164_p12 = scmp.ne.s32.totalorder %s7168_s30, %s8163_s16  ;;  %p8170_p3 = scmp.lt.s32.totalorder %s7168_s30, %s7168_s30 }
 0x8b5   : > { %p8171_p9 = scmp.lt.s32.totalorder %s8163_s16, %s8163_s16 }
 0x8b7   : > { %p7665_p11 = scmp.eq.s32.totalorder %s11861_s19, 3  ;;  %p8172_p1 = por %p8171_p9, %p8170_p3 }
 0x8b9   : > { %p8165_p2 = pnand %p8164_p12, %p7665_p11 }
 0x8bb   : > { %p8166_p13 = pneg %p8165_p2 }
 0x8bd   : > { %p8173_p4 = pnand %p8172_p1, %p8166_p13 }
 0x8bf   : > { %8176 = shalt.err (!%p8173_p4)
}
 0x8c0   : > { %s11862_s11 = sld [smem:[#allocation64_spill]]  ;;  %s8187_s3 = scalar_lea.vmem %s7157_s1, 128 }
 0x8c1   : > { %p8188_p8 = scmp.ne.s32.totalorder %s7157_s1, %s8187_s3  ;;  %p8194_p5 = scmp.lt.s32.totalorder %s7157_s1, %s7157_s1 }
 0x8c2   : > { %p8195_p6 = scmp.lt.s32.totalorder %s8187_s3, %s8187_s3 }
 0x8c3   : > { %p8189_p10 = pnand %p8188_p8, %p7665_p11 }
 0x8c4   : > { %p8196_p7 = por %p8195_p6, %p8194_p5 }
 0x8c5   : > { %p8190_p0 = pneg %p8189_p10 }
 0x8c6   : > { %7594 = dma.vmem_to_hbm [thread:$0]  (%p7665_p11), %s7168_s30, 128, %s11862_s11, [#allocation28]  }
 0x8c7   : > { %p8197_p12 = pnand %p8196_p7, %p8190_p0 }
 0x8c9   : > { %8200 = shalt.err (!%p8197_p12)
}
 0x8ca   : > { %s11863_s29 = sld [smem:[#allocation63_spill]]  ;;  %s8372_s7 = smov [#allocation29]  }
 0x8cb   : > { %s7178_s13 = sshll.u32 %s8372_s7, 4  ;;  %s7179_s13 = int_to_ptr.vmem [resolvable:$true] %s7178_s13 }
 0x8cc   : > { %s8211_s20 = scalar_lea.vmem %s7179_s13, 256  ;;  %p8218_p9 = scmp.lt.s32.totalorder %s7179_s13, %s7179_s13 }
 0x8cd   : > { %p8212_p2 = scmp.ne.s32.totalorder %s7179_s13, %s8211_s20  ;;  %p8219_p1 = scmp.lt.s32.totalorder %s8211_s20, %s8211_s20 }
 0x8cf   : > { %p8213_p13 = pnand %p8212_p2, %p7665_p11  ;;  %p8220_p4 = por %p8219_p1, %p8218_p9 }
 0x8d0   : > { %7592 = dma.vmem_to_hbm [thread:$0]  (%p7665_p11), %s7157_s1, 128, %s11863_s29, [#allocation7]  }
 0x8d1   : > { %p8214_p3 = pneg %p8213_p13 }
 0x8d3   : > { %p8221_p8 = pnand %p8220_p4, %p8214_p3 }
 0x8d5   : > { %8224 = shalt.err (!%p8221_p8)
}
 0x8d6   : > { %s11864_s4 = sld [smem:[#allocation65_spill]] }
 0x8dc   : > { %7596 = dma.vmem_to_hbm [thread:$0]  (%p7665_p11), %s7179_s13, 256, %s11864_s4, [#allocation28]  }
 0x8dd   : > { %8312 = dma.done.wait (%p7665_p11), [#allocation7], 128  }
 0x8de   : > { %8314 = vsyncadd (%p7665_p11), [#allocation7], 4294967168 }
 0x8df   : > { %8316 = dma.done.wait (%p7665_p11), [#allocation28], 384  }
 0x8e0   : > { %8318 = vsyncadd (%p7665_p11), [#allocation28], 4294966912 }
 0x8e1 PF: > { %s11865_s27 = sld [smem:[#allocation44_spill]]  ;;  %p36_p10 = scmp.ge.s32.totalorder %s8562_s23, 6  }
 0x8e2   : > { %s11866_s28 = sld [smem:[#allocation45_spill]]  ;;  %s11868_s24 = smov %s8325_s25 }
 0x8e3   : > { %s11867_s29 = sld [smem:[#allocation49_spill]]  ;;  %s11869_s25 = smov %s8329_s26 }
 0x8e4   : > { %s11870_s26 = smov %s8766_s22  ;;  %s11871_s0 = smov %s8562_s23 }
 0x8e5   :  { %38 = sbr.rel (!%p36_p10) target bundleno = 29 (0x1d), region = 261 }
 0x8ea   :  { %7199 = vsyncpa [#allocation6], 1 }
 0x8eb   :  { %7201 = vsyncpa [#allocation6 + $0x1], 1 }
 0x8ec   :  { %7202 = vsyncpa [#allocation9], 1 }
 0x8ed   :  { %7203 = vsyncpa [#allocation12], 1 }
 0x8ee   :  { %7205 = vsyncpa [#allocation12 + $0x1], 1 }
 0x8ef   :  { %7206 = vsyncpa [#allocation15], 1 }
 0x8f0   :  { %7208 = vsyncpa [#allocation15 + $0x1], 1 }
 0x8f1   :  { %7209 = vsyncpa [#allocation18], 1 }
 0x8f2   :  { %7210 = vsyncpa [#allocation7], 1 }
 0x8f3   :  { %7212 = vsyncpa [#allocation7 + $0x1], 1 }
 0x8f4   :  { %7213 = vsyncpa [#allocation28], 1 }

</bundles_post_ra>
